<compile_context>
chip_gen: v5e
topology: v5e:2x2
jax: 0.10.0
libtpu: 0.0.40
codegen_flags: <defaults>
</compile_context>

<pallas_src>
import functools

import jax
import jax.numpy as jnp
from jax.experimental import pallas as pl
from jax.experimental.pallas import tpu as pltpu

_VMEM_LIMIT_BYTES = 48 * 1024 * 1024      # safely below v7x's 64 MiB physical VMEM
_TILE_BUDGET_BYTES = 4 * 1024 * 1024      # target per-grid-step working set for row tiles


# ---------------------------------------------------------------------------
# In-kernel helpers
# ---------------------------------------------------------------------------
def _im2col_conv(pad_ref, w_ref, b_ref, rows, cols, cin):
    """3x3 conv over the zero-padded VMEM slab pad_ref ((rows+2, cols+2, cin)).

    im2col: the 9 shifted taps are concatenated along the channel/lane axis and
    contracted in a single MXU matmul with K = 9*cin.  Returns (rows*cols, cout) f32
    with the bias already added.
    """
    taps = []
    for kh in range(3):
        for kw in range(3):
            taps.append(pad_ref[kh:kh + rows, kw:kw + cols, :].reshape(rows * cols, cin))
    patches = jnp.concatenate(taps, axis=-1)                      # (rows*cols, 9*cin)
    acc = jnp.dot(patches, w_ref[...], preferred_element_type=jnp.float32)
    return acc + b_ref[...]


def _conv3x3_kernel(*refs, relu, has_res):
    """Row-tiled 3x3 'same' conv (+bias, optional fused ReLU, optional residual add)."""
    if has_res:
        x_ref, top_ref, bot_ref, w_ref, b_ref, res_ref, out_ref, pad_ref = refs
    else:
        x_ref, top_ref, bot_ref, w_ref, b_ref, out_ref, pad_ref = refs
        res_ref = None

    _, th, wdt, cin = x_ref.shape
    i = pl.program_id(1)

    # Build the zero-padded (th+2, W+2, cin) slab in VMEM.  Interior rows come from this
    # tile, the 1-row halos from the clamped neighbour-row blocks (skipped via pl.when at
    # the image borders).  No HBM-level jnp.pad copy is ever made.
    pad_ref[...] = jnp.zeros_like(pad_ref)
    pad_ref[1:th + 1, 1:wdt + 1, :] = x_ref[0]

    @pl.when(i > 0)
    def _():
        pad_ref[0:1, 1:wdt + 1, :] = top_ref[0]

    @pl.when(i < pl.num_programs(1) - 1)
    def _():
        pad_ref[th + 1:th + 2, 1:wdt + 1, :] = bot_ref[0]

    acc = _im2col_conv(pad_ref, w_ref, b_ref, th, wdt, cin)       # (th*W, cout)
    if relu:
        acc = jnp.maximum(acc, 0.0)
    acc = acc.reshape(out_ref.shape)                              # (1, th, W, cout)
    if res_ref is not None:
        acc = acc + res_ref[...].astype(jnp.float32)
    out_ref[...] = acc.astype(out_ref.dtype)


def _rcab_kernel(x_ref, w1_ref, b1_ref, w2_ref, b2_ref,
                 wd_ref, bd_ref, wu_ref, bu_ref, out_ref, pad_ref):
    """Fully fused RCAB: out = x + y * sigmoid(W2 @ relu(W1 @ avgpool(y) + b1) + b2),
    with y = conv2(relu(conv1(x))).  Grid is over the batch dimension."""
    _, hgt, wdt, ch = x_ref.shape
    x = x_ref[...].astype(jnp.float32)                            # (1, H, W, C)

    pad_ref[...] = jnp.zeros_like(pad_ref)
    pad_ref[1:hgt + 1, 1:wdt + 1, :] = x[0]

    y = _im2col_conv(pad_ref, w1_ref, b1_ref, hgt, wdt, ch)       # conv1 + bias
    y = jnp.maximum(y, 0.0)                                       # ReLU
    pad_ref[1:hgt + 1, 1:wdt + 1, :] = y.reshape(hgt, wdt, ch)    # re-pad in VMEM only
    y = _im2col_conv(pad_ref, w2_ref, b2_ref, hgt, wdt, ch)       # conv2 + bias

    # Channel attention: global avg pool -> 1x1 conv -> ReLU -> 1x1 conv -> sigmoid.
    pooled = jnp.mean(y, axis=0, keepdims=True)                   # (1, C)
    z = jnp.dot(pooled, wd_ref[...], preferred_element_type=jnp.float32) + bd_ref[...]
    z = jnp.maximum(z, 0.0)
    s = jnp.dot(z, wu_ref[...], preferred_element_type=jnp.float32) + bu_ref[...]
    s = jax.nn.sigmoid(s)                                         # (1, C)

    out = x + y.reshape(1, hgt, wdt, ch) * s.reshape(1, 1, 1, ch)
    out_ref[...] = out.astype(out_ref.dtype)


# ---------------------------------------------------------------------------
# pallas_call wrappers
# ---------------------------------------------------------------------------
def _pick_tile_h(h, w, cin, cout, budget=_TILE_BUDGET_BYTES):
    """Largest divisor of h whose per-grid-step working set fits the VMEM budget."""
    best = 1
    for th in range(1, h + 1):
        if h % th:
            continue
        need = 4 * ((th + 2) * (w + 2) * cin          # padded slab scratch
                    + th * w * 9 * cin                # im2col patches (live value)
                    + 2 * th * w * (cin + 2 * cout))  # double-buffered in/out/res blocks
        if need <= budget:
            best = th
    return best


def conv3x3(x, params, *, relu=False, residual=None, alias_residual=False, tile_h=None):
    """Row-tiled 3x3 'same' conv in NHWC.  params = (w[3,3,Cin,Cout], b[Cout])."""
    w, b = params
    n, h, wdt, cin = x.shape
    cout = w.shape[-1]
    th = _pick_tile_h(h, wdt, cin, cout) if tile_h is None else tile_h
    if h % th:
        raise ValueError(f"tile_h={th} must divide H={h}")
    n_tiles = h // th

    wf = w.reshape(9 * cin, cout)     # (kh, kw, ci) flattening matches the im2col order
    bf = b.reshape(1, cout)

    x_spec = pl.BlockSpec((1, th, wdt, cin), lambda bn, it: (bn, it, 0, 0))
    top_spec = pl.BlockSpec(
        (1, 1, wdt, cin), lambda bn, it: (bn, jnp.maximum(it * th - 1, 0), 0, 0))
    bot_spec = pl.BlockSpec(
        (1, 1, wdt, cin), lambda bn, it: (bn, jnp.minimum(it * th + th, h - 1), 0, 0))
    w_spec = pl.BlockSpec((9 * cin, cout), lambda bn, it: (0, 0))
    b_spec = pl.BlockSpec((1, cout), lambda bn, it: (0, 0))
    out_spec = pl.BlockSpec((1, th, wdt, cout), lambda bn, it: (bn, it, 0, 0))

    in_specs = [x_spec, top_spec, bot_spec, w_spec, b_spec]
    args = [x, x, x, wf, bf]
    io_aliases = {}
    if residual is not None:
        in_specs.append(pl.BlockSpec((1, th, wdt, cout), lambda bn, it: (bn, it, 0, 0)))
        args.append(residual)
        if alias_residual:
            io_aliases = {len(args) - 1: 0}   # residual buffer == output buffer

    kernel = functools.partial(_conv3x3_kernel, relu=relu, has_res=residual is not None)
    return pl.pallas_call(
        kernel,
        grid=(n, n_tiles),
        in_specs=in_specs,
        out_specs=out_spec,
        out_shape=jax.ShapeDtypeStruct((n, h, wdt, cout), x.dtype),
        scratch_shapes=[pltpu.VMEM((th + 2, wdt + 2, cin), jnp.float32)],
        input_output_aliases=io_aliases,
        compiler_params=pltpu.CompilerParams(
            dimension_semantics=("parallel", "parallel"),
            vmem_limit_bytes=_VMEM_LIMIT_BYTES),
    )(*args)


def rcab_fused(x, rcab_params):
    """One fused RCAB: x + ChannelAttention(conv2(relu(conv1(x))))."""
    w1, b1 = rcab_params["conv1"]
    w2, b2 = rcab_params["conv2"]
    wd, bd, wu, bu = rcab_params["ca"]
    n, h, wdt, ch = x.shape
    cr = wd.shape[-1]

    x_spec = pl.BlockSpec((1, h, wdt, ch), lambda bn: (bn, 0, 0, 0))

    def _full2d(r, c):
        return pl.BlockSpec((r, c), lambda bn: (0, 0))

    in_specs = [
        x_spec,
        _full2d(9 * ch, ch), _full2d(1, ch),      # conv1
        _full2d(9 * ch, ch), _full2d(1, ch),      # conv2
        _full2d(ch, cr), _full2d(1, cr),          # CA squeeze (1x1 conv)
        _full2d(cr, ch), _full2d(1, ch),          # CA excite (1x1 conv)
    ]
    args = (x,
            w1.reshape(9 * ch, ch), b1.reshape(1, ch),
            w2.reshape(9 * ch, ch), b2.reshape(1, ch),
            wd, bd.reshape(1, cr), wu, bu.reshape(1, ch))

    return pl.pallas_call(
        _rcab_kernel,
        grid=(n,),
        in_specs=in_specs,
        out_specs=x_spec,
        out_shape=jax.ShapeDtypeStruct((n, h, wdt, ch), x.dtype),
        scratch_shapes=[pltpu.VMEM((h + 2, wdt + 2, ch), jnp.float32)],
        compiler_params=pltpu.CompilerParams(
            dimension_semantics=("parallel",),
            vmem_limit_bytes=_VMEM_LIMIT_BYTES),
    )(*args)


# ---------------------------------------------------------------------------
# Parameter construction (deterministic, PyTorch-default-style uniform init)
# ---------------------------------------------------------------------------
def _init_conv(key, cin, cout, k):
    kw_, kb_ = jax.random.split(key)
    bound = 1.0 / jnp.sqrt(cin * k * k)
    w = jax.random.uniform(kw_, (k, k, cin, cout), jnp.float32, -bound, bound)
    b = jax.random.uniform(kb_, (cout,), jnp.float32, -bound, bound)
    return w, b


def init_rcan_a_params(key, *, in_nc, out_nc, nf, n_resgroups, n_resblocks):
    reduction = nf // 4
    cr = nf // reduction
    keys = iter(jax.random.split(key, 3 + n_resgroups * (4 * n_resblocks + 1)))

    params = {"conv_first": _init_conv(next(keys), in_nc, nf, 3)}
    rgs = []
    for _ in range(n_resgroups):
        rcabs = []
        for _ in range(n_resblocks):
            conv1 = _init_conv(next(keys), nf, nf, 3)
            conv2 = _init_conv(next(keys), nf, nf, 3)
            w1, b1 = _init_conv(next(keys), nf, cr, 1)        # 1x1 conv == matmul
            w2, b2 = _init_conv(next(keys), cr, nf, 1)
            ca = (w1.reshape(nf, cr), b1, w2.reshape(cr, nf), b2)
            rcabs.append({"conv1": conv1, "conv2": conv2, "ca": ca})
        tail = _init_conv(next(keys), nf, nf, 3)
        rgs.append({"rcabs": rcabs, "tail": tail})
    params["rgs"] = rgs
    params["recons"] = _init_conv(next(keys), nf, nf, 3)
    params["conv_last"] = _init_conv(next(keys), nf, out_nc, 3)
    return params


# ---------------------------------------------------------------------------
# Forward pass (mirrors rcan_a.forward exactly; NCHW in / NCHW out)
# ---------------------------------------------------------------------------
def rcan_a_forward(params, x_nchw, *, conv_tile_h=None):
    x = jnp.transpose(x_nchw, (0, 2, 3, 1))                       # NCHW -> NHWC
    ref = x                                                       # rcan_a: ref = x

    x = conv3x3(x, params["conv_first"], tile_h=conv_tile_h)      # conv_first

    trunk_in = x                                                  # RCAN: residual = x
    for rg_p in params["rgs"]:                                    # RG blocks
        rg_in = x
        for rcab_p in rg_p["rcabs"]:
            x = rcab_fused(x, rcab_p)                             # fused RCAB
        x = conv3x3(x, rg_p["tail"], residual=rg_in, tile_h=conv_tile_h)
    x = conv3x3(x, params["recons"], residual=trunk_in,
                alias_residual=True, tile_h=conv_tile_h)          # RCAN recons + residual
    x = conv3x3(x, params["conv_last"], residual=ref,
                alias_residual=True, tile_h=conv_tile_h)          # conv_last + torch.add
    return jnp.transpose(x, (0, 3, 1, 2))                         # NHWC -> NCHW


# ---------------------------------------------------------------------------
# Pure-JAX reference (correctness check only)
# ---------------------------------------------------------------------------
def _ref_conv3x3(x, w, b):
    h, wdt = x.shape[1], x.shape[2]
    xp = jnp.pad(x, ((0, 0), (1, 1), (1, 1), (0, 0)))
    out = jnp.zeros(x.shape[:3] + (w.shape[-1],), jnp.float32) + b.reshape(1, 1, 1, -1)
    for kh in range(3):
        for kw in range(3):
            out = out + jnp.einsum("nhwc,cd->nhwd",
                                   xp[:, kh:kh + h, kw:kw + wdt, :], w[kh, kw],
                                   precision=jax.lax.Precision.HIGHEST)
    return out


def _ref_rcab(x, p):
    w1, b1 = p["conv1"]
    w2, b2 = p["conv2"]
    wd, bd, wu, bu = p["ca"]
    y = jax.nn.relu(_ref_conv3x3(x, w1, b1))
    y = _ref_conv3x3(y, w2, b2)
    pooled = jnp.mean(y, axis=(1, 2))
    z = jax.nn.relu(pooled @ wd + bd[None, :])
    s = jax.nn.sigmoid(z @ wu + bu[None, :])
    return x + y * s[:, None, None, :]


def rcan_a_forward_ref(params, x_nchw):
    x = jnp.transpose(x_nchw, (0, 2, 3, 1))
    ref = x
    x = _ref_conv3x3(x, *params["conv_first"])
    trunk_in = x
    for rg_p in params["rgs"]:
        rg_in = x
        for rcab_p in rg_p["rcabs"]:
            x = _ref_rcab(x, rcab_p)
        x = rg_in + _ref_conv3x3(x, *rg_p["tail"])
    x = trunk_in + _ref_conv3x3(x, *params["recons"])
    x = ref + _ref_conv3x3(x, *params["conv_last"])
    return jnp.transpose(x, (0, 3, 1, 2))


# ---------------------------------------------------------------------------
# Demo
# ---------------------------------------------------------------------------
if __name__ == "__main__":
    # Small config: in_nc = out_nc = 3, nf = n_feats = 8, 1 residual group,
    # 2 RCABs per group, reduction = nf // 4 = 2.
    IN_NC, OUT_NC, NF = 3, 3, 8
    N_RESGROUPS, N_RESBLOCKS = 1, 2
    N, H, W = 2, 16, 16

    key = jax.random.PRNGKey(0)
    k_params, k_x = jax.random.split(key)
    params = init_rcan_a_params(k_params, in_nc=IN_NC, out_nc=OUT_NC, nf=NF,
                                n_resgroups=N_RESGROUPS, n_resblocks=N_RESBLOCKS)
    x = jax.random.normal(k_x, (N, IN_NC, H, W), jnp.float32)     # NCHW like PyTorch

    # tile_h = 8 -> 2 row tiles per image so the halo / pipelining path is exercised.
    fwd = jax.jit(functools.partial(rcan_a_forward, conv_tile_h=8))
    out = fwd(params, x)
    jax.block_until_ready(out)

    assert out.shape == (N, OUT_NC, H, W), out.shape
    assert bool(jnp.all(jnp.isfinite(out)))

    # Correctness check against a pure-JAX reference (loose tolerance: MXU f32 matmul
    # path vs. Precision.HIGHEST einsum).
    ref_out = jax.jit(rcan_a_forward_ref)(params, x)
    max_err = float(jnp.max(jnp.abs(out - ref_out)))
    assert max_err < 5e-2, f"max abs error vs reference: {max_err}"

    print("KERNEL_OK")
</pallas_src>

<mosaic_0001>
module attributes {stable_mosaic.version = 11 : i64} {
  func.func @_rcab_kernel(%arg0: i32, %arg1: memref<1x16x16x8xf32, #tpu.memory_space<vmem>>, %arg2: memref<72x8xf32, #tpu.memory_space<vmem>>, %arg3: memref<1x8xf32, #tpu.memory_space<vmem>>, %arg4: memref<72x8xf32, #tpu.memory_space<vmem>>, %arg5: memref<1x8xf32, #tpu.memory_space<vmem>>, %arg6: memref<8x4xf32, #tpu.memory_space<vmem>>, %arg7: memref<1x4xf32, #tpu.memory_space<vmem>>, %arg8: memref<4x8xf32, #tpu.memory_space<vmem>>, %arg9: memref<1x8xf32, #tpu.memory_space<vmem>>, %arg10: memref<1x16x16x8xf32, #tpu.memory_space<vmem>>, %arg11: memref<18x18x8xf32, #tpu.memory_space<vmem>>) attributes {dimension_semantics = [#tpu.dimension_semantics<parallel>], iteration_bounds = array<i64: 2>, scalar_prefetch = 0 : i64, scratch_operands = 1 : i64, tpu.core_type = #tpu.core_type<tc>, window_params = [{transform_indices = @transform_0, window_bounds = array<i64: 1, 16, 16, 8>}, {pipeline_mode = #tpu.pipeline_mode<synchronous>, transform_indices = @transform_1, window_bounds = array<i64: 72, 8>}, {pipeline_mode = #tpu.pipeline_mode<synchronous>, transform_indices = @transform_2, window_bounds = array<i64: 1, 8>}, {pipeline_mode = #tpu.pipeline_mode<synchronous>, transform_indices = @transform_3, window_bounds = array<i64: 72, 8>}, {pipeline_mode = #tpu.pipeline_mode<synchronous>, transform_indices = @transform_4, window_bounds = array<i64: 1, 8>}, {pipeline_mode = #tpu.pipeline_mode<synchronous>, transform_indices = @transform_5, window_bounds = array<i64: 8, 4>}, {pipeline_mode = #tpu.pipeline_mode<synchronous>, transform_indices = @transform_6, window_bounds = array<i64: 1, 4>}, {pipeline_mode = #tpu.pipeline_mode<synchronous>, transform_indices = @transform_7, window_bounds = array<i64: 4, 8>}, {pipeline_mode = #tpu.pipeline_mode<synchronous>, transform_indices = @transform_8, window_bounds = array<i64: 1, 8>}, {transform_indices = @transform_9, window_bounds = array<i64: 1, 16, 16, 8>}]} {
    %c0 = arith.constant 0 : index
    %c0_0 = arith.constant 0 : index
    %c0_1 = arith.constant 0 : index
    %c0_2 = arith.constant 0 : index
    %0 = vector.load %arg1[%c0, %c0_0, %c0_1, %c0_2] : memref<1x16x16x8xf32, #tpu.memory_space<vmem>>, vector<1x16x16x8xf32>
    %cst = arith.constant 0.000000e+00 : f32
    %1 = vector.broadcast %cst : f32 to vector<18x18x8xf32>
    %c0_3 = arith.constant 0 : index
    %c0_4 = arith.constant 0 : index
    %c0_5 = arith.constant 0 : index
    %2 = vector.load %arg11[%c0_3, %c0_4, %c0_5] : memref<18x18x8xf32, #tpu.memory_space<vmem>>, vector<18x18x8xf32>
    tpu.vector_store %arg11[%c0_3, %c0_4, %c0_5], %1 {strides = array<i32>} : memref<18x18x8xf32, #tpu.memory_space<vmem>>, vector<18x18x8xf32>,
    %3 = vector.shape_cast %0 : vector<1x16x16x8xf32> to vector<16x16x8xf32>
    %c1 = arith.constant 1 : index
    %c1_6 = arith.constant 1 : index
    %c0_7 = arith.constant 0 : index
    %4 = vector.load %arg11[%c1, %c1_6, %c0_7] : memref<18x18x8xf32, #tpu.memory_space<vmem>>, vector<16x16x8xf32>
    tpu.vector_store %arg11[%c1, %c1_6, %c0_7], %3 {strides = array<i32>} : memref<18x18x8xf32, #tpu.memory_space<vmem>>, vector<16x16x8xf32>,
    %c0_8 = arith.constant 0 : index
    %c0_9 = arith.constant 0 : index
    %c0_10 = arith.constant 0 : index
    %5 = vector.load %arg11[%c0_8, %c0_9, %c0_10] : memref<18x18x8xf32, #tpu.memory_space<vmem>>, vector<16x16x8xf32>
    %6 = vector.shape_cast %5 : vector<16x16x8xf32> to vector<256x8xf32>
    %c0_11 = arith.constant 0 : index
    %c1_12 = arith.constant 1 : index
    %c0_13 = arith.constant 0 : index
    %7 = vector.load %arg11[%c0_11, %c1_12, %c0_13] : memref<18x18x8xf32, #tpu.memory_space<vmem>>, vector<16x16x8xf32>
    %8 = vector.shape_cast %7 : vector<16x16x8xf32> to vector<256x8xf32>
    %c0_14 = arith.constant 0 : index
    %c2 = arith.constant 2 : index
    %c0_15 = arith.constant 0 : index
    %9 = vector.load %arg11[%c0_14, %c2, %c0_15] : memref<18x18x8xf32, #tpu.memory_space<vmem>>, vector<16x16x8xf32>
    %10 = vector.shape_cast %9 : vector<16x16x8xf32> to vector<256x8xf32>
    %c1_16 = arith.constant 1 : index
    %c0_17 = arith.constant 0 : index
    %c0_18 = arith.constant 0 : index
    %11 = vector.load %arg11[%c1_16, %c0_17, %c0_18] : memref<18x18x8xf32, #tpu.memory_space<vmem>>, vector<16x16x8xf32>
    %12 = vector.shape_cast %11 : vector<16x16x8xf32> to vector<256x8xf32>
    %c1_19 = arith.constant 1 : index
    %c1_20 = arith.constant 1 : index
    %c0_21 = arith.constant 0 : index
    %13 = vector.load %arg11[%c1_19, %c1_20, %c0_21] : memref<18x18x8xf32, #tpu.memory_space<vmem>>, vector<16x16x8xf32>
    %14 = vector.shape_cast %13 : vector<16x16x8xf32> to vector<256x8xf32>
    %c1_22 = arith.constant 1 : index
    %c2_23 = arith.constant 2 : index
    %c0_24 = arith.constant 0 : index
    %15 = vector.load %arg11[%c1_22, %c2_23, %c0_24] : memref<18x18x8xf32, #tpu.memory_space<vmem>>, vector<16x16x8xf32>
    %16 = vector.shape_cast %15 : vector<16x16x8xf32> to vector<256x8xf32>
    %c2_25 = arith.constant 2 : index
    %c0_26 = arith.constant 0 : index
    %c0_27 = arith.constant 0 : index
    %17 = vector.load %arg11[%c2_25, %c0_26, %c0_27] : memref<18x18x8xf32, #tpu.memory_space<vmem>>, vector<16x16x8xf32>
    %18 = vector.shape_cast %17 : vector<16x16x8xf32> to vector<256x8xf32>
    %c2_28 = arith.constant 2 : index
    %c1_29 = arith.constant 1 : index
    %c0_30 = arith.constant 0 : index
    %19 = vector.load %arg11[%c2_28, %c1_29, %c0_30] : memref<18x18x8xf32, #tpu.memory_space<vmem>>, vector<16x16x8xf32>
    %20 = vector.shape_cast %19 : vector<16x16x8xf32> to vector<256x8xf32>
    %c2_31 = arith.constant 2 : index
    %c2_32 = arith.constant 2 : index
    %c0_33 = arith.constant 0 : index
    %21 = vector.load %arg11[%c2_31, %c2_32, %c0_33] : memref<18x18x8xf32, #tpu.memory_space<vmem>>, vector<16x16x8xf32>
    %22 = vector.shape_cast %21 : vector<16x16x8xf32> to vector<256x8xf32>
    %23 = tpu.concatenate %6, %8, %10, %12, %14, %16, %18, %20, %22 in 1 : vector<256x8xf32>, vector<256x8xf32>, vector<256x8xf32>, vector<256x8xf32>, vector<256x8xf32>, vector<256x8xf32>, vector<256x8xf32>, vector<256x8xf32>, vector<256x8xf32> -> vector<256x72xf32>
    %c0_34 = arith.constant 0 : index
    %c0_35 = arith.constant 0 : index
    %24 = vector.load %arg2[%c0_34, %c0_35] : memref<72x8xf32, #tpu.memory_space<vmem>>, vector<72x8xf32>
    %cst_36 = arith.constant dense<0.000000e+00> : vector<256x8xf32>
    %25 = tpu.matmul %23, %24, %cst_36 {dimension_numbers = #tpu.dot_dimension_numbers<[1], [0], [0], [1], [0, 0, 1, 1], [], []>} : vector<256x72xf32>, vector<72x8xf32>, vector<256x8xf32> -> vector<256x8xf32>
    %c0_37 = arith.constant 0 : index
    %c0_38 = arith.constant 0 : index
    %26 = vector.load %arg3[%c0_37, %c0_38] : memref<1x8xf32, #tpu.memory_space<vmem>>, vector<1x8xf32>
    %27 = vector.broadcast %26 : vector<1x8xf32> to vector<256x8xf32>
    %28 = arith.addf %25, %27 : vector<256x8xf32>
    %cst_39 = arith.constant 0.000000e+00 : f32
    %29 = vector.broadcast %cst_39 : f32 to vector<256x8xf32>
    %30 = arith.maximumf %28, %29 : vector<256x8xf32>
    %31 = vector.shape_cast %30 : vector<256x8xf32> to vector<16x16x8xf32>
    %c1_40 = arith.constant 1 : index
    %c1_41 = arith.constant 1 : index
    %c0_42 = arith.constant 0 : index
    %32 = vector.load %arg11[%c1_40, %c1_41, %c0_42] : memref<18x18x8xf32, #tpu.memory_space<vmem>>, vector<16x16x8xf32>
    tpu.vector_store %arg11[%c1_40, %c1_41, %c0_42], %31 {strides = array<i32>} : memref<18x18x8xf32, #tpu.memory_space<vmem>>, vector<16x16x8xf32>,
    %c0_43 = arith.constant 0 : index
    %c0_44 = arith.constant 0 : index
    %c0_45 = arith.constant 0 : index
    %33 = vector.load %arg11[%c0_43, %c0_44, %c0_45] : memref<18x18x8xf32, #tpu.memory_space<vmem>>, vector<16x16x8xf32>
    %34 = vector.shape_cast %33 : vector<16x16x8xf32> to vector<256x8xf32>
    %c0_46 = arith.constant 0 : index
    %c1_47 = arith.constant 1 : index
    %c0_48 = arith.constant 0 : index
    %35 = vector.load %arg11[%c0_46, %c1_47, %c0_48] : memref<18x18x8xf32, #tpu.memory_space<vmem>>, vector<16x16x8xf32>
    %36 = vector.shape_cast %35 : vector<16x16x8xf32> to vector<256x8xf32>
    %c0_49 = arith.constant 0 : index
    %c2_50 = arith.constant 2 : index
    %c0_51 = arith.constant 0 : index
    %37 = vector.load %arg11[%c0_49, %c2_50, %c0_51] : memref<18x18x8xf32, #tpu.memory_space<vmem>>, vector<16x16x8xf32>
    %38 = vector.shape_cast %37 : vector<16x16x8xf32> to vector<256x8xf32>
    %c1_52 = arith.constant 1 : index
    %c0_53 = arith.constant 0 : index
    %c0_54 = arith.constant 0 : index
    %39 = vector.load %arg11[%c1_52, %c0_53, %c0_54] : memref<18x18x8xf32, #tpu.memory_space<vmem>>, vector<16x16x8xf32>
    %40 = vector.shape_cast %39 : vector<16x16x8xf32> to vector<256x8xf32>
    %c1_55 = arith.constant 1 : index
    %c1_56 = arith.constant 1 : index
    %c0_57 = arith.constant 0 : index
    %41 = vector.load %arg11[%c1_55, %c1_56, %c0_57] : memref<18x18x8xf32, #tpu.memory_space<vmem>>, vector<16x16x8xf32>
    %42 = vector.shape_cast %41 : vector<16x16x8xf32> to vector<256x8xf32>
    %c1_58 = arith.constant 1 : index
    %c2_59 = arith.constant 2 : index
    %c0_60 = arith.constant 0 : index
    %43 = vector.load %arg11[%c1_58, %c2_59, %c0_60] : memref<18x18x8xf32, #tpu.memory_space<vmem>>, vector<16x16x8xf32>
    %44 = vector.shape_cast %43 : vector<16x16x8xf32> to vector<256x8xf32>
    %c2_61 = arith.constant 2 : index
    %c0_62 = arith.constant 0 : index
    %c0_63 = arith.constant 0 : index
    %45 = vector.load %arg11[%c2_61, %c0_62, %c0_63] : memref<18x18x8xf32, #tpu.memory_space<vmem>>, vector<16x16x8xf32>
    %46 = vector.shape_cast %45 : vector<16x16x8xf32> to vector<256x8xf32>
    %c2_64 = arith.constant 2 : index
    %c1_65 = arith.constant 1 : index
    %c0_66 = arith.constant 0 : index
    %47 = vector.load %arg11[%c2_64, %c1_65, %c0_66] : memref<18x18x8xf32, #tpu.memory_space<vmem>>, vector<16x16x8xf32>
    %48 = vector.shape_cast %47 : vector<16x16x8xf32> to vector<256x8xf32>
    %c2_67 = arith.constant 2 : index
    %c2_68 = arith.constant 2 : index
    %c0_69 = arith.constant 0 : index
    %49 = vector.load %arg11[%c2_67, %c2_68, %c0_69] : memref<18x18x8xf32, #tpu.memory_space<vmem>>, vector<16x16x8xf32>
    %50 = vector.shape_cast %49 : vector<16x16x8xf32> to vector<256x8xf32>
    %51 = tpu.concatenate %34, %36, %38, %40, %42, %44, %46, %48, %50 in 1 : vector<256x8xf32>, vector<256x8xf32>, vector<256x8xf32>, vector<256x8xf32>, vector<256x8xf32>, vector<256x8xf32>, vector<256x8xf32>, vector<256x8xf32>, vector<256x8xf32> -> vector<256x72xf32>
    %c0_70 = arith.constant 0 : index
    %c0_71 = arith.constant 0 : index
    %52 = vector.load %arg4[%c0_70, %c0_71] : memref<72x8xf32, #tpu.memory_space<vmem>>, vector<72x8xf32>
    %cst_72 = arith.constant dense<0.000000e+00> : vector<256x8xf32>
    %53 = tpu.matmul %51, %52, %cst_72 {dimension_numbers = #tpu.dot_dimension_numbers<[1], [0], [0], [1], [0, 0, 1, 1], [], []>} : vector<256x72xf32>, vector<72x8xf32>, vector<256x8xf32> -> vector<256x8xf32>
    %c0_73 = arith.constant 0 : index
    %c0_74 = arith.constant 0 : index
    %54 = vector.load %arg5[%c0_73, %c0_74] : memref<1x8xf32, #tpu.memory_space<vmem>>, vector<1x8xf32>
    %55 = vector.broadcast %54 : vector<1x8xf32> to vector<256x8xf32>
    %56 = arith.addf %53, %55 : vector<256x8xf32>
    %cst_75 = arith.constant dense<0.000000e+00> : vector<8xf32>
    %57 = vector.multi_reduction <add>, %56, %cst_75 [0] : vector<256x8xf32> to vector<8xf32>
    %58 = vector.shape_cast %57 : vector<8xf32> to vector<1x8xf32>
    %cst_76 = arith.constant 2.560000e+02 : f32
    %59 = vector.broadcast %cst_76 : f32 to vector<1x8xf32>
    %60 = arith.divf %58, %59 : vector<1x8xf32>
    %c0_77 = arith.constant 0 : index
    %c0_78 = arith.constant 0 : index
    %61 = vector.load %arg6[%c0_77, %c0_78] : memref<8x4xf32, #tpu.memory_space<vmem>>, vector<8x4xf32>
    %cst_79 = arith.constant dense<0.000000e+00> : vector<1x4xf32>
    %62 = tpu.matmul %60, %61, %cst_79 {dimension_numbers = #tpu.dot_dimension_numbers<[1], [0], [0], [1], [0, 0, 1, 1], [], []>} : vector<1x8xf32>, vector<8x4xf32>, vector<1x4xf32> -> vector<1x4xf32>
    %c0_80 = arith.constant 0 : index
    %c0_81 = arith.constant 0 : index
    %63 = vector.load %arg7[%c0_80, %c0_81] : memref<1x4xf32, #tpu.memory_space<vmem>>, vector<1x4xf32>
    %64 = arith.addf %62, %63 : vector<1x4xf32>
    %cst_82 = arith.constant 0.000000e+00 : f32
    %65 = vector.broadcast %cst_82 : f32 to vector<1x4xf32>
    %66 = arith.maximumf %64, %65 : vector<1x4xf32>
    %c0_83 = arith.constant 0 : index
    %c0_84 = arith.constant 0 : index
    %67 = vector.load %arg8[%c0_83, %c0_84] : memref<4x8xf32, #tpu.memory_space<vmem>>, vector<4x8xf32>
    %cst_85 = arith.constant dense<0.000000e+00> : vector<1x8xf32>
    %68 = tpu.matmul %66, %67, %cst_85 {dimension_numbers = #tpu.dot_dimension_numbers<[1], [0], [0], [1], [0, 0, 1, 1], [], []>} : vector<1x4xf32>, vector<4x8xf32>, vector<1x8xf32> -> vector<1x8xf32>
    %c0_86 = arith.constant 0 : index
    %c0_87 = arith.constant 0 : index
    %69 = vector.load %arg9[%c0_86, %c0_87] : memref<1x8xf32, #tpu.memory_space<vmem>>, vector<1x8xf32>
    %70 = arith.addf %68, %69 : vector<1x8xf32>
    %71 = arith.negf %70 : vector<1x8xf32>
    %72 = math.exp %71 : vector<1x8xf32>
    %cst_88 = arith.constant 1.000000e+00 : f32
    %73 = vector.broadcast %cst_88 : f32 to vector<1x8xf32>
    %74 = arith.addf %73, %72 : vector<1x8xf32>
    %75 = arith.divf %73, %74 : vector<1x8xf32>
    %76 = vector.shape_cast %56 : vector<256x8xf32> to vector<1x16x16x8xf32>
    %77 = vector.shape_cast %75 : vector<1x8xf32> to vector<1x1x1x8xf32>
    %78 = vector.broadcast %77 : vector<1x1x1x8xf32> to vector<1x16x16x8xf32>
    %79 = arith.mulf %76, %78 : vector<1x16x16x8xf32>
    %80 = arith.addf %0, %79 : vector<1x16x16x8xf32>
    %c0_89 = arith.constant 0 : index
    %c0_90 = arith.constant 0 : index
    %c0_91 = arith.constant 0 : index
    %c0_92 = arith.constant 0 : index
    %81 = vector.load %arg10[%c0_89, %c0_90, %c0_91, %c0_92] : memref<1x16x16x8xf32, #tpu.memory_space<vmem>>, vector<1x16x16x8xf32>
    tpu.vector_store %arg10[%c0_89, %c0_90, %c0_91, %c0_92], %80 {strides = array<i32>} : memref<1x16x16x8xf32, #tpu.memory_space<vmem>>, vector<1x16x16x8xf32>,
    return
  }
  func.func @transform_0(%arg0: i32) -> (i32, i32, i32, i32) {
    %c0_i32 = arith.constant 0 : i32
    %c0_i32_0 = arith.constant 0 : i32
    %c0_i32_1 = arith.constant 0 : i32
    %c0_i32_2 = arith.constant 0 : i32
    return %arg0, %c0_i32, %c0_i32_0, %c0_i32_1 : i32, i32, i32, i32
  }
  func.func @transform_1(%arg0: i32) -> (i32, i32) {
    %c0_i32 = arith.constant 0 : i32
    %c0_i32_0 = arith.constant 0 : i32
    %c0_i32_1 = arith.constant 0 : i32
    return %c0_i32, %c0_i32_0 : i32, i32
  }
  func.func @transform_2(%arg0: i32) -> (i32, i32) {
    %c0_i32 = arith.constant 0 : i32
    %c0_i32_0 = arith.constant 0 : i32
    %c0_i32_1 = arith.constant 0 : i32
    return %c0_i32, %c0_i32_0 : i32, i32
  }
  func.func @transform_3(%arg0: i32) -> (i32, i32) {
    %c0_i32 = arith.constant 0 : i32
    %c0_i32_0 = arith.constant 0 : i32
    %c0_i32_1 = arith.constant 0 : i32
    return %c0_i32, %c0_i32_0 : i32, i32
  }
  func.func @transform_4(%arg0: i32) -> (i32, i32) {
    %c0_i32 = arith.constant 0 : i32
    %c0_i32_0 = arith.constant 0 : i32
    %c0_i32_1 = arith.constant 0 : i32
    return %c0_i32, %c0_i32_0 : i32, i32
  }
  func.func @transform_5(%arg0: i32) -> (i32, i32) {
    %c0_i32 = arith.constant 0 : i32
    %c0_i32_0 = arith.constant 0 : i32
    %c0_i32_1 = arith.constant 0 : i32
    return %c0_i32, %c0_i32_0 : i32, i32
  }
  func.func @transform_6(%arg0: i32) -> (i32, i32) {
    %c0_i32 = arith.constant 0 : i32
    %c0_i32_0 = arith.constant 0 : i32
    %c0_i32_1 = arith.constant 0 : i32
    return %c0_i32, %c0_i32_0 : i32, i32
  }
  func.func @transform_7(%arg0: i32) -> (i32, i32) {
    %c0_i32 = arith.constant 0 : i32
    %c0_i32_0 = arith.constant 0 : i32
    %c0_i32_1 = arith.constant 0 : i32
    return %c0_i32, %c0_i32_0 : i32, i32
  }
  func.func @transform_8(%arg0: i32) -> (i32, i32) {
    %c0_i32 = arith.constant 0 : i32
    %c0_i32_0 = arith.constant 0 : i32
    %c0_i32_1 = arith.constant 0 : i32
    return %c0_i32, %c0_i32_0 : i32, i32
  }
  func.func @transform_9(%arg0: i32) -> (i32, i32, i32, i32) {
    %c0_i32 = arith.constant 0 : i32
    %c0_i32_0 = arith.constant 0 : i32
    %c0_i32_1 = arith.constant 0 : i32
    %c0_i32_2 = arith.constant 0 : i32
    return %arg0, %c0_i32, %c0_i32_0, %c0_i32_1 : i32, i32, i32, i32
  }
}

module attributes {stable_mosaic.version = 11 : i64} {
  func.func @_conv3x3_kernel(%arg0: i32, %arg1: i32, %arg2: memref<1x8x16x3xf32, #tpu.memory_space<vmem>>, %arg3: memref<1x1x16x3xf32, #tpu.memory_space<vmem>>, %arg4: memref<1x1x16x3xf32, #tpu.memory_space<vmem>>, %arg5: memref<27x8xf32, #tpu.memory_space<vmem>>, %arg6: memref<1x8xf32, #tpu.memory_space<vmem>>, %arg7: memref<1x8x16x8xf32, #tpu.memory_space<vmem>>, %arg8: memref<10x18x3xf32, #tpu.memory_space<vmem>>) attributes {dimension_semantics = [#tpu.dimension_semantics<parallel>, #tpu.dimension_semantics<parallel>], iteration_bounds = array<i64: 2, 2>, scalar_prefetch = 0 : i64, scratch_operands = 1 : i64, tpu.core_type = #tpu.core_type<tc>, window_params = [{transform_indices = @transform_0, window_bounds = array<i64: 1, 8, 16, 3>}, {transform_indices = @transform_1, window_bounds = array<i64: 1, 1, 16, 3>}, {transform_indices = @transform_2, window_bounds = array<i64: 1, 1, 16, 3>}, {pipeline_mode = #tpu.pipeline_mode<synchronous>, transform_indices = @transform_3, window_bounds = array<i64: 27, 8>}, {pipeline_mode = #tpu.pipeline_mode<synchronous>, transform_indices = @transform_4, window_bounds = array<i64: 1, 8>}, {transform_indices = @transform_5, window_bounds = array<i64: 1, 8, 16, 8>}]} {
    %cst = arith.constant 0.000000e+00 : f32
    %0 = vector.broadcast %cst : f32 to vector<10x18x3xf32>
    %c0 = arith.constant 0 : index
    %c0_0 = arith.constant 0 : index
    %c0_1 = arith.constant 0 : index
    %1 = vector.load %arg8[%c0, %c0_0, %c0_1] : memref<10x18x3xf32, #tpu.memory_space<vmem>>, vector<10x18x3xf32>
    tpu.vector_store %arg8[%c0, %c0_0, %c0_1], %0 {strides = array<i32>} : memref<10x18x3xf32, #tpu.memory_space<vmem>>, vector<10x18x3xf32>,
    %c0_2 = arith.constant 0 : index
    %c0_3 = arith.constant 0 : index
    %c0_4 = arith.constant 0 : index
    %c0_5 = arith.constant 0 : index
    %2 = vector.load %arg2[%c0_2, %c0_3, %c0_4, %c0_5] : memref<1x8x16x3xf32, #tpu.memory_space<vmem>>, vector<1x8x16x3xf32>
    %3 = vector.shape_cast %2 : vector<1x8x16x3xf32> to vector<8x16x3xf32>
    %c1 = arith.constant 1 : index
    %c1_6 = arith.constant 1 : index
    %c0_7 = arith.constant 0 : index
    %4 = vector.load %arg8[%c1, %c1_6, %c0_7] : memref<10x18x3xf32, #tpu.memory_space<vmem>>, vector<8x16x3xf32>
    tpu.vector_store %arg8[%c1, %c1_6, %c0_7], %3 {strides = array<i32>} : memref<10x18x3xf32, #tpu.memory_space<vmem>>, vector<8x16x3xf32>,
    %c0_i32 = arith.constant 0 : i32
    %5 = arith.cmpi sgt, %arg1, %c0_i32 : i32
    %6 = arith.extui %5 : i1 to i32
    %c0_i32_8 = arith.constant 0 : i32
    %7 = arith.cmpi ne, %6, %c0_i32_8 : i32
    scf.if %7 {
      %c0_45 = arith.constant 0 : index
      %c0_46 = arith.constant 0 : index
      %c0_47 = arith.constant 0 : index
      %c0_48 = arith.constant 0 : index
      %37 = vector.load %arg3[%c0_45, %c0_46, %c0_47, %c0_48] : memref<1x1x16x3xf32, #tpu.memory_space<vmem>>, vector<1x1x16x3xf32>
      %38 = vector.shape_cast %37 : vector<1x1x16x3xf32> to vector<1x16x3xf32>
      %c0_49 = arith.constant 0 : index
      %c1_50 = arith.constant 1 : index
      %c0_51 = arith.constant 0 : index
      %39 = vector.load %arg8[%c0_49, %c1_50, %c0_51] : memref<10x18x3xf32, #tpu.memory_space<vmem>>, vector<1x16x3xf32>
      tpu.vector_store %arg8[%c0_49, %c1_50, %c0_51], %38 {strides = array<i32>} : memref<10x18x3xf32, #tpu.memory_space<vmem>>, vector<1x16x3xf32>,
    } else {
    }
    %c1_i32 = arith.constant 1 : i32
    %8 = arith.cmpi slt, %arg1, %c1_i32 : i32
    %9 = arith.extui %8 : i1 to i32
    %c0_i32_9 = arith.constant 0 : i32
    %10 = arith.cmpi ne, %9, %c0_i32_9 : i32
    scf.if %10 {
      %c0_45 = arith.constant 0 : index
      %c0_46 = arith.constant 0 : index
      %c0_47 = arith.constant 0 : index
      %c0_48 = arith.constant 0 : index
      %37 = vector.load %arg4[%c0_45, %c0_46, %c0_47, %c0_48] : memref<1x1x16x3xf32, #tpu.memory_space<vmem>>, vector<1x1x16x3xf32>
      %38 = vector.shape_cast %37 : vector<1x1x16x3xf32> to vector<1x16x3xf32>
      %c9 = arith.constant 9 : index
      %c1_49 = arith.constant 1 : index
      %c0_50 = arith.constant 0 : index
      %39 = vector.load %arg8[%c9, %c1_49, %c0_50] : memref<10x18x3xf32, #tpu.memory_space<vmem>>, vector<1x16x3xf32>
      tpu.vector_store %arg8[%c9, %c1_49, %c0_50], %38 {strides = array<i32>} : memref<10x18x3xf32, #tpu.memory_space<vmem>>, vector<1x16x3xf32>,
    } else {
    }
    %c0_10 = arith.constant 0 : index
    %c0_11 = arith.constant 0 : index
    %c0_12 = arith.constant 0 : index
    %11 = vector.load %arg8[%c0_10, %c0_11, %c0_12] : memref<10x18x3xf32, #tpu.memory_space<vmem>>, vector<8x16x3xf32>
    %12 = vector.shape_cast %11 : vector<8x16x3xf32> to vector<128x3xf32>
    %c0_13 = arith.constant 0 : index
    %c1_14 = arith.constant 1 : index
    %c0_15 = arith.constant 0 : index
    %13 = vector.load %arg8[%c0_13, %c1_14, %c0_15] : memref<10x18x3xf32, #tpu.memory_space<vmem>>, vector<8x16x3xf32>
    %14 = vector.shape_cast %13 : vector<8x16x3xf32> to vector<128x3xf32>
    %c0_16 = arith.constant 0 : index
    %c2 = arith.constant 2 : index
    %c0_17 = arith.constant 0 : index
    %15 = vector.load %arg8[%c0_16, %c2, %c0_17] : memref<10x18x3xf32, #tpu.memory_space<vmem>>, vector<8x16x3xf32>
    %16 = vector.shape_cast %15 : vector<8x16x3xf32> to vector<128x3xf32>
    %c1_18 = arith.constant 1 : index
    %c0_19 = arith.constant 0 : index
    %c0_20 = arith.constant 0 : index
    %17 = vector.load %arg8[%c1_18, %c0_19, %c0_20] : memref<10x18x3xf32, #tpu.memory_space<vmem>>, vector<8x16x3xf32>
    %18 = vector.shape_cast %17 : vector<8x16x3xf32> to vector<128x3xf32>
    %c1_21 = arith.constant 1 : index
    %c1_22 = arith.constant 1 : index
    %c0_23 = arith.constant 0 : index
    %19 = vector.load %arg8[%c1_21, %c1_22, %c0_23] : memref<10x18x3xf32, #tpu.memory_space<vmem>>, vector<8x16x3xf32>
    %20 = vector.shape_cast %19 : vector<8x16x3xf32> to vector<128x3xf32>
    %c1_24 = arith.constant 1 : index
    %c2_25 = arith.constant 2 : index
    %c0_26 = arith.constant 0 : index
    %21 = vector.load %arg8[%c1_24, %c2_25, %c0_26] : memref<10x18x3xf32, #tpu.memory_space<vmem>>, vector<8x16x3xf32>
    %22 = vector.shape_cast %21 : vector<8x16x3xf32> to vector<128x3xf32>
    %c2_27 = arith.constant 2 : index
    %c0_28 = arith.constant 0 : index
    %c0_29 = arith.constant 0 : index
    %23 = vector.load %arg8[%c2_27, %c0_28, %c0_29] : memref<10x18x3xf32, #tpu.memory_space<vmem>>, vector<8x16x3xf32>
    %24 = vector.shape_cast %23 : vector<8x16x3xf32> to vector<128x3xf32>
    %c2_30 = arith.constant 2 : index
    %c1_31 = arith.constant 1 : index
    %c0_32 = arith.constant 0 : index
    %25 = vector.load %arg8[%c2_30, %c1_31, %c0_32] : memref<10x18x3xf32, #tpu.memory_space<vmem>>, vector<8x16x3xf32>
    %26 = vector.shape_cast %25 : vector<8x16x3xf32> to vector<128x3xf32>
    %c2_33 = arith.constant 2 : index
    %c2_34 = arith.constant 2 : index
    %c0_35 = arith.constant 0 : index
    %27 = vector.load %arg8[%c2_33, %c2_34, %c0_35] : memref<10x18x3xf32, #tpu.memory_space<vmem>>, vector<8x16x3xf32>
    %28 = vector.shape_cast %27 : vector<8x16x3xf32> to vector<128x3xf32>
    %29 = tpu.concatenate %12, %14, %16, %18, %20, %22, %24, %26, %28 in 1 : vector<128x3xf32>, vector<128x3xf32>, vector<128x3xf32>, vector<128x3xf32>, vector<128x3xf32>, vector<128x3xf32>, vector<128x3xf32>, vector<128x3xf32>, vector<128x3xf32> -> vector<128x27xf32>
    %c0_36 = arith.constant 0 : index
    %c0_37 = arith.constant 0 : index
    %30 = vector.load %arg5[%c0_36, %c0_37] : memref<27x8xf32, #tpu.memory_space<vmem>>, vector<27x8xf32>
    %cst_38 = arith.constant dense<0.000000e+00> : vector<128x8xf32>
    %31 = tpu.matmul %29, %30, %cst_38 {dimension_numbers = #tpu.dot_dimension_numbers<[1], [0], [0], [1], [0, 0, 1, 1], [], []>} : vector<128x27xf32>, vector<27x8xf32>, vector<128x8xf32> -> vector<128x8xf32>
    %c0_39 = arith.constant 0 : index
    %c0_40 = arith.constant 0 : index
    %32 = vector.load %arg6[%c0_39, %c0_40] : memref<1x8xf32, #tpu.memory_space<vmem>>, vector<1x8xf32>
    %33 = vector.broadcast %32 : vector<1x8xf32> to vector<128x8xf32>
    %34 = arith.addf %31, %33 : vector<128x8xf32>
    %35 = vector.shape_cast %34 : vector<128x8xf32> to vector<1x8x16x8xf32>
    %c0_41 = arith.constant 0 : index
    %c0_42 = arith.constant 0 : index
    %c0_43 = arith.constant 0 : index
    %c0_44 = arith.constant 0 : index
    %36 = vector.load %arg7[%c0_41, %c0_42, %c0_43, %c0_44] : memref<1x8x16x8xf32, #tpu.memory_space<vmem>>, vector<1x8x16x8xf32>
    tpu.vector_store %arg7[%c0_41, %c0_42, %c0_43, %c0_44], %35 {strides = array<i32>} : memref<1x8x16x8xf32, #tpu.memory_space<vmem>>, vector<1x8x16x8xf32>,
    return
  }
  func.func @transform_0(%arg0: i32, %arg1: i32) -> (i32, i32, i32, i32) {
    %c0_i32 = arith.constant 0 : i32
    %c0_i32_0 = arith.constant 0 : i32
    %c0_i32_1 = arith.constant 0 : i32
    return %arg0, %arg1, %c0_i32, %c0_i32_0 : i32, i32, i32, i32
  }
  func.func @transform_1(%arg0: i32, %arg1: i32) -> (i32, i32, i32, i32) {
    %c8_i32 = arith.constant 8 : i32
    %0 = arith.muli %arg1, %c8_i32 : i32
    %c1_i32 = arith.constant 1 : i32
    %1 = arith.subi %0, %c1_i32 : i32
    %c0_i32 = arith.constant 0 : i32
    %2 = arith.maxsi %1, %c0_i32 : i32
    %c0_i32_0 = arith.constant 0 : i32
    %c0_i32_1 = arith.constant 0 : i32
    %c0_i32_2 = arith.constant 0 : i32
    return %arg0, %2, %c0_i32_0, %c0_i32_1 : i32, i32, i32, i32
  }
  func.func @transform_2(%arg0: i32, %arg1: i32) -> (i32, i32, i32, i32) {
    %c8_i32 = arith.constant 8 : i32
    %0 = arith.muli %arg1, %c8_i32 : i32
    %c8_i32_0 = arith.constant 8 : i32
    %1 = arith.addi %0, %c8_i32_0 : i32
    %c15_i32 = arith.constant 15 : i32
    %2 = arith.minsi %1, %c15_i32 : i32
    %c0_i32 = arith.constant 0 : i32
    %c0_i32_1 = arith.constant 0 : i32
    %c0_i32_2 = arith.constant 0 : i32
    return %arg0, %2, %c0_i32, %c0_i32_1 : i32, i32, i32, i32
  }
  func.func @transform_3(%arg0: i32, %arg1: i32) -> (i32, i32) {
    %c0_i32 = arith.constant 0 : i32
    %c0_i32_0 = arith.constant 0 : i32
    %c0_i32_1 = arith.constant 0 : i32
    return %c0_i32, %c0_i32_0 : i32, i32
  }
  func.func @transform_4(%arg0: i32, %arg1: i32) -> (i32, i32) {
    %c0_i32 = arith.constant 0 : i32
    %c0_i32_0 = arith.constant 0 : i32
    %c0_i32_1 = arith.constant 0 : i32
    return %c0_i32, %c0_i32_0 : i32, i32
  }
  func.func @transform_5(%arg0: i32, %arg1: i32) -> (i32, i32, i32, i32) {
    %c0_i32 = arith.constant 0 : i32
    %c0_i32_0 = arith.constant 0 : i32
    %c0_i32_1 = arith.constant 0 : i32
    return %arg0, %arg1, %c0_i32, %c0_i32_0 : i32, i32, i32, i32
  }
}

module attributes {stable_mosaic.version = 11 : i64} {
  func.func @_conv3x3_kernel(%arg0: i32, %arg1: i32, %arg2: memref<1x8x16x8xf32, #tpu.memory_space<vmem>>, %arg3: memref<1x1x16x8xf32, #tpu.memory_space<vmem>>, %arg4: memref<1x1x16x8xf32, #tpu.memory_space<vmem>>, %arg5: memref<72x8xf32, #tpu.memory_space<vmem>>, %arg6: memref<1x8xf32, #tpu.memory_space<vmem>>, %arg7: memref<1x8x16x8xf32, #tpu.memory_space<vmem>>, %arg8: memref<1x8x16x8xf32, #tpu.memory_space<vmem>>, %arg9: memref<10x18x8xf32, #tpu.memory_space<vmem>>) attributes {dimension_semantics = [#tpu.dimension_semantics<parallel>, #tpu.dimension_semantics<parallel>], iteration_bounds = array<i64: 2, 2>, scalar_prefetch = 0 : i64, scratch_operands = 1 : i64, tpu.core_type = #tpu.core_type<tc>, window_params = [{transform_indices = @transform_0, window_bounds = array<i64: 1, 8, 16, 8>}, {transform_indices = @transform_1, window_bounds = array<i64: 1, 1, 16, 8>}, {transform_indices = @transform_2, window_bounds = array<i64: 1, 1, 16, 8>}, {pipeline_mode = #tpu.pipeline_mode<synchronous>, transform_indices = @transform_3, window_bounds = array<i64: 72, 8>}, {pipeline_mode = #tpu.pipeline_mode<synchronous>, transform_indices = @transform_4, window_bounds = array<i64: 1, 8>}, {transform_indices = @transform_5, window_bounds = array<i64: 1, 8, 16, 8>}, {transform_indices = @transform_6, window_bounds = array<i64: 1, 8, 16, 8>}]} {
    %cst = arith.constant 0.000000e+00 : f32
    %0 = vector.broadcast %cst : f32 to vector<10x18x8xf32>
    %c0 = arith.constant 0 : index
    %c0_0 = arith.constant 0 : index
    %c0_1 = arith.constant 0 : index
    %1 = vector.load %arg9[%c0, %c0_0, %c0_1] : memref<10x18x8xf32, #tpu.memory_space<vmem>>, vector<10x18x8xf32>
    tpu.vector_store %arg9[%c0, %c0_0, %c0_1], %0 {strides = array<i32>} : memref<10x18x8xf32, #tpu.memory_space<vmem>>, vector<10x18x8xf32>,
    %c0_2 = arith.constant 0 : index
    %c0_3 = arith.constant 0 : index
    %c0_4 = arith.constant 0 : index
    %c0_5 = arith.constant 0 : index
    %2 = vector.load %arg2[%c0_2, %c0_3, %c0_4, %c0_5] : memref<1x8x16x8xf32, #tpu.memory_space<vmem>>, vector<1x8x16x8xf32>
    %3 = vector.shape_cast %2 : vector<1x8x16x8xf32> to vector<8x16x8xf32>
    %c1 = arith.constant 1 : index
    %c1_6 = arith.constant 1 : index
    %c0_7 = arith.constant 0 : index
    %4 = vector.load %arg9[%c1, %c1_6, %c0_7] : memref<10x18x8xf32, #tpu.memory_space<vmem>>, vector<8x16x8xf32>
    tpu.vector_store %arg9[%c1, %c1_6, %c0_7], %3 {strides = array<i32>} : memref<10x18x8xf32, #tpu.memory_space<vmem>>, vector<8x16x8xf32>,
    %c0_i32 = arith.constant 0 : i32
    %5 = arith.cmpi sgt, %arg1, %c0_i32 : i32
    %6 = arith.extui %5 : i1 to i32
    %c0_i32_8 = arith.constant 0 : i32
    %7 = arith.cmpi ne, %6, %c0_i32_8 : i32
    scf.if %7 {
      %c0_49 = arith.constant 0 : index
      %c0_50 = arith.constant 0 : index
      %c0_51 = arith.constant 0 : index
      %c0_52 = arith.constant 0 : index
      %39 = vector.load %arg3[%c0_49, %c0_50, %c0_51, %c0_52] : memref<1x1x16x8xf32, #tpu.memory_space<vmem>>, vector<1x1x16x8xf32>
      %40 = vector.shape_cast %39 : vector<1x1x16x8xf32> to vector<1x16x8xf32>
      %c0_53 = arith.constant 0 : index
      %c1_54 = arith.constant 1 : index
      %c0_55 = arith.constant 0 : index
      %41 = vector.load %arg9[%c0_53, %c1_54, %c0_55] : memref<10x18x8xf32, #tpu.memory_space<vmem>>, vector<1x16x8xf32>
      tpu.vector_store %arg9[%c0_53, %c1_54, %c0_55], %40 {strides = array<i32>} : memref<10x18x8xf32, #tpu.memory_space<vmem>>, vector<1x16x8xf32>,
    } else {
    }
    %c1_i32 = arith.constant 1 : i32
    %8 = arith.cmpi slt, %arg1, %c1_i32 : i32
    %9 = arith.extui %8 : i1 to i32
    %c0_i32_9 = arith.constant 0 : i32
    %10 = arith.cmpi ne, %9, %c0_i32_9 : i32
    scf.if %10 {
      %c0_49 = arith.constant 0 : index
      %c0_50 = arith.constant 0 : index
      %c0_51 = arith.constant 0 : index
      %c0_52 = arith.constant 0 : index
      %39 = vector.load %arg4[%c0_49, %c0_50, %c0_51, %c0_52] : memref<1x1x16x8xf32, #tpu.memory_space<vmem>>, vector<1x1x16x8xf32>
      %40 = vector.shape_cast %39 : vector<1x1x16x8xf32> to vector<1x16x8xf32>
      %c9 = arith.constant 9 : index
      %c1_53 = arith.constant 1 : index
      %c0_54 = arith.constant 0 : index
      %41 = vector.load %arg9[%c9, %c1_53, %c0_54] : memref<10x18x8xf32, #tpu.memory_space<vmem>>, vector<1x16x8xf32>
      tpu.vector_store %arg9[%c9, %c1_53, %c0_54], %40 {strides = array<i32>} : memref<10x18x8xf32, #tpu.memory_space<vmem>>, vector<1x16x8xf32>,
    } else {
    }
    %c0_10 = arith.constant 0 : index
    %c0_11 = arith.constant 0 : index
    %c0_12 = arith.constant 0 : index
    %11 = vector.load %arg9[%c0_10, %c0_11, %c0_12] : memref<10x18x8xf32, #tpu.memory_space<vmem>>, vector<8x16x8xf32>
    %12 = vector.shape_cast %11 : vector<8x16x8xf32> to vector<128x8xf32>
    %c0_13 = arith.constant 0 : index
    %c1_14 = arith.constant 1 : index
    %c0_15 = arith.constant 0 : index
    %13 = vector.load %arg9[%c0_13, %c1_14, %c0_15] : memref<10x18x8xf32, #tpu.memory_space<vmem>>, vector<8x16x8xf32>
    %14 = vector.shape_cast %13 : vector<8x16x8xf32> to vector<128x8xf32>
    %c0_16 = arith.constant 0 : index
    %c2 = arith.constant 2 : index
    %c0_17 = arith.constant 0 : index
    %15 = vector.load %arg9[%c0_16, %c2, %c0_17] : memref<10x18x8xf32, #tpu.memory_space<vmem>>, vector<8x16x8xf32>
    %16 = vector.shape_cast %15 : vector<8x16x8xf32> to vector<128x8xf32>
    %c1_18 = arith.constant 1 : index
    %c0_19 = arith.constant 0 : index
    %c0_20 = arith.constant 0 : index
    %17 = vector.load %arg9[%c1_18, %c0_19, %c0_20] : memref<10x18x8xf32, #tpu.memory_space<vmem>>, vector<8x16x8xf32>
    %18 = vector.shape_cast %17 : vector<8x16x8xf32> to vector<128x8xf32>
    %c1_21 = arith.constant 1 : index
    %c1_22 = arith.constant 1 : index
    %c0_23 = arith.constant 0 : index
    %19 = vector.load %arg9[%c1_21, %c1_22, %c0_23] : memref<10x18x8xf32, #tpu.memory_space<vmem>>, vector<8x16x8xf32>
    %20 = vector.shape_cast %19 : vector<8x16x8xf32> to vector<128x8xf32>
    %c1_24 = arith.constant 1 : index
    %c2_25 = arith.constant 2 : index
    %c0_26 = arith.constant 0 : index
    %21 = vector.load %arg9[%c1_24, %c2_25, %c0_26] : memref<10x18x8xf32, #tpu.memory_space<vmem>>, vector<8x16x8xf32>
    %22 = vector.shape_cast %21 : vector<8x16x8xf32> to vector<128x8xf32>
    %c2_27 = arith.constant 2 : index
    %c0_28 = arith.constant 0 : index
    %c0_29 = arith.constant 0 : index
    %23 = vector.load %arg9[%c2_27, %c0_28, %c0_29] : memref<10x18x8xf32, #tpu.memory_space<vmem>>, vector<8x16x8xf32>
    %24 = vector.shape_cast %23 : vector<8x16x8xf32> to vector<128x8xf32>
    %c2_30 = arith.constant 2 : index
    %c1_31 = arith.constant 1 : index
    %c0_32 = arith.constant 0 : index
    %25 = vector.load %arg9[%c2_30, %c1_31, %c0_32] : memref<10x18x8xf32, #tpu.memory_space<vmem>>, vector<8x16x8xf32>
    %26 = vector.shape_cast %25 : vector<8x16x8xf32> to vector<128x8xf32>
    %c2_33 = arith.constant 2 : index
    %c2_34 = arith.constant 2 : index
    %c0_35 = arith.constant 0 : index
    %27 = vector.load %arg9[%c2_33, %c2_34, %c0_35] : memref<10x18x8xf32, #tpu.memory_space<vmem>>, vector<8x16x8xf32>
    %28 = vector.shape_cast %27 : vector<8x16x8xf32> to vector<128x8xf32>
    %29 = tpu.concatenate %12, %14, %16, %18, %20, %22, %24, %26, %28 in 1 : vector<128x8xf32>, vector<128x8xf32>, vector<128x8xf32>, vector<128x8xf32>, vector<128x8xf32>, vector<128x8xf32>, vector<128x8xf32>, vector<128x8xf32>, vector<128x8xf32> -> vector<128x72xf32>
    %c0_36 = arith.constant 0 : index
    %c0_37 = arith.constant 0 : index
    %30 = vector.load %arg5[%c0_36, %c0_37] : memref<72x8xf32, #tpu.memory_space<vmem>>, vector<72x8xf32>
    %cst_38 = arith.constant dense<0.000000e+00> : vector<128x8xf32>
    %31 = tpu.matmul %29, %30, %cst_38 {dimension_numbers = #tpu.dot_dimension_numbers<[1], [0], [0], [1], [0, 0, 1, 1], [], []>} : vector<128x72xf32>, vector<72x8xf32>, vector<128x8xf32> -> vector<128x8xf32>
    %c0_39 = arith.constant 0 : index
    %c0_40 = arith.constant 0 : index
    %32 = vector.load %arg6[%c0_39, %c0_40] : memref<1x8xf32, #tpu.memory_space<vmem>>, vector<1x8xf32>
    %33 = vector.broadcast %32 : vector<1x8xf32> to vector<128x8xf32>
    %34 = arith.addf %31, %33 : vector<128x8xf32>
    %35 = vector.shape_cast %34 : vector<128x8xf32> to vector<1x8x16x8xf32>
    %c0_41 = arith.constant 0 : index
    %c0_42 = arith.constant 0 : index
    %c0_43 = arith.constant 0 : index
    %c0_44 = arith.constant 0 : index
    %36 = vector.load %arg7[%c0_41, %c0_42, %c0_43, %c0_44] : memref<1x8x16x8xf32, #tpu.memory_space<vmem>>, vector<1x8x16x8xf32>
    %37 = arith.addf %35, %36 : vector<1x8x16x8xf32>
    %c0_45 = arith.constant 0 : index
    %c0_46 = arith.constant 0 : index
    %c0_47 = arith.constant 0 : index
    %c0_48 = arith.constant 0 : index
    %38 = vector.load %arg8[%c0_45, %c0_46, %c0_47, %c0_48] : memref<1x8x16x8xf32, #tpu.memory_space<vmem>>, vector<1x8x16x8xf32>
    tpu.vector_store %arg8[%c0_45, %c0_46, %c0_47, %c0_48], %37 {strides = array<i32>} : memref<1x8x16x8xf32, #tpu.memory_space<vmem>>, vector<1x8x16x8xf32>,
    return
  }
  func.func @transform_0(%arg0: i32, %arg1: i32) -> (i32, i32, i32, i32) {
    %c0_i32 = arith.constant 0 : i32
    %c0_i32_0 = arith.constant 0 : i32
    %c0_i32_1 = arith.constant 0 : i32
    return %arg0, %arg1, %c0_i32, %c0_i32_0 : i32, i32, i32, i32
  }
  func.func @transform_1(%arg0: i32, %arg1: i32) -> (i32, i32, i32, i32) {
    %c8_i32 = arith.constant 8 : i32
    %0 = arith.muli %arg1, %c8_i32 : i32
    %c1_i32 = arith.constant 1 : i32
    %1 = arith.subi %0, %c1_i32 : i32
    %c0_i32 = arith.constant 0 : i32
    %2 = arith.maxsi %1, %c0_i32 : i32
    %c0_i32_0 = arith.constant 0 : i32
    %c0_i32_1 = arith.constant 0 : i32
    %c0_i32_2 = arith.constant 0 : i32
    return %arg0, %2, %c0_i32_0, %c0_i32_1 : i32, i32, i32, i32
  }
  func.func @transform_2(%arg0: i32, %arg1: i32) -> (i32, i32, i32, i32) {
    %c8_i32 = arith.constant 8 : i32
    %0 = arith.muli %arg1, %c8_i32 : i32
    %c8_i32_0 = arith.constant 8 : i32
    %1 = arith.addi %0, %c8_i32_0 : i32
    %c15_i32 = arith.constant 15 : i32
    %2 = arith.minsi %1, %c15_i32 : i32
    %c0_i32 = arith.constant 0 : i32
    %c0_i32_1 = arith.constant 0 : i32
    %c0_i32_2 = arith.constant 0 : i32
    return %arg0, %2, %c0_i32, %c0_i32_1 : i32, i32, i32, i32
  }
  func.func @transform_3(%arg0: i32, %arg1: i32) -> (i32, i32) {
    %c0_i32 = arith.constant 0 : i32
    %c0_i32_0 = arith.constant 0 : i32
    %c0_i32_1 = arith.constant 0 : i32
    return %c0_i32, %c0_i32_0 : i32, i32
  }
  func.func @transform_4(%arg0: i32, %arg1: i32) -> (i32, i32) {
    %c0_i32 = arith.constant 0 : i32
    %c0_i32_0 = arith.constant 0 : i32
    %c0_i32_1 = arith.constant 0 : i32
    return %c0_i32, %c0_i32_0 : i32, i32
  }
  func.func @transform_5(%arg0: i32, %arg1: i32) -> (i32, i32, i32, i32) {
    %c0_i32 = arith.constant 0 : i32
    %c0_i32_0 = arith.constant 0 : i32
    %c0_i32_1 = arith.constant 0 : i32
    return %arg0, %arg1, %c0_i32, %c0_i32_0 : i32, i32, i32, i32
  }
  func.func @transform_6(%arg0: i32, %arg1: i32) -> (i32, i32, i32, i32) {
    %c0_i32 = arith.constant 0 : i32
    %c0_i32_0 = arith.constant 0 : i32
    %c0_i32_1 = arith.constant 0 : i32
    return %arg0, %arg1, %c0_i32, %c0_i32_0 : i32, i32, i32, i32
  }
}

module attributes {stable_mosaic.version = 11 : i64} {
  func.func @_conv3x3_kernel(%arg0: i32, %arg1: i32, %arg2: memref<1x8x16x8xf32, #tpu.memory_space<vmem>>, %arg3: memref<1x1x16x8xf32, #tpu.memory_space<vmem>>, %arg4: memref<1x1x16x8xf32, #tpu.memory_space<vmem>>, %arg5: memref<72x8xf32, #tpu.memory_space<vmem>>, %arg6: memref<1x8xf32, #tpu.memory_space<vmem>>, %arg7: memref<1x8x16x8xf32, #tpu.memory_space<vmem>>, %arg8: memref<1x8x16x8xf32, #tpu.memory_space<vmem>>, %arg9: memref<10x18x8xf32, #tpu.memory_space<vmem>>) attributes {dimension_semantics = [#tpu.dimension_semantics<parallel>, #tpu.dimension_semantics<parallel>], iteration_bounds = array<i64: 2, 2>, scalar_prefetch = 0 : i64, scratch_operands = 1 : i64, tpu.core_type = #tpu.core_type<tc>, window_params = [{transform_indices = @transform_0, window_bounds = array<i64: 1, 8, 16, 8>}, {transform_indices = @transform_1, window_bounds = array<i64: 1, 1, 16, 8>}, {transform_indices = @transform_2, window_bounds = array<i64: 1, 1, 16, 8>}, {pipeline_mode = #tpu.pipeline_mode<synchronous>, transform_indices = @transform_3, window_bounds = array<i64: 72, 8>}, {pipeline_mode = #tpu.pipeline_mode<synchronous>, transform_indices = @transform_4, window_bounds = array<i64: 1, 8>}, {transform_indices = @transform_5, window_bounds = array<i64: 1, 8, 16, 8>}, {transform_indices = @transform_6, window_bounds = array<i64: 1, 8, 16, 8>}]} {
    %cst = arith.constant 0.000000e+00 : f32
    %0 = vector.broadcast %cst : f32 to vector<10x18x8xf32>
    %c0 = arith.constant 0 : index
    %c0_0 = arith.constant 0 : index
    %c0_1 = arith.constant 0 : index
    %1 = vector.load %arg9[%c0, %c0_0, %c0_1] : memref<10x18x8xf32, #tpu.memory_space<vmem>>, vector<10x18x8xf32>
    tpu.vector_store %arg9[%c0, %c0_0, %c0_1], %0 {strides = array<i32>} : memref<10x18x8xf32, #tpu.memory_space<vmem>>, vector<10x18x8xf32>,
    %c0_2 = arith.constant 0 : index
    %c0_3 = arith.constant 0 : index
    %c0_4 = arith.constant 0 : index
    %c0_5 = arith.constant 0 : index
    %2 = vector.load %arg2[%c0_2, %c0_3, %c0_4, %c0_5] : memref<1x8x16x8xf32, #tpu.memory_space<vmem>>, vector<1x8x16x8xf32>
    %3 = vector.shape_cast %2 : vector<1x8x16x8xf32> to vector<8x16x8xf32>
    %c1 = arith.constant 1 : index
    %c1_6 = arith.constant 1 : index
    %c0_7 = arith.constant 0 : index
    %4 = vector.load %arg9[%c1, %c1_6, %c0_7] : memref<10x18x8xf32, #tpu.memory_space<vmem>>, vector<8x16x8xf32>
    tpu.vector_store %arg9[%c1, %c1_6, %c0_7], %3 {strides = array<i32>} : memref<10x18x8xf32, #tpu.memory_space<vmem>>, vector<8x16x8xf32>,
    %c0_i32 = arith.constant 0 : i32
    %5 = arith.cmpi sgt, %arg1, %c0_i32 : i32
    %6 = arith.extui %5 : i1 to i32
    %c0_i32_8 = arith.constant 0 : i32
    %7 = arith.cmpi ne, %6, %c0_i32_8 : i32
    scf.if %7 {
      %c0_49 = arith.constant 0 : index
      %c0_50 = arith.constant 0 : index
      %c0_51 = arith.constant 0 : index
      %c0_52 = arith.constant 0 : index
      %39 = vector.load %arg3[%c0_49, %c0_50, %c0_51, %c0_52] : memref<1x1x16x8xf32, #tpu.memory_space<vmem>>, vector<1x1x16x8xf32>
      %40 = vector.shape_cast %39 : vector<1x1x16x8xf32> to vector<1x16x8xf32>
      %c0_53 = arith.constant 0 : index
      %c1_54 = arith.constant 1 : index
      %c0_55 = arith.constant 0 : index
      %41 = vector.load %arg9[%c0_53, %c1_54, %c0_55] : memref<10x18x8xf32, #tpu.memory_space<vmem>>, vector<1x16x8xf32>
      tpu.vector_store %arg9[%c0_53, %c1_54, %c0_55], %40 {strides = array<i32>} : memref<10x18x8xf32, #tpu.memory_space<vmem>>, vector<1x16x8xf32>,
    } else {
    }
    %c1_i32 = arith.constant 1 : i32
    %8 = arith.cmpi slt, %arg1, %c1_i32 : i32
    %9 = arith.extui %8 : i1 to i32
    %c0_i32_9 = arith.constant 0 : i32
    %10 = arith.cmpi ne, %9, %c0_i32_9 : i32
    scf.if %10 {
      %c0_49 = arith.constant 0 : index
      %c0_50 = arith.constant 0 : index
      %c0_51 = arith.constant 0 : index
      %c0_52 = arith.constant 0 : index
      %39 = vector.load %arg4[%c0_49, %c0_50, %c0_51, %c0_52] : memref<1x1x16x8xf32, #tpu.memory_space<vmem>>, vector<1x1x16x8xf32>
      %40 = vector.shape_cast %39 : vector<1x1x16x8xf32> to vector<1x16x8xf32>
      %c9 = arith.constant 9 : index
      %c1_53 = arith.constant 1 : index
      %c0_54 = arith.constant 0 : index
      %41 = vector.load %arg9[%c9, %c1_53, %c0_54] : memref<10x18x8xf32, #tpu.memory_space<vmem>>, vector<1x16x8xf32>
      tpu.vector_store %arg9[%c9, %c1_53, %c0_54], %40 {strides = array<i32>} : memref<10x18x8xf32, #tpu.memory_space<vmem>>, vector<1x16x8xf32>,
    } else {
    }
    %c0_10 = arith.constant 0 : index
    %c0_11 = arith.constant 0 : index
    %c0_12 = arith.constant 0 : index
    %11 = vector.load %arg9[%c0_10, %c0_11, %c0_12] : memref<10x18x8xf32, #tpu.memory_space<vmem>>, vector<8x16x8xf32>
    %12 = vector.shape_cast %11 : vector<8x16x8xf32> to vector<128x8xf32>
    %c0_13 = arith.constant 0 : index
    %c1_14 = arith.constant 1 : index
    %c0_15 = arith.constant 0 : index
    %13 = vector.load %arg9[%c0_13, %c1_14, %c0_15] : memref<10x18x8xf32, #tpu.memory_space<vmem>>, vector<8x16x8xf32>
    %14 = vector.shape_cast %13 : vector<8x16x8xf32> to vector<128x8xf32>
    %c0_16 = arith.constant 0 : index
    %c2 = arith.constant 2 : index
    %c0_17 = arith.constant 0 : index
    %15 = vector.load %arg9[%c0_16, %c2, %c0_17] : memref<10x18x8xf32, #tpu.memory_space<vmem>>, vector<8x16x8xf32>
    %16 = vector.shape_cast %15 : vector<8x16x8xf32> to vector<128x8xf32>
    %c1_18 = arith.constant 1 : index
    %c0_19 = arith.constant 0 : index
    %c0_20 = arith.constant 0 : index
    %17 = vector.load %arg9[%c1_18, %c0_19, %c0_20] : memref<10x18x8xf32, #tpu.memory_space<vmem>>, vector<8x16x8xf32>
    %18 = vector.shape_cast %17 : vector<8x16x8xf32> to vector<128x8xf32>
    %c1_21 = arith.constant 1 : index
    %c1_22 = arith.constant 1 : index
    %c0_23 = arith.constant 0 : index
    %19 = vector.load %arg9[%c1_21, %c1_22, %c0_23] : memref<10x18x8xf32, #tpu.memory_space<vmem>>, vector<8x16x8xf32>
    %20 = vector.shape_cast %19 : vector<8x16x8xf32> to vector<128x8xf32>
    %c1_24 = arith.constant 1 : index
    %c2_25 = arith.constant 2 : index
    %c0_26 = arith.constant 0 : index
    %21 = vector.load %arg9[%c1_24, %c2_25, %c0_26] : memref<10x18x8xf32, #tpu.memory_space<vmem>>, vector<8x16x8xf32>
    %22 = vector.shape_cast %21 : vector<8x16x8xf32> to vector<128x8xf32>
    %c2_27 = arith.constant 2 : index
    %c0_28 = arith.constant 0 : index
    %c0_29 = arith.constant 0 : index
    %23 = vector.load %arg9[%c2_27, %c0_28, %c0_29] : memref<10x18x8xf32, #tpu.memory_space<vmem>>, vector<8x16x8xf32>
    %24 = vector.shape_cast %23 : vector<8x16x8xf32> to vector<128x8xf32>
    %c2_30 = arith.constant 2 : index
    %c1_31 = arith.constant 1 : index
    %c0_32 = arith.constant 0 : index
    %25 = vector.load %arg9[%c2_30, %c1_31, %c0_32] : memref<10x18x8xf32, #tpu.memory_space<vmem>>, vector<8x16x8xf32>
    %26 = vector.shape_cast %25 : vector<8x16x8xf32> to vector<128x8xf32>
    %c2_33 = arith.constant 2 : index
    %c2_34 = arith.constant 2 : index
    %c0_35 = arith.constant 0 : index
    %27 = vector.load %arg9[%c2_33, %c2_34, %c0_35] : memref<10x18x8xf32, #tpu.memory_space<vmem>>, vector<8x16x8xf32>
    %28 = vector.shape_cast %27 : vector<8x16x8xf32> to vector<128x8xf32>
    %29 = tpu.concatenate %12, %14, %16, %18, %20, %22, %24, %26, %28 in 1 : vector<128x8xf32>, vector<128x8xf32>, vector<128x8xf32>, vector<128x8xf32>, vector<128x8xf32>, vector<128x8xf32>, vector<128x8xf32>, vector<128x8xf32>, vector<128x8xf32> -> vector<128x72xf32>
    %c0_36 = arith.constant 0 : index
    %c0_37 = arith.constant 0 : index
    %30 = vector.load %arg5[%c0_36, %c0_37] : memref<72x8xf32, #tpu.memory_space<vmem>>, vector<72x8xf32>
    %cst_38 = arith.constant dense<0.000000e+00> : vector<128x8xf32>
    %31 = tpu.matmul %29, %30, %cst_38 {dimension_numbers = #tpu.dot_dimension_numbers<[1], [0], [0], [1], [0, 0, 1, 1], [], []>} : vector<128x72xf32>, vector<72x8xf32>, vector<128x8xf32> -> vector<128x8xf32>
    %c0_39 = arith.constant 0 : index
    %c0_40 = arith.constant 0 : index
    %32 = vector.load %arg6[%c0_39, %c0_40] : memref<1x8xf32, #tpu.memory_space<vmem>>, vector<1x8xf32>
    %33 = vector.broadcast %32 : vector<1x8xf32> to vector<128x8xf32>
    %34 = arith.addf %31, %33 : vector<128x8xf32>
    %35 = vector.shape_cast %34 : vector<128x8xf32> to vector<1x8x16x8xf32>
    %c0_41 = arith.constant 0 : index
    %c0_42 = arith.constant 0 : index
    %c0_43 = arith.constant 0 : index
    %c0_44 = arith.constant 0 : index
    %36 = vector.load %arg7[%c0_41, %c0_42, %c0_43, %c0_44] : memref<1x8x16x8xf32, #tpu.memory_space<vmem>>, vector<1x8x16x8xf32>
    %37 = arith.addf %35, %36 : vector<1x8x16x8xf32>
    %c0_45 = arith.constant 0 : index
    %c0_46 = arith.constant 0 : index
    %c0_47 = arith.constant 0 : index
    %c0_48 = arith.constant 0 : index
    %38 = vector.load %arg8[%c0_45, %c0_46, %c0_47, %c0_48] : memref<1x8x16x8xf32, #tpu.memory_space<vmem>>, vector<1x8x16x8xf32>
    tpu.vector_store %arg8[%c0_45, %c0_46, %c0_47, %c0_48], %37 {strides = array<i32>} : memref<1x8x16x8xf32, #tpu.memory_space<vmem>>, vector<1x8x16x8xf32>,
    return
  }
  func.func @transform_0(%arg0: i32, %arg1: i32) -> (i32, i32, i32, i32) {
    %c0_i32 = arith.constant 0 : i32
    %c0_i32_0 = arith.constant 0 : i32
    %c0_i32_1 = arith.constant 0 : i32
    return %arg0, %arg1, %c0_i32, %c0_i32_0 : i32, i32, i32, i32
  }
  func.func @transform_1(%arg0: i32, %arg1: i32) -> (i32, i32, i32, i32) {
    %c8_i32 = arith.constant 8 : i32
    %0 = arith.muli %arg1, %c8_i32 : i32
    %c1_i32 = arith.constant 1 : i32
    %1 = arith.subi %0, %c1_i32 : i32
    %c0_i32 = arith.constant 0 : i32
    %2 = arith.maxsi %1, %c0_i32 : i32
    %c0_i32_0 = arith.constant 0 : i32
    %c0_i32_1 = arith.constant 0 : i32
    %c0_i32_2 = arith.constant 0 : i32
    return %arg0, %2, %c0_i32_0, %c0_i32_1 : i32, i32, i32, i32
  }
  func.func @transform_2(%arg0: i32, %arg1: i32) -> (i32, i32, i32, i32) {
    %c8_i32 = arith.constant 8 : i32
    %0 = arith.muli %arg1, %c8_i32 : i32
    %c8_i32_0 = arith.constant 8 : i32
    %1 = arith.addi %0, %c8_i32_0 : i32
    %c15_i32 = arith.constant 15 : i32
    %2 = arith.minsi %1, %c15_i32 : i32
    %c0_i32 = arith.constant 0 : i32
    %c0_i32_1 = arith.constant 0 : i32
    %c0_i32_2 = arith.constant 0 : i32
    return %arg0, %2, %c0_i32, %c0_i32_1 : i32, i32, i32, i32
  }
  func.func @transform_3(%arg0: i32, %arg1: i32) -> (i32, i32) {
    %c0_i32 = arith.constant 0 : i32
    %c0_i32_0 = arith.constant 0 : i32
    %c0_i32_1 = arith.constant 0 : i32
    return %c0_i32, %c0_i32_0 : i32, i32
  }
  func.func @transform_4(%arg0: i32, %arg1: i32) -> (i32, i32) {
    %c0_i32 = arith.constant 0 : i32
    %c0_i32_0 = arith.constant 0 : i32
    %c0_i32_1 = arith.constant 0 : i32
    return %c0_i32, %c0_i32_0 : i32, i32
  }
  func.func @transform_5(%arg0: i32, %arg1: i32) -> (i32, i32, i32, i32) {
    %c0_i32 = arith.constant 0 : i32
    %c0_i32_0 = arith.constant 0 : i32
    %c0_i32_1 = arith.constant 0 : i32
    return %arg0, %arg1, %c0_i32, %c0_i32_0 : i32, i32, i32, i32
  }
  func.func @transform_6(%arg0: i32, %arg1: i32) -> (i32, i32, i32, i32) {
    %c0_i32 = arith.constant 0 : i32
    %c0_i32_0 = arith.constant 0 : i32
    %c0_i32_1 = arith.constant 0 : i32
    return %arg0, %arg1, %c0_i32, %c0_i32_0 : i32, i32, i32, i32
  }
}

module attributes {stable_mosaic.version = 11 : i64} {
  func.func @_conv3x3_kernel(%arg0: i32, %arg1: i32, %arg2: memref<1x8x16x8xf32, #tpu.memory_space<vmem>>, %arg3: memref<1x1x16x8xf32, #tpu.memory_space<vmem>>, %arg4: memref<1x1x16x8xf32, #tpu.memory_space<vmem>>, %arg5: memref<72x3xf32, #tpu.memory_space<vmem>>, %arg6: memref<1x3xf32, #tpu.memory_space<vmem>>, %arg7: memref<1x8x16x3xf32, #tpu.memory_space<vmem>>, %arg8: memref<1x8x16x3xf32, #tpu.memory_space<vmem>>, %arg9: memref<10x18x8xf32, #tpu.memory_space<vmem>>) attributes {dimension_semantics = [#tpu.dimension_semantics<parallel>, #tpu.dimension_semantics<parallel>], iteration_bounds = array<i64: 2, 2>, scalar_prefetch = 0 : i64, scratch_operands = 1 : i64, tpu.core_type = #tpu.core_type<tc>, window_params = [{transform_indices = @transform_0, window_bounds = array<i64: 1, 8, 16, 8>}, {transform_indices = @transform_1, window_bounds = array<i64: 1, 1, 16, 8>}, {transform_indices = @transform_2, window_bounds = array<i64: 1, 1, 16, 8>}, {pipeline_mode = #tpu.pipeline_mode<synchronous>, transform_indices = @transform_3, window_bounds = array<i64: 72, 3>}, {pipeline_mode = #tpu.pipeline_mode<synchronous>, transform_indices = @transform_4, window_bounds = array<i64: 1, 3>}, {transform_indices = @transform_5, window_bounds = array<i64: 1, 8, 16, 3>}, {transform_indices = @transform_6, window_bounds = array<i64: 1, 8, 16, 3>}]} {
    %cst = arith.constant 0.000000e+00 : f32
    %0 = vector.broadcast %cst : f32 to vector<10x18x8xf32>
    %c0 = arith.constant 0 : index
    %c0_0 = arith.constant 0 : index
    %c0_1 = arith.constant 0 : index
    %1 = vector.load %arg9[%c0, %c0_0, %c0_1] : memref<10x18x8xf32, #tpu.memory_space<vmem>>, vector<10x18x8xf32>
    tpu.vector_store %arg9[%c0, %c0_0, %c0_1], %0 {strides = array<i32>} : memref<10x18x8xf32, #tpu.memory_space<vmem>>, vector<10x18x8xf32>,
    %c0_2 = arith.constant 0 : index
    %c0_3 = arith.constant 0 : index
    %c0_4 = arith.constant 0 : index
    %c0_5 = arith.constant 0 : index
    %2 = vector.load %arg2[%c0_2, %c0_3, %c0_4, %c0_5] : memref<1x8x16x8xf32, #tpu.memory_space<vmem>>, vector<1x8x16x8xf32>
    %3 = vector.shape_cast %2 : vector<1x8x16x8xf32> to vector<8x16x8xf32>
    %c1 = arith.constant 1 : index
    %c1_6 = arith.constant 1 : index
    %c0_7 = arith.constant 0 : index
    %4 = vector.load %arg9[%c1, %c1_6, %c0_7] : memref<10x18x8xf32, #tpu.memory_space<vmem>>, vector<8x16x8xf32>
    tpu.vector_store %arg9[%c1, %c1_6, %c0_7], %3 {strides = array<i32>} : memref<10x18x8xf32, #tpu.memory_space<vmem>>, vector<8x16x8xf32>,
    %c0_i32 = arith.constant 0 : i32
    %5 = arith.cmpi sgt, %arg1, %c0_i32 : i32
    %6 = arith.extui %5 : i1 to i32
    %c0_i32_8 = arith.constant 0 : i32
    %7 = arith.cmpi ne, %6, %c0_i32_8 : i32
    scf.if %7 {
      %c0_49 = arith.constant 0 : index
      %c0_50 = arith.constant 0 : index
      %c0_51 = arith.constant 0 : index
      %c0_52 = arith.constant 0 : index
      %39 = vector.load %arg3[%c0_49, %c0_50, %c0_51, %c0_52] : memref<1x1x16x8xf32, #tpu.memory_space<vmem>>, vector<1x1x16x8xf32>
      %40 = vector.shape_cast %39 : vector<1x1x16x8xf32> to vector<1x16x8xf32>
      %c0_53 = arith.constant 0 : index
      %c1_54 = arith.constant 1 : index
      %c0_55 = arith.constant 0 : index
      %41 = vector.load %arg9[%c0_53, %c1_54, %c0_55] : memref<10x18x8xf32, #tpu.memory_space<vmem>>, vector<1x16x8xf32>
      tpu.vector_store %arg9[%c0_53, %c1_54, %c0_55], %40 {strides = array<i32>} : memref<10x18x8xf32, #tpu.memory_space<vmem>>, vector<1x16x8xf32>,
    } else {
    }
    %c1_i32 = arith.constant 1 : i32
    %8 = arith.cmpi slt, %arg1, %c1_i32 : i32
    %9 = arith.extui %8 : i1 to i32
    %c0_i32_9 = arith.constant 0 : i32
    %10 = arith.cmpi ne, %9, %c0_i32_9 : i32
    scf.if %10 {
      %c0_49 = arith.constant 0 : index
      %c0_50 = arith.constant 0 : index
      %c0_51 = arith.constant 0 : index
      %c0_52 = arith.constant 0 : index
      %39 = vector.load %arg4[%c0_49, %c0_50, %c0_51, %c0_52] : memref<1x1x16x8xf32, #tpu.memory_space<vmem>>, vector<1x1x16x8xf32>
      %40 = vector.shape_cast %39 : vector<1x1x16x8xf32> to vector<1x16x8xf32>
      %c9 = arith.constant 9 : index
      %c1_53 = arith.constant 1 : index
      %c0_54 = arith.constant 0 : index
      %41 = vector.load %arg9[%c9, %c1_53, %c0_54] : memref<10x18x8xf32, #tpu.memory_space<vmem>>, vector<1x16x8xf32>
      tpu.vector_store %arg9[%c9, %c1_53, %c0_54], %40 {strides = array<i32>} : memref<10x18x8xf32, #tpu.memory_space<vmem>>, vector<1x16x8xf32>,
    } else {
    }
    %c0_10 = arith.constant 0 : index
    %c0_11 = arith.constant 0 : index
    %c0_12 = arith.constant 0 : index
    %11 = vector.load %arg9[%c0_10, %c0_11, %c0_12] : memref<10x18x8xf32, #tpu.memory_space<vmem>>, vector<8x16x8xf32>
    %12 = vector.shape_cast %11 : vector<8x16x8xf32> to vector<128x8xf32>
    %c0_13 = arith.constant 0 : index
    %c1_14 = arith.constant 1 : index
    %c0_15 = arith.constant 0 : index
    %13 = vector.load %arg9[%c0_13, %c1_14, %c0_15] : memref<10x18x8xf32, #tpu.memory_space<vmem>>, vector<8x16x8xf32>
    %14 = vector.shape_cast %13 : vector<8x16x8xf32> to vector<128x8xf32>
    %c0_16 = arith.constant 0 : index
    %c2 = arith.constant 2 : index
    %c0_17 = arith.constant 0 : index
    %15 = vector.load %arg9[%c0_16, %c2, %c0_17] : memref<10x18x8xf32, #tpu.memory_space<vmem>>, vector<8x16x8xf32>
    %16 = vector.shape_cast %15 : vector<8x16x8xf32> to vector<128x8xf32>
    %c1_18 = arith.constant 1 : index
    %c0_19 = arith.constant 0 : index
    %c0_20 = arith.constant 0 : index
    %17 = vector.load %arg9[%c1_18, %c0_19, %c0_20] : memref<10x18x8xf32, #tpu.memory_space<vmem>>, vector<8x16x8xf32>
    %18 = vector.shape_cast %17 : vector<8x16x8xf32> to vector<128x8xf32>
    %c1_21 = arith.constant 1 : index
    %c1_22 = arith.constant 1 : index
    %c0_23 = arith.constant 0 : index
    %19 = vector.load %arg9[%c1_21, %c1_22, %c0_23] : memref<10x18x8xf32, #tpu.memory_space<vmem>>, vector<8x16x8xf32>
    %20 = vector.shape_cast %19 : vector<8x16x8xf32> to vector<128x8xf32>
    %c1_24 = arith.constant 1 : index
    %c2_25 = arith.constant 2 : index
    %c0_26 = arith.constant 0 : index
    %21 = vector.load %arg9[%c1_24, %c2_25, %c0_26] : memref<10x18x8xf32, #tpu.memory_space<vmem>>, vector<8x16x8xf32>
    %22 = vector.shape_cast %21 : vector<8x16x8xf32> to vector<128x8xf32>
    %c2_27 = arith.constant 2 : index
    %c0_28 = arith.constant 0 : index
    %c0_29 = arith.constant 0 : index
    %23 = vector.load %arg9[%c2_27, %c0_28, %c0_29] : memref<10x18x8xf32, #tpu.memory_space<vmem>>, vector<8x16x8xf32>
    %24 = vector.shape_cast %23 : vector<8x16x8xf32> to vector<128x8xf32>
    %c2_30 = arith.constant 2 : index
    %c1_31 = arith.constant 1 : index
    %c0_32 = arith.constant 0 : index
    %25 = vector.load %arg9[%c2_30, %c1_31, %c0_32] : memref<10x18x8xf32, #tpu.memory_space<vmem>>, vector<8x16x8xf32>
    %26 = vector.shape_cast %25 : vector<8x16x8xf32> to vector<128x8xf32>
    %c2_33 = arith.constant 2 : index
    %c2_34 = arith.constant 2 : index
    %c0_35 = arith.constant 0 : index
    %27 = vector.load %arg9[%c2_33, %c2_34, %c0_35] : memref<10x18x8xf32, #tpu.memory_space<vmem>>, vector<8x16x8xf32>
    %28 = vector.shape_cast %27 : vector<8x16x8xf32> to vector<128x8xf32>
    %29 = tpu.concatenate %12, %14, %16, %18, %20, %22, %24, %26, %28 in 1 : vector<128x8xf32>, vector<128x8xf32>, vector<128x8xf32>, vector<128x8xf32>, vector<128x8xf32>, vector<128x8xf32>, vector<128x8xf32>, vector<128x8xf32>, vector<128x8xf32> -> vector<128x72xf32>
    %c0_36 = arith.constant 0 : index
    %c0_37 = arith.constant 0 : index
    %30 = vector.load %arg5[%c0_36, %c0_37] : memref<72x3xf32, #tpu.memory_space<vmem>>, vector<72x3xf32>
    %cst_38 = arith.constant dense<0.000000e+00> : vector<128x3xf32>
    %31 = tpu.matmul %29, %30, %cst_38 {dimension_numbers = #tpu.dot_dimension_numbers<[1], [0], [0], [1], [0, 0, 1, 1], [], []>} : vector<128x72xf32>, vector<72x3xf32>, vector<128x3xf32> -> vector<128x3xf32>
    %c0_39 = arith.constant 0 : index
    %c0_40 = arith.constant 0 : index
    %32 = vector.load %arg6[%c0_39, %c0_40] : memref<1x3xf32, #tpu.memory_space<vmem>>, vector<1x3xf32>
    %33 = vector.broadcast %32 : vector<1x3xf32> to vector<128x3xf32>
    %34 = arith.addf %31, %33 : vector<128x3xf32>
    %35 = vector.shape_cast %34 : vector<128x3xf32> to vector<1x8x16x3xf32>
    %c0_41 = arith.constant 0 : index
    %c0_42 = arith.constant 0 : index
    %c0_43 = arith.constant 0 : index
    %c0_44 = arith.constant 0 : index
    %36 = vector.load %arg7[%c0_41, %c0_42, %c0_43, %c0_44] : memref<1x8x16x3xf32, #tpu.memory_space<vmem>>, vector<1x8x16x3xf32>
    %37 = arith.addf %35, %36 : vector<1x8x16x3xf32>
    %c0_45 = arith.constant 0 : index
    %c0_46 = arith.constant 0 : index
    %c0_47 = arith.constant 0 : index
    %c0_48 = arith.constant 0 : index
    %38 = vector.load %arg8[%c0_45, %c0_46, %c0_47, %c0_48] : memref<1x8x16x3xf32, #tpu.memory_space<vmem>>, vector<1x8x16x3xf32>
    tpu.vector_store %arg8[%c0_45, %c0_46, %c0_47, %c0_48], %37 {strides = array<i32>} : memref<1x8x16x3xf32, #tpu.memory_space<vmem>>, vector<1x8x16x3xf32>,
    return
  }
  func.func @transform_0(%arg0: i32, %arg1: i32) -> (i32, i32, i32, i32) {
    %c0_i32 = arith.constant 0 : i32
    %c0_i32_0 = arith.constant 0 : i32
    %c0_i32_1 = arith.constant 0 : i32
    return %arg0, %arg1, %c0_i32, %c0_i32_0 : i32, i32, i32, i32
  }
  func.func @transform_1(%arg0: i32, %arg1: i32) -> (i32, i32, i32, i32) {
    %c8_i32 = arith.constant 8 : i32
    %0 = arith.muli %arg1, %c8_i32 : i32
    %c1_i32 = arith.constant 1 : i32
    %1 = arith.subi %0, %c1_i32 : i32
    %c0_i32 = arith.constant 0 : i32
    %2 = arith.maxsi %1, %c0_i32 : i32
    %c0_i32_0 = arith.constant 0 : i32
    %c0_i32_1 = arith.constant 0 : i32
    %c0_i32_2 = arith.constant 0 : i32
    return %arg0, %2, %c0_i32_0, %c0_i32_1 : i32, i32, i32, i32
  }
  func.func @transform_2(%arg0: i32, %arg1: i32) -> (i32, i32, i32, i32) {
    %c8_i32 = arith.constant 8 : i32
    %0 = arith.muli %arg1, %c8_i32 : i32
    %c8_i32_0 = arith.constant 8 : i32
    %1 = arith.addi %0, %c8_i32_0 : i32
    %c15_i32 = arith.constant 15 : i32
    %2 = arith.minsi %1, %c15_i32 : i32
    %c0_i32 = arith.constant 0 : i32
    %c0_i32_1 = arith.constant 0 : i32
    %c0_i32_2 = arith.constant 0 : i32
    return %arg0, %2, %c0_i32, %c0_i32_1 : i32, i32, i32, i32
  }
  func.func @transform_3(%arg0: i32, %arg1: i32) -> (i32, i32) {
    %c0_i32 = arith.constant 0 : i32
    %c0_i32_0 = arith.constant 0 : i32
    %c0_i32_1 = arith.constant 0 : i32
    return %c0_i32, %c0_i32_0 : i32, i32
  }
  func.func @transform_4(%arg0: i32, %arg1: i32) -> (i32, i32) {
    %c0_i32 = arith.constant 0 : i32
    %c0_i32_0 = arith.constant 0 : i32
    %c0_i32_1 = arith.constant 0 : i32
    return %c0_i32, %c0_i32_0 : i32, i32
  }
  func.func @transform_5(%arg0: i32, %arg1: i32) -> (i32, i32, i32, i32) {
    %c0_i32 = arith.constant 0 : i32
    %c0_i32_0 = arith.constant 0 : i32
    %c0_i32_1 = arith.constant 0 : i32
    return %arg0, %arg1, %c0_i32, %c0_i32_0 : i32, i32, i32, i32
  }
  func.func @transform_6(%arg0: i32, %arg1: i32) -> (i32, i32, i32, i32) {
    %c0_i32 = arith.constant 0 : i32
    %c0_i32_0 = arith.constant 0 : i32
    %c0_i32_1 = arith.constant 0 : i32
    return %arg0, %arg1, %c0_i32, %c0_i32_0 : i32, i32, i32, i32
  }
}

</mosaic_0001>

<bundles_post_ra>
// kernel: rcan_a_forward.6
= control target key start
LH: loop header
LB: loop body
LE: loop exit
PB: predicated region body
PF: predicated region fallthrough
CT: control target
= control target key end

     0   :  { %s1751_s18 = smov 0   ;;  %s1753_s19 = smov 0   ;;  %s2557_s0 = inlined_call_operand.vmem [shape: f32[2,16,16,3], index: 0, kind: input, shape index: {}, may-alias: {0,1,2}]   ;;  %s2558_s1 = inlined_call_operand.vmem [shape: f32[2,16,16,3], index: 1, kind: input, shape index: {}, may-alias: {0,1,2}]   ;;  %s2559_s2 = inlined_call_operand.vmem [shape: f32[2,16,16,3], index: 2, kind: input, shape index: {}, may-alias: {0,1,2}]   ;;  %s2560_s3 = inlined_call_operand.vmem [shape: f32[27,8], index: 3, kind: input, shape index: {}]   ;;  %s2561_s4 = inlined_call_operand.vmem [shape: f32[1,8], index: 4, kind: input, shape index: {}]   ;;  %s2562_s5 = inlined_call_operand.vmem [shape: f32[2,16,16,8], index: 5, kind: output, shape index: {}]  }
   0x1   :  { %s1755_s20 = smov 0   ;;  %s1757_s21 = smov 0  }
   0x2   :  { %s1759_s22 = smov 0  }
   0x3 LB: > { %s24_s23 = sadd.s32 1, %s1702_s20  ;;  %s27_s24 = sadd.s32 1, %s1706_s21  ;;  %s1710_s22 = sphi %s1759_s22, %s15_s22   ;;  %s1706_s21 = sphi %s1757_s21, %s2567_s21   ;;  %s1702_s20 = sphi %s1755_s20, %s2566_s20   ;;  %s1698_s19 = sphi %s1753_s19, %s2565_s19   ;;  %s1694_s18 = sphi %s1751_s18, %s2564_s18  }
   0x4   : > { %p25_p0 = scmp.ge.s32.totalorder %s24_s23, 2  ;;  %p1561_p1 = scmp.ge.s32.totalorder %s1710_s22, 1 }
   0x5   : > { %p273_p2 = scmp.lt.s32.totalorder %s1710_s22, 5 }
   0x6   : > { %s2569_s23 = smov (%p25_p0, %s24_s23), 0  ;;  %s2571_s24 = smov (!%p25_p0, %s27_s24), %s1706_s21 }
   0x7   : > { %p274_p3 = pnand %p1561_p1, %p273_p2  ;;  %p29_p4 = scmp.ge.s32.totalorder %s2571_s24, 2 }
   0x8   : > { %s1562_s25 = sshll.u32 (!%p274_p3), %s1694_s18, 3  ;;  %p338_p5 = scmp.lt.s32.totalorder (!%p274_p3), %s1698_s19, 1 }
   0x9   : > { %s2573_s24 = smov (%p29_p4, %s2571_s24), 0  ;;  %277 = sbr.rel (%p274_p3) target bundleno = 657 (0x291), region = 40 }
   0xa   : > { %p340_p6 = scmp.lt.s32.totalorder (!%p274_p3), %s1562_s25, 15  ;;  %s1567_s26 = sadd.s32 (!%p274_p3), 4294967295, %s1562_s25 }
   0xb   : > { %p350_p7 = scmp.gt.s32.totalorder (!%p274_p3), %s1567_s26, 0  ;;  %p1568_p8 = scmp.lt.s32.totalorder (!%p274_p3), %s1567_s26, 15 }
   0xc   : > { %s366_s6 = sadd.s32 (!%p274_p3), 8, %s1562_s25  ;;  %p1587_p10 = scmp.le.s32.totalorder (!%p274_p3), %s1694_s18, 0 }
   0xd   : > { %p1797_p9 = scmp.lt.s32.totalorder (!%p274_p3), %s366_s6, 15 }
   0xe   : > { %vm393_vm0 = vcmask 23552   ;;  %v1712_v0 = vmov 0.0   ;;  %s2575_s19 = smov (!%p338_p5, %s1698_s19), 1  ;;  %vm396_vm1 = vcmask 17408  }
   0xf   : > { %398 = vst.msk [vmem:[#allocation2 + $0x18] sm:$0xff] %vm393_vm0, %v1712_v0  ;;  %s341_s27 = scalar_select %p340_p6, %s1562_s25, 15 }
  0x10   : > { %394 = vst.msk [vmem:[#allocation2] sm:$0xff] %vm393_vm0, %v1712_v0  ;;  %s1788_s28 = sshll.u32 %s2575_s19, 5  ;;  %s2577_s6 = smov (!%p1797_p9, %s366_s6), 15 }
  0x11   : > { %395 = vst.msk [vmem:[#allocation2 + $0x8] sm:$0xff] %vm393_vm0, %v1712_v0  ;;  %s1563_s29 = sshll.u32 %s341_s27, 1  ;;  %s2581_s6 = smov (!%p1797_p9, %s2577_s6), 15 }
  0x12   : > { %399 = vst.msk [vmem:[#allocation2 + $0x20] sm:$0xff] %vm393_vm0, %v1712_v0  ;;  %s1793_s30 = sadd.s32 %s1788_s28, %s1563_s29  ;;  %s1580_s15 = sshll.u32 %s2581_s6, 1 }
  0x13   : > { %401 = vst.msk [vmem:[#allocation2 + $0x30] sm:$0xff] %vm393_vm0, %v1712_v0  ;;  %s1565_s7 = sshll.u32 %s1793_s30, 3  ;;  %s375_s17 = sadd.s32 %s1580_s15, %s1788_s28 }
  0x14   : > { %402 = vst.msk [vmem:[#allocation2 + $0x38] sm:$0xff] %vm393_vm0, %v1712_v0  ;;  %s1807_s11 = scalar_lea.vmem %s2562_s5, %s1565_s7  ;;  %s1582_s27 = sshll.u32 %s375_s17, 3 }
  0x15   : > { %404 = vst.msk [vmem:[#allocation2 + $0x48] sm:$0xff] %vm393_vm0, %v1712_v0  ;;  %s351_s12 = scalar_select %p350_p7, %s1567_s26, 0 }
  0x16   : > { %405 = vst.msk [vmem:[#allocation2 + $0x50] sm:$0xff] %vm393_vm0, %v1712_v0  ;;  %s1833_s9 = scalar_lea.vmem %s2559_s2, %s1582_s27  ;;  %s1843_s10 = scalar_lea.vmem %s2557_s0, %s1565_s7 }
  0x17   : > { %407 = vst.msk [vmem:[#allocation2 + $0x60] sm:$0xff] %vm393_vm0, %v1712_v0  ;;  %s2579_s12 = smov (!%p1568_p8, %s351_s12), 15  ;;  %v425_v1 = vld [vmem:[%s1843_s10] sm:$0xff]  ;;  %v426_v2 = vld [vmem:[%s1843_s10 + $0x8] sm:$0xff]  ;;  %v427_v3 = vld [vmem:[%s1843_s10 + $0x10] sm:$0xff] }
  0x18   : > { %408 = vst.msk [vmem:[#allocation2 + $0x68] sm:$0xff] %vm393_vm0, %v1712_v0  ;;  %s1573_s13 = sshll.u32 %s2579_s12, 1  ;;  %v428_v4 = vld [vmem:[%s1843_s10 + $0x18] sm:$0xff]  ;;  %v429_v5 = vld [vmem:[%s1843_s10 + $0x20] sm:$0xff]  ;;  %v430_v6 = vld [vmem:[%s1843_s10 + $0x28] sm:$0xff] }
  0x19   : > { %410 = vst.msk [vmem:[#allocation2 + $0x78] sm:$0xff] %vm393_vm0, %v1712_v0  ;;  %s358_s14 = sadd.s32 %s1573_s13, %s1788_s28  ;;  %v431_v7 = vld [vmem:[%s1843_s10 + $0x30] sm:$0xff]  ;;  %v432_v8 = vld [vmem:[%s1843_s10 + $0x38] sm:$0xff]  ;;  %v433_v9 = vld [vmem:[%s1843_s10 + $0x40] sm:$0xff] }
  0x1a   : > { %411 = vst.msk [vmem:[#allocation2 + $0x80] sm:$0xff] %vm393_vm0, %v1712_v0  ;;  %s1575_s16 = sshll.u32 %s358_s14, 3  ;;  %v434_v10 = vld [vmem:[%s1843_s10 + $0x48] sm:$0xff]  ;;  %v435_v11 = vld [vmem:[%s1843_s10 + $0x50] sm:$0xff]  ;;  %v436_v12 = vld [vmem:[%s1843_s10 + $0x58] sm:$0xff] }
  0x1b   : > { %413 = vst.msk [vmem:[#allocation2 + $0x90] sm:$0xff] %vm393_vm0, %v1712_v0  ;;  %s1827_s26 = scalar_lea.vmem %s2558_s1, %s1575_s16  ;;  %v437_v13 = vld [vmem:[%s1843_s10 + $0x60] sm:$0xff]  ;;  %v438_v14 = vld [vmem:[%s1843_s10 + $0x68] sm:$0xff]  ;;  %v439_v15 = vld [vmem:[%s1843_s10 + $0x70] sm:$0xff] }
  0x1c   : > { %414 = vst.msk [vmem:[#allocation2 + $0x98] sm:$0xff] %vm393_vm0, %v1712_v0  ;;  %v440_v16 = vld [vmem:[%s1843_s10 + $0x78] sm:$0xff] }
  0x1d   : > { %416 = vst.msk [vmem:[#allocation2 + $0xa8] sm:$0xff] %vm393_vm0, %v1712_v0 }
  0x1e   : > { %417 = vst.msk [vmem:[#allocation2 + $0xb0] sm:$0xff] %vm393_vm0, %v1712_v0 }
  0x1f   : > { %419 = vst.msk [vmem:[#allocation2 + $0xc0] sm:$0xff] %vm393_vm0, %v1712_v0 }
  0x20   : > { %420 = vst.msk [vmem:[#allocation2 + $0xc8] sm:$0xff] %vm393_vm0, %v1712_v0 }
  0x21   : > { %422 = vst.msk [vmem:[#allocation2 + $0xd8] sm:$0xff] %vm393_vm0, %v1712_v0 }
  0x22   : > { %423 = vst.msk [vmem:[#allocation2 + $0xe0] sm:$0xff] %vm393_vm0, %v1712_v0 }
  0x23   : > { %400 = vst.msk [vmem:[#allocation2 + $0x28] sm:$0x3] %vm396_vm1, %v1712_v0 }
  0x24   : > { %397 = vst.msk [vmem:[#allocation2 + $0x10] sm:$0x3] %vm396_vm1, %v1712_v0 }
  0x25   : > { %403 = vst.msk [vmem:[#allocation2 + $0x40] sm:$0x3] %vm396_vm1, %v1712_v0 }
  0x26   : > { %406 = vst.msk [vmem:[#allocation2 + $0x58] sm:$0x3] %vm396_vm1, %v1712_v0 }
  0x27   : > { %409 = vst.msk [vmem:[#allocation2 + $0x70] sm:$0x3] %vm396_vm1, %v1712_v0 }
  0x28   : > { %412 = vst.msk [vmem:[#allocation2 + $0x88] sm:$0x3] %vm396_vm1, %v1712_v0 }
  0x29   : > { %415 = vst.msk [vmem:[#allocation2 + $0xa0] sm:$0x3] %vm396_vm1, %v1712_v0 }
  0x2a   : > { %418 = vst.msk [vmem:[#allocation2 + $0xb8] sm:$0x3] %vm396_vm1, %v1712_v0 }
  0x2b   : > { %421 = vst.msk [vmem:[#allocation2 + $0xd0] sm:$0x3] %vm396_vm1, %v1712_v0 }
  0x2c   : > { %424 = vst.msk [vmem:[#allocation2 + $0xe8] sm:$0x3] %vm396_vm1, %v1712_v0 }
  0x2d   : > { %442 = vst.msk [vmem:[#allocation2 + $0x19] sm:$0xff] %vm393_vm0, %v425_v1 }
  0x2e   : > { %443 = vst.msk [vmem:[#allocation2 + $0x21] sm:$0xff] %vm393_vm0, %v426_v2 }
  0x2f   : > { %444 = vst.msk [vmem:[#allocation2 + $0x31] sm:$0xff] %vm393_vm0, %v427_v3 }
  0x30   : > { %445 = vst.msk [vmem:[#allocation2 + $0x39] sm:$0xff] %vm393_vm0, %v428_v4 }
  0x31   : > { %446 = vst.msk [vmem:[#allocation2 + $0x49] sm:$0xff] %vm393_vm0, %v429_v5 }
  0x32   : > { %447 = vst.msk [vmem:[#allocation2 + $0x51] sm:$0xff] %vm393_vm0, %v430_v6 }
  0x33   : > { %448 = vst.msk [vmem:[#allocation2 + $0x61] sm:$0xff] %vm393_vm0, %v431_v7 }
  0x34   : > { %449 = vst.msk [vmem:[#allocation2 + $0x69] sm:$0xff] %vm393_vm0, %v432_v8 }
  0x35   : > { %450 = vst.msk [vmem:[#allocation2 + $0x79] sm:$0xff] %vm393_vm0, %v433_v9 }
  0x36   : > { %451 = vst.msk [vmem:[#allocation2 + $0x81] sm:$0xff] %vm393_vm0, %v434_v10 }
  0x37   : > { %452 = vst.msk [vmem:[#allocation2 + $0x91] sm:$0xff] %vm393_vm0, %v435_v11 }
  0x38   : > { %453 = vst.msk [vmem:[#allocation2 + $0x99] sm:$0xff] %vm393_vm0, %v436_v12  ;;  %461 = sbr.rel (%p1587_p10) target bundleno = 64 (0x40), region = 44 }
  0x39   : > { %454 = vst.msk [vmem:[#allocation2 + $0xa9] sm:$0xff] %vm393_vm0, %v437_v13 }
  0x3a   : > { %455 = vst.msk [vmem:[#allocation2 + $0xb1] sm:$0xff] %vm393_vm0, %v438_v14 }
  0x3b   : > { %456 = vst.msk [vmem:[#allocation2 + $0xc1] sm:$0xff] %vm393_vm0, %v439_v15 }
  0x3c   : > { %457 = vst.msk [vmem:[#allocation2 + $0xc9] sm:$0xff] %vm393_vm0, %v440_v16 }
  0x3d   : > { %v462_v17 = vld [vmem:[%s1827_s26] sm:$0xff]  ;;  %v463_v18 = vld [vmem:[%s1827_s26 + $0x8] sm:$0xff] }
  0x3e   : > { %464 = vst.msk [vmem:[#allocation2 + $0x1] sm:$0xff] %vm393_vm0, %v462_v17 }
  0x3f   : > { %465 = vst.msk [vmem:[#allocation2 + $0x9] sm:$0xff] %vm393_vm0, %v463_v18 }
  0x40 PF: > { %p1588_p11 = scmp.ge.s32.totalorder %s1694_s18, 1 }
  0x42   : > { %469 = sbr.rel (%p1588_p11) target bundleno = 74 (0x4a), region = 48 }
  0x47   : > { %v470_v19 = vld [vmem:[%s1833_s9] sm:$0xff]  ;;  %v471_v20 = vld [vmem:[%s1833_s9 + $0x8] sm:$0xff] }
  0x48   : > { %473 = vst.msk [vmem:[#allocation2 + $0xd9] sm:$0xff] %vm393_vm0, %v470_v19 }
  0x49   : > { %474 = vst.msk [vmem:[#allocation2 + $0xe1] sm:$0xff] %vm393_vm0, %v471_v20 }
  0x4a PF: > { %v1887_v21 = vld [vmem:[#allocation2 + $0x31] sm:$0xff]  ;;  %v1889_v22 = vld [vmem:[#allocation2 + $0x19] sm:$0xff]  ;;  %v491_v23 = vld [vmem:[#allocation2 + $0x1] sm:$0xff]  ;;  %s1713_s30 = smov 3   ;;  %s1714_s18 = smov 6   ;;  %vm1148_vm2 = vcmask 48128  }
  0x4b   : > { %644 = vrot.lane.b32.xlu2 %v1887_v21, %s1713_s30  ;;  %640 = vrot.lane.b32.xlu1 %v1889_v22, %s1713_s30  ;;  %v1896_v24 = vld [vmem:[#allocation2 + $0x39] sm:$0xff]  ;;  %v1898_v25 = vld [vmem:[#allocation2 + $0x21] sm:$0xff]  ;;  %v492_v26 = vld [vmem:[#allocation2 + $0x9] sm:$0xff]  ;;  %s1715_s7 = smov 9   ;;  %s1716_s12 = smov 12   ;;  %vm1165_vm3 = vcmask 72704  }
  0x4c   : > { %636 = vrot.lane.b32.xlu0 %v491_v23, %s1713_s30  ;;  %v1905_v27 = vld [vmem:[#allocation2 + $0x61] sm:$0xff]  ;;  %v1907_v28 = vld [vmem:[#allocation2 + $0x51] sm:$0xff]  ;;  %v1909_v29 = vld [vmem:[#allocation2 + $0x49] sm:$0xff]  ;;  %s1717_s13 = smov 15   ;;  %s1718_s14 = smov 21   ;;  %vm1182_vm4 = vcmask 97280  }
  0x4d   : > { %v1917_v30 = vld [vmem:[#allocation2 + $0x81] sm:$0xff]  ;;  %v1919_v31 = vld [vmem:[#allocation2 + $0x79] sm:$0xff]  ;;  %v1921_v32 = vld [vmem:[#allocation2 + $0x69] sm:$0xff]  ;;  %s1719_s15 = smov 18   ;;  %s1720_s16 = smov 24   ;;  %vm1324_vm5 = vcmask 1042432  }
  0x4e   : > { %v1929_v33 = vld [vmem:[#allocation2 + $0xa9] sm:$0xff]  ;;  %v1931_v34 = vld [vmem:[#allocation2 + $0x99] sm:$0xff]  ;;  %v1933_v35 = vld [vmem:[#allocation2 + $0x91] sm:$0xff]  ;;  %vm1199_vm6 = vcmask 121856   ;;  %vm1216_vm7 = vcmask 146432   ;;  %vm1233_vm8 = vcmask 171008  }
  0x4f   : > { %v508_v36 = vld [vmem:[#allocation2 + $0xa] sm:$0xff]  ;;  %v507_v37 = vld [vmem:[#allocation2 + $0x2] sm:$0xff]  ;;  %v1947_v39 = vld [vmem:[#allocation2 + $0x32] sm:$0xff]  ;;  %vm1250_vm9 = vcmask 195584   ;;  %vm1275_vm10 = vcmask 220160   ;;  %vm1393_vm11 = vcmask 64512  }
  0x50   : > { %v1941_v38 = vld [vmem:[#allocation2 + $0xb1] sm:$0xff]  ;;  %v1949_v40 = vld [vmem:[#allocation2 + $0x22] sm:$0xff]  ;;  %v1951_v41 = vld [vmem:[#allocation2 + $0x1a] sm:$0xff] }
  0x51   : > { %v1959_v42 = vld [vmem:[#allocation2 + $0x52] sm:$0xff]  ;;  %v1961_v43 = vld [vmem:[#allocation2 + $0x4a] sm:$0xff]  ;;  %v1963_v44 = vld [vmem:[#allocation2 + $0x3a] sm:$0xff] }
  0x52   : > { %v1971_v45 = vld [vmem:[#allocation2 + $0x7a] sm:$0xff]  ;;  %v1973_v46 = vld [vmem:[#allocation2 + $0x6a] sm:$0xff]  ;;  %v1975_v47 = vld [vmem:[#allocation2 + $0x62] sm:$0xff] }
  0x53   : > { %646 = vrot.lane.b32.xlu2 %v1896_v24, %s1713_s30  ;;  %642 = vrot.lane.b32.xlu1 %v1898_v25, %s1713_s30  ;;  %v1983_v48 = vld [vmem:[#allocation2 + $0x9a] sm:$0xff]  ;;  %v1985_v49 = vld [vmem:[#allocation2 + $0x92] sm:$0xff]  ;;  %v1987_v50 = vld [vmem:[#allocation2 + $0x82] sm:$0xff] }
  0x54   : > { %638 = vrot.lane.b32.xlu0 %v492_v26, %s1713_s30  ;;  %v523_v51 = vld [vmem:[#allocation2 + $0x18] sm:$0xff]  ;;  %v1997_v53 = vld [vmem:[#allocation2 + $0xaa] sm:$0xff]  ;;  %v524_v56 = vld [vmem:[#allocation2 + $0x20] sm:$0xff] }
  0x55   : > { %v1995_v52 = vld [vmem:[#allocation2 + $0xb2] sm:$0xff]  ;;  %v2013_v58 = vld [vmem:[#allocation2 + $0x60] sm:$0xff]  ;;  %v2017_v60 = vld [vmem:[#allocation2 + $0x48] sm:$0xff] }
  0x56   : > { %v2004_v54 = vld [vmem:[#allocation2 + $0x38] sm:$0xff]  ;;  %v2006_v55 = vld [vmem:[#allocation2 + $0x30] sm:$0xff]  ;;  %v2027_v62 = vld [vmem:[#allocation2 + $0x80] sm:$0xff] }
  0x57   : > { %v2015_v59 = vld [vmem:[#allocation2 + $0x50] sm:$0xff]  ;;  %v2029_v63 = vld [vmem:[#allocation2 + $0x78] sm:$0xff]  ;;  %v2031_v0 = vld [vmem:[#allocation2 + $0x68] sm:$0xff] }
  0x58   : > { %v2041_v2 = vld [vmem:[#allocation2 + $0xa8] sm:$0xff]  ;;  %v2043_v3 = vld [vmem:[#allocation2 + $0x98] sm:$0xff]  ;;  %v2045_v4 = vld [vmem:[#allocation2 + $0x90] sm:$0xff] }
  0x59   : > { %v2056_v9 = vld [vmem:[#allocation2 + $0xc8] sm:$0xff]  ;;  %v537_v10 = vld [vmem:[#allocation2 + $0xc0] sm:$0xff]  ;;  %v2058_v11 = vld [vmem:[#allocation2 + $0xb0] sm:$0xff] }
  0x5a   : > { %v476_v16 = vld [vmem:[#allocation2 + $0x8] sm:$0xff] }
  0x5b   : > { %652 = vrot.lane.b32.xlu2 %v1905_v27, %s1713_s30  ;;  %650 = vrot.lane.b32.xlu1 %v1907_v28, %s1713_s30 }
  0x5c   : > { %648 = vrot.lane.b32.xlu0 %v1909_v29, %s1713_s30 }
  0x63   : > { %658 = vrot.lane.b32.xlu2 %v1917_v30, %s1713_s30  ;;  %656 = vrot.lane.b32.xlu1 %v1919_v31, %s1713_s30 }
  0x64   : > { %654 = vrot.lane.b32.xlu0 %v1921_v32, %s1713_s30 }
  0x6b   : > { %664 = vrot.lane.b32.xlu2 %v1929_v33, %s1713_s30  ;;  %662 = vrot.lane.b32.xlu1 %v1931_v34, %s1713_s30 }
  0x6c   : > { %660 = vrot.lane.b32.xlu0 %v1933_v35, %s1713_s30 }
  0x73   : > { %702 = vrot.lane.b32.xlu2 %v508_v36, %s1714_s18  ;;  %700 = vrot.lane.b32.xlu1 %v507_v37, %s1714_s18 }
  0x74   : > { %666 = vrot.lane.b32.xlu0 %v1941_v38, %s1713_s30 }
  0x7b   : > { %708 = vrot.lane.b32.xlu2 %v1947_v39, %s1714_s18  ;;  %706 = vrot.lane.b32.xlu1 %v1949_v40, %s1714_s18 }
  0x7c   : > { %704 = vrot.lane.b32.xlu0 %v1951_v41, %s1714_s18 }
  0x83   : > { %714 = vrot.lane.b32.xlu2 %v1959_v42, %s1714_s18  ;;  %712 = vrot.lane.b32.xlu1 %v1961_v43, %s1714_s18 }
  0x84   : > { %710 = vrot.lane.b32.xlu0 %v1963_v44, %s1714_s18 }
  0x8b   : > { %720 = vrot.lane.b32.xlu2 %v1971_v45, %s1714_s18  ;;  %718 = vrot.lane.b32.xlu1 %v1973_v46, %s1714_s18 }
  0x8c   : > { %716 = vrot.lane.b32.xlu0 %v1975_v47, %s1714_s18 }
  0x93   : > { %726 = vrot.lane.b32.xlu2 %v1983_v48, %s1714_s18  ;;  %724 = vrot.lane.b32.xlu1 %v1985_v49, %s1714_s18 }
  0x94   : > { %722 = vrot.lane.b32.xlu0 %v1987_v50, %s1714_s18 }
  0x9b   : > { %764 = vrot.lane.b32.xlu2 %v523_v51, %s1715_s7  ;;  %730 = vrot.lane.b32.xlu1 %v1995_v52, %s1714_s18 }
  0x9c   : > { %728 = vrot.lane.b32.xlu0 %v1997_v53, %s1714_s18 }
  0xa3   : > { %770 = vrot.lane.b32.xlu2 %v2004_v54, %s1715_s7  ;;  %768 = vrot.lane.b32.xlu1 %v2006_v55, %s1715_s7 }
  0xa4   : > { %766 = vrot.lane.b32.xlu0 %v524_v56, %s1715_s7 }
  0xa5   : > { %v645_v57 = vpop.permute.xlu2 %644 }
  0xab   : > { %776 = vrot.lane.b32.xlu2 %v2013_v58, %s1715_s7  ;;  %774 = vrot.lane.b32.xlu1 %v2015_v59, %s1715_s7 }
  0xac   : > { %772 = vrot.lane.b32.xlu0 %v2017_v60, %s1715_s7 }
  0xad   : > { %v2025_v61 = vpop.permute.xlu2 %646 }
  0xb3   : > { %782 = vrot.lane.b32.xlu2 %v2027_v62, %s1715_s7  ;;  %780 = vrot.lane.b32.xlu1 %v2029_v63, %s1715_s7 }
  0xb4   : > { %778 = vrot.lane.b32.xlu0 %v2031_v0, %s1715_s7 }
  0xb5   : > { %v2039_v1 = vpop.permute.xlu2 %652 }
  0xbb   : > { %788 = vrot.lane.b32.xlu2 %v2041_v2, %s1715_s7  ;;  %786 = vrot.lane.b32.xlu1 %v2043_v3, %s1715_s7 }
  0xbc   : > { %784 = vrot.lane.b32.xlu0 %v2045_v4, %s1715_s7 }
  0xbd   : > { %v2053_v5 = vpop.permute.xlu2 %658  ;;  %v641_v6 = vpop.permute.xlu1 %640 }
  0xbe   : > { %v1134_v7 = vsel %vm393_vm0, %v523_v51, %v641_v6  ;;  %v637_v8 = vpop.permute.xlu0 %636 }
  0xc3   : > { %794 = vrot.lane.b32.xlu2 %v2056_v9, %s1715_s7  ;;  %792 = vrot.lane.b32.xlu1 %v537_v10, %s1715_s7 }
  0xc4   : > { %790 = vrot.lane.b32.xlu0 %v2058_v11, %s1715_s7 }
  0xc5   : > { %v2065_v12 = vpop.permute.xlu2 %664  ;;  %v643_v13 = vpop.permute.xlu1 %642 }
  0xc6   : > { %v1135_v14 = vsel %vm393_vm0, %v524_v56, %v643_v13  ;;  %v639_v15 = vpop.permute.xlu0 %638 }
  0xc7   : > { %v1133_v17 = vsel %vm393_vm0, %v476_v16, %v639_v15  ;;  %v475_v16 = vld [vmem:[#allocation2] sm:$0xff] }
  0xcb   : > { %832 = vrot.lane.b32.xlu2 %v1887_v21, %s1716_s12  ;;  %830 = vrot.lane.b32.xlu1 %v1898_v25, %s1716_s12 }
  0xcc   : > { %828 = vrot.lane.b32.xlu0 %v1889_v22, %s1716_s12  ;;  %v1136_v22 = vsel %vm393_vm0, %v2006_v55, %v645_v57 }
  0xcd   : > { %v703_v18 = vpop.permute.xlu2 %702  ;;  %v651_v19 = vpop.permute.xlu1 %650 }
  0xce   : > { %v2076_v20 = vsel %vm1148_vm2, %v1133_v17, %v703_v18  ;;  %v649_v23 = vpop.permute.xlu0 %648  ;;  %v1139_v51 = vsel %vm393_vm0, %v2015_v59, %v651_v19  ;;  %v1132_v17 = vsel %vm393_vm0, %v475_v16, %v637_v8 }
  0xd3   : > { %838 = vrot.lane.b32.xlu2 %v1907_v28, %s1716_s12  ;;  %836 = vrot.lane.b32.xlu1 %v1909_v29, %s1716_s12 }
  0xd4   : > { %834 = vrot.lane.b32.xlu0 %v1896_v24, %s1716_s12 }
  0xd5   : > { %v709_v25 = vpop.permute.xlu2 %708  ;;  %v657_v26 = vpop.permute.xlu1 %656 }
  0xd6   : > { %v2087_v36 = vsel %vm1148_vm2, %v1136_v22, %v709_v25  ;;  %v655_v37 = vpop.permute.xlu0 %654  ;;  %v1142_v18 = vsel %vm393_vm0, %v2029_v63, %v657_v26 }
  0xdb   : > { %844 = vrot.lane.b32.xlu2 %v1919_v31, %s1716_s12  ;;  %842 = vrot.lane.b32.xlu1 %v1921_v32, %s1716_s12 }
  0xdc   : > { %840 = vrot.lane.b32.xlu0 %v1905_v27, %s1716_s12 }
  0xdd   : > { %v715_v56 = vpop.permute.xlu2 %714  ;;  %v663_v57 = vpop.permute.xlu1 %662 }
  0xde   : > { %v2098_v6 = vsel %vm1148_vm2, %v1139_v51, %v715_v56  ;;  %v661_v13 = vpop.permute.xlu0 %660  ;;  %v1145_v8 = vsel %vm393_vm0, %v2043_v3, %v663_v57  ;;  %v1138_v57 = vsel %vm393_vm0, %v2017_v60, %v649_v23 }
  0xdf   : > { %v1144_v15 = vsel %vm393_vm0, %v2045_v4, %v661_v13 }
  0xe3   : > { %850 = vrot.lane.b32.xlu2 %v1931_v34, %s1716_s12  ;;  %848 = vrot.lane.b32.xlu1 %v1933_v35, %s1716_s12 }
  0xe4   : > { %846 = vrot.lane.b32.xlu0 %v1917_v30, %s1716_s12 }
  0xe5   : > { %v721_v19 = vpop.permute.xlu2 %720  ;;  %v701_v22 = vpop.permute.xlu1 %700 }
  0xe6   : > { %v2112_v25 = vsel %vm1148_vm2, %v1142_v18, %v721_v19  ;;  %v1149_v51 = vsel %vm1148_vm2, %v1132_v17, %v701_v22  ;;  %v667_v56 = vpop.permute.xlu0 %666 }
  0xeb   : > { %916 = vrot.lane.b32.xlu2 %v1997_v53, %s1717_s13  ;;  %908 = vrot.lane.b32.xlu1 %v1971_v45, %s1717_s13 }
  0xec   : > { %852 = vrot.lane.b32.xlu0 %v1929_v33, %s1716_s12 }
  0xed   : > { %v727_v26 = vpop.permute.xlu2 %726  ;;  %v707_v13 = vpop.permute.xlu1 %706 }
  0xee   : > { %v2124_v16 = vsel %vm1148_vm2, %v1145_v8, %v727_v26  ;;  %v1152_v17 = vsel %vm1148_vm2, %v1135_v14, %v707_v13  ;;  %v705_v18 = vpop.permute.xlu0 %704  ;;  %v2143_v13 = vld [vmem:[#allocation2 + $0xc2] sm:$0xff] }
  0xef   : > { %v1151_v19 = vsel %vm1148_vm2, %v1134_v7, %v705_v18  ;;  %v1137_v7 = vsel %vm393_vm0, %v2004_v54, %v2025_v61  ;;  %v1141_v61 = vsel %vm393_vm0, %v2031_v0, %v655_v37  ;;  %v1140_v18 = vsel %vm393_vm0, %v2013_v58, %v2039_v1 }
  0xf0   : > { %v1143_v1 = vsel %vm393_vm0, %v2027_v62, %v2053_v5 }
  0xf3   : > { %1036 = vrot.lane.b32.xlu2 %v1933_v35, %s1718_s14  ;;  %980 = vrot.lane.b32.xlu1 %v537_v10, %s1719_s15 }
  0xf4   : > { %972 = vrot.lane.b32.xlu0 %v2045_v4, %s1719_s15  ;;  %v2145_v4 = vld [vmem:[#allocation2 + $0xc1] sm:$0xff] }
  0xf5   : > { %v765_v22 = vpop.permute.xlu2 %764  ;;  %v713_v8 = vpop.permute.xlu1 %712 }
  0xf6   : > { %v2139_v14 = vsel %vm1165_vm3, %v1149_v51, %v765_v22  ;;  %v1155_v35 = vsel %vm1148_vm2, %v1138_v57, %v713_v8  ;;  %v711_v26 = vpop.permute.xlu0 %710 }
  0xf7   : > { %v1154_v10 = vsel %vm1148_vm2, %v1137_v7, %v711_v26 }
  0xfb   : > { %1108 = vrot.lane.b32.xlu2 %v2143_v13, %s1720_s16  ;;  %1100 = vrot.lane.b32.xlu1 %v1985_v49, %s1720_s16 }
  0xfc   : > { %1044 = vrot.lane.b32.xlu0 %v2145_v4, %s1718_s14 }
  0xfd   : > { %v771_v23 = vpop.permute.xlu2 %770  ;;  %v719_v51 = vpop.permute.xlu1 %718 }
  0xfe   : > { %v2159_v57 = vsel %vm1165_vm3, %v1152_v17, %v771_v23  ;;  %v1158_v22 = vsel %vm1148_vm2, %v1141_v61, %v719_v51  ;;  %v717_v8 = vpop.permute.xlu0 %716 }
  0xff   : > { %v1157_v7 = vsel %vm1148_vm2, %v1140_v18, %v717_v8 }
 0x103   : > { %854 = vrot.lane.b32.xlu2 %v1941_v38, %s1716_s12  ;;  %900 = vrot.lane.b32.xlu1 %v1961_v43, %s1717_s13 }
 0x104   : > { %892 = vrot.lane.b32.xlu0 %v1951_v41, %s1717_s13  ;;  %v1147_v41 = vsel %vm393_vm0, %v2058_v11, %v667_v56 }
 0x105   : > { %v777_v37 = vpop.permute.xlu2 %776  ;;  %v725_v26 = vpop.permute.xlu1 %724 }
 0x106   : > { %v2173_v17 = vsel %vm1165_vm3, %v1155_v35, %v777_v37  ;;  %v1161_v61 = vsel %vm1148_vm2, %v1144_v15, %v725_v26  ;;  %v723_v23 = vpop.permute.xlu0 %722  ;;  %v1146_v15 = vsel %vm393_vm0, %v2041_v2, %v2065_v12 }
 0x107   : > { %v1160_v51 = vsel %vm1148_vm2, %v1143_v1, %v723_v23 }
 0x10b   : > { %910 = vrot.lane.b32.xlu2 %v1987_v50, %s1717_s13  ;;  %964 = vrot.lane.b32.xlu1 %v2013_v58, %s1719_s15 }
 0x10c   : > { %956 = vrot.lane.b32.xlu0 %v2006_v55, %s1719_s15 }
 0x10d   : > { %v783_v5 = vpop.permute.xlu2 %782  ;;  %v731_v35 = vpop.permute.xlu1 %730 }
 0x10e   : > { %v2189_v18 = vsel %vm1165_vm3, %v1158_v22, %v783_v5  ;;  %v1164_v8 = vsel %vm1148_vm2, %v1147_v41, %v731_v35  ;;  %v729_v37 = vpop.permute.xlu0 %728  ;;  %v2217_v41 = vld [vmem:[#allocation2 + $0xc9] sm:$0xff] }
 0x10f   : > { %v1163_v58 = vsel %vm1148_vm2, %v1146_v15, %v729_v37  ;;  %v2233_v15 = vld [vmem:[#allocation2 + $0xca] sm:$0xff] }
 0x113   : > { %1028 = vrot.lane.b32.xlu2 %v1905_v27, %s1718_s14  ;;  %1020 = vrot.lane.b32.xlu1 %v1887_v21, %s1718_s14 }
 0x114   : > { %918 = vrot.lane.b32.xlu0 %v1995_v52, %s1717_s13 }
 0x115   : > { %v789_v55 = vpop.permute.xlu2 %788  ;;  %v769_v56 = vpop.permute.xlu1 %768 }
 0x116   : > { %v2200_v12 = vsel %vm1165_vm3, %v1161_v61, %v789_v55  ;;  %v1168_v22 = vsel %vm1165_vm3, %v1151_v19, %v769_v56  ;;  %v767_v26 = vpop.permute.xlu0 %766 }
 0x117   : > { %v1167_v1 = vsel %vm1165_vm3, %v2076_v20, %v767_v26 }
 0x11b   : > { %1084 = vrot.lane.b32.xlu2 %v1947_v39, %s1720_s16  ;;  %982 = vrot.lane.b32.xlu1 %v2056_v9, %s1719_s15 }
 0x11c   : > { %974 = vrot.lane.b32.xlu0 %v2043_v3, %s1719_s15 }
 0x11d   : > { %v795_v21 = vpop.permute.xlu2 %794  ;;  %v775_v27 = vpop.permute.xlu1 %774 }
 0x11e   : > { %v2212_v61 = vsel %vm1165_vm3, %v1164_v8, %v795_v21  ;;  %v1171_v19 = vsel %vm1165_vm3, %v1154_v10, %v775_v27  ;;  %v773_v23 = vpop.permute.xlu0 %772 }
 0x11f   : > { %v1170_v20 = vsel %vm1165_vm3, %v2087_v36, %v773_v23 }
 0x123   : > { %1046 = vrot.lane.b32.xlu2 %v2217_v41, %s1718_s14  ;;  %1038 = vrot.lane.b32.xlu1 %v1931_v34, %s1718_s14 }
 0x124   : > { %1092 = vrot.lane.b32.xlu0 %v1975_v47, %s1720_s16 }
 0x125   : > { %v833_v3 = vpop.permute.xlu2 %832  ;;  %v781_v9 = vpop.permute.xlu1 %780 }
 0x126   : > { %v2226_v10 = vsel %vm1182_vm4, %v1168_v22, %v833_v3  ;;  %v2229_v5 = vsel %vm1165_vm3, %v1157_v7, %v781_v9  ;;  %v779_v36 = vpop.permute.xlu0 %778  ;;  %v1267_v3 = vld [vmem:[%s2560_s3] sm:$0xff] }
 0x127   : > { %v1173_v35 = vsel %vm1165_vm3, %v2098_v6, %v779_v36  ;;  %v602_v36 = vld [vmem:[#allocation2 + $0xd9] sm:$0xff] }
 0x12b   : > { %894 = vrot.lane.b32.xlu2 %v1949_v40, %s1717_s13  ;;  %1110 = vrot.lane.b32.xlu1 %v2233_v15, %s1720_s16 }
 0x12c   : > { %1102 = vrot.lane.b32.xlu0 %v1983_v48, %s1720_s16 }
 0x12d   : > { %v839_v34 = vpop.permute.xlu2 %838  ;;  %v787_v8 = vpop.permute.xlu1 %786 }
 0x12e   : > { %v2242_v7 = vsel %vm1182_vm4, %v1171_v19, %v839_v34  ;;  %v1177_v37 = vsel %vm1165_vm3, %v1160_v51, %v787_v8  ;;  %v785_v55 = vpop.permute.xlu0 %784 }
 0x12f   : > { %v2247_v6 = vsel %vm1165_vm3, %v2112_v25, %v785_v55  ;;  %v618_v55 = vld [vmem:[#allocation2 + $0xda] sm:$0xff] }
 0x133   : > { %958 = vrot.lane.b32.xlu2 %v2004_v54, %s1719_s15  ;;  %856 = vrot.lane.b32.xlu1 %v2145_v4, %s1716_s12 }
 0x134   : > { %902 = vrot.lane.b32.xlu0 %v1959_v42, %s1717_s13 }
 0x135   : > { %v2255_v40 = vpop.permute.xlu2 %844  ;;  %v793_v56 = vpop.permute.xlu1 %792 }
 0x136   : > { %v2258_v22 = vsel %vm1165_vm3, %v1163_v58, %v793_v56  ;;  %v791_v51 = vpop.permute.xlu0 %790 }
 0x137   : > { %v2262_v25 = vsel %vm1165_vm3, %v2124_v16, %v791_v51 }
 0x13b   : > { %920 = vrot.lane.b32.xlu2 %v2143_v13, %s1717_s13  ;;  %912 = vrot.lane.b32.xlu1 %v1985_v49, %s1717_s13 }
 0x13c   : > { %966 = vrot.lane.b32.xlu0 %v2031_v0, %s1719_s15 }
 0x13d   : > { %v851_v54 = vpop.permute.xlu2 %850  ;;  %v831_v4 = vpop.permute.xlu1 %830 }
 0x13e   : > { %v2271_v26 = vsel %vm1182_vm4, %v1177_v37, %v851_v54  ;;  %v2274_v58 = vsel %vm1182_vm4, %v1167_v1, %v831_v4  ;;  %v829_v21 = vpop.permute.xlu0 %828 }
 0x13f   : > { %v2278_v16 = vsel %vm1182_vm4, %v2139_v14, %v829_v21 }
 0x143   : > { %976 = vrot.lane.b32.xlu2 %v2041_v2, %s1719_s15  ;;  %1030 = vrot.lane.b32.xlu1 %v1921_v32, %s1718_s14  ;;  %v1270_v2 = vld [vmem:[%s2560_s3 + $0x18] sm:$0x7] }
 0x144   : > { %1022 = vrot.lane.b32.xlu0 %v1896_v24, %s1718_s14  ;;  %v1269_v24 = vld [vmem:[%s2560_s3 + $0x10] sm:$0xff]  ;;  %1611 = vmatpush.msk.msra.mxu2 %vm1324_vm5, %v1270_v2  ;;  %v586_v32 = vld [vmem:[#allocation2 + $0xd8] sm:$0xff] }
 0x145   : > { %v2286_v49 = vpop.permute.xlu2 %916  ;;  %v837_v0 = vpop.permute.xlu1 %836  ;;  %1612 = vmatpush.msk.msra.mxu3 %vm1324_vm5, %v1270_v2  ;;  %1589 = vmatpush.msk.msra.mxu0 %vm1324_vm5, %v1270_v2 }
 0x146   : > { %v2289_v13 = vsel %vm1182_vm4, %v1170_v20, %v837_v0  ;;  %v835_v1 = vpop.permute.xlu0 %834  ;;  %1610 = vmatpush.msk.msra.mxu1 %vm1324_vm5, %v1270_v2  ;;  %1614 = vmatpush.msra.mxu2 %v1269_v24 }
 0x147   : > { %v2293_v14 = vsel %vm1182_vm4, %v2159_v57, %v835_v1  ;;  %1615 = vmatpush.msra.mxu3 %v1269_v24  ;;  %v1268_v57 = vld [vmem:[%s2560_s3 + $0x8] sm:$0xff]  ;;  %1341 = vmatpush.msra.mxu0 %v1269_v24 }
 0x148   : > { %1617 = vmatpush.msra.mxu2 %v1268_v57  ;;  %1613 = vmatpush.msra.mxu1 %v1269_v24 }
 0x149   : > { %1618 = vmatpush.msra.mxu3 %v1268_v57  ;;  %1342 = vmatpush.msra.mxu0 %v1268_v57 }
 0x14a   : > { %1620 = vmatpush.msra.mxu2 %v1267_v3  ;;  %1616 = vmatpush.msra.mxu1 %v1268_v57  ;;  %v603_v57 = vld [vmem:[#allocation2 + $0xe1] sm:$0xff] }
 0x14b   : > { %1094 = vrot.lane.b32.xlu2 %v1973_v46, %s1720_s16  ;;  %1086 = vrot.lane.b32.xlu1 %v1963_v44, %s1720_s16 }
 0x14c   : > { %984 = vrot.lane.b32.xlu0 %v586_v32, %s1719_s15  ;;  %1621 = vmatpush.msra.mxu3 %v1267_v3 }
 0x14d   : > { %v1037_v27 = vpop.permute.xlu2 %1036  ;;  %v843_v19 = vpop.permute.xlu1 %842  ;;  %1343 = vmatpush.msra.mxu0 %v1267_v3  ;;  %1619 = vmatpush.msra.mxu1 %v1267_v3 }
 0x14e   : > { %v2310_v23 = vsel %vm1182_vm4, %v1173_v35, %v843_v19  ;;  %v841_v20 = vpop.permute.xlu0 %840 }
 0x14f   : > { %v2317_v9 = vsel %vm1182_vm4, %v2173_v17, %v841_v20 }
 0x153   : > { %1104 = vrot.lane.b32.xlu2 %v1997_v53, %s1720_s16  ;;  %1048 = vrot.lane.b32.xlu1 %v602_v36, %s1718_s14 }
 0x154   : > { %1040 = vrot.lane.b32.xlu0 %v1929_v33, %s1718_s14 }
 0x155   : > { %v1109_v35 = vpop.permute.xlu2 %1108  ;;  %v849_v34 = vpop.permute.xlu1 %848 }
 0x156   : > { %v2326_v17 = vsel %vm1182_vm4, %v2247_v6, %v849_v34  ;;  %v847_v8 = vpop.permute.xlu0 %846  ;;  %v1191_v6 = vsel %vm1182_vm4, %v2229_v5, %v2255_v40 }
 0x157   : > { %v2330_v37 = vsel %vm1182_vm4, %v2189_v18, %v847_v8 }
 0x15b   : > { %904 = vrot.lane.b32.xlu2 %v1975_v47, %s1717_s13  ;;  %896 = vrot.lane.b32.xlu1 %v1947_v39, %s1717_s13 }
 0x15c   : > { %1112 = vrot.lane.b32.xlu0 %v618_v55, %s1720_s16 }
 0x15d   : > { %v2337_v33 = vpop.permute.xlu2 %854  ;;  %v909_v53 = vpop.permute.xlu1 %908 }
 0x15e   : > { %v853_v56 = vpop.permute.xlu0 %852  ;;  %v1208_v51 = vsel %vm1199_vm6, %v1191_v6, %v909_v53 }
 0x163   : > { %968 = vrot.lane.b32.xlu2 %v2029_v63, %s1719_s15  ;;  %960 = vrot.lane.b32.xlu1 %v2017_v60, %s1719_s15  ;;  %v1195_v63 = vsel %vm1182_vm4, %v2200_v12, %v853_v56 }
 0x164   : > { %858 = vrot.lane.b32.xlu0 %v2217_v41, %s1716_s12  ;;  %v1212_v41 = vsel %vm1199_vm6, %v1195_v63, %v2286_v49 }
 0x165   : > { %v2345_v18 = vpop.permute.xlu2 %910  ;;  %v981_v47 = vpop.permute.xlu1 %980 }
 0x166   : > { %v973_v39 = vpop.permute.xlu0 %972  ;;  %v1229_v54 = vsel %vm1216_vm7, %v1212_v41, %v981_v47 }
 0x167   : > { %v1225_v60 = vsel %vm1216_vm7, %v1208_v51, %v973_v39 }
 0x168   : > { %v1242_v12 = vsel %vm1233_vm8, %v1225_v60, %v1037_v27 }
 0x16b   : > { %922 = vrot.lane.b32.xlu1 %v2233_v15, %s1717_s13  ;;  %1024 = vrot.lane.b32.xlu2 %v1909_v29, %s1718_s14 }
 0x16c   : > { %914 = vrot.lane.b32.xlu0 %v1983_v48, %s1717_s13  ;;  %v587_v48 = vld [vmem:[#allocation2 + $0xe0] sm:$0xff] }
 0x16d   : > { %v1029_v5 = vpop.permute.xlu2 %1028  ;;  %v1101_v40 = vpop.permute.xlu1 %1100 }
 0x16e   : > { %v1045_v4 = vpop.permute.xlu0 %1044  ;;  %v1259_v15 = vsel %vm1250_vm9, %v1242_v12, %v1101_v40 }
 0x16f   : > { %v1246_v21 = vsel %vm1233_vm8, %v1229_v54, %v1045_v4  ;;  %1598 = vmatmul.msk.f32.vlgmr.msra.gmra.mxu2 %vm1275_vm10, %v1259_v15 }
 0x170   : > { %v1263_v29 = vsel %vm1250_vm9, %v1246_v21, %v1109_v35 }
 0x171   : > { %1602 = vmatmul.msk.f32.vlgmr.msra.gmra.mxu3 %vm1275_vm10, %v1263_v29 }
 0x173   : > { %978 = vrot.lane.b32.xlu1 %v2058_v11, %s1719_s15  ;;  %986 = vrot.lane.b32.xlu2 %v587_v48, %s1719_s15  ;;  %v619_v11 = vld [vmem:[#allocation2 + $0xe2] sm:$0xff] }
 0x174   : > { %1032 = vrot.lane.b32.xlu0 %v1919_v31, %s1718_s14 }
 0x175   : > { %v901_v49 = vpop.permute.xlu1 %900  ;;  %v1085_v1 = vpop.permute.xlu2 %1084 }
 0x176   : > { %v893_v0 = vpop.permute.xlu0 %892  ;;  %v1204_v3 = vsel %vm1199_vm6, %v2289_v13, %v901_v49  ;;  %v1196_v13 = vsel %vm1182_vm4, %v2262_v25, %v2337_v33 }
 0x177   : > { %v1200_v31 = vsel %vm1199_vm6, %v2278_v16, %v893_v0 }
 0x17b   : > { %1096 = vrot.lane.b32.xlu1 %v1971_v45, %s1720_s16  ;;  %1042 = vrot.lane.b32.xlu2 %v1941_v38, %s1718_s14 }
 0x17c   : > { %1088 = vrot.lane.b32.xlu0 %v1961_v43, %s1720_s16 }
 0x17d   : > { %v965_v2 = vpop.permute.xlu1 %964  ;;  %v1047_v32 = vpop.permute.xlu2 %1046 }
 0x17e   : > { %v957_v24 = vpop.permute.xlu0 %956  ;;  %v1221_v36 = vsel %vm1216_vm7, %v1204_v3, %v965_v2 }
 0x17f   : > { %v1217_v38 = vsel %vm1216_vm7, %v1200_v31, %v957_v24 }
 0x183   : > { %1106 = vrot.lane.b32.xlu1 %v1995_v52, %s1720_s16  ;;  %1114 = vrot.lane.b32.xlu2 %v619_v11, %s1720_s16 }
 0x184   : > { %1050 = vrot.lane.b32.xlu0 %v603_v57, %s1718_s14 }
 0x185   : > { %v1021_v45 = vpop.permute.xlu1 %1020  ;;  %v895_v20 = vpop.permute.xlu2 %894 }
 0x186   : > { %v1234_v43 = vsel %vm1233_vm8, %v1217_v38, %v1021_v45  ;;  %v919_v27 = vpop.permute.xlu0 %918  ;;  %v1201_v54 = vsel %vm1199_vm6, %v2274_v58, %v895_v20 }
 0x187   : > { %v1251_v19 = vsel %vm1250_vm9, %v1234_v43, %v1085_v1 }
 0x188   : > { %1590 = vmatmul.msk.f32.vlgmr.msra.gmra.mxu0 %vm1275_vm10, %v1251_v19 }
 0x18b   : > { %906 = vrot.lane.b32.xlu1 %v1973_v46, %s1717_s13  ;;  %962 = vrot.lane.b32.xlu2 %v2015_v59, %s1719_s15 }
 0x18c   : > { %898 = vrot.lane.b32.xlu0 %v1963_v44, %s1717_s13  ;;  %v1238_v44 = vsel %vm1233_vm8, %v1221_v36, %v1029_v5 }
 0x18d   : > { %v983_v52 = vpop.permute.xlu1 %982  ;;  %v959_v46 = vpop.permute.xlu2 %958 }
 0x18e   : > { %v975_v16 = vpop.permute.xlu0 %974  ;;  %v1218_v4 = vsel %vm1216_vm7, %v1201_v54, %v959_v46 }
 0x193   : > { %1026 = vrot.lane.b32.xlu1 %v1907_v28, %s1718_s14  ;;  %1034 = vrot.lane.b32.xlu2 %v1917_v30, %s1718_s14  ;;  %v1213_v28 = vsel %vm1199_vm6, %v1196_v13, %v919_v27 }
 0x194   : > { %970 = vrot.lane.b32.xlu0 %v2027_v62, %s1719_s15  ;;  %v1230_v30 = vsel %vm1216_vm7, %v1213_v28, %v983_v52  ;;  %v1209_v62 = vsel %vm1199_vm6, %v2330_v37, %v2345_v18 }
 0x195   : > { %v1039_v59 = vpop.permute.xlu1 %1038  ;;  %v1226_v8 = vsel %vm1216_vm7, %v1209_v62, %v975_v16  ;;  %v1247_v25 = vsel %vm1233_vm8, %v1230_v30, %v1047_v32  ;;  %v921_v47 = vpop.permute.xlu2 %920 }
 0x196   : > { %v1093_v35 = vpop.permute.xlu0 %1092  ;;  %v1243_v33 = vsel %vm1233_vm8, %v1226_v8, %v1039_v59 }
 0x197   : > { %v1255_v34 = vsel %vm1250_vm9, %v1238_v44, %v1093_v35 }
 0x198   : > { %1594 = vmatmul.msk.f32.vlgmr.msra.gmra.mxu1 %vm1275_vm10, %v1255_v34 }
 0x19b   : > { %1098 = vrot.lane.b32.xlu1 %v1987_v50, %s1720_s16 }
 0x19c   : > { %1090 = vrot.lane.b32.xlu0 %v1959_v42, %s1720_s16 }
 0x19d   : > { %v1111_v55 = vpop.permute.xlu1 %1110  ;;  %v977_v42 = vpop.permute.xlu2 %976 }
 0x19e   : > { %v1103_v53 = vpop.permute.xlu0 %1102  ;;  %v1264_v56 = vsel %vm1250_vm9, %v1247_v25, %v1111_v55 }
 0x19f   : > { %v1260_v50 = vsel %vm1250_vm9, %v1243_v33, %v1103_v53  ;;  %1603 = vmatmul.msk.f32.gmra.mxu3 %vm1275_vm10, %v1264_v56 }
 0x1a0   : > { %1599 = vmatmul.msk.f32.gmra.mxu2 %vm1275_vm10, %v1260_v50 }
 0x1a5   : > { %v857_v37 = vpop.permute.xlu1 %856  ;;  %v1095_v51 = vpop.permute.xlu2 %1094 }
 0x1a6   : > { %v903_v18 = vpop.permute.xlu0 %902  ;;  %v1197_v32 = vsel %vm1182_vm4, %v2258_v22, %v857_v37 }
 0x1a7   : > { %v1205_v63 = vsel %vm1199_vm6, %v2242_v7, %v903_v18  ;;  %v1214_v57 = vsel %vm1199_vm6, %v1197_v32, %v921_v47 }
 0x1ad   : > { %v913_v39 = vpop.permute.xlu1 %912  ;;  %v1105_v15 = vpop.permute.xlu2 %1104 }
 0x1ae   : > { %v967_v6 = vpop.permute.xlu0 %966  ;;  %v1210_v49 = vsel %vm1199_vm6, %v2326_v17, %v913_v39 }
 0x1af   : > { %v1222_v60 = vsel %vm1216_vm7, %v1205_v63, %v967_v6  ;;  %v1227_v2 = vsel %vm1216_vm7, %v1210_v49, %v977_v42 }
 0x1b5   : > { %v1031_v41 = vpop.permute.xlu1 %1030  ;;  %v905_v24 = vpop.permute.xlu2 %904 }
 0x1b6   : > { %v1239_v5 = vsel %vm1233_vm8, %v1222_v60, %v1031_v41  ;;  %v1023_v40 = vpop.permute.xlu0 %1022  ;;  %v1206_v35 = vsel %vm1199_vm6, %v2317_v9, %v905_v24 }
 0x1b7   : > { %v1256_v12 = vsel %vm1250_vm9, %v1239_v5, %v1095_v51  ;;  %v1235_v21 = vsel %vm1233_vm8, %v1218_v4, %v1023_v40 }
 0x1b8   : > { %1595 = vmatmul.msk.f32.gmra.mxu1 %vm1275_vm10, %v1256_v12 }
 0x1bd   : > { %v1087_v29 = vpop.permute.xlu1 %1086  ;;  %v969_v27 = vpop.permute.xlu2 %968 }
 0x1be   : > { %v985_v7 = vpop.permute.xlu0 %984  ;;  %v1252_v48 = vsel %vm1250_vm9, %v1235_v21, %v1087_v29  ;;  %v1223_v34 = vsel %vm1216_vm7, %v1206_v35, %v969_v27 }
 0x1bf   : > { %1591 = vmatmul.msk.f32.gmra.mxu0 %vm1275_vm10, %v1252_v48  ;;  %v1231_v31 = vsel %vm1216_vm7, %v1214_v57, %v985_v7 }
 0x1c5   : > { %v1049_v0 = vpop.permute.xlu1 %1048  ;;  %v1025_v52 = vpop.permute.xlu2 %1024 }
 0x1c6   : > { %v1041_v1 = vpop.permute.xlu0 %1040  ;;  %v1248_v17 = vsel %vm1233_vm8, %v1231_v31, %v1049_v0 }
 0x1c7   : > { %v1244_v58 = vsel %vm1233_vm8, %v1227_v2, %v1041_v1 }
 0x1c8   : > { %v1261_v11 = vsel %vm1250_vm9, %v1244_v58, %v1105_v15 }
 0x1c9   : > { %1600 = vmatmul.msk.f32.gmra.mxu2 %vm1275_vm10, %v1261_v11 }
 0x1cd   : > { %v897_v38 = vpop.permute.xlu1 %896  ;;  %v987_v3 = vpop.permute.xlu2 %986 }
 0x1ce   : > { %v1113_v45 = vpop.permute.xlu0 %1112  ;;  %v1202_v59 = vsel %vm1199_vm6, %v2226_v10, %v897_v38  ;;  %v2466_v10 = vld [vmem:[%s2561_s4] ss:$0 sm:$0xff] }
 0x1cf   : > { %v1265_v43 = vsel %vm1250_vm9, %v1248_v17, %v1113_v45 }
 0x1d0   : > { %1604 = vmatmul.msk.f32.gmra.mxu3 %vm1275_vm10, %v1265_v43 }
 0x1d5   : > { %v961_v19 = vpop.permute.xlu1 %960  ;;  %v1043_v28 = vpop.permute.xlu2 %1042 }
 0x1d6   : > { %v859_v20 = vpop.permute.xlu0 %858  ;;  %v1219_v44 = vsel %vm1216_vm7, %v1202_v59, %v961_v19 }
 0x1d7   : > { %v1236_v62 = vsel %vm1233_vm8, %v1219_v44, %v1025_v52  ;;  %v1198_v33 = vsel %vm1182_vm4, %v2212_v61, %v859_v20 }
 0x1dd   : > { %v923_v16 = vpop.permute.xlu1 %922  ;;  %v1115_v39 = vpop.permute.xlu2 %1114 }
 0x1de   : > { %v915_v22 = vpop.permute.xlu0 %914  ;;  %v1215_v47 = vsel %vm1199_vm6, %v1198_v33, %v923_v16 }
 0x1df   : > { %v1211_v9 = vsel %vm1199_vm6, %v2271_v26, %v915_v22  ;;  %v1232_v61 = vsel %vm1216_vm7, %v1215_v47, %v987_v3 }
 0x1e5   : > { %v979_v36 = vpop.permute.xlu1 %978  ;;  %v963_v40 = vpop.permute.xlu2 %962 }
 0x1e6   : > { %v1033_v46 = vpop.permute.xlu0 %1032  ;;  %v1228_v53 = vsel %vm1216_vm7, %v1211_v9, %v979_v36 }
 0x1e7   : > { %v1240_v13 = vsel %vm1233_vm8, %v1223_v34, %v1033_v46  ;;  %v1245_v18 = vsel %vm1233_vm8, %v1228_v53, %v1043_v28 }
 0x1ed   : > { %v1097_v30 = vpop.permute.xlu1 %1096  ;;  %v1035_v48 = vpop.permute.xlu2 %1034 }
 0x1ee   : > { %v1089_v8 = vpop.permute.xlu0 %1088  ;;  %v1257_v55 = vsel %vm1250_vm9, %v1240_v13, %v1097_v30 }
 0x1ef   : > { %v1253_v25 = vsel %vm1250_vm9, %v1236_v62, %v1089_v8  ;;  %1596 = vmatmul.msk.f32.gmra.mxu1 %vm1275_vm10, %v1257_v55 }
 0x1f0   : > { %1592 = vmatmul.msk.f32.gmra.mxu0 %vm1275_vm10, %v1253_v25 }
 0x1f2   : > { %v1369_v56 = vpop.f32.mrf.mxu2 }
 0x1f3   : > { %v1370_v50 = vadd.f32 %v2466_v10, %v1369_v56 }
 0x1f4   : > { %v1381_v37 = vpop.f32.mrf.mxu3 }
 0x1f5   : > { %1402 = vst.msk [vmem:[%s1807_s11 + $0x40] sm:$0xff] %vm1393_vm11, %v1370_v50  ;;  %v1382_v42 = vadd.f32 %v2466_v10, %v1381_v37  ;;  %v1107_v26 = vpop.permute.xlu1 %1106 }
 0x1f6   : > { %v1051_v6 = vpop.permute.xlu0 %1050  ;;  %v1262_v51 = vsel %vm1250_vm9, %v1245_v18, %v1107_v26 }
 0x1f7   : > { %1406 = vst.msk [vmem:[%s1807_s11 + $0x60] sm:$0xff] %vm1393_vm11, %v1382_v42  ;;  %v1249_v63 = vsel %vm1233_vm8, %v1232_v61, %v1051_v6  ;;  %1601 = vmatmul.msk.f32.gmra.mxu2 %vm1275_vm10, %v1262_v51 }
 0x1f8   : > { %v1266_v60 = vsel %vm1250_vm9, %v1249_v63, %v1115_v39 }
 0x1f9   : > { %1605 = vmatmul.msk.f32.gmra.mxu3 %vm1275_vm10, %v1266_v60 }
 0x1fd   : > { %v907_v41 = vpop.permute.xlu1 %906 }
 0x1fe   : > { %v899_v5 = vpop.permute.xlu0 %898  ;;  %v1207_v21 = vsel %vm1199_vm6, %v2310_v23, %v907_v41 }
 0x1ff   : > { %v1203_v29 = vsel %vm1199_vm6, %v2293_v14, %v899_v5 }
 0x200   : > { %v1220_v49 = vsel %vm1216_vm7, %v1203_v29, %v963_v40 }
 0x205   : > { %v1027_v12 = vpop.permute.xlu1 %1026  ;;  %v1345_v54 = vpop.f32.mrf.mxu0 }
 0x206   : > { %v971_v4 = vpop.permute.xlu0 %970  ;;  %v1346_v15 = vadd.f32 %v2466_v10, %v1345_v54  ;;  %v1237_v2 = vsel %vm1233_vm8, %v1220_v49, %v1027_v12 }
 0x207   : > { %v1224_v7 = vsel %vm1216_vm7, %v1207_v21, %v971_v4 }
 0x208   : > { %1394 = vst.msk [vmem:[%s1807_s11] sm:$0xff] %vm1393_vm11, %v1346_v15  ;;  %v1241_v0 = vsel %vm1233_vm8, %v1224_v7, %v1035_v48 }
 0x20d   : > { %v1099_v1 = vpop.permute.xlu1 %1098 }
 0x20e   : > { %v1091_v24 = vpop.permute.xlu0 %1090  ;;  %v1258_v58 = vsel %vm1250_vm9, %v1241_v0, %v1099_v1 }
 0x20f   : > { %v1254_v23 = vsel %vm1250_vm9, %v1237_v2, %v1091_v24  ;;  %1597 = vmatmul.msk.f32.gmra.mxu1 %vm1275_vm10, %v1258_v58 }
 0x210   : > { %1593 = vmatmul.msk.f32.gmra.mxu0 %vm1275_vm10, %v1254_v23 }
 0x215   : > { %v1357_v14 = vpop.f32.mrf.mxu1 }
 0x216   : > { %v1358_v11 = vadd.f32 %v2466_v10, %v1357_v14 }
 0x218   : > { %1398 = vst.msk [vmem:[%s1807_s11 + $0x20] sm:$0xff] %vm1393_vm11, %v1358_v11 }
 0x222   : > { %v1384_v32 = vpop.f32.mrf.mxu3 }
 0x223   : > { %v1372_v57 = vpop.f32.mrf.mxu2  ;;  %v1385_v31 = vadd.f32 %v2466_v10, %v1384_v32 }
 0x224   : > { %v1373_v38 = vadd.f32 %v2466_v10, %v1372_v57 }
 0x225   : > { %1407 = vst.msk [vmem:[%s1807_s11 + $0x68] sm:$0xff] %vm1393_vm11, %v1385_v31 }
 0x226   : > { %1403 = vst.msk [vmem:[%s1807_s11 + $0x48] sm:$0xff] %vm1393_vm11, %v1373_v38 }
 0x235   : > { %v1360_v17 = vpop.f32.mrf.mxu1 }
 0x236   : > { %v1361_v45 = vadd.f32 %v2466_v10, %v1360_v17 }
 0x238   : > { %1399 = vst.msk [vmem:[%s1807_s11 + $0x28] sm:$0xff] %vm1393_vm11, %v1361_v45 }
 0x23c   : > { %v1348_v43 = vpop.f32.mrf.mxu0 }
 0x23d   : > { %v1349_v27 = vadd.f32 %v2466_v10, %v1348_v43 }
 0x23f   : > { %1395 = vst.msk [vmem:[%s1807_s11 + $0x8] sm:$0xff] %vm1393_vm11, %v1349_v27 }
 0x24c   : > { %v1375_v19 = vpop.f32.mrf.mxu2 }
 0x24d   : > { %v1376_v20 = vadd.f32 %v2466_v10, %v1375_v19 }
 0x24f   : > { %1404 = vst.msk [vmem:[%s1807_s11 + $0x50] sm:$0xff] %vm1393_vm11, %v1376_v20 }
 0x253   : > { %v1387_v52 = vpop.f32.mrf.mxu3 }
 0x254   : > { %v1388_v16 = vadd.f32 %v2466_v10, %v1387_v52 }
 0x256   : > { %1408 = vst.msk [vmem:[%s1807_s11 + $0x70] sm:$0xff] %vm1393_vm11, %v1388_v16 }
 0x26c   : > { %v1363_v22 = vpop.f32.mrf.mxu1 }
 0x26d   : > { %v1351_v3 = vpop.f32.mrf.mxu0  ;;  %v1364_v36 = vadd.f32 %v2466_v10, %v1363_v22 }
 0x26e   : > { %v1352_v46 = vadd.f32 %v2466_v10, %v1351_v3 }
 0x26f   : > { %1400 = vst.msk [vmem:[%s1807_s11 + $0x30] sm:$0xff] %vm1393_vm11, %v1364_v36 }
 0x270   : > { %1396 = vst.msk [vmem:[%s1807_s11 + $0x10] sm:$0xff] %vm1393_vm11, %v1352_v46 }
 0x27a   : > { %v1378_v59 = vpop.f32.mrf.mxu2 }
 0x27b   : > { %v1379_v35 = vadd.f32 %v2466_v10, %v1378_v59 }
 0x27c   : > { %v1390_v44 = vpop.f32.mrf.mxu3 }
 0x27d   : > { %1405 = vst.msk [vmem:[%s1807_s11 + $0x58] sm:$0xff] %vm1393_vm11, %v1379_v35  ;;  %v1391_v34 = vadd.f32 %v2466_v10, %v1390_v44 }
 0x27f   : > { %1409 = vst.msk [vmem:[%s1807_s11 + $0x78] sm:$0xff] %vm1393_vm11, %v1391_v34 }
 0x28c   : > { %v1366_v13 = vpop.f32.mrf.mxu1 }
 0x28d   : > { %v1354_v28 = vpop.f32.mrf.mxu0  ;;  %v1367_v30 = vadd.f32 %v2466_v10, %v1366_v13 }
 0x28e   : > { %v1355_v62 = vadd.f32 %v2466_v10, %v1354_v28 }
 0x28f   : > { %1401 = vst.msk [vmem:[%s1807_s11 + $0x38] sm:$0xff] %vm1393_vm11, %v1367_v30 }
 0x290   : > { %1397 = vst.msk [vmem:[%s1807_s11 + $0x18] sm:$0xff] %vm1393_vm11, %v1355_v62 }
 0x291 PF: > { %s15_s22 = sadd.s32 1, %s1710_s22   ;;  %s2564_s18 = smov %s1702_s20 }
 0x292   : > { %p12_p12 = scmp.ge.s32.totalorder %s15_s22, 6   ;;  %s2565_s19 = smov %s1706_s21 }
 0x293   : > { %s2566_s20 = smov %s2569_s23  ;;  %s2567_s21 = smov %s2573_s24 }
 0x294   :  { %14 = sbr.rel (!%p12_p12) target bundleno = 3 (0x3), region = 87 }

// kernel: rcan_a_forward.9
= control target key start
LH: loop header
LB: loop body
LE: loop exit
PB: predicated region body
PF: predicated region fallthrough
CT: control target
= control target key end

     0   :  { %s1893_s21 = smov 0   ;;  %s1895_s22 = smov 0   ;;  %s2736_s0 = inlined_call_operand.vmem [shape: f32[2,16,16,8], index: 0, kind: input, shape index: {}, may-alias: {0,1,2}]   ;;  %s2737_s1 = inlined_call_operand.vmem [shape: f32[2,16,16,8], index: 1, kind: input, shape index: {}, may-alias: {0,1,2}]   ;;  %s2738_s2 = inlined_call_operand.vmem [shape: f32[2,16,16,8], index: 2, kind: input, shape index: {}, may-alias: {0,1,2}]   ;;  %s2739_s3 = inlined_call_operand.vmem [shape: f32[72,8], index: 3, kind: input, shape index: {}]   ;;  %s2740_s4 = inlined_call_operand.vmem [shape: f32[1,8], index: 4, kind: input, shape index: {}]   ;;  %s2741_s5 = inlined_call_operand.vmem [shape: f32[2,16,16,8], index: 5, kind: input, shape index: {}]   ;;  %s2742_s6 = inlined_call_operand.vmem [shape: f32[2,16,16,8], index: 6, kind: output, shape index: {}]  }
   0x1   :  { %s1897_s23 = smov 0   ;;  %s1899_s24 = smov 0  }
   0x2   :  { %s1901_s25 = smov 0  }
   0x3 LB: > { %s25_s26 = sadd.s32 1, %s1839_s23  ;;  %s28_s27 = sadd.s32 1, %s1843_s24  ;;  %s1847_s25 = sphi %s1901_s25, %s16_s25   ;;  %s1843_s24 = sphi %s1899_s24, %s2747_s24   ;;  %s1839_s23 = sphi %s1897_s23, %s2746_s23   ;;  %s1835_s22 = sphi %s1895_s22, %s2745_s22   ;;  %s1831_s21 = sphi %s1893_s21, %s2744_s21  }
   0x4   : > { %p26_p0 = scmp.ge.s32.totalorder %s25_s26, 2  ;;  %p1680_p1 = scmp.ge.s32.totalorder %s1847_s25, 1 }
   0x5   : > { %p316_p2 = scmp.lt.s32.totalorder %s1847_s25, 5 }
   0x6   : > { %s2749_s26 = smov (%p26_p0, %s25_s26), 0  ;;  %s2751_s27 = smov (!%p26_p0, %s28_s27), %s1843_s24 }
   0x7   : > { %p317_p3 = pnand %p1680_p1, %p316_p2  ;;  %p30_p4 = scmp.ge.s32.totalorder %s2751_s27, 2 }
   0x8   : > { %s1681_s28 = sshll.u32 (!%p317_p3), %s1831_s21, 3  ;;  %p393_p5 = scmp.lt.s32.totalorder (!%p317_p3), %s1835_s22, 1 }
   0x9   : > { %s2753_s27 = smov (%p30_p4, %s2751_s27), 0  ;;  %320 = sbr.rel (%p317_p3) target bundleno = 659 (0x293), region = 44 }
   0xa   : > { %p395_p6 = scmp.lt.s32.totalorder (!%p317_p3), %s1681_s28, 15  ;;  %s1686_s29 = sadd.s32 (!%p317_p3), 4294967295, %s1681_s28 }
   0xb   : > { %p405_p7 = scmp.gt.s32.totalorder (!%p317_p3), %s1686_s29, 0  ;;  %p1687_p8 = scmp.lt.s32.totalorder (!%p317_p3), %s1686_s29, 15 }
   0xc   : > { %s421_s10 = sadd.s32 (!%p317_p3), 8, %s1681_s28  ;;  %p1710_p10 = scmp.le.s32.totalorder (!%p317_p3), %s1831_s21, 0 }
   0xd   : > { %p1938_p9 = scmp.lt.s32.totalorder (!%p317_p3), %s421_s10, 15 }
   0xe   : > { %vm459_vm0 = vcmask 64512   ;;  %v1849_v0 = vmov 0.0   ;;  %s2755_s22 = smov (!%p393_p5, %s1835_s22), 1  ;;  %vm462_vm1 = vcmask 58368  }
   0xf   : > { %464 = vst.msk [vmem:[#allocation2 + $0x18] sm:$0xff] %vm459_vm0, %v1849_v0  ;;  %s396_s30 = scalar_select %p395_p6, %s1681_s28, 15 }
  0x10   : > { %460 = vst.msk [vmem:[#allocation2] sm:$0xff] %vm459_vm0, %v1849_v0  ;;  %s1930_s7 = sshll.u32 %s2755_s22, 5  ;;  %s2757_s10 = smov (!%p1938_p9, %s421_s10), 15 }
  0x11   : > { %461 = vst.msk [vmem:[#allocation2 + $0x8] sm:$0xff] %vm459_vm0, %v1849_v0  ;;  %s1682_s8 = sshll.u32 %s396_s30, 1  ;;  %s2761_s10 = smov (!%p1938_p9, %s2757_s10), 15 }
  0x12   : > { %465 = vst.msk [vmem:[#allocation2 + $0x20] sm:$0xff] %vm459_vm0, %v1849_v0  ;;  %s399_s9 = sadd.s32 %s1930_s7, %s1682_s8  ;;  %s1699_s28 = sshll.u32 %s2761_s10, 1 }
  0x13   : > { %467 = vst.msk [vmem:[#allocation2 + $0x30] sm:$0xff] %vm459_vm0, %v1849_v0  ;;  %s1936_s11 = sshll.u32 %s399_s9, 3  ;;  %s430_s30 = sadd.s32 %s1699_s28, %s1930_s7 }
  0x14   : > { %468 = vst.msk [vmem:[#allocation2 + $0x38] sm:$0xff] %vm459_vm0, %v1849_v0  ;;  %s1947_s15 = scalar_lea.vmem %s2741_s5, %s1936_s11  ;;  %s1963_s20 = scalar_lea.vmem %s2742_s6, %s1936_s11 }
  0x15   : > { %470 = vst.msk [vmem:[#allocation2 + $0x48] sm:$0xff] %vm459_vm0, %v1849_v0  ;;  %s406_s16 = scalar_select %p405_p7, %s1686_s29, 0 }
  0x16   : > { %471 = vst.msk [vmem:[#allocation2 + $0x50] sm:$0xff] %vm459_vm0, %v1849_v0  ;;  %s1701_s13 = sshll.u32 %s430_s30, 3  ;;  %s1988_s18 = scalar_lea.vmem %s2736_s0, %s1936_s11 }
  0x17   : > { %473 = vst.msk [vmem:[#allocation2 + $0x60] sm:$0xff] %vm459_vm0, %v1849_v0  ;;  %s2759_s16 = smov (!%p1687_p8, %s406_s16), 15  ;;  %v491_v1 = vld [vmem:[%s1988_s18] sm:$0xff]  ;;  %v492_v2 = vld [vmem:[%s1988_s18 + $0x8] sm:$0xff]  ;;  %v493_v3 = vld [vmem:[%s1988_s18 + $0x10] sm:$0xff] }
  0x18   : > { %474 = vst.msk [vmem:[#allocation2 + $0x68] sm:$0xff] %vm459_vm0, %v1849_v0  ;;  %s1692_s17 = sshll.u32 %s2759_s16, 1  ;;  %v494_v4 = vld [vmem:[%s1988_s18 + $0x18] sm:$0xff]  ;;  %v495_v5 = vld [vmem:[%s1988_s18 + $0x20] sm:$0xff]  ;;  %v496_v6 = vld [vmem:[%s1988_s18 + $0x28] sm:$0xff] }
  0x19   : > { %476 = vst.msk [vmem:[#allocation2 + $0x78] sm:$0xff] %vm459_vm0, %v1849_v0  ;;  %s413_s22 = sadd.s32 %s1692_s17, %s1930_s7  ;;  %s1979_s17 = scalar_lea.vmem %s2738_s2, %s1701_s13  ;;  %v497_v7 = vld [vmem:[%s1988_s18 + $0x30] sm:$0xff]  ;;  %v498_v8 = vld [vmem:[%s1988_s18 + $0x38] sm:$0xff]  ;;  %v499_v9 = vld [vmem:[%s1988_s18 + $0x40] sm:$0xff] }
  0x1a   : > { %477 = vst.msk [vmem:[#allocation2 + $0x80] sm:$0xff] %vm459_vm0, %v1849_v0  ;;  %s1694_s29 = sshll.u32 %s413_s22, 3  ;;  %v500_v10 = vld [vmem:[%s1988_s18 + $0x48] sm:$0xff]  ;;  %v501_v11 = vld [vmem:[%s1988_s18 + $0x50] sm:$0xff]  ;;  %v502_v12 = vld [vmem:[%s1988_s18 + $0x58] sm:$0xff] }
  0x1b   : > { %479 = vst.msk [vmem:[#allocation2 + $0x90] sm:$0xff] %vm459_vm0, %v1849_v0  ;;  %s1973_s12 = scalar_lea.vmem %s2737_s1, %s1694_s29  ;;  %v503_v13 = vld [vmem:[%s1988_s18 + $0x60] sm:$0xff]  ;;  %v504_v14 = vld [vmem:[%s1988_s18 + $0x68] sm:$0xff]  ;;  %v505_v15 = vld [vmem:[%s1988_s18 + $0x70] sm:$0xff] }
  0x1c   : > { %480 = vst.msk [vmem:[#allocation2 + $0x98] sm:$0xff] %vm459_vm0, %v1849_v0  ;;  %v506_v16 = vld [vmem:[%s1988_s18 + $0x78] sm:$0xff] }
  0x1d   : > { %482 = vst.msk [vmem:[#allocation2 + $0xa8] sm:$0xff] %vm459_vm0, %v1849_v0 }
  0x1e   : > { %483 = vst.msk [vmem:[#allocation2 + $0xb0] sm:$0xff] %vm459_vm0, %v1849_v0 }
  0x1f   : > { %485 = vst.msk [vmem:[#allocation2 + $0xc0] sm:$0xff] %vm459_vm0, %v1849_v0 }
  0x20   : > { %486 = vst.msk [vmem:[#allocation2 + $0xc8] sm:$0xff] %vm459_vm0, %v1849_v0 }
  0x21   : > { %488 = vst.msk [vmem:[#allocation2 + $0xd8] sm:$0xff] %vm459_vm0, %v1849_v0 }
  0x22   : > { %489 = vst.msk [vmem:[#allocation2 + $0xe0] sm:$0xff] %vm459_vm0, %v1849_v0 }
  0x23   : > { %466 = vst.msk [vmem:[#allocation2 + $0x28] sm:$0x3] %vm462_vm1, %v1849_v0 }
  0x24   : > { %463 = vst.msk [vmem:[#allocation2 + $0x10] sm:$0x3] %vm462_vm1, %v1849_v0 }
  0x25   : > { %469 = vst.msk [vmem:[#allocation2 + $0x40] sm:$0x3] %vm462_vm1, %v1849_v0 }
  0x26   : > { %472 = vst.msk [vmem:[#allocation2 + $0x58] sm:$0x3] %vm462_vm1, %v1849_v0 }
  0x27   : > { %475 = vst.msk [vmem:[#allocation2 + $0x70] sm:$0x3] %vm462_vm1, %v1849_v0 }
  0x28   : > { %478 = vst.msk [vmem:[#allocation2 + $0x88] sm:$0x3] %vm462_vm1, %v1849_v0 }
  0x29   : > { %481 = vst.msk [vmem:[#allocation2 + $0xa0] sm:$0x3] %vm462_vm1, %v1849_v0 }
  0x2a   : > { %484 = vst.msk [vmem:[#allocation2 + $0xb8] sm:$0x3] %vm462_vm1, %v1849_v0 }
  0x2b   : > { %487 = vst.msk [vmem:[#allocation2 + $0xd0] sm:$0x3] %vm462_vm1, %v1849_v0 }
  0x2c   : > { %490 = vst.msk [vmem:[#allocation2 + $0xe8] sm:$0x3] %vm462_vm1, %v1849_v0 }
  0x2d   : > { %508 = vst.msk [vmem:[#allocation2 + $0x19] sm:$0xff] %vm459_vm0, %v491_v1 }
  0x2e   : > { %509 = vst.msk [vmem:[#allocation2 + $0x21] sm:$0xff] %vm459_vm0, %v492_v2 }
  0x2f   : > { %510 = vst.msk [vmem:[#allocation2 + $0x31] sm:$0xff] %vm459_vm0, %v493_v3 }
  0x30   : > { %511 = vst.msk [vmem:[#allocation2 + $0x39] sm:$0xff] %vm459_vm0, %v494_v4 }
  0x31   : > { %512 = vst.msk [vmem:[#allocation2 + $0x49] sm:$0xff] %vm459_vm0, %v495_v5 }
  0x32   : > { %513 = vst.msk [vmem:[#allocation2 + $0x51] sm:$0xff] %vm459_vm0, %v496_v6 }
  0x33   : > { %514 = vst.msk [vmem:[#allocation2 + $0x61] sm:$0xff] %vm459_vm0, %v497_v7 }
  0x34   : > { %515 = vst.msk [vmem:[#allocation2 + $0x69] sm:$0xff] %vm459_vm0, %v498_v8 }
  0x35   : > { %516 = vst.msk [vmem:[#allocation2 + $0x79] sm:$0xff] %vm459_vm0, %v499_v9 }
  0x36   : > { %517 = vst.msk [vmem:[#allocation2 + $0x81] sm:$0xff] %vm459_vm0, %v500_v10 }
  0x37   : > { %518 = vst.msk [vmem:[#allocation2 + $0x91] sm:$0xff] %vm459_vm0, %v501_v11 }
  0x38   : > { %519 = vst.msk [vmem:[#allocation2 + $0x99] sm:$0xff] %vm459_vm0, %v502_v12  ;;  %527 = sbr.rel (%p1710_p10) target bundleno = 64 (0x40), region = 48 }
  0x39   : > { %520 = vst.msk [vmem:[#allocation2 + $0xa9] sm:$0xff] %vm459_vm0, %v503_v13 }
  0x3a   : > { %521 = vst.msk [vmem:[#allocation2 + $0xb1] sm:$0xff] %vm459_vm0, %v504_v14 }
  0x3b   : > { %522 = vst.msk [vmem:[#allocation2 + $0xc1] sm:$0xff] %vm459_vm0, %v505_v15 }
  0x3c   : > { %523 = vst.msk [vmem:[#allocation2 + $0xc9] sm:$0xff] %vm459_vm0, %v506_v16 }
  0x3d   : > { %v528_v17 = vld [vmem:[%s1973_s12] sm:$0xff]  ;;  %v529_v18 = vld [vmem:[%s1973_s12 + $0x8] sm:$0xff] }
  0x3e   : > { %530 = vst.msk [vmem:[#allocation2 + $0x1] sm:$0xff] %vm459_vm0, %v528_v17 }
  0x3f   : > { %531 = vst.msk [vmem:[#allocation2 + $0x9] sm:$0xff] %vm459_vm0, %v529_v18 }
  0x40 PF: > { %p1711_p11 = scmp.ge.s32.totalorder %s1831_s21, 1 }
  0x42   : > { %535 = sbr.rel (%p1711_p11) target bundleno = 74 (0x4a), region = 52 }
  0x47   : > { %v536_v19 = vld [vmem:[%s1979_s17] sm:$0xff]  ;;  %v537_v20 = vld [vmem:[%s1979_s17 + $0x8] sm:$0xff] }
  0x48   : > { %539 = vst.msk [vmem:[#allocation2 + $0xd9] sm:$0xff] %vm459_vm0, %v536_v19 }
  0x49   : > { %540 = vst.msk [vmem:[#allocation2 + $0xe1] sm:$0xff] %vm459_vm0, %v537_v20 }
  0x4a PF: > { %v2032_v21 = vld [vmem:[#allocation2 + $0x31] sm:$0xff]  ;;  %v2034_v22 = vld [vmem:[#allocation2 + $0x19] sm:$0xff]  ;;  %v557_v23 = vld [vmem:[#allocation2 + $0x1] sm:$0xff]  ;;  %s1850_s11 = smov 8   ;;  %s1851_s21 = smov 16   ;;  %vm1214_vm2 = vcmask 130048  }
  0x4b   : > { %710 = vrot.lane.b32.xlu2 %v2032_v21, %s1850_s11  ;;  %706 = vrot.lane.b32.xlu1 %v2034_v22, %s1850_s11  ;;  %v2041_v24 = vld [vmem:[#allocation2 + $0x39] sm:$0xff]  ;;  %v2043_v25 = vld [vmem:[#allocation2 + $0x21] sm:$0xff]  ;;  %v558_v26 = vld [vmem:[#allocation2 + $0x9] sm:$0xff]  ;;  %s1852_s19 = smov 24   ;;  %s1853_s22 = smov 32   ;;  %vm1231_vm3 = vcmask 195584  }
  0x4c   : > { %702 = vrot.lane.b32.xlu0 %v557_v23, %s1850_s11  ;;  %v2050_v27 = vld [vmem:[#allocation2 + $0x61] sm:$0xff]  ;;  %v2052_v28 = vld [vmem:[#allocation2 + $0x51] sm:$0xff]  ;;  %v2054_v29 = vld [vmem:[#allocation2 + $0x49] sm:$0xff]  ;;  %s1854_s28 = smov 40   ;;  %s1855_s29 = smov 56   ;;  %vm1248_vm4 = vcmask 261120  }
  0x4d   : > { %v2062_v30 = vld [vmem:[#allocation2 + $0x81] sm:$0xff]  ;;  %v2064_v31 = vld [vmem:[#allocation2 + $0x79] sm:$0xff]  ;;  %v2066_v32 = vld [vmem:[#allocation2 + $0x69] sm:$0xff]  ;;  %s1856_s30 = smov 48   ;;  %s1857_s8 = smov 64   ;;  %vm1265_vm5 = vcmask 326656  }
  0x4e   : > { %v2074_v33 = vld [vmem:[#allocation2 + $0xa9] sm:$0xff]  ;;  %v2076_v34 = vld [vmem:[#allocation2 + $0x99] sm:$0xff]  ;;  %v2078_v35 = vld [vmem:[#allocation2 + $0x91] sm:$0xff]  ;;  %vm1282_vm6 = vcmask 392192   ;;  %vm1299_vm7 = vcmask 457728   ;;  %vm1316_vm8 = vcmask 523264  }
  0x4f   : > { %v574_v36 = vld [vmem:[#allocation2 + $0xa] sm:$0xff]  ;;  %v573_v37 = vld [vmem:[#allocation2 + $0x2] sm:$0xff]  ;;  %v2092_v39 = vld [vmem:[#allocation2 + $0x32] sm:$0xff]  ;;  %vm1346_vm9 = vcmask 588800  }
  0x50   : > { %v2086_v38 = vld [vmem:[#allocation2 + $0xb1] sm:$0xff]  ;;  %v2094_v40 = vld [vmem:[#allocation2 + $0x22] sm:$0xff]  ;;  %v2096_v41 = vld [vmem:[#allocation2 + $0x1a] sm:$0xff] }
  0x51   : > { %v2104_v42 = vld [vmem:[#allocation2 + $0x52] sm:$0xff]  ;;  %v2106_v43 = vld [vmem:[#allocation2 + $0x4a] sm:$0xff]  ;;  %v2108_v44 = vld [vmem:[#allocation2 + $0x3a] sm:$0xff] }
  0x52   : > { %v2116_v45 = vld [vmem:[#allocation2 + $0x7a] sm:$0xff]  ;;  %v2118_v46 = vld [vmem:[#allocation2 + $0x6a] sm:$0xff]  ;;  %v2120_v47 = vld [vmem:[#allocation2 + $0x62] sm:$0xff] }
  0x53   : > { %712 = vrot.lane.b32.xlu2 %v2041_v24, %s1850_s11  ;;  %708 = vrot.lane.b32.xlu1 %v2043_v25, %s1850_s11  ;;  %v2128_v48 = vld [vmem:[#allocation2 + $0x9a] sm:$0xff]  ;;  %v2130_v49 = vld [vmem:[#allocation2 + $0x92] sm:$0xff]  ;;  %v2132_v50 = vld [vmem:[#allocation2 + $0x82] sm:$0xff] }
  0x54   : > { %704 = vrot.lane.b32.xlu0 %v558_v26, %s1850_s11  ;;  %v589_v51 = vld [vmem:[#allocation2 + $0x18] sm:$0xff]  ;;  %v2142_v53 = vld [vmem:[#allocation2 + $0xaa] sm:$0xff]  ;;  %v590_v56 = vld [vmem:[#allocation2 + $0x20] sm:$0xff] }
  0x55   : > { %v2140_v52 = vld [vmem:[#allocation2 + $0xb2] sm:$0xff]  ;;  %v2158_v58 = vld [vmem:[#allocation2 + $0x60] sm:$0xff]  ;;  %v2162_v60 = vld [vmem:[#allocation2 + $0x48] sm:$0xff] }
  0x56   : > { %v2149_v54 = vld [vmem:[#allocation2 + $0x38] sm:$0xff]  ;;  %v2151_v55 = vld [vmem:[#allocation2 + $0x30] sm:$0xff]  ;;  %v2172_v62 = vld [vmem:[#allocation2 + $0x80] sm:$0xff] }
  0x57   : > { %v2160_v59 = vld [vmem:[#allocation2 + $0x50] sm:$0xff]  ;;  %v2174_v63 = vld [vmem:[#allocation2 + $0x78] sm:$0xff]  ;;  %v2176_v0 = vld [vmem:[#allocation2 + $0x68] sm:$0xff] }
  0x58   : > { %v2186_v2 = vld [vmem:[#allocation2 + $0xa8] sm:$0xff]  ;;  %v2188_v3 = vld [vmem:[#allocation2 + $0x98] sm:$0xff]  ;;  %v2190_v4 = vld [vmem:[#allocation2 + $0x90] sm:$0xff] }
  0x59   : > { %v2201_v9 = vld [vmem:[#allocation2 + $0xc8] sm:$0xff]  ;;  %v603_v10 = vld [vmem:[#allocation2 + $0xc0] sm:$0xff]  ;;  %v2203_v11 = vld [vmem:[#allocation2 + $0xb0] sm:$0xff] }
  0x5a   : > { %v542_v16 = vld [vmem:[#allocation2 + $0x8] sm:$0xff] }
  0x5b   : > { %718 = vrot.lane.b32.xlu2 %v2050_v27, %s1850_s11  ;;  %716 = vrot.lane.b32.xlu1 %v2052_v28, %s1850_s11 }
  0x5c   : > { %714 = vrot.lane.b32.xlu0 %v2054_v29, %s1850_s11 }
  0x63   : > { %724 = vrot.lane.b32.xlu2 %v2062_v30, %s1850_s11  ;;  %722 = vrot.lane.b32.xlu1 %v2064_v31, %s1850_s11 }
  0x64   : > { %720 = vrot.lane.b32.xlu0 %v2066_v32, %s1850_s11 }
  0x6b   : > { %730 = vrot.lane.b32.xlu2 %v2074_v33, %s1850_s11  ;;  %728 = vrot.lane.b32.xlu1 %v2076_v34, %s1850_s11 }
  0x6c   : > { %726 = vrot.lane.b32.xlu0 %v2078_v35, %s1850_s11 }
  0x73   : > { %768 = vrot.lane.b32.xlu2 %v574_v36, %s1851_s21  ;;  %766 = vrot.lane.b32.xlu1 %v573_v37, %s1851_s21 }
  0x74   : > { %732 = vrot.lane.b32.xlu0 %v2086_v38, %s1850_s11 }
  0x7b   : > { %774 = vrot.lane.b32.xlu2 %v2092_v39, %s1851_s21  ;;  %772 = vrot.lane.b32.xlu1 %v2094_v40, %s1851_s21 }
  0x7c   : > { %770 = vrot.lane.b32.xlu0 %v2096_v41, %s1851_s21 }
  0x83   : > { %780 = vrot.lane.b32.xlu2 %v2104_v42, %s1851_s21  ;;  %778 = vrot.lane.b32.xlu1 %v2106_v43, %s1851_s21 }
  0x84   : > { %776 = vrot.lane.b32.xlu0 %v2108_v44, %s1851_s21 }
  0x8b   : > { %786 = vrot.lane.b32.xlu2 %v2116_v45, %s1851_s21  ;;  %784 = vrot.lane.b32.xlu1 %v2118_v46, %s1851_s21 }
  0x8c   : > { %782 = vrot.lane.b32.xlu0 %v2120_v47, %s1851_s21 }
  0x93   : > { %792 = vrot.lane.b32.xlu2 %v2128_v48, %s1851_s21  ;;  %790 = vrot.lane.b32.xlu1 %v2130_v49, %s1851_s21 }
  0x94   : > { %788 = vrot.lane.b32.xlu0 %v2132_v50, %s1851_s21 }
  0x9b   : > { %830 = vrot.lane.b32.xlu2 %v589_v51, %s1852_s19  ;;  %796 = vrot.lane.b32.xlu1 %v2140_v52, %s1851_s21 }
  0x9c   : > { %794 = vrot.lane.b32.xlu0 %v2142_v53, %s1851_s21 }
  0xa3   : > { %836 = vrot.lane.b32.xlu2 %v2149_v54, %s1852_s19  ;;  %834 = vrot.lane.b32.xlu1 %v2151_v55, %s1852_s19 }
  0xa4   : > { %832 = vrot.lane.b32.xlu0 %v590_v56, %s1852_s19 }
  0xa5   : > { %v711_v57 = vpop.permute.xlu2 %710 }
  0xab   : > { %842 = vrot.lane.b32.xlu2 %v2158_v58, %s1852_s19  ;;  %840 = vrot.lane.b32.xlu1 %v2160_v59, %s1852_s19 }
  0xac   : > { %838 = vrot.lane.b32.xlu0 %v2162_v60, %s1852_s19 }
  0xad   : > { %v2170_v61 = vpop.permute.xlu2 %712 }
  0xb3   : > { %848 = vrot.lane.b32.xlu2 %v2172_v62, %s1852_s19  ;;  %846 = vrot.lane.b32.xlu1 %v2174_v63, %s1852_s19 }
  0xb4   : > { %844 = vrot.lane.b32.xlu0 %v2176_v0, %s1852_s19 }
  0xb5   : > { %v2184_v1 = vpop.permute.xlu2 %718 }
  0xbb   : > { %854 = vrot.lane.b32.xlu2 %v2186_v2, %s1852_s19  ;;  %852 = vrot.lane.b32.xlu1 %v2188_v3, %s1852_s19 }
  0xbc   : > { %850 = vrot.lane.b32.xlu0 %v2190_v4, %s1852_s19 }
  0xbd   : > { %v2198_v5 = vpop.permute.xlu2 %724  ;;  %v707_v6 = vpop.permute.xlu1 %706 }
  0xbe   : > { %v1200_v7 = vsel %vm459_vm0, %v589_v51, %v707_v6  ;;  %v703_v8 = vpop.permute.xlu0 %702 }
  0xc3   : > { %860 = vrot.lane.b32.xlu2 %v2201_v9, %s1852_s19  ;;  %858 = vrot.lane.b32.xlu1 %v603_v10, %s1852_s19 }
  0xc4   : > { %856 = vrot.lane.b32.xlu0 %v2203_v11, %s1852_s19 }
  0xc5   : > { %v2210_v12 = vpop.permute.xlu2 %730  ;;  %v709_v13 = vpop.permute.xlu1 %708 }
  0xc6   : > { %v1201_v14 = vsel %vm459_vm0, %v590_v56, %v709_v13  ;;  %v705_v15 = vpop.permute.xlu0 %704 }
  0xc7   : > { %v1199_v17 = vsel %vm459_vm0, %v542_v16, %v705_v15  ;;  %v541_v16 = vld [vmem:[#allocation2] sm:$0xff] }
  0xcb   : > { %898 = vrot.lane.b32.xlu2 %v2032_v21, %s1853_s22  ;;  %896 = vrot.lane.b32.xlu1 %v2043_v25, %s1853_s22 }
  0xcc   : > { %894 = vrot.lane.b32.xlu0 %v2034_v22, %s1853_s22  ;;  %v1202_v22 = vsel %vm459_vm0, %v2151_v55, %v711_v57 }
  0xcd   : > { %v769_v18 = vpop.permute.xlu2 %768  ;;  %v717_v19 = vpop.permute.xlu1 %716 }
  0xce   : > { %v2221_v20 = vsel %vm1214_vm2, %v1199_v17, %v769_v18  ;;  %v715_v23 = vpop.permute.xlu0 %714  ;;  %v1205_v51 = vsel %vm459_vm0, %v2160_v59, %v717_v19  ;;  %v1198_v17 = vsel %vm459_vm0, %v541_v16, %v703_v8 }
  0xd3   : > { %904 = vrot.lane.b32.xlu2 %v2052_v28, %s1853_s22  ;;  %902 = vrot.lane.b32.xlu1 %v2054_v29, %s1853_s22 }
  0xd4   : > { %900 = vrot.lane.b32.xlu0 %v2041_v24, %s1853_s22 }
  0xd5   : > { %v775_v25 = vpop.permute.xlu2 %774  ;;  %v723_v26 = vpop.permute.xlu1 %722 }
  0xd6   : > { %v2232_v36 = vsel %vm1214_vm2, %v1202_v22, %v775_v25  ;;  %v721_v37 = vpop.permute.xlu0 %720  ;;  %v1208_v18 = vsel %vm459_vm0, %v2174_v63, %v723_v26 }
  0xdb   : > { %910 = vrot.lane.b32.xlu2 %v2064_v31, %s1853_s22  ;;  %908 = vrot.lane.b32.xlu1 %v2066_v32, %s1853_s22 }
  0xdc   : > { %906 = vrot.lane.b32.xlu0 %v2050_v27, %s1853_s22 }
  0xdd   : > { %v781_v56 = vpop.permute.xlu2 %780  ;;  %v729_v57 = vpop.permute.xlu1 %728 }
  0xde   : > { %v2243_v6 = vsel %vm1214_vm2, %v1205_v51, %v781_v56  ;;  %v727_v13 = vpop.permute.xlu0 %726  ;;  %v1211_v8 = vsel %vm459_vm0, %v2188_v3, %v729_v57  ;;  %v1204_v57 = vsel %vm459_vm0, %v2162_v60, %v715_v23 }
  0xdf   : > { %v1210_v15 = vsel %vm459_vm0, %v2190_v4, %v727_v13 }
  0xe3   : > { %916 = vrot.lane.b32.xlu2 %v2076_v34, %s1853_s22  ;;  %914 = vrot.lane.b32.xlu1 %v2078_v35, %s1853_s22 }
  0xe4   : > { %912 = vrot.lane.b32.xlu0 %v2062_v30, %s1853_s22 }
  0xe5   : > { %v787_v19 = vpop.permute.xlu2 %786  ;;  %v767_v22 = vpop.permute.xlu1 %766 }
  0xe6   : > { %v2257_v25 = vsel %vm1214_vm2, %v1208_v18, %v787_v19  ;;  %v1215_v51 = vsel %vm1214_vm2, %v1198_v17, %v767_v22  ;;  %v733_v56 = vpop.permute.xlu0 %732 }
  0xeb   : > { %982 = vrot.lane.b32.xlu2 %v2142_v53, %s1854_s28  ;;  %974 = vrot.lane.b32.xlu1 %v2116_v45, %s1854_s28 }
  0xec   : > { %918 = vrot.lane.b32.xlu0 %v2074_v33, %s1853_s22 }
  0xed   : > { %v793_v26 = vpop.permute.xlu2 %792  ;;  %v773_v13 = vpop.permute.xlu1 %772 }
  0xee   : > { %v2269_v16 = vsel %vm1214_vm2, %v1211_v8, %v793_v26  ;;  %v1218_v17 = vsel %vm1214_vm2, %v1201_v14, %v773_v13  ;;  %v771_v18 = vpop.permute.xlu0 %770  ;;  %v2288_v13 = vld [vmem:[#allocation2 + $0xc2] sm:$0xff] }
  0xef   : > { %v1217_v19 = vsel %vm1214_vm2, %v1200_v7, %v771_v18  ;;  %v1203_v7 = vsel %vm459_vm0, %v2149_v54, %v2170_v61  ;;  %v1207_v61 = vsel %vm459_vm0, %v2176_v0, %v721_v37  ;;  %v1206_v18 = vsel %vm459_vm0, %v2158_v58, %v2184_v1 }
  0xf0   : > { %v1209_v1 = vsel %vm459_vm0, %v2172_v62, %v2198_v5 }
  0xf3   : > { %1102 = vrot.lane.b32.xlu2 %v2078_v35, %s1855_s29  ;;  %1046 = vrot.lane.b32.xlu1 %v603_v10, %s1856_s30 }
  0xf4   : > { %1038 = vrot.lane.b32.xlu0 %v2190_v4, %s1856_s30  ;;  %v2290_v4 = vld [vmem:[#allocation2 + $0xc1] sm:$0xff] }
  0xf5   : > { %v831_v22 = vpop.permute.xlu2 %830  ;;  %v779_v8 = vpop.permute.xlu1 %778 }
  0xf6   : > { %v2284_v14 = vsel %vm1231_vm3, %v1215_v51, %v831_v22  ;;  %v1221_v35 = vsel %vm1214_vm2, %v1204_v57, %v779_v8  ;;  %v777_v26 = vpop.permute.xlu0 %776 }
  0xf7   : > { %v1220_v10 = vsel %vm1214_vm2, %v1203_v7, %v777_v26 }
  0xfb   : > { %1174 = vrot.lane.b32.xlu2 %v2288_v13, %s1857_s8  ;;  %1166 = vrot.lane.b32.xlu1 %v2130_v49, %s1857_s8 }
  0xfc   : > { %1110 = vrot.lane.b32.xlu0 %v2290_v4, %s1855_s29 }
  0xfd   : > { %v837_v23 = vpop.permute.xlu2 %836  ;;  %v785_v51 = vpop.permute.xlu1 %784 }
  0xfe   : > { %v2304_v57 = vsel %vm1231_vm3, %v1218_v17, %v837_v23  ;;  %v1224_v22 = vsel %vm1214_vm2, %v1207_v61, %v785_v51  ;;  %v783_v8 = vpop.permute.xlu0 %782 }
  0xff   : > { %v1223_v7 = vsel %vm1214_vm2, %v1206_v18, %v783_v8 }
 0x103   : > { %920 = vrot.lane.b32.xlu2 %v2086_v38, %s1853_s22  ;;  %966 = vrot.lane.b32.xlu1 %v2106_v43, %s1854_s28 }
 0x104   : > { %958 = vrot.lane.b32.xlu0 %v2096_v41, %s1854_s28  ;;  %v1213_v41 = vsel %vm459_vm0, %v2203_v11, %v733_v56 }
 0x105   : > { %v843_v37 = vpop.permute.xlu2 %842  ;;  %v791_v26 = vpop.permute.xlu1 %790 }
 0x106   : > { %v2318_v17 = vsel %vm1231_vm3, %v1221_v35, %v843_v37  ;;  %v1227_v61 = vsel %vm1214_vm2, %v1210_v15, %v791_v26  ;;  %v789_v23 = vpop.permute.xlu0 %788  ;;  %v1212_v15 = vsel %vm459_vm0, %v2186_v2, %v2210_v12 }
 0x107   : > { %v1226_v51 = vsel %vm1214_vm2, %v1209_v1, %v789_v23 }
 0x10b   : > { %976 = vrot.lane.b32.xlu2 %v2132_v50, %s1854_s28  ;;  %1030 = vrot.lane.b32.xlu1 %v2158_v58, %s1856_s30 }
 0x10c   : > { %1022 = vrot.lane.b32.xlu0 %v2151_v55, %s1856_s30 }
 0x10d   : > { %v849_v5 = vpop.permute.xlu2 %848  ;;  %v797_v35 = vpop.permute.xlu1 %796 }
 0x10e   : > { %v2334_v18 = vsel %vm1231_vm3, %v1224_v22, %v849_v5  ;;  %v1230_v8 = vsel %vm1214_vm2, %v1213_v41, %v797_v35  ;;  %v795_v37 = vpop.permute.xlu0 %794  ;;  %v2362_v41 = vld [vmem:[#allocation2 + $0xc9] sm:$0xff] }
 0x10f   : > { %v1229_v58 = vsel %vm1214_vm2, %v1212_v15, %v795_v37  ;;  %v2380_v15 = vld [vmem:[#allocation2 + $0xca] sm:$0xff] }
 0x113   : > { %1094 = vrot.lane.b32.xlu2 %v2050_v27, %s1855_s29  ;;  %1086 = vrot.lane.b32.xlu1 %v2032_v21, %s1855_s29 }
 0x114   : > { %984 = vrot.lane.b32.xlu0 %v2140_v52, %s1854_s28 }
 0x115   : > { %v855_v55 = vpop.permute.xlu2 %854  ;;  %v835_v56 = vpop.permute.xlu1 %834 }
 0x116   : > { %v2345_v12 = vsel %vm1231_vm3, %v1227_v61, %v855_v55  ;;  %v1234_v22 = vsel %vm1231_vm3, %v1217_v19, %v835_v56  ;;  %v833_v26 = vpop.permute.xlu0 %832 }
 0x117   : > { %v1233_v1 = vsel %vm1231_vm3, %v2221_v20, %v833_v26 }
 0x11b   : > { %1150 = vrot.lane.b32.xlu2 %v2092_v39, %s1857_s8  ;;  %1048 = vrot.lane.b32.xlu1 %v2201_v9, %s1856_s30 }
 0x11c   : > { %1040 = vrot.lane.b32.xlu0 %v2188_v3, %s1856_s30 }
 0x11d   : > { %v861_v21 = vpop.permute.xlu2 %860  ;;  %v841_v27 = vpop.permute.xlu1 %840 }
 0x11e   : > { %v2357_v61 = vsel %vm1231_vm3, %v1230_v8, %v861_v21  ;;  %v1237_v19 = vsel %vm1231_vm3, %v1220_v10, %v841_v27  ;;  %v839_v23 = vpop.permute.xlu0 %838 }
 0x11f   : > { %v1236_v20 = vsel %vm1231_vm3, %v2232_v36, %v839_v23  ;;  %v1336_v23 = vld [vmem:[%s2739_s3 + $0x18] sm:$0xff] }
 0x123   : > { %1112 = vrot.lane.b32.xlu2 %v2362_v41, %s1855_s29  ;;  %1104 = vrot.lane.b32.xlu1 %v2076_v34, %s1855_s29 }
 0x124   : > { %1158 = vrot.lane.b32.xlu0 %v2120_v47, %s1857_s8 }
 0x125   : > { %v899_v3 = vpop.permute.xlu2 %898  ;;  %v847_v9 = vpop.permute.xlu1 %846 }
 0x126   : > { %v2371_v10 = vsel %vm1248_vm4, %v1234_v22, %v899_v3  ;;  %v2374_v5 = vsel %vm1231_vm3, %v1223_v7, %v847_v9  ;;  %v845_v36 = vpop.permute.xlu0 %844  ;;  %v1335_v3 = vld [vmem:[%s2739_s3 + $0x10] sm:$0xff] }
 0x127   : > { %v2378_v35 = vsel %vm1231_vm3, %v2243_v6, %v845_v36 }
 0x12b   : > { %960 = vrot.lane.b32.xlu2 %v2094_v40, %s1854_s28  ;;  %1176 = vrot.lane.b32.xlu1 %v2380_v15, %s1857_s8 }
 0x12c   : > { %1168 = vrot.lane.b32.xlu0 %v2128_v48, %s1857_s8 }
 0x12d   : > { %v905_v34 = vpop.permute.xlu2 %904  ;;  %v853_v8 = vpop.permute.xlu1 %852 }
 0x12e   : > { %v2389_v7 = vsel %vm1248_vm4, %v1237_v19, %v905_v34  ;;  %v1243_v37 = vsel %vm1231_vm3, %v1226_v51, %v853_v8  ;;  %v851_v6 = vpop.permute.xlu0 %850 }
 0x12f   : > { %v2394_v55 = vsel %vm1231_vm3, %v2257_v25, %v851_v6 }
 0x133   : > { %1024 = vrot.lane.b32.xlu2 %v2149_v54, %s1856_s30  ;;  %922 = vrot.lane.b32.xlu1 %v2290_v4, %s1853_s22 }
 0x134   : > { %968 = vrot.lane.b32.xlu0 %v2104_v42, %s1854_s28 }
 0x135   : > { %v2402_v40 = vpop.permute.xlu2 %910  ;;  %v859_v56 = vpop.permute.xlu1 %858 }
 0x136   : > { %v2405_v22 = vsel %vm1231_vm3, %v1229_v58, %v859_v56  ;;  %v857_v51 = vpop.permute.xlu0 %856  ;;  %v668_v56 = vld [vmem:[#allocation2 + $0xd9] sm:$0xff] }
 0x137   : > { %v2409_v25 = vsel %vm1231_vm3, %v2269_v16, %v857_v51  ;;  %v1341_v16 = vld [vmem:[%s2739_s3 + $0x40] sm:$0xff] }
 0x138   : > { %1733 = vmatpush.msra.mxu2 %v1341_v16  ;;  %1734 = vmatpush.msra.mxu3 %v1341_v16 }
 0x139   : > { %1402 = vmatpush.msra.mxu0 %v1341_v16  ;;  %1732 = vmatpush.msra.mxu1 %v1341_v16 }
 0x13b   : > { %986 = vrot.lane.b32.xlu2 %v2288_v13, %s1854_s28  ;;  %978 = vrot.lane.b32.xlu1 %v2130_v49, %s1854_s28  ;;  %v1340_v49 = vld [vmem:[%s2739_s3 + $0x38] sm:$0xff] }
 0x13c   : > { %1032 = vrot.lane.b32.xlu0 %v2176_v0, %s1856_s30  ;;  %1736 = vmatpush.msra.mxu2 %v1340_v49  ;;  %v1339_v0 = vld [vmem:[%s2739_s3 + $0x30] sm:$0xff] }
 0x13d   : > { %v917_v54 = vpop.permute.xlu2 %916  ;;  %v897_v4 = vpop.permute.xlu1 %896  ;;  %1737 = vmatpush.msra.mxu3 %v1340_v49  ;;  %1403 = vmatpush.msra.mxu0 %v1340_v49 }
 0x13e   : > { %v2418_v26 = vsel %vm1248_vm4, %v1243_v37, %v917_v54  ;;  %v2421_v58 = vsel %vm1248_vm4, %v1233_v1, %v897_v4  ;;  %v895_v21 = vpop.permute.xlu0 %894  ;;  %1735 = vmatpush.msra.mxu1 %v1340_v49  ;;  %1739 = vmatpush.msra.mxu2 %v1339_v0  ;;  %v1333_v37 = vld [vmem:[%s2739_s3] sm:$0xff] }
 0x13f   : > { %v2428_v13 = vsel %vm1248_vm4, %v2284_v14, %v895_v21  ;;  %v1338_v14 = vld [vmem:[%s2739_s3 + $0x28] sm:$0xff]  ;;  %1740 = vmatpush.msra.mxu3 %v1339_v0  ;;  %1404 = vmatpush.msra.mxu0 %v1339_v0  ;;  %v684_v21 = vld [vmem:[#allocation2 + $0xda] sm:$0xff] }
 0x140   : > { %1742 = vmatpush.msra.mxu2 %v1338_v14  ;;  %1738 = vmatpush.msra.mxu1 %v1339_v0 }
 0x141   : > { %1743 = vmatpush.msra.mxu3 %v1338_v14  ;;  %1405 = vmatpush.msra.mxu0 %v1338_v14 }
 0x142   : > { %1741 = vmatpush.msra.mxu1 %v1338_v14 }
 0x143   : > { %1042 = vrot.lane.b32.xlu2 %v2186_v2, %s1856_s30  ;;  %1096 = vrot.lane.b32.xlu1 %v2066_v32, %s1855_s29  ;;  %v1337_v32 = vld [vmem:[%s2739_s3 + $0x20] sm:$0xff] }
 0x144   : > { %1088 = vrot.lane.b32.xlu0 %v2041_v24, %s1855_s29  ;;  %1745 = vmatpush.msra.mxu2 %v1337_v32 }
 0x145   : > { %v2445_v1 = vpop.permute.xlu2 %982  ;;  %v903_v27 = vpop.permute.xlu1 %902  ;;  %1746 = vmatpush.msra.mxu3 %v1337_v32  ;;  %1406 = vmatpush.msra.mxu0 %v1337_v32 }
 0x146   : > { %v2448_v19 = vsel %vm1248_vm4, %v1236_v20, %v903_v27  ;;  %v901_v2 = vpop.permute.xlu0 %900  ;;  %v652_v20 = vld [vmem:[#allocation2 + $0xd8] sm:$0xff]  ;;  %1748 = vmatpush.msra.mxu2 %v1336_v23  ;;  %1744 = vmatpush.msra.mxu1 %v1337_v32 }
 0x147   : > { %v2455_v24 = vsel %vm1248_vm4, %v2304_v57, %v901_v2  ;;  %1749 = vmatpush.msra.mxu3 %v1336_v23  ;;  %v1334_v57 = vld [vmem:[%s2739_s3 + $0x8] sm:$0xff]  ;;  %1407 = vmatpush.msra.mxu0 %v1336_v23 }
 0x148   : > { %1751 = vmatpush.msra.mxu2 %v1335_v3  ;;  %1747 = vmatpush.msra.mxu1 %v1336_v23 }
 0x149   : > { %1752 = vmatpush.msra.mxu3 %v1335_v3  ;;  %1408 = vmatpush.msra.mxu0 %v1335_v3 }
 0x14a   : > { %1754 = vmatpush.msra.mxu2 %v1334_v57  ;;  %1750 = vmatpush.msra.mxu1 %v1335_v3 }
 0x14b   : > { %1160 = vrot.lane.b32.xlu2 %v2118_v46, %s1857_s8  ;;  %1152 = vrot.lane.b32.xlu1 %v2108_v44, %s1857_s8 }
 0x14c   : > { %1050 = vrot.lane.b32.xlu0 %v652_v20, %s1856_s30  ;;  %1755 = vmatpush.msra.mxu3 %v1334_v57 }
 0x14d   : > { %v1103_v9 = vpop.permute.xlu2 %1102  ;;  %v909_v36 = vpop.permute.xlu1 %908  ;;  %1757 = vmatpush.msra.mxu2 %v1333_v37  ;;  %1409 = vmatpush.msra.mxu0 %v1334_v57 }
 0x14e   : > { %v2473_v34 = vsel %vm1248_vm4, %v2378_v35, %v909_v36  ;;  %v907_v8 = vpop.permute.xlu0 %906  ;;  %1758 = vmatpush.msra.mxu3 %v1333_v37  ;;  %1753 = vmatpush.msra.mxu1 %v1334_v57  ;;  %v669_v57 = vld [vmem:[#allocation2 + $0xe1] sm:$0xff] }
 0x14f   : > { %v2480_v6 = vsel %vm1248_vm4, %v2318_v17, %v907_v8  ;;  %1410 = vmatpush.msra.mxu0 %v1333_v37 }
 0x150   : > { %1756 = vmatpush.msra.mxu1 %v1333_v37 }
 0x153   : > { %1170 = vrot.lane.b32.xlu2 %v2142_v53, %s1857_s8  ;;  %1114 = vrot.lane.b32.xlu1 %v668_v56, %s1855_s29 }
 0x154   : > { %1106 = vrot.lane.b32.xlu0 %v2074_v33, %s1855_s29 }
 0x155   : > { %v1175_v17 = vpop.permute.xlu2 %1174  ;;  %v915_v35 = vpop.permute.xlu1 %914 }
 0x156   : > { %v2489_v51 = vsel %vm1248_vm4, %v2394_v55, %v915_v35  ;;  %v913_v54 = vpop.permute.xlu0 %912  ;;  %v1257_v55 = vsel %vm1248_vm4, %v2374_v5, %v2402_v40 }
 0x157   : > { %v2493_v4 = vsel %vm1248_vm4, %v2334_v18, %v913_v54 }
 0x15b   : > { %970 = vrot.lane.b32.xlu2 %v2120_v47, %s1854_s28  ;;  %962 = vrot.lane.b32.xlu1 %v2092_v39, %s1854_s28 }
 0x15c   : > { %1178 = vrot.lane.b32.xlu0 %v684_v21, %s1857_s8 }
 0x15d   : > { %v2500_v33 = vpop.permute.xlu2 %920  ;;  %v975_v53 = vpop.permute.xlu1 %974 }
 0x15e   : > { %v919_v16 = vpop.permute.xlu0 %918  ;;  %v1274_v49 = vsel %vm1265_vm5, %v1257_v55, %v975_v53 }
 0x163   : > { %1034 = vrot.lane.b32.xlu2 %v2174_v63, %s1856_s30  ;;  %1026 = vrot.lane.b32.xlu1 %v2162_v60, %s1856_s30  ;;  %v1261_v63 = vsel %vm1248_vm4, %v2345_v12, %v919_v16 }
 0x164   : > { %924 = vrot.lane.b32.xlu0 %v2362_v41, %s1853_s22  ;;  %v1278_v41 = vsel %vm1265_vm5, %v1261_v63, %v2445_v1 }
 0x165   : > { %v2508_v18 = vpop.permute.xlu2 %976  ;;  %v1047_v47 = vpop.permute.xlu1 %1046 }
 0x166   : > { %v1039_v39 = vpop.permute.xlu0 %1038  ;;  %v1295_v0 = vsel %vm1282_vm6, %v1278_v41, %v1047_v47 }
 0x167   : > { %v1291_v60 = vsel %vm1282_vm6, %v1274_v49, %v1039_v39 }
 0x168   : > { %v1308_v12 = vsel %vm1299_vm7, %v1291_v60, %v1103_v9 }
 0x16b   : > { %988 = vrot.lane.b32.xlu1 %v2380_v15, %s1854_s28  ;;  %1090 = vrot.lane.b32.xlu2 %v2054_v29, %s1855_s29 }
 0x16c   : > { %980 = vrot.lane.b32.xlu0 %v2128_v48, %s1854_s28  ;;  %v653_v48 = vld [vmem:[#allocation2 + $0xe0] sm:$0xff] }
 0x16d   : > { %v1095_v5 = vpop.permute.xlu2 %1094  ;;  %v1167_v40 = vpop.permute.xlu1 %1166 }
 0x16e   : > { %v1111_v14 = vpop.permute.xlu0 %1110  ;;  %v1325_v15 = vsel %vm1316_vm8, %v1308_v12, %v1167_v40 }
 0x16f   : > { %v1312_v27 = vsel %vm1299_vm7, %v1295_v0, %v1111_v14  ;;  %1720 = vmatmul.msk.f32.vlgmr.msra.gmra.mxu2 %vm1346_vm9, %v1325_v15 }
 0x170   : > { %v1329_v29 = vsel %vm1316_vm8, %v1312_v27, %v1175_v17 }
 0x171   : > { %1724 = vmatmul.msk.f32.vlgmr.msra.gmra.mxu3 %vm1346_vm9, %v1329_v29 }
 0x173   : > { %1044 = vrot.lane.b32.xlu1 %v2203_v11, %s1856_s30  ;;  %1052 = vrot.lane.b32.xlu2 %v653_v48, %s1856_s30  ;;  %v685_v11 = vld [vmem:[#allocation2 + $0xe2] sm:$0xff] }
 0x174   : > { %1098 = vrot.lane.b32.xlu0 %v2064_v31, %s1855_s29 }
 0x175   : > { %v967_v1 = vpop.permute.xlu1 %966  ;;  %v1151_v32 = vpop.permute.xlu2 %1150 }
 0x176   : > { %v959_v2 = vpop.permute.xlu0 %958  ;;  %v1270_v37 = vsel %vm1265_vm5, %v2448_v19, %v967_v1  ;;  %v1262_v19 = vsel %vm1248_vm4, %v2409_v25, %v2500_v33 }
 0x177   : > { %v1266_v31 = vsel %vm1265_vm5, %v2428_v13, %v959_v2 }
 0x17b   : > { %1162 = vrot.lane.b32.xlu1 %v2116_v45, %s1857_s8  ;;  %1108 = vrot.lane.b32.xlu2 %v2086_v38, %s1855_s29 }
 0x17c   : > { %1154 = vrot.lane.b32.xlu0 %v2106_v43, %s1857_s8 }
 0x17d   : > { %v1031_v23 = vpop.permute.xlu1 %1030  ;;  %v1113_v3 = vpop.permute.xlu2 %1112 }
 0x17e   : > { %v1023_v20 = vpop.permute.xlu0 %1022  ;;  %v1287_v56 = vsel %vm1282_vm6, %v1270_v37, %v1031_v23 }
 0x17f   : > { %v1283_v38 = vsel %vm1282_vm6, %v1266_v31, %v1023_v20 }
 0x183   : > { %1172 = vrot.lane.b32.xlu1 %v2140_v52, %s1857_s8  ;;  %1180 = vrot.lane.b32.xlu2 %v685_v11, %s1857_s8 }
 0x184   : > { %1116 = vrot.lane.b32.xlu0 %v669_v57, %s1855_s29 }
 0x185   : > { %v1087_v45 = vpop.permute.xlu1 %1086  ;;  %v961_v8 = vpop.permute.xlu2 %960 }
 0x186   : > { %v1300_v43 = vsel %vm1299_vm7, %v1283_v38, %v1087_v45  ;;  %v985_v9 = vpop.permute.xlu0 %984  ;;  %v1267_v0 = vsel %vm1265_vm5, %v2421_v58, %v961_v8 }
 0x187   : > { %v1317_v36 = vsel %vm1316_vm8, %v1300_v43, %v1151_v32 }
 0x188   : > { %1712 = vmatmul.msk.f32.vlgmr.msra.gmra.mxu0 %vm1346_vm9, %v1317_v36 }
 0x18b   : > { %972 = vrot.lane.b32.xlu1 %v2118_v46, %s1854_s28  ;;  %1028 = vrot.lane.b32.xlu2 %v2160_v59, %s1856_s30 }
 0x18c   : > { %964 = vrot.lane.b32.xlu0 %v2108_v44, %s1854_s28  ;;  %v1304_v44 = vsel %vm1299_vm7, %v1287_v56, %v1095_v5 }
 0x18d   : > { %v1049_v52 = vpop.permute.xlu1 %1048  ;;  %v1025_v46 = vpop.permute.xlu2 %1024 }
 0x18e   : > { %v1041_v13 = vpop.permute.xlu0 %1040  ;;  %v1284_v14 = vsel %vm1282_vm6, %v1267_v0, %v1025_v46 }
 0x193   : > { %1092 = vrot.lane.b32.xlu1 %v2052_v28, %s1855_s29  ;;  %1100 = vrot.lane.b32.xlu2 %v2062_v30, %s1855_s29  ;;  %v1279_v28 = vsel %vm1265_vm5, %v1262_v19, %v985_v9 }
 0x194   : > { %1036 = vrot.lane.b32.xlu0 %v2172_v62, %s1856_s30  ;;  %v1296_v30 = vsel %vm1282_vm6, %v1279_v28, %v1049_v52  ;;  %v1275_v62 = vsel %vm1265_vm5, %v2493_v4, %v2508_v18 }
 0x195   : > { %v1105_v59 = vpop.permute.xlu1 %1104  ;;  %v1292_v54 = vsel %vm1282_vm6, %v1275_v62, %v1041_v13  ;;  %v1313_v25 = vsel %vm1299_vm7, %v1296_v30, %v1113_v3  ;;  %v987_v47 = vpop.permute.xlu2 %986 }
 0x196   : > { %v1159_v17 = vpop.permute.xlu0 %1158  ;;  %v1309_v33 = vsel %vm1299_vm7, %v1292_v54, %v1105_v59 }
 0x197   : > { %v1321_v35 = vsel %vm1316_vm8, %v1304_v44, %v1159_v17 }
 0x198   : > { %1716 = vmatmul.msk.f32.vlgmr.msra.gmra.mxu1 %vm1346_vm9, %v1321_v35 }
 0x19b   : > { %1164 = vrot.lane.b32.xlu1 %v2132_v50, %s1857_s8 }
 0x19c   : > { %1156 = vrot.lane.b32.xlu0 %v2104_v42, %s1857_s8 }
 0x19d   : > { %v1177_v21 = vpop.permute.xlu1 %1176  ;;  %v1043_v42 = vpop.permute.xlu2 %1042 }
 0x19e   : > { %v1169_v53 = vpop.permute.xlu0 %1168  ;;  %v1330_v16 = vsel %vm1316_vm8, %v1313_v25, %v1177_v21 }
 0x19f   : > { %v1326_v50 = vsel %vm1316_vm8, %v1309_v33, %v1169_v53  ;;  %1725 = vmatmul.msk.f32.gmra.mxu3 %vm1346_vm9, %v1330_v16 }
 0x1a0   : > { %1721 = vmatmul.msk.f32.gmra.mxu2 %vm1346_vm9, %v1326_v50 }
 0x1a5   : > { %v923_v4 = vpop.permute.xlu1 %922  ;;  %v1161_v49 = vpop.permute.xlu2 %1160 }
 0x1a6   : > { %v969_v18 = vpop.permute.xlu0 %968  ;;  %v1263_v3 = vsel %vm1248_vm4, %v2405_v22, %v923_v4 }
 0x1a7   : > { %v1271_v63 = vsel %vm1265_vm5, %v2389_v7, %v969_v18  ;;  %v1280_v57 = vsel %vm1265_vm5, %v1263_v3, %v987_v47  ;;  %v1468_v47 = vld [vmem:[%s1947_s15 + $0x40] sm:$0xff] }
 0x1ad   : > { %v979_v39 = vpop.permute.xlu1 %978  ;;  %v1171_v15 = vpop.permute.xlu2 %1170 }
 0x1ae   : > { %v1033_v55 = vpop.permute.xlu0 %1032  ;;  %v1276_v1 = vsel %vm1265_vm5, %v2489_v51, %v979_v39 }
 0x1af   : > { %v1288_v60 = vsel %vm1282_vm6, %v1271_v63, %v1033_v55  ;;  %v1293_v23 = vsel %vm1282_vm6, %v1276_v1, %v1043_v42  ;;  %v1472_v42 = vld [vmem:[%s1947_s15 + $0x60] sm:$0xff] }
 0x1b5   : > { %v1097_v41 = vpop.permute.xlu1 %1096  ;;  %v971_v20 = vpop.permute.xlu2 %970 }
 0x1b6   : > { %v1305_v5 = vsel %vm1299_vm7, %v1288_v60, %v1097_v41  ;;  %v1089_v40 = vpop.permute.xlu0 %1088  ;;  %v1272_v17 = vsel %vm1265_vm5, %v2480_v6, %v971_v20  ;;  %v2629_v6 = vld [vmem:[%s2740_s4] ss:$0 sm:$0xff] }
 0x1b7   : > { %v1322_v12 = vsel %vm1316_vm8, %v1305_v5, %v1161_v49  ;;  %v1301_v27 = vsel %vm1299_vm7, %v1284_v14, %v1089_v40 }
 0x1b8   : > { %1717 = vmatmul.msk.f32.gmra.mxu1 %vm1346_vm9, %v1322_v12 }
 0x1bd   : > { %v1153_v29 = vpop.permute.xlu1 %1152  ;;  %v1035_v9 = vpop.permute.xlu2 %1034 }
 0x1be   : > { %v1051_v7 = vpop.permute.xlu0 %1050  ;;  %v1318_v48 = vsel %vm1316_vm8, %v1301_v27, %v1153_v29  ;;  %v1289_v35 = vsel %vm1282_vm6, %v1272_v17, %v1035_v9  ;;  %v1465_v17 = vld [vmem:[%s1947_s15 + $0x28] sm:$0xff] }
 0x1bf   : > { %1713 = vmatmul.msk.f32.gmra.mxu0 %vm1346_vm9, %v1318_v48  ;;  %v1297_v31 = vsel %vm1282_vm6, %v1280_v57, %v1051_v7  ;;  %v1460_v7 = vld [vmem:[%s1947_s15] sm:$0xff] }
 0x1c5   : > { %v1115_v2 = vpop.permute.xlu1 %1114  ;;  %v1091_v52 = vpop.permute.xlu2 %1090 }
 0x1c6   : > { %v1107_v32 = vpop.permute.xlu0 %1106  ;;  %v1314_v51 = vsel %vm1299_vm7, %v1297_v31, %v1115_v2 }
 0x1c7   : > { %v1310_v58 = vsel %vm1299_vm7, %v1293_v23, %v1107_v32 }
 0x1c8   : > { %v1327_v11 = vsel %vm1316_vm8, %v1310_v58, %v1171_v15 }
 0x1c9   : > { %1722 = vmatmul.msk.f32.gmra.mxu2 %vm1346_vm9, %v1327_v11 }
 0x1cd   : > { %v963_v38 = vpop.permute.xlu1 %962  ;;  %v1053_v37 = vpop.permute.xlu2 %1052 }
 0x1ce   : > { %v1179_v45 = vpop.permute.xlu0 %1178  ;;  %v1268_v59 = vsel %vm1265_vm5, %v2371_v10, %v963_v38 }
 0x1cf   : > { %v1331_v43 = vsel %vm1316_vm8, %v1314_v51, %v1179_v45  ;;  %v1464_v45 = vld [vmem:[%s1947_s15 + $0x20] sm:$0xff] }
 0x1d0   : > { %1726 = vmatmul.msk.f32.gmra.mxu3 %vm1346_vm9, %v1331_v43 }
 0x1d5   : > { %v1027_v36 = vpop.permute.xlu1 %1026  ;;  %v1109_v28 = vpop.permute.xlu2 %1108 }
 0x1d6   : > { %v925_v8 = vpop.permute.xlu0 %924  ;;  %v1285_v44 = vsel %vm1282_vm6, %v1268_v59, %v1027_v36 }
 0x1d7   : > { %v1302_v62 = vsel %vm1299_vm7, %v1285_v44, %v1091_v52  ;;  %v1264_v33 = vsel %vm1248_vm4, %v2357_v61, %v925_v8  ;;  %v1473_v8 = vld [vmem:[%s1947_s15 + $0x68] sm:$0xff] }
 0x1dd   : > { %v989_v13 = vpop.permute.xlu1 %988  ;;  %v1181_v63 = vpop.permute.xlu2 %1180 }
 0x1de   : > { %v981_v22 = vpop.permute.xlu0 %980  ;;  %v1281_v50 = vsel %vm1265_vm5, %v1264_v33, %v989_v13  ;;  %v1469_v13 = vld [vmem:[%s1947_s15 + $0x48] sm:$0xff] }
 0x1df   : > { %v1277_v25 = vsel %vm1265_vm5, %v2418_v26, %v981_v22  ;;  %v1298_v61 = vsel %vm1282_vm6, %v1281_v50, %v1053_v37 }
 0x1e5   : > { %v1045_v56 = vpop.permute.xlu1 %1044  ;;  %v1029_v15 = vpop.permute.xlu2 %1028 }
 0x1e6   : > { %v1099_v46 = vpop.permute.xlu0 %1098  ;;  %v1294_v53 = vsel %vm1282_vm6, %v1277_v25, %v1045_v56 }
 0x1e7   : > { %v1306_v19 = vsel %vm1299_vm7, %v1289_v35, %v1099_v46  ;;  %v1311_v39 = vsel %vm1299_vm7, %v1294_v53, %v1109_v28  ;;  %v1461_v28 = vld [vmem:[%s1947_s15 + $0x8] sm:$0xff]  ;;  %v1474_v53 = vld [vmem:[%s1947_s15 + $0x70] sm:$0xff] }
 0x1ed   : > { %v1163_v30 = vpop.permute.xlu1 %1162  ;;  %v1101_v58 = vpop.permute.xlu2 %1100 }
 0x1ee   : > { %v1155_v54 = vpop.permute.xlu0 %1154  ;;  %v1323_v21 = vsel %vm1316_vm8, %v1306_v19, %v1163_v30 }
 0x1ef   : > { %v1319_v10 = vsel %vm1316_vm8, %v1302_v62, %v1155_v54  ;;  %1718 = vmatmul.msk.f32.gmra.mxu1 %vm1346_vm9, %v1323_v21  ;;  %v1470_v21 = vld [vmem:[%s1947_s15 + $0x50] sm:$0xff] }
 0x1f0   : > { %1714 = vmatmul.msk.f32.gmra.mxu0 %vm1346_vm9, %v1319_v10 }
 0x1f2   : > { %v1436_v16 = vpop.f32.mrf.mxu2 }
 0x1f3   : > { %v1437_v4 = vadd.f32 %v2629_v6, %v1436_v16 }
 0x1f4   : > { %v1448_v18 = vpop.f32.mrf.mxu3 }
 0x1f5   : > { %v1484_v55 = vadd.f32 %v1468_v47, %v1437_v4  ;;  %v1449_v26 = vadd.f32 %v2629_v6, %v1448_v18  ;;  %v1173_v49 = vpop.permute.xlu1 %1172  ;;  %v1466_v4 = vld [vmem:[%s1947_s15 + $0x30] sm:$0xff] }
 0x1f6   : > { %v1117_v60 = vpop.permute.xlu0 %1116  ;;  %v1328_v41 = vsel %vm1316_vm8, %v1311_v39, %v1173_v49 }
 0x1f7   : > { %1500 = vst.msk [vmem:[%s1963_s20 + $0x40] sm:$0xff] %vm459_vm0, %v1484_v55  ;;  %v1488_v5 = vadd.f32 %v1472_v42, %v1449_v26  ;;  %v1315_v40 = vsel %vm1299_vm7, %v1298_v61, %v1117_v60  ;;  %1723 = vmatmul.msk.f32.gmra.mxu2 %vm1346_vm9, %v1328_v41  ;;  %v1462_v42 = vld [vmem:[%s1947_s15 + $0x10] sm:$0xff]  ;;  %v1471_v61 = vld [vmem:[%s1947_s15 + $0x58] sm:$0xff] }
 0x1f8   : > { %v1332_v12 = vsel %vm1316_vm8, %v1315_v40, %v1181_v63 }
 0x1f9   : > { %1504 = vst.msk [vmem:[%s1963_s20 + $0x60] sm:$0xff] %vm459_vm0, %v1488_v5  ;;  %1727 = vmatmul.msk.f32.gmra.mxu3 %vm1346_vm9, %v1332_v12  ;;  %v1475_v5 = vld [vmem:[%s1947_s15 + $0x78] sm:$0xff] }
 0x1fd   : > { %v973_v0 = vpop.permute.xlu1 %972 }
 0x1fe   : > { %v965_v14 = vpop.permute.xlu0 %964  ;;  %v1273_v32 = vsel %vm1265_vm5, %v2473_v34, %v973_v0 }
 0x1ff   : > { %v1269_v23 = vsel %vm1265_vm5, %v2455_v24, %v965_v14 }
 0x200   : > { %v1286_v11 = vsel %vm1282_vm6, %v1269_v23, %v1029_v15  ;;  %v1467_v15 = vld [vmem:[%s1947_s15 + $0x38] sm:$0xff] }
 0x205   : > { %v1093_v27 = vpop.permute.xlu1 %1092  ;;  %v1412_v29 = vpop.f32.mrf.mxu0 }
 0x206   : > { %v1037_v48 = vpop.permute.xlu0 %1036  ;;  %v1413_v1 = vadd.f32 %v2629_v6, %v1412_v29  ;;  %v1303_v31 = vsel %vm1299_vm7, %v1286_v11, %v1093_v27  ;;  %v1463_v29 = vld [vmem:[%s1947_s15 + $0x18] sm:$0xff] }
 0x207   : > { %v1290_v20 = vsel %vm1282_vm6, %v1273_v32, %v1037_v48 }
 0x208   : > { %v1476_v2 = vadd.f32 %v1460_v7, %v1413_v1  ;;  %v1307_v3 = vsel %vm1299_vm7, %v1290_v20, %v1101_v58 }
 0x20a   : > { %1492 = vst.msk [vmem:[%s1963_s20] sm:$0xff] %vm459_vm0, %v1476_v2 }
 0x20d   : > { %v1165_v57 = vpop.permute.xlu1 %1164 }
 0x20e   : > { %v1157_v38 = vpop.permute.xlu0 %1156  ;;  %v1324_v34 = vsel %vm1316_vm8, %v1307_v3, %v1165_v57 }
 0x20f   : > { %v1320_v24 = vsel %vm1316_vm8, %v1303_v31, %v1157_v38  ;;  %1719 = vmatmul.msk.f32.gmra.mxu1 %vm1346_vm9, %v1324_v34 }
 0x210   : > { %1715 = vmatmul.msk.f32.gmra.mxu0 %vm1346_vm9, %v1320_v24 }
 0x215   : > { %v1424_v51 = vpop.f32.mrf.mxu1 }
 0x216   : > { %v1425_v43 = vadd.f32 %v2629_v6, %v1424_v51 }
 0x218   : > { %v1480_v9 = vadd.f32 %v1464_v45, %v1425_v43 }
 0x21a   : > { %1496 = vst.msk [vmem:[%s1963_s20 + $0x20] sm:$0xff] %vm459_vm0, %v1480_v9 }
 0x222   : > { %v1451_v36 = vpop.f32.mrf.mxu3 }
 0x223   : > { %v1439_v52 = vpop.f32.mrf.mxu2  ;;  %v1452_v22 = vadd.f32 %v2629_v6, %v1451_v36 }
 0x224   : > { %v1440_v37 = vadd.f32 %v2629_v6, %v1439_v52 }
 0x225   : > { %v1489_v56 = vadd.f32 %v1473_v8, %v1452_v22 }
 0x226   : > { %v1485_v46 = vadd.f32 %v1469_v13, %v1440_v37 }
 0x227   : > { %1505 = vst.msk [vmem:[%s1963_s20 + $0x68] sm:$0xff] %vm459_vm0, %v1489_v56 }
 0x228   : > { %1501 = vst.msk [vmem:[%s1963_s20 + $0x48] sm:$0xff] %vm459_vm0, %v1485_v46 }
 0x235   : > { %v1427_v59 = vpop.f32.mrf.mxu1 }
 0x236   : > { %v1428_v44 = vadd.f32 %v2629_v6, %v1427_v59 }
 0x238   : > { %v1481_v35 = vadd.f32 %v1465_v17, %v1428_v44 }
 0x23a   : > { %1497 = vst.msk [vmem:[%s1963_s20 + $0x28] sm:$0xff] %vm459_vm0, %v1481_v35 }
 0x23c   : > { %v1415_v19 = vpop.f32.mrf.mxu0 }
 0x23d   : > { %v1416_v30 = vadd.f32 %v2629_v6, %v1415_v19 }
 0x23f   : > { %v1477_v62 = vadd.f32 %v1461_v28, %v1416_v30 }
 0x241   : > { %1493 = vst.msk [vmem:[%s1963_s20 + $0x8] sm:$0xff] %vm459_vm0, %v1477_v62 }
 0x24c   : > { %v1442_v54 = vpop.f32.mrf.mxu2 }
 0x24d   : > { %v1443_v10 = vadd.f32 %v2629_v6, %v1442_v54 }
 0x24f   : > { %v1486_v25 = vadd.f32 %v1470_v21, %v1443_v10 }
 0x251   : > { %1502 = vst.msk [vmem:[%s1963_s20 + $0x50] sm:$0xff] %vm459_vm0, %v1486_v25 }
 0x253   : > { %v1454_v33 = vpop.f32.mrf.mxu3 }
 0x254   : > { %v1455_v16 = vadd.f32 %v2629_v6, %v1454_v33 }
 0x256   : > { %v1490_v47 = vadd.f32 %v1474_v53, %v1455_v16 }
 0x258   : > { %1506 = vst.msk [vmem:[%s1963_s20 + $0x70] sm:$0xff] %vm459_vm0, %v1490_v47 }
 0x26c   : > { %v1430_v50 = vpop.f32.mrf.mxu1 }
 0x26d   : > { %v1418_v18 = vpop.f32.mrf.mxu0  ;;  %v1431_v39 = vadd.f32 %v2629_v6, %v1430_v50 }
 0x26e   : > { %v1419_v55 = vadd.f32 %v2629_v6, %v1418_v18 }
 0x26f   : > { %v1482_v26 = vadd.f32 %v1466_v4, %v1431_v39 }
 0x270   : > { %v1478_v49 = vadd.f32 %v1462_v42, %v1419_v55 }
 0x271   : > { %1498 = vst.msk [vmem:[%s1963_s20 + $0x30] sm:$0xff] %vm459_vm0, %v1482_v26 }
 0x272   : > { %1494 = vst.msk [vmem:[%s1963_s20 + $0x10] sm:$0xff] %vm459_vm0, %v1478_v49 }
 0x27a   : > { %v1445_v63 = vpop.f32.mrf.mxu2 }
 0x27b   : > { %v1446_v60 = vadd.f32 %v2629_v6, %v1445_v63 }
 0x27c   : > { %v1457_v41 = vpop.f32.mrf.mxu3 }
 0x27d   : > { %v1487_v40 = vadd.f32 %v1471_v61, %v1446_v60  ;;  %v1458_v12 = vadd.f32 %v2629_v6, %v1457_v41 }
 0x27f   : > { %1503 = vst.msk [vmem:[%s1963_s20 + $0x58] sm:$0xff] %vm459_vm0, %v1487_v40  ;;  %v1491_v0 = vadd.f32 %v1475_v5, %v1458_v12 }
 0x281   : > { %1507 = vst.msk [vmem:[%s1963_s20 + $0x78] sm:$0xff] %vm459_vm0, %v1491_v0 }
 0x28c   : > { %v1433_v14 = vpop.f32.mrf.mxu1 }
 0x28d   : > { %v1421_v27 = vpop.f32.mrf.mxu0  ;;  %v1434_v7 = vadd.f32 %v2629_v6, %v1433_v14 }
 0x28e   : > { %v1422_v48 = vadd.f32 %v2629_v6, %v1421_v27 }
 0x28f   : > { %v1483_v1 = vadd.f32 %v1467_v15, %v1434_v7 }
 0x290   : > { %v1479_v2 = vadd.f32 %v1463_v29, %v1422_v48 }
 0x291   : > { %1499 = vst.msk [vmem:[%s1963_s20 + $0x38] sm:$0xff] %vm459_vm0, %v1483_v1 }
 0x292   : > { %1495 = vst.msk [vmem:[%s1963_s20 + $0x18] sm:$0xff] %vm459_vm0, %v1479_v2 }
 0x293 PF: > { %s16_s25 = sadd.s32 1, %s1847_s25   ;;  %s2744_s21 = smov %s1839_s23 }
 0x294   : > { %p13_p12 = scmp.ge.s32.totalorder %s16_s25, 6   ;;  %s2745_s22 = smov %s1843_s24 }
 0x295   : > { %s2746_s23 = smov %s2749_s26  ;;  %s2747_s24 = smov %s2753_s27 }
 0x296   :  { %15 = sbr.rel (!%p13_p12) target bundleno = 3 (0x3), region = 94 }

// kernel: rcan_a_forward.10
= control target key start
LH: loop header
LB: loop body
LE: loop exit
PB: predicated region body
PF: predicated region fallthrough
CT: control target
= control target key end

     0   :  { %s1893_s21 = smov 0   ;;  %s1895_s22 = smov 0   ;;  %s2766_s0 = inlined_call_operand.vmem [shape: f32[2,16,16,8], index: 0, kind: input, shape index: {}, may-alias: {0,1,2}]   ;;  %s2767_s1 = inlined_call_operand.vmem [shape: f32[2,16,16,8], index: 1, kind: input, shape index: {}, may-alias: {0,1,2}]   ;;  %s2768_s2 = inlined_call_operand.vmem [shape: f32[2,16,16,8], index: 2, kind: input, shape index: {}, may-alias: {0,1,2}]   ;;  %s2769_s3 = inlined_call_operand.vmem [shape: f32[72,8], index: 3, kind: input, shape index: {}]   ;;  %s2770_s4 = inlined_call_operand.vmem [shape: f32[1,8], index: 4, kind: input, shape index: {}]   ;;  %s2771_s5 = inlined_call_operand.vmem [shape: f32[2,16,16,8], index: 5, kind: input, shape index: {}, may-alias: {5,6}]   ;;  %s2772_s6 = inlined_call_operand.vmem [shape: f32[2,16,16,8], index: 6, kind: output, shape index: {}, may-alias: {5,6}]  }
   0x1   :  { %s1897_s23 = smov 0   ;;  %s1899_s24 = smov 0  }
   0x2   :  { %s1901_s25 = smov 0  }
   0x3 LB: > { %s25_s26 = sadd.s32 1, %s1839_s23  ;;  %s28_s27 = sadd.s32 1, %s1843_s24  ;;  %s1847_s25 = sphi %s1901_s25, %s16_s25   ;;  %s1843_s24 = sphi %s1899_s24, %s2777_s24   ;;  %s1839_s23 = sphi %s1897_s23, %s2776_s23   ;;  %s1835_s22 = sphi %s1895_s22, %s2775_s22   ;;  %s1831_s21 = sphi %s1893_s21, %s2774_s21  }
   0x4   : > { %p26_p0 = scmp.ge.s32.totalorder %s25_s26, 2  ;;  %p1680_p1 = scmp.ge.s32.totalorder %s1847_s25, 1 }
   0x5   : > { %p316_p2 = scmp.lt.s32.totalorder %s1847_s25, 5 }
   0x6   : > { %s2779_s26 = smov (%p26_p0, %s25_s26), 0  ;;  %s2781_s27 = smov (!%p26_p0, %s28_s27), %s1843_s24 }
   0x7   : > { %p317_p3 = pnand %p1680_p1, %p316_p2  ;;  %p30_p4 = scmp.ge.s32.totalorder %s2781_s27, 2 }
   0x8   : > { %s1681_s28 = sshll.u32 (!%p317_p3), %s1831_s21, 3  ;;  %p393_p5 = scmp.lt.s32.totalorder (!%p317_p3), %s1835_s22, 1 }
   0x9   : > { %s2783_s27 = smov (%p30_p4, %s2781_s27), 0  ;;  %320 = sbr.rel (%p317_p3) target bundleno = 659 (0x293), region = 44 }
   0xa   : > { %p395_p6 = scmp.lt.s32.totalorder (!%p317_p3), %s1681_s28, 15  ;;  %s1686_s29 = sadd.s32 (!%p317_p3), 4294967295, %s1681_s28 }
   0xb   : > { %p405_p7 = scmp.gt.s32.totalorder (!%p317_p3), %s1686_s29, 0  ;;  %p1687_p8 = scmp.lt.s32.totalorder (!%p317_p3), %s1686_s29, 15 }
   0xc   : > { %s421_s10 = sadd.s32 (!%p317_p3), 8, %s1681_s28  ;;  %p1710_p10 = scmp.le.s32.totalorder (!%p317_p3), %s1831_s21, 0 }
   0xd   : > { %p1938_p9 = scmp.lt.s32.totalorder (!%p317_p3), %s421_s10, 15 }
   0xe   : > { %vm459_vm0 = vcmask 64512   ;;  %v1849_v0 = vmov 0.0   ;;  %s2785_s22 = smov (!%p393_p5, %s1835_s22), 1  ;;  %vm462_vm1 = vcmask 58368  }
   0xf   : > { %464 = vst.msk [vmem:[#allocation2 + $0x18] sm:$0xff] %vm459_vm0, %v1849_v0  ;;  %s396_s30 = scalar_select %p395_p6, %s1681_s28, 15 }
  0x10   : > { %460 = vst.msk [vmem:[#allocation2] sm:$0xff] %vm459_vm0, %v1849_v0  ;;  %s1930_s7 = sshll.u32 %s2785_s22, 5  ;;  %s2787_s10 = smov (!%p1938_p9, %s421_s10), 15 }
  0x11   : > { %461 = vst.msk [vmem:[#allocation2 + $0x8] sm:$0xff] %vm459_vm0, %v1849_v0  ;;  %s1682_s8 = sshll.u32 %s396_s30, 1  ;;  %s2791_s10 = smov (!%p1938_p9, %s2787_s10), 15 }
  0x12   : > { %465 = vst.msk [vmem:[#allocation2 + $0x20] sm:$0xff] %vm459_vm0, %v1849_v0  ;;  %s399_s9 = sadd.s32 %s1930_s7, %s1682_s8  ;;  %s1699_s28 = sshll.u32 %s2791_s10, 1 }
  0x13   : > { %467 = vst.msk [vmem:[#allocation2 + $0x30] sm:$0xff] %vm459_vm0, %v1849_v0  ;;  %s1936_s11 = sshll.u32 %s399_s9, 3  ;;  %s430_s30 = sadd.s32 %s1699_s28, %s1930_s7 }
  0x14   : > { %468 = vst.msk [vmem:[#allocation2 + $0x38] sm:$0xff] %vm459_vm0, %v1849_v0  ;;  %s1947_s15 = scalar_lea.vmem %s2771_s5, %s1936_s11  ;;  %s1963_s20 = scalar_lea.vmem %s2772_s6, %s1936_s11 }
  0x15   : > { %470 = vst.msk [vmem:[#allocation2 + $0x48] sm:$0xff] %vm459_vm0, %v1849_v0  ;;  %s406_s16 = scalar_select %p405_p7, %s1686_s29, 0 }
  0x16   : > { %471 = vst.msk [vmem:[#allocation2 + $0x50] sm:$0xff] %vm459_vm0, %v1849_v0  ;;  %s1701_s13 = sshll.u32 %s430_s30, 3  ;;  %s1988_s18 = scalar_lea.vmem %s2766_s0, %s1936_s11 }
  0x17   : > { %473 = vst.msk [vmem:[#allocation2 + $0x60] sm:$0xff] %vm459_vm0, %v1849_v0  ;;  %s2789_s16 = smov (!%p1687_p8, %s406_s16), 15  ;;  %v491_v1 = vld [vmem:[%s1988_s18] sm:$0xff]  ;;  %v492_v2 = vld [vmem:[%s1988_s18 + $0x8] sm:$0xff]  ;;  %v493_v3 = vld [vmem:[%s1988_s18 + $0x10] sm:$0xff] }
  0x18   : > { %474 = vst.msk [vmem:[#allocation2 + $0x68] sm:$0xff] %vm459_vm0, %v1849_v0  ;;  %s1692_s17 = sshll.u32 %s2789_s16, 1  ;;  %v494_v4 = vld [vmem:[%s1988_s18 + $0x18] sm:$0xff]  ;;  %v495_v5 = vld [vmem:[%s1988_s18 + $0x20] sm:$0xff]  ;;  %v496_v6 = vld [vmem:[%s1988_s18 + $0x28] sm:$0xff] }
  0x19   : > { %476 = vst.msk [vmem:[#allocation2 + $0x78] sm:$0xff] %vm459_vm0, %v1849_v0  ;;  %s413_s22 = sadd.s32 %s1692_s17, %s1930_s7  ;;  %s1979_s17 = scalar_lea.vmem %s2768_s2, %s1701_s13  ;;  %v497_v7 = vld [vmem:[%s1988_s18 + $0x30] sm:$0xff]  ;;  %v498_v8 = vld [vmem:[%s1988_s18 + $0x38] sm:$0xff]  ;;  %v499_v9 = vld [vmem:[%s1988_s18 + $0x40] sm:$0xff] }
  0x1a   : > { %477 = vst.msk [vmem:[#allocation2 + $0x80] sm:$0xff] %vm459_vm0, %v1849_v0  ;;  %s1694_s29 = sshll.u32 %s413_s22, 3  ;;  %v500_v10 = vld [vmem:[%s1988_s18 + $0x48] sm:$0xff]  ;;  %v501_v11 = vld [vmem:[%s1988_s18 + $0x50] sm:$0xff]  ;;  %v502_v12 = vld [vmem:[%s1988_s18 + $0x58] sm:$0xff] }
  0x1b   : > { %479 = vst.msk [vmem:[#allocation2 + $0x90] sm:$0xff] %vm459_vm0, %v1849_v0  ;;  %s1973_s12 = scalar_lea.vmem %s2767_s1, %s1694_s29  ;;  %v503_v13 = vld [vmem:[%s1988_s18 + $0x60] sm:$0xff]  ;;  %v504_v14 = vld [vmem:[%s1988_s18 + $0x68] sm:$0xff]  ;;  %v505_v15 = vld [vmem:[%s1988_s18 + $0x70] sm:$0xff] }
  0x1c   : > { %480 = vst.msk [vmem:[#allocation2 + $0x98] sm:$0xff] %vm459_vm0, %v1849_v0  ;;  %v506_v16 = vld [vmem:[%s1988_s18 + $0x78] sm:$0xff] }
  0x1d   : > { %482 = vst.msk [vmem:[#allocation2 + $0xa8] sm:$0xff] %vm459_vm0, %v1849_v0 }
  0x1e   : > { %483 = vst.msk [vmem:[#allocation2 + $0xb0] sm:$0xff] %vm459_vm0, %v1849_v0 }
  0x1f   : > { %485 = vst.msk [vmem:[#allocation2 + $0xc0] sm:$0xff] %vm459_vm0, %v1849_v0 }
  0x20   : > { %486 = vst.msk [vmem:[#allocation2 + $0xc8] sm:$0xff] %vm459_vm0, %v1849_v0 }
  0x21   : > { %488 = vst.msk [vmem:[#allocation2 + $0xd8] sm:$0xff] %vm459_vm0, %v1849_v0 }
  0x22   : > { %489 = vst.msk [vmem:[#allocation2 + $0xe0] sm:$0xff] %vm459_vm0, %v1849_v0 }
  0x23   : > { %466 = vst.msk [vmem:[#allocation2 + $0x28] sm:$0x3] %vm462_vm1, %v1849_v0 }
  0x24   : > { %463 = vst.msk [vmem:[#allocation2 + $0x10] sm:$0x3] %vm462_vm1, %v1849_v0 }
  0x25   : > { %469 = vst.msk [vmem:[#allocation2 + $0x40] sm:$0x3] %vm462_vm1, %v1849_v0 }
  0x26   : > { %472 = vst.msk [vmem:[#allocation2 + $0x58] sm:$0x3] %vm462_vm1, %v1849_v0 }
  0x27   : > { %475 = vst.msk [vmem:[#allocation2 + $0x70] sm:$0x3] %vm462_vm1, %v1849_v0 }
  0x28   : > { %478 = vst.msk [vmem:[#allocation2 + $0x88] sm:$0x3] %vm462_vm1, %v1849_v0 }
  0x29   : > { %481 = vst.msk [vmem:[#allocation2 + $0xa0] sm:$0x3] %vm462_vm1, %v1849_v0 }
  0x2a   : > { %484 = vst.msk [vmem:[#allocation2 + $0xb8] sm:$0x3] %vm462_vm1, %v1849_v0 }
  0x2b   : > { %487 = vst.msk [vmem:[#allocation2 + $0xd0] sm:$0x3] %vm462_vm1, %v1849_v0 }
  0x2c   : > { %490 = vst.msk [vmem:[#allocation2 + $0xe8] sm:$0x3] %vm462_vm1, %v1849_v0 }
  0x2d   : > { %508 = vst.msk [vmem:[#allocation2 + $0x19] sm:$0xff] %vm459_vm0, %v491_v1 }
  0x2e   : > { %509 = vst.msk [vmem:[#allocation2 + $0x21] sm:$0xff] %vm459_vm0, %v492_v2 }
  0x2f   : > { %510 = vst.msk [vmem:[#allocation2 + $0x31] sm:$0xff] %vm459_vm0, %v493_v3 }
  0x30   : > { %511 = vst.msk [vmem:[#allocation2 + $0x39] sm:$0xff] %vm459_vm0, %v494_v4 }
  0x31   : > { %512 = vst.msk [vmem:[#allocation2 + $0x49] sm:$0xff] %vm459_vm0, %v495_v5 }
  0x32   : > { %513 = vst.msk [vmem:[#allocation2 + $0x51] sm:$0xff] %vm459_vm0, %v496_v6 }
  0x33   : > { %514 = vst.msk [vmem:[#allocation2 + $0x61] sm:$0xff] %vm459_vm0, %v497_v7 }
  0x34   : > { %515 = vst.msk [vmem:[#allocation2 + $0x69] sm:$0xff] %vm459_vm0, %v498_v8 }
  0x35   : > { %516 = vst.msk [vmem:[#allocation2 + $0x79] sm:$0xff] %vm459_vm0, %v499_v9 }
  0x36   : > { %517 = vst.msk [vmem:[#allocation2 + $0x81] sm:$0xff] %vm459_vm0, %v500_v10 }
  0x37   : > { %518 = vst.msk [vmem:[#allocation2 + $0x91] sm:$0xff] %vm459_vm0, %v501_v11 }
  0x38   : > { %519 = vst.msk [vmem:[#allocation2 + $0x99] sm:$0xff] %vm459_vm0, %v502_v12  ;;  %527 = sbr.rel (%p1710_p10) target bundleno = 64 (0x40), region = 48 }
  0x39   : > { %520 = vst.msk [vmem:[#allocation2 + $0xa9] sm:$0xff] %vm459_vm0, %v503_v13 }
  0x3a   : > { %521 = vst.msk [vmem:[#allocation2 + $0xb1] sm:$0xff] %vm459_vm0, %v504_v14 }
  0x3b   : > { %522 = vst.msk [vmem:[#allocation2 + $0xc1] sm:$0xff] %vm459_vm0, %v505_v15 }
  0x3c   : > { %523 = vst.msk [vmem:[#allocation2 + $0xc9] sm:$0xff] %vm459_vm0, %v506_v16 }
  0x3d   : > { %v528_v17 = vld [vmem:[%s1973_s12] sm:$0xff]  ;;  %v529_v18 = vld [vmem:[%s1973_s12 + $0x8] sm:$0xff] }
  0x3e   : > { %530 = vst.msk [vmem:[#allocation2 + $0x1] sm:$0xff] %vm459_vm0, %v528_v17 }
  0x3f   : > { %531 = vst.msk [vmem:[#allocation2 + $0x9] sm:$0xff] %vm459_vm0, %v529_v18 }
  0x40 PF: > { %p1711_p11 = scmp.ge.s32.totalorder %s1831_s21, 1 }
  0x42   : > { %535 = sbr.rel (%p1711_p11) target bundleno = 74 (0x4a), region = 52 }
  0x47   : > { %v536_v19 = vld [vmem:[%s1979_s17] sm:$0xff]  ;;  %v537_v20 = vld [vmem:[%s1979_s17 + $0x8] sm:$0xff] }
  0x48   : > { %539 = vst.msk [vmem:[#allocation2 + $0xd9] sm:$0xff] %vm459_vm0, %v536_v19 }
  0x49   : > { %540 = vst.msk [vmem:[#allocation2 + $0xe1] sm:$0xff] %vm459_vm0, %v537_v20 }
  0x4a PF: > { %v2032_v21 = vld [vmem:[#allocation2 + $0x31] sm:$0xff]  ;;  %v2034_v22 = vld [vmem:[#allocation2 + $0x19] sm:$0xff]  ;;  %v557_v23 = vld [vmem:[#allocation2 + $0x1] sm:$0xff]  ;;  %s1850_s11 = smov 8   ;;  %s1851_s21 = smov 16   ;;  %vm1214_vm2 = vcmask 130048  }
  0x4b   : > { %710 = vrot.lane.b32.xlu2 %v2032_v21, %s1850_s11  ;;  %706 = vrot.lane.b32.xlu1 %v2034_v22, %s1850_s11  ;;  %v2041_v24 = vld [vmem:[#allocation2 + $0x39] sm:$0xff]  ;;  %v2043_v25 = vld [vmem:[#allocation2 + $0x21] sm:$0xff]  ;;  %v558_v26 = vld [vmem:[#allocation2 + $0x9] sm:$0xff]  ;;  %s1852_s19 = smov 24   ;;  %s1853_s22 = smov 32   ;;  %vm1231_vm3 = vcmask 195584  }
  0x4c   : > { %702 = vrot.lane.b32.xlu0 %v557_v23, %s1850_s11  ;;  %v2050_v27 = vld [vmem:[#allocation2 + $0x61] sm:$0xff]  ;;  %v2052_v28 = vld [vmem:[#allocation2 + $0x51] sm:$0xff]  ;;  %v2054_v29 = vld [vmem:[#allocation2 + $0x49] sm:$0xff]  ;;  %s1854_s28 = smov 40   ;;  %s1855_s29 = smov 56   ;;  %vm1248_vm4 = vcmask 261120  }
  0x4d   : > { %v2062_v30 = vld [vmem:[#allocation2 + $0x81] sm:$0xff]  ;;  %v2064_v31 = vld [vmem:[#allocation2 + $0x79] sm:$0xff]  ;;  %v2066_v32 = vld [vmem:[#allocation2 + $0x69] sm:$0xff]  ;;  %s1856_s30 = smov 48   ;;  %s1857_s8 = smov 64   ;;  %vm1265_vm5 = vcmask 326656  }
  0x4e   : > { %v2074_v33 = vld [vmem:[#allocation2 + $0xa9] sm:$0xff]  ;;  %v2076_v34 = vld [vmem:[#allocation2 + $0x99] sm:$0xff]  ;;  %v2078_v35 = vld [vmem:[#allocation2 + $0x91] sm:$0xff]  ;;  %vm1282_vm6 = vcmask 392192   ;;  %vm1299_vm7 = vcmask 457728   ;;  %vm1316_vm8 = vcmask 523264  }
  0x4f   : > { %v574_v36 = vld [vmem:[#allocation2 + $0xa] sm:$0xff]  ;;  %v573_v37 = vld [vmem:[#allocation2 + $0x2] sm:$0xff]  ;;  %v2092_v39 = vld [vmem:[#allocation2 + $0x32] sm:$0xff]  ;;  %vm1346_vm9 = vcmask 588800  }
  0x50   : > { %v2086_v38 = vld [vmem:[#allocation2 + $0xb1] sm:$0xff]  ;;  %v2094_v40 = vld [vmem:[#allocation2 + $0x22] sm:$0xff]  ;;  %v2096_v41 = vld [vmem:[#allocation2 + $0x1a] sm:$0xff] }
  0x51   : > { %v2104_v42 = vld [vmem:[#allocation2 + $0x52] sm:$0xff]  ;;  %v2106_v43 = vld [vmem:[#allocation2 + $0x4a] sm:$0xff]  ;;  %v2108_v44 = vld [vmem:[#allocation2 + $0x3a] sm:$0xff] }
  0x52   : > { %v2116_v45 = vld [vmem:[#allocation2 + $0x7a] sm:$0xff]  ;;  %v2118_v46 = vld [vmem:[#allocation2 + $0x6a] sm:$0xff]  ;;  %v2120_v47 = vld [vmem:[#allocation2 + $0x62] sm:$0xff] }
  0x53   : > { %712 = vrot.lane.b32.xlu2 %v2041_v24, %s1850_s11  ;;  %708 = vrot.lane.b32.xlu1 %v2043_v25, %s1850_s11  ;;  %v2128_v48 = vld [vmem:[#allocation2 + $0x9a] sm:$0xff]  ;;  %v2130_v49 = vld [vmem:[#allocation2 + $0x92] sm:$0xff]  ;;  %v2132_v50 = vld [vmem:[#allocation2 + $0x82] sm:$0xff] }
  0x54   : > { %704 = vrot.lane.b32.xlu0 %v558_v26, %s1850_s11  ;;  %v589_v51 = vld [vmem:[#allocation2 + $0x18] sm:$0xff]  ;;  %v2142_v53 = vld [vmem:[#allocation2 + $0xaa] sm:$0xff]  ;;  %v590_v56 = vld [vmem:[#allocation2 + $0x20] sm:$0xff] }
  0x55   : > { %v2140_v52 = vld [vmem:[#allocation2 + $0xb2] sm:$0xff]  ;;  %v2158_v58 = vld [vmem:[#allocation2 + $0x60] sm:$0xff]  ;;  %v2162_v60 = vld [vmem:[#allocation2 + $0x48] sm:$0xff] }
  0x56   : > { %v2149_v54 = vld [vmem:[#allocation2 + $0x38] sm:$0xff]  ;;  %v2151_v55 = vld [vmem:[#allocation2 + $0x30] sm:$0xff]  ;;  %v2172_v62 = vld [vmem:[#allocation2 + $0x80] sm:$0xff] }
  0x57   : > { %v2160_v59 = vld [vmem:[#allocation2 + $0x50] sm:$0xff]  ;;  %v2174_v63 = vld [vmem:[#allocation2 + $0x78] sm:$0xff]  ;;  %v2176_v0 = vld [vmem:[#allocation2 + $0x68] sm:$0xff] }
  0x58   : > { %v2186_v2 = vld [vmem:[#allocation2 + $0xa8] sm:$0xff]  ;;  %v2188_v3 = vld [vmem:[#allocation2 + $0x98] sm:$0xff]  ;;  %v2190_v4 = vld [vmem:[#allocation2 + $0x90] sm:$0xff] }
  0x59   : > { %v2201_v9 = vld [vmem:[#allocation2 + $0xc8] sm:$0xff]  ;;  %v603_v10 = vld [vmem:[#allocation2 + $0xc0] sm:$0xff]  ;;  %v2203_v11 = vld [vmem:[#allocation2 + $0xb0] sm:$0xff] }
  0x5a   : > { %v542_v16 = vld [vmem:[#allocation2 + $0x8] sm:$0xff] }
  0x5b   : > { %718 = vrot.lane.b32.xlu2 %v2050_v27, %s1850_s11  ;;  %716 = vrot.lane.b32.xlu1 %v2052_v28, %s1850_s11 }
  0x5c   : > { %714 = vrot.lane.b32.xlu0 %v2054_v29, %s1850_s11 }
  0x63   : > { %724 = vrot.lane.b32.xlu2 %v2062_v30, %s1850_s11  ;;  %722 = vrot.lane.b32.xlu1 %v2064_v31, %s1850_s11 }
  0x64   : > { %720 = vrot.lane.b32.xlu0 %v2066_v32, %s1850_s11 }
  0x6b   : > { %730 = vrot.lane.b32.xlu2 %v2074_v33, %s1850_s11  ;;  %728 = vrot.lane.b32.xlu1 %v2076_v34, %s1850_s11 }
  0x6c   : > { %726 = vrot.lane.b32.xlu0 %v2078_v35, %s1850_s11 }
  0x73   : > { %768 = vrot.lane.b32.xlu2 %v574_v36, %s1851_s21  ;;  %766 = vrot.lane.b32.xlu1 %v573_v37, %s1851_s21 }
  0x74   : > { %732 = vrot.lane.b32.xlu0 %v2086_v38, %s1850_s11 }
  0x7b   : > { %774 = vrot.lane.b32.xlu2 %v2092_v39, %s1851_s21  ;;  %772 = vrot.lane.b32.xlu1 %v2094_v40, %s1851_s21 }
  0x7c   : > { %770 = vrot.lane.b32.xlu0 %v2096_v41, %s1851_s21 }
  0x83   : > { %780 = vrot.lane.b32.xlu2 %v2104_v42, %s1851_s21  ;;  %778 = vrot.lane.b32.xlu1 %v2106_v43, %s1851_s21 }
  0x84   : > { %776 = vrot.lane.b32.xlu0 %v2108_v44, %s1851_s21 }
  0x8b   : > { %786 = vrot.lane.b32.xlu2 %v2116_v45, %s1851_s21  ;;  %784 = vrot.lane.b32.xlu1 %v2118_v46, %s1851_s21 }
  0x8c   : > { %782 = vrot.lane.b32.xlu0 %v2120_v47, %s1851_s21 }
  0x93   : > { %792 = vrot.lane.b32.xlu2 %v2128_v48, %s1851_s21  ;;  %790 = vrot.lane.b32.xlu1 %v2130_v49, %s1851_s21 }
  0x94   : > { %788 = vrot.lane.b32.xlu0 %v2132_v50, %s1851_s21 }
  0x9b   : > { %830 = vrot.lane.b32.xlu2 %v589_v51, %s1852_s19  ;;  %796 = vrot.lane.b32.xlu1 %v2140_v52, %s1851_s21 }
  0x9c   : > { %794 = vrot.lane.b32.xlu0 %v2142_v53, %s1851_s21 }
  0xa3   : > { %836 = vrot.lane.b32.xlu2 %v2149_v54, %s1852_s19  ;;  %834 = vrot.lane.b32.xlu1 %v2151_v55, %s1852_s19 }
  0xa4   : > { %832 = vrot.lane.b32.xlu0 %v590_v56, %s1852_s19 }
  0xa5   : > { %v711_v57 = vpop.permute.xlu2 %710 }
  0xab   : > { %842 = vrot.lane.b32.xlu2 %v2158_v58, %s1852_s19  ;;  %840 = vrot.lane.b32.xlu1 %v2160_v59, %s1852_s19 }
  0xac   : > { %838 = vrot.lane.b32.xlu0 %v2162_v60, %s1852_s19 }
  0xad   : > { %v2170_v61 = vpop.permute.xlu2 %712 }
  0xb3   : > { %848 = vrot.lane.b32.xlu2 %v2172_v62, %s1852_s19  ;;  %846 = vrot.lane.b32.xlu1 %v2174_v63, %s1852_s19 }
  0xb4   : > { %844 = vrot.lane.b32.xlu0 %v2176_v0, %s1852_s19 }
  0xb5   : > { %v2184_v1 = vpop.permute.xlu2 %718 }
  0xbb   : > { %854 = vrot.lane.b32.xlu2 %v2186_v2, %s1852_s19  ;;  %852 = vrot.lane.b32.xlu1 %v2188_v3, %s1852_s19 }
  0xbc   : > { %850 = vrot.lane.b32.xlu0 %v2190_v4, %s1852_s19 }
  0xbd   : > { %v2198_v5 = vpop.permute.xlu2 %724  ;;  %v707_v6 = vpop.permute.xlu1 %706 }
  0xbe   : > { %v1200_v7 = vsel %vm459_vm0, %v589_v51, %v707_v6  ;;  %v703_v8 = vpop.permute.xlu0 %702 }
  0xc3   : > { %860 = vrot.lane.b32.xlu2 %v2201_v9, %s1852_s19  ;;  %858 = vrot.lane.b32.xlu1 %v603_v10, %s1852_s19 }
  0xc4   : > { %856 = vrot.lane.b32.xlu0 %v2203_v11, %s1852_s19 }
  0xc5   : > { %v2210_v12 = vpop.permute.xlu2 %730  ;;  %v709_v13 = vpop.permute.xlu1 %708 }
  0xc6   : > { %v1201_v14 = vsel %vm459_vm0, %v590_v56, %v709_v13  ;;  %v705_v15 = vpop.permute.xlu0 %704 }
  0xc7   : > { %v1199_v17 = vsel %vm459_vm0, %v542_v16, %v705_v15  ;;  %v541_v16 = vld [vmem:[#allocation2] sm:$0xff] }
  0xcb   : > { %898 = vrot.lane.b32.xlu2 %v2032_v21, %s1853_s22  ;;  %896 = vrot.lane.b32.xlu1 %v2043_v25, %s1853_s22 }
  0xcc   : > { %894 = vrot.lane.b32.xlu0 %v2034_v22, %s1853_s22  ;;  %v1202_v22 = vsel %vm459_vm0, %v2151_v55, %v711_v57 }
  0xcd   : > { %v769_v18 = vpop.permute.xlu2 %768  ;;  %v717_v19 = vpop.permute.xlu1 %716 }
  0xce   : > { %v2221_v20 = vsel %vm1214_vm2, %v1199_v17, %v769_v18  ;;  %v715_v23 = vpop.permute.xlu0 %714  ;;  %v1205_v51 = vsel %vm459_vm0, %v2160_v59, %v717_v19  ;;  %v1198_v17 = vsel %vm459_vm0, %v541_v16, %v703_v8 }
  0xd3   : > { %904 = vrot.lane.b32.xlu2 %v2052_v28, %s1853_s22  ;;  %902 = vrot.lane.b32.xlu1 %v2054_v29, %s1853_s22 }
  0xd4   : > { %900 = vrot.lane.b32.xlu0 %v2041_v24, %s1853_s22 }
  0xd5   : > { %v775_v25 = vpop.permute.xlu2 %774  ;;  %v723_v26 = vpop.permute.xlu1 %722 }
  0xd6   : > { %v2232_v36 = vsel %vm1214_vm2, %v1202_v22, %v775_v25  ;;  %v721_v37 = vpop.permute.xlu0 %720  ;;  %v1208_v18 = vsel %vm459_vm0, %v2174_v63, %v723_v26 }
  0xdb   : > { %910 = vrot.lane.b32.xlu2 %v2064_v31, %s1853_s22  ;;  %908 = vrot.lane.b32.xlu1 %v2066_v32, %s1853_s22 }
  0xdc   : > { %906 = vrot.lane.b32.xlu0 %v2050_v27, %s1853_s22 }
  0xdd   : > { %v781_v56 = vpop.permute.xlu2 %780  ;;  %v729_v57 = vpop.permute.xlu1 %728 }
  0xde   : > { %v2243_v6 = vsel %vm1214_vm2, %v1205_v51, %v781_v56  ;;  %v727_v13 = vpop.permute.xlu0 %726  ;;  %v1211_v8 = vsel %vm459_vm0, %v2188_v3, %v729_v57  ;;  %v1204_v57 = vsel %vm459_vm0, %v2162_v60, %v715_v23 }
  0xdf   : > { %v1210_v15 = vsel %vm459_vm0, %v2190_v4, %v727_v13 }
  0xe3   : > { %916 = vrot.lane.b32.xlu2 %v2076_v34, %s1853_s22  ;;  %914 = vrot.lane.b32.xlu1 %v2078_v35, %s1853_s22 }
  0xe4   : > { %912 = vrot.lane.b32.xlu0 %v2062_v30, %s1853_s22 }
  0xe5   : > { %v787_v19 = vpop.permute.xlu2 %786  ;;  %v767_v22 = vpop.permute.xlu1 %766 }
  0xe6   : > { %v2257_v25 = vsel %vm1214_vm2, %v1208_v18, %v787_v19  ;;  %v1215_v51 = vsel %vm1214_vm2, %v1198_v17, %v767_v22  ;;  %v733_v56 = vpop.permute.xlu0 %732 }
  0xeb   : > { %982 = vrot.lane.b32.xlu2 %v2142_v53, %s1854_s28  ;;  %974 = vrot.lane.b32.xlu1 %v2116_v45, %s1854_s28 }
  0xec   : > { %918 = vrot.lane.b32.xlu0 %v2074_v33, %s1853_s22 }
  0xed   : > { %v793_v26 = vpop.permute.xlu2 %792  ;;  %v773_v13 = vpop.permute.xlu1 %772 }
  0xee   : > { %v2269_v16 = vsel %vm1214_vm2, %v1211_v8, %v793_v26  ;;  %v1218_v17 = vsel %vm1214_vm2, %v1201_v14, %v773_v13  ;;  %v771_v18 = vpop.permute.xlu0 %770  ;;  %v2288_v13 = vld [vmem:[#allocation2 + $0xc2] sm:$0xff] }
  0xef   : > { %v1217_v19 = vsel %vm1214_vm2, %v1200_v7, %v771_v18  ;;  %v1203_v7 = vsel %vm459_vm0, %v2149_v54, %v2170_v61  ;;  %v1207_v61 = vsel %vm459_vm0, %v2176_v0, %v721_v37  ;;  %v1206_v18 = vsel %vm459_vm0, %v2158_v58, %v2184_v1 }
  0xf0   : > { %v1209_v1 = vsel %vm459_vm0, %v2172_v62, %v2198_v5 }
  0xf3   : > { %1102 = vrot.lane.b32.xlu2 %v2078_v35, %s1855_s29  ;;  %1046 = vrot.lane.b32.xlu1 %v603_v10, %s1856_s30 }
  0xf4   : > { %1038 = vrot.lane.b32.xlu0 %v2190_v4, %s1856_s30  ;;  %v2290_v4 = vld [vmem:[#allocation2 + $0xc1] sm:$0xff] }
  0xf5   : > { %v831_v22 = vpop.permute.xlu2 %830  ;;  %v779_v8 = vpop.permute.xlu1 %778 }
  0xf6   : > { %v2284_v14 = vsel %vm1231_vm3, %v1215_v51, %v831_v22  ;;  %v1221_v35 = vsel %vm1214_vm2, %v1204_v57, %v779_v8  ;;  %v777_v26 = vpop.permute.xlu0 %776 }
  0xf7   : > { %v1220_v10 = vsel %vm1214_vm2, %v1203_v7, %v777_v26 }
  0xfb   : > { %1174 = vrot.lane.b32.xlu2 %v2288_v13, %s1857_s8  ;;  %1166 = vrot.lane.b32.xlu1 %v2130_v49, %s1857_s8 }
  0xfc   : > { %1110 = vrot.lane.b32.xlu0 %v2290_v4, %s1855_s29 }
  0xfd   : > { %v837_v23 = vpop.permute.xlu2 %836  ;;  %v785_v51 = vpop.permute.xlu1 %784 }
  0xfe   : > { %v2304_v57 = vsel %vm1231_vm3, %v1218_v17, %v837_v23  ;;  %v1224_v22 = vsel %vm1214_vm2, %v1207_v61, %v785_v51  ;;  %v783_v8 = vpop.permute.xlu0 %782 }
  0xff   : > { %v1223_v7 = vsel %vm1214_vm2, %v1206_v18, %v783_v8 }
 0x103   : > { %920 = vrot.lane.b32.xlu2 %v2086_v38, %s1853_s22  ;;  %966 = vrot.lane.b32.xlu1 %v2106_v43, %s1854_s28 }
 0x104   : > { %958 = vrot.lane.b32.xlu0 %v2096_v41, %s1854_s28  ;;  %v1213_v41 = vsel %vm459_vm0, %v2203_v11, %v733_v56 }
 0x105   : > { %v843_v37 = vpop.permute.xlu2 %842  ;;  %v791_v26 = vpop.permute.xlu1 %790 }
 0x106   : > { %v2318_v17 = vsel %vm1231_vm3, %v1221_v35, %v843_v37  ;;  %v1227_v61 = vsel %vm1214_vm2, %v1210_v15, %v791_v26  ;;  %v789_v23 = vpop.permute.xlu0 %788  ;;  %v1212_v15 = vsel %vm459_vm0, %v2186_v2, %v2210_v12 }
 0x107   : > { %v1226_v51 = vsel %vm1214_vm2, %v1209_v1, %v789_v23 }
 0x10b   : > { %976 = vrot.lane.b32.xlu2 %v2132_v50, %s1854_s28  ;;  %1030 = vrot.lane.b32.xlu1 %v2158_v58, %s1856_s30 }
 0x10c   : > { %1022 = vrot.lane.b32.xlu0 %v2151_v55, %s1856_s30 }
 0x10d   : > { %v849_v5 = vpop.permute.xlu2 %848  ;;  %v797_v35 = vpop.permute.xlu1 %796 }
 0x10e   : > { %v2334_v18 = vsel %vm1231_vm3, %v1224_v22, %v849_v5  ;;  %v1230_v8 = vsel %vm1214_vm2, %v1213_v41, %v797_v35  ;;  %v795_v37 = vpop.permute.xlu0 %794  ;;  %v2362_v41 = vld [vmem:[#allocation2 + $0xc9] sm:$0xff] }
 0x10f   : > { %v1229_v58 = vsel %vm1214_vm2, %v1212_v15, %v795_v37  ;;  %v2380_v15 = vld [vmem:[#allocation2 + $0xca] sm:$0xff] }
 0x113   : > { %1094 = vrot.lane.b32.xlu2 %v2050_v27, %s1855_s29  ;;  %1086 = vrot.lane.b32.xlu1 %v2032_v21, %s1855_s29 }
 0x114   : > { %984 = vrot.lane.b32.xlu0 %v2140_v52, %s1854_s28 }
 0x115   : > { %v855_v55 = vpop.permute.xlu2 %854  ;;  %v835_v56 = vpop.permute.xlu1 %834 }
 0x116   : > { %v2345_v12 = vsel %vm1231_vm3, %v1227_v61, %v855_v55  ;;  %v1234_v22 = vsel %vm1231_vm3, %v1217_v19, %v835_v56  ;;  %v833_v26 = vpop.permute.xlu0 %832 }
 0x117   : > { %v1233_v1 = vsel %vm1231_vm3, %v2221_v20, %v833_v26 }
 0x11b   : > { %1150 = vrot.lane.b32.xlu2 %v2092_v39, %s1857_s8  ;;  %1048 = vrot.lane.b32.xlu1 %v2201_v9, %s1856_s30 }
 0x11c   : > { %1040 = vrot.lane.b32.xlu0 %v2188_v3, %s1856_s30 }
 0x11d   : > { %v861_v21 = vpop.permute.xlu2 %860  ;;  %v841_v27 = vpop.permute.xlu1 %840 }
 0x11e   : > { %v2357_v61 = vsel %vm1231_vm3, %v1230_v8, %v861_v21  ;;  %v1237_v19 = vsel %vm1231_vm3, %v1220_v10, %v841_v27  ;;  %v839_v23 = vpop.permute.xlu0 %838 }
 0x11f   : > { %v1236_v20 = vsel %vm1231_vm3, %v2232_v36, %v839_v23  ;;  %v1336_v23 = vld [vmem:[%s2769_s3 + $0x18] sm:$0xff] }
 0x123   : > { %1112 = vrot.lane.b32.xlu2 %v2362_v41, %s1855_s29  ;;  %1104 = vrot.lane.b32.xlu1 %v2076_v34, %s1855_s29 }
 0x124   : > { %1158 = vrot.lane.b32.xlu0 %v2120_v47, %s1857_s8 }
 0x125   : > { %v899_v3 = vpop.permute.xlu2 %898  ;;  %v847_v9 = vpop.permute.xlu1 %846 }
 0x126   : > { %v2371_v10 = vsel %vm1248_vm4, %v1234_v22, %v899_v3  ;;  %v2374_v5 = vsel %vm1231_vm3, %v1223_v7, %v847_v9  ;;  %v845_v36 = vpop.permute.xlu0 %844  ;;  %v1335_v3 = vld [vmem:[%s2769_s3 + $0x10] sm:$0xff] }
 0x127   : > { %v2378_v35 = vsel %vm1231_vm3, %v2243_v6, %v845_v36 }
 0x12b   : > { %960 = vrot.lane.b32.xlu2 %v2094_v40, %s1854_s28  ;;  %1176 = vrot.lane.b32.xlu1 %v2380_v15, %s1857_s8 }
 0x12c   : > { %1168 = vrot.lane.b32.xlu0 %v2128_v48, %s1857_s8 }
 0x12d   : > { %v905_v34 = vpop.permute.xlu2 %904  ;;  %v853_v8 = vpop.permute.xlu1 %852 }
 0x12e   : > { %v2389_v7 = vsel %vm1248_vm4, %v1237_v19, %v905_v34  ;;  %v1243_v37 = vsel %vm1231_vm3, %v1226_v51, %v853_v8  ;;  %v851_v6 = vpop.permute.xlu0 %850 }
 0x12f   : > { %v2394_v55 = vsel %vm1231_vm3, %v2257_v25, %v851_v6 }
 0x133   : > { %1024 = vrot.lane.b32.xlu2 %v2149_v54, %s1856_s30  ;;  %922 = vrot.lane.b32.xlu1 %v2290_v4, %s1853_s22 }
 0x134   : > { %968 = vrot.lane.b32.xlu0 %v2104_v42, %s1854_s28 }
 0x135   : > { %v2402_v40 = vpop.permute.xlu2 %910  ;;  %v859_v56 = vpop.permute.xlu1 %858 }
 0x136   : > { %v2405_v22 = vsel %vm1231_vm3, %v1229_v58, %v859_v56  ;;  %v857_v51 = vpop.permute.xlu0 %856  ;;  %v668_v56 = vld [vmem:[#allocation2 + $0xd9] sm:$0xff] }
 0x137   : > { %v2409_v25 = vsel %vm1231_vm3, %v2269_v16, %v857_v51  ;;  %v1341_v16 = vld [vmem:[%s2769_s3 + $0x40] sm:$0xff] }
 0x138   : > { %1733 = vmatpush.msra.mxu2 %v1341_v16  ;;  %1734 = vmatpush.msra.mxu3 %v1341_v16 }
 0x139   : > { %1402 = vmatpush.msra.mxu0 %v1341_v16  ;;  %1732 = vmatpush.msra.mxu1 %v1341_v16 }
 0x13b   : > { %986 = vrot.lane.b32.xlu2 %v2288_v13, %s1854_s28  ;;  %978 = vrot.lane.b32.xlu1 %v2130_v49, %s1854_s28  ;;  %v1340_v49 = vld [vmem:[%s2769_s3 + $0x38] sm:$0xff] }
 0x13c   : > { %1032 = vrot.lane.b32.xlu0 %v2176_v0, %s1856_s30  ;;  %1736 = vmatpush.msra.mxu2 %v1340_v49  ;;  %v1339_v0 = vld [vmem:[%s2769_s3 + $0x30] sm:$0xff] }
 0x13d   : > { %v917_v54 = vpop.permute.xlu2 %916  ;;  %v897_v4 = vpop.permute.xlu1 %896  ;;  %1737 = vmatpush.msra.mxu3 %v1340_v49  ;;  %1403 = vmatpush.msra.mxu0 %v1340_v49 }
 0x13e   : > { %v2418_v26 = vsel %vm1248_vm4, %v1243_v37, %v917_v54  ;;  %v2421_v58 = vsel %vm1248_vm4, %v1233_v1, %v897_v4  ;;  %v895_v21 = vpop.permute.xlu0 %894  ;;  %1735 = vmatpush.msra.mxu1 %v1340_v49  ;;  %1739 = vmatpush.msra.mxu2 %v1339_v0  ;;  %v1333_v37 = vld [vmem:[%s2769_s3] sm:$0xff] }
 0x13f   : > { %v2428_v13 = vsel %vm1248_vm4, %v2284_v14, %v895_v21  ;;  %v1338_v14 = vld [vmem:[%s2769_s3 + $0x28] sm:$0xff]  ;;  %1740 = vmatpush.msra.mxu3 %v1339_v0  ;;  %1404 = vmatpush.msra.mxu0 %v1339_v0  ;;  %v684_v21 = vld [vmem:[#allocation2 + $0xda] sm:$0xff] }
 0x140   : > { %1742 = vmatpush.msra.mxu2 %v1338_v14  ;;  %1738 = vmatpush.msra.mxu1 %v1339_v0 }
 0x141   : > { %1743 = vmatpush.msra.mxu3 %v1338_v14  ;;  %1405 = vmatpush.msra.mxu0 %v1338_v14 }
 0x142   : > { %1741 = vmatpush.msra.mxu1 %v1338_v14 }
 0x143   : > { %1042 = vrot.lane.b32.xlu2 %v2186_v2, %s1856_s30  ;;  %1096 = vrot.lane.b32.xlu1 %v2066_v32, %s1855_s29  ;;  %v1337_v32 = vld [vmem:[%s2769_s3 + $0x20] sm:$0xff] }
 0x144   : > { %1088 = vrot.lane.b32.xlu0 %v2041_v24, %s1855_s29  ;;  %1745 = vmatpush.msra.mxu2 %v1337_v32 }
 0x145   : > { %v2445_v1 = vpop.permute.xlu2 %982  ;;  %v903_v27 = vpop.permute.xlu1 %902  ;;  %1746 = vmatpush.msra.mxu3 %v1337_v32  ;;  %1406 = vmatpush.msra.mxu0 %v1337_v32 }
 0x146   : > { %v2448_v19 = vsel %vm1248_vm4, %v1236_v20, %v903_v27  ;;  %v901_v2 = vpop.permute.xlu0 %900  ;;  %v652_v20 = vld [vmem:[#allocation2 + $0xd8] sm:$0xff]  ;;  %1748 = vmatpush.msra.mxu2 %v1336_v23  ;;  %1744 = vmatpush.msra.mxu1 %v1337_v32 }
 0x147   : > { %v2455_v24 = vsel %vm1248_vm4, %v2304_v57, %v901_v2  ;;  %1749 = vmatpush.msra.mxu3 %v1336_v23  ;;  %v1334_v57 = vld [vmem:[%s2769_s3 + $0x8] sm:$0xff]  ;;  %1407 = vmatpush.msra.mxu0 %v1336_v23 }
 0x148   : > { %1751 = vmatpush.msra.mxu2 %v1335_v3  ;;  %1747 = vmatpush.msra.mxu1 %v1336_v23 }
 0x149   : > { %1752 = vmatpush.msra.mxu3 %v1335_v3  ;;  %1408 = vmatpush.msra.mxu0 %v1335_v3 }
 0x14a   : > { %1754 = vmatpush.msra.mxu2 %v1334_v57  ;;  %1750 = vmatpush.msra.mxu1 %v1335_v3 }
 0x14b   : > { %1160 = vrot.lane.b32.xlu2 %v2118_v46, %s1857_s8  ;;  %1152 = vrot.lane.b32.xlu1 %v2108_v44, %s1857_s8 }
 0x14c   : > { %1050 = vrot.lane.b32.xlu0 %v652_v20, %s1856_s30  ;;  %1755 = vmatpush.msra.mxu3 %v1334_v57 }
 0x14d   : > { %v1103_v9 = vpop.permute.xlu2 %1102  ;;  %v909_v36 = vpop.permute.xlu1 %908  ;;  %1757 = vmatpush.msra.mxu2 %v1333_v37  ;;  %1409 = vmatpush.msra.mxu0 %v1334_v57 }
 0x14e   : > { %v2473_v34 = vsel %vm1248_vm4, %v2378_v35, %v909_v36  ;;  %v907_v8 = vpop.permute.xlu0 %906  ;;  %1758 = vmatpush.msra.mxu3 %v1333_v37  ;;  %1753 = vmatpush.msra.mxu1 %v1334_v57  ;;  %v669_v57 = vld [vmem:[#allocation2 + $0xe1] sm:$0xff] }
 0x14f   : > { %v2480_v6 = vsel %vm1248_vm4, %v2318_v17, %v907_v8  ;;  %1410 = vmatpush.msra.mxu0 %v1333_v37 }
 0x150   : > { %1756 = vmatpush.msra.mxu1 %v1333_v37 }
 0x153   : > { %1170 = vrot.lane.b32.xlu2 %v2142_v53, %s1857_s8  ;;  %1114 = vrot.lane.b32.xlu1 %v668_v56, %s1855_s29 }
 0x154   : > { %1106 = vrot.lane.b32.xlu0 %v2074_v33, %s1855_s29 }
 0x155   : > { %v1175_v17 = vpop.permute.xlu2 %1174  ;;  %v915_v35 = vpop.permute.xlu1 %914 }
 0x156   : > { %v2489_v51 = vsel %vm1248_vm4, %v2394_v55, %v915_v35  ;;  %v913_v54 = vpop.permute.xlu0 %912  ;;  %v1257_v55 = vsel %vm1248_vm4, %v2374_v5, %v2402_v40 }
 0x157   : > { %v2493_v4 = vsel %vm1248_vm4, %v2334_v18, %v913_v54 }
 0x15b   : > { %970 = vrot.lane.b32.xlu2 %v2120_v47, %s1854_s28  ;;  %962 = vrot.lane.b32.xlu1 %v2092_v39, %s1854_s28 }
 0x15c   : > { %1178 = vrot.lane.b32.xlu0 %v684_v21, %s1857_s8 }
 0x15d   : > { %v2500_v33 = vpop.permute.xlu2 %920  ;;  %v975_v53 = vpop.permute.xlu1 %974 }
 0x15e   : > { %v919_v16 = vpop.permute.xlu0 %918  ;;  %v1274_v49 = vsel %vm1265_vm5, %v1257_v55, %v975_v53 }
 0x163   : > { %1034 = vrot.lane.b32.xlu2 %v2174_v63, %s1856_s30  ;;  %1026 = vrot.lane.b32.xlu1 %v2162_v60, %s1856_s30  ;;  %v1261_v63 = vsel %vm1248_vm4, %v2345_v12, %v919_v16 }
 0x164   : > { %924 = vrot.lane.b32.xlu0 %v2362_v41, %s1853_s22  ;;  %v1278_v41 = vsel %vm1265_vm5, %v1261_v63, %v2445_v1 }
 0x165   : > { %v2508_v18 = vpop.permute.xlu2 %976  ;;  %v1047_v47 = vpop.permute.xlu1 %1046 }
 0x166   : > { %v1039_v39 = vpop.permute.xlu0 %1038  ;;  %v1295_v0 = vsel %vm1282_vm6, %v1278_v41, %v1047_v47 }
 0x167   : > { %v1291_v60 = vsel %vm1282_vm6, %v1274_v49, %v1039_v39 }
 0x168   : > { %v1308_v12 = vsel %vm1299_vm7, %v1291_v60, %v1103_v9 }
 0x16b   : > { %988 = vrot.lane.b32.xlu1 %v2380_v15, %s1854_s28  ;;  %1090 = vrot.lane.b32.xlu2 %v2054_v29, %s1855_s29 }
 0x16c   : > { %980 = vrot.lane.b32.xlu0 %v2128_v48, %s1854_s28  ;;  %v653_v48 = vld [vmem:[#allocation2 + $0xe0] sm:$0xff] }
 0x16d   : > { %v1095_v5 = vpop.permute.xlu2 %1094  ;;  %v1167_v40 = vpop.permute.xlu1 %1166 }
 0x16e   : > { %v1111_v14 = vpop.permute.xlu0 %1110  ;;  %v1325_v15 = vsel %vm1316_vm8, %v1308_v12, %v1167_v40 }
 0x16f   : > { %v1312_v27 = vsel %vm1299_vm7, %v1295_v0, %v1111_v14  ;;  %1720 = vmatmul.msk.f32.vlgmr.msra.gmra.mxu2 %vm1346_vm9, %v1325_v15 }
 0x170   : > { %v1329_v29 = vsel %vm1316_vm8, %v1312_v27, %v1175_v17 }
 0x171   : > { %1724 = vmatmul.msk.f32.vlgmr.msra.gmra.mxu3 %vm1346_vm9, %v1329_v29 }
 0x173   : > { %1044 = vrot.lane.b32.xlu1 %v2203_v11, %s1856_s30  ;;  %1052 = vrot.lane.b32.xlu2 %v653_v48, %s1856_s30  ;;  %v685_v11 = vld [vmem:[#allocation2 + $0xe2] sm:$0xff] }
 0x174   : > { %1098 = vrot.lane.b32.xlu0 %v2064_v31, %s1855_s29 }
 0x175   : > { %v967_v1 = vpop.permute.xlu1 %966  ;;  %v1151_v32 = vpop.permute.xlu2 %1150 }
 0x176   : > { %v959_v2 = vpop.permute.xlu0 %958  ;;  %v1270_v37 = vsel %vm1265_vm5, %v2448_v19, %v967_v1  ;;  %v1262_v19 = vsel %vm1248_vm4, %v2409_v25, %v2500_v33 }
 0x177   : > { %v1266_v31 = vsel %vm1265_vm5, %v2428_v13, %v959_v2 }
 0x17b   : > { %1162 = vrot.lane.b32.xlu1 %v2116_v45, %s1857_s8  ;;  %1108 = vrot.lane.b32.xlu2 %v2086_v38, %s1855_s29 }
 0x17c   : > { %1154 = vrot.lane.b32.xlu0 %v2106_v43, %s1857_s8 }
 0x17d   : > { %v1031_v23 = vpop.permute.xlu1 %1030  ;;  %v1113_v3 = vpop.permute.xlu2 %1112 }
 0x17e   : > { %v1023_v20 = vpop.permute.xlu0 %1022  ;;  %v1287_v56 = vsel %vm1282_vm6, %v1270_v37, %v1031_v23 }
 0x17f   : > { %v1283_v38 = vsel %vm1282_vm6, %v1266_v31, %v1023_v20 }
 0x183   : > { %1172 = vrot.lane.b32.xlu1 %v2140_v52, %s1857_s8  ;;  %1180 = vrot.lane.b32.xlu2 %v685_v11, %s1857_s8 }
 0x184   : > { %1116 = vrot.lane.b32.xlu0 %v669_v57, %s1855_s29 }
 0x185   : > { %v1087_v45 = vpop.permute.xlu1 %1086  ;;  %v961_v8 = vpop.permute.xlu2 %960 }
 0x186   : > { %v1300_v43 = vsel %vm1299_vm7, %v1283_v38, %v1087_v45  ;;  %v985_v9 = vpop.permute.xlu0 %984  ;;  %v1267_v0 = vsel %vm1265_vm5, %v2421_v58, %v961_v8 }
 0x187   : > { %v1317_v36 = vsel %vm1316_vm8, %v1300_v43, %v1151_v32 }
 0x188   : > { %1712 = vmatmul.msk.f32.vlgmr.msra.gmra.mxu0 %vm1346_vm9, %v1317_v36 }
 0x18b   : > { %972 = vrot.lane.b32.xlu1 %v2118_v46, %s1854_s28  ;;  %1028 = vrot.lane.b32.xlu2 %v2160_v59, %s1856_s30 }
 0x18c   : > { %964 = vrot.lane.b32.xlu0 %v2108_v44, %s1854_s28  ;;  %v1304_v44 = vsel %vm1299_vm7, %v1287_v56, %v1095_v5 }
 0x18d   : > { %v1049_v52 = vpop.permute.xlu1 %1048  ;;  %v1025_v46 = vpop.permute.xlu2 %1024 }
 0x18e   : > { %v1041_v13 = vpop.permute.xlu0 %1040  ;;  %v1284_v14 = vsel %vm1282_vm6, %v1267_v0, %v1025_v46  ;;  %v2667_v0 = vld [vmem:[%s1947_s15 + $0x78] sm:$0xff] }
 0x193   : > { %1092 = vrot.lane.b32.xlu1 %v2052_v28, %s1855_s29  ;;  %1100 = vrot.lane.b32.xlu2 %v2062_v30, %s1855_s29  ;;  %v1279_v28 = vsel %vm1265_vm5, %v1262_v19, %v985_v9 }
 0x194   : > { %1036 = vrot.lane.b32.xlu0 %v2172_v62, %s1856_s30  ;;  %v1296_v30 = vsel %vm1282_vm6, %v1279_v28, %v1049_v52  ;;  %v1275_v62 = vsel %vm1265_vm5, %v2493_v4, %v2508_v18 }
 0x195   : > { %v1105_v59 = vpop.permute.xlu1 %1104  ;;  %v1292_v54 = vsel %vm1282_vm6, %v1275_v62, %v1041_v13  ;;  %v1313_v25 = vsel %vm1299_vm7, %v1296_v30, %v1113_v3  ;;  %v987_v47 = vpop.permute.xlu2 %986 }
 0x196   : > { %v1159_v17 = vpop.permute.xlu0 %1158  ;;  %v1309_v33 = vsel %vm1299_vm7, %v1292_v54, %v1105_v59 }
 0x197   : > { %v1321_v35 = vsel %vm1316_vm8, %v1304_v44, %v1159_v17 }
 0x198   : > { %1716 = vmatmul.msk.f32.vlgmr.msra.gmra.mxu1 %vm1346_vm9, %v1321_v35 }
 0x19b   : > { %1164 = vrot.lane.b32.xlu1 %v2132_v50, %s1857_s8 }
 0x19c   : > { %1156 = vrot.lane.b32.xlu0 %v2104_v42, %s1857_s8 }
 0x19d   : > { %v1177_v21 = vpop.permute.xlu1 %1176  ;;  %v1043_v42 = vpop.permute.xlu2 %1042 }
 0x19e   : > { %v1169_v53 = vpop.permute.xlu0 %1168  ;;  %v1330_v16 = vsel %vm1316_vm8, %v1313_v25, %v1177_v21  ;;  %v2629_v21 = vld [vmem:[%s2770_s4] ss:$0 sm:$0xff] }
 0x19f   : > { %v1326_v50 = vsel %vm1316_vm8, %v1309_v33, %v1169_v53  ;;  %1725 = vmatmul.msk.f32.gmra.mxu3 %vm1346_vm9, %v1330_v16  ;;  %v1468_v33 = vld [vmem:[%s1947_s15 + $0x40] sm:$0xff] }
 0x1a0   : > { %1721 = vmatmul.msk.f32.gmra.mxu2 %vm1346_vm9, %v1326_v50  ;;  %v1472_v50 = vld [vmem:[%s1947_s15 + $0x60] sm:$0xff] }
 0x1a5   : > { %v923_v4 = vpop.permute.xlu1 %922  ;;  %v1161_v49 = vpop.permute.xlu2 %1160 }
 0x1a6   : > { %v969_v18 = vpop.permute.xlu0 %968  ;;  %v1263_v3 = vsel %vm1248_vm4, %v2405_v22, %v923_v4  ;;  %v1460_v4 = vld [vmem:[%s1947_s15] sm:$0xff] }
 0x1a7   : > { %v1271_v63 = vsel %vm1265_vm5, %v2389_v7, %v969_v18  ;;  %v1280_v57 = vsel %vm1265_vm5, %v1263_v3, %v987_v47  ;;  %v1464_v18 = vld [vmem:[%s1947_s15 + $0x20] sm:$0xff] }
 0x1ad   : > { %v979_v39 = vpop.permute.xlu1 %978  ;;  %v1171_v15 = vpop.permute.xlu2 %1170 }
 0x1ae   : > { %v1033_v55 = vpop.permute.xlu0 %1032  ;;  %v1276_v1 = vsel %vm1265_vm5, %v2489_v51, %v979_v39  ;;  %v1473_v39 = vld [vmem:[%s1947_s15 + $0x68] sm:$0xff] }
 0x1af   : > { %v1288_v60 = vsel %vm1282_vm6, %v1271_v63, %v1033_v55  ;;  %v1293_v23 = vsel %vm1282_vm6, %v1276_v1, %v1043_v42  ;;  %v1469_v42 = vld [vmem:[%s1947_s15 + $0x48] sm:$0xff]  ;;  %v2653_v63 = vld [vmem:[%s1947_s15 + $0x70] sm:$0xff] }
 0x1b0   : > { %v2644_v55 = vld [vmem:[%s1947_s15 + $0x28] sm:$0xff] }
 0x1b5   : > { %v1097_v41 = vpop.permute.xlu1 %1096  ;;  %v971_v20 = vpop.permute.xlu2 %970 }
 0x1b6   : > { %v1305_v5 = vsel %vm1299_vm7, %v1288_v60, %v1097_v41  ;;  %v1089_v40 = vpop.permute.xlu0 %1088  ;;  %v1272_v17 = vsel %vm1265_vm5, %v2480_v6, %v971_v20  ;;  %v2658_v41 = vld [vmem:[%s1947_s15 + $0x10] sm:$0xff] }
 0x1b7   : > { %v1322_v12 = vsel %vm1316_vm8, %v1305_v5, %v1161_v49  ;;  %v1301_v27 = vsel %vm1299_vm7, %v1284_v14, %v1089_v40  ;;  %v2650_v49 = vld [vmem:[%s1947_s15 + $0x50] sm:$0xff]  ;;  %v2664_v40 = vld [vmem:[%s1947_s15 + $0x58] sm:$0xff] }
 0x1b8   : > { %1717 = vmatmul.msk.f32.gmra.mxu1 %vm1346_vm9, %v1322_v12  ;;  %v2661_v5 = vld [vmem:[%s1947_s15 + $0x30] sm:$0xff]  ;;  %v2670_v14 = vld [vmem:[%s1947_s15 + $0x18] sm:$0xff] }
 0x1bd   : > { %v1153_v29 = vpop.permute.xlu1 %1152  ;;  %v1035_v9 = vpop.permute.xlu2 %1034 }
 0x1be   : > { %v1051_v7 = vpop.permute.xlu0 %1050  ;;  %v1318_v48 = vsel %vm1316_vm8, %v1301_v27, %v1153_v29  ;;  %v1289_v35 = vsel %vm1282_vm6, %v1272_v17, %v1035_v9 }
 0x1bf   : > { %1713 = vmatmul.msk.f32.gmra.mxu0 %vm1346_vm9, %v1318_v48  ;;  %v1297_v31 = vsel %vm1282_vm6, %v1280_v57, %v1051_v7 }
 0x1c5   : > { %v1115_v2 = vpop.permute.xlu1 %1114  ;;  %v1091_v52 = vpop.permute.xlu2 %1090 }
 0x1c6   : > { %v1107_v32 = vpop.permute.xlu0 %1106  ;;  %v1314_v51 = vsel %vm1299_vm7, %v1297_v31, %v1115_v2 }
 0x1c7   : > { %v1310_v58 = vsel %vm1299_vm7, %v1293_v23, %v1107_v32 }
 0x1c8   : > { %v1327_v11 = vsel %vm1316_vm8, %v1310_v58, %v1171_v15  ;;  %v2673_v15 = vld [vmem:[%s1947_s15 + $0x38] sm:$0xff] }
 0x1c9   : > { %1722 = vmatmul.msk.f32.gmra.mxu2 %vm1346_vm9, %v1327_v11 }
 0x1cd   : > { %v963_v38 = vpop.permute.xlu1 %962  ;;  %v1053_v37 = vpop.permute.xlu2 %1052 }
 0x1ce   : > { %v1179_v45 = vpop.permute.xlu0 %1178  ;;  %v1268_v59 = vsel %vm1265_vm5, %v2371_v10, %v963_v38 }
 0x1cf   : > { %v1331_v43 = vsel %vm1316_vm8, %v1314_v51, %v1179_v45 }
 0x1d0   : > { %1726 = vmatmul.msk.f32.gmra.mxu3 %vm1346_vm9, %v1331_v43 }
 0x1d5   : > { %v1027_v36 = vpop.permute.xlu1 %1026  ;;  %v1109_v28 = vpop.permute.xlu2 %1108 }
 0x1d6   : > { %v925_v8 = vpop.permute.xlu0 %924  ;;  %v1285_v44 = vsel %vm1282_vm6, %v1268_v59, %v1027_v36 }
 0x1d7   : > { %v1302_v62 = vsel %vm1299_vm7, %v1285_v44, %v1091_v52  ;;  %v1264_v53 = vsel %vm1248_vm4, %v2357_v61, %v925_v8 }
 0x1dd   : > { %v989_v13 = vpop.permute.xlu1 %988  ;;  %v1181_v1 = vpop.permute.xlu2 %1180 }
 0x1de   : > { %v981_v22 = vpop.permute.xlu0 %980  ;;  %v1281_v61 = vsel %vm1265_vm5, %v1264_v53, %v989_v13 }
 0x1df   : > { %v1277_v25 = vsel %vm1265_vm5, %v2418_v26, %v981_v22  ;;  %v2647_v26 = vld [vmem:[%s1947_s15 + $0x8] sm:$0xff]  ;;  %v1298_v2 = vsel %vm1282_vm6, %v1281_v61, %v1053_v37 }
 0x1e5   : > { %v1045_v56 = vpop.permute.xlu1 %1044  ;;  %v1029_v31 = vpop.permute.xlu2 %1028 }
 0x1e6   : > { %v1099_v46 = vpop.permute.xlu0 %1098  ;;  %v1294_v16 = vsel %vm1282_vm6, %v1277_v25, %v1045_v56 }
 0x1e7   : > { %v1306_v19 = vsel %vm1299_vm7, %v1289_v35, %v1099_v46  ;;  %v1311_v27 = vsel %vm1299_vm7, %v1294_v16, %v1109_v28 }
 0x1ed   : > { %v1163_v30 = vpop.permute.xlu1 %1162  ;;  %v1101_v13 = vpop.permute.xlu2 %1100 }
 0x1ee   : > { %v1155_v54 = vpop.permute.xlu0 %1154  ;;  %v1323_v10 = vsel %vm1316_vm8, %v1306_v19, %v1163_v30 }
 0x1ef   : > { %v1319_v6 = vsel %vm1316_vm8, %v1302_v62, %v1155_v54  ;;  %1718 = vmatmul.msk.f32.gmra.mxu1 %vm1346_vm9, %v1323_v10 }
 0x1f0   : > { %1714 = vmatmul.msk.f32.gmra.mxu0 %vm1346_vm9, %v1319_v6 }
 0x1f2   : > { %v1436_v47 = vpop.f32.mrf.mxu2 }
 0x1f3   : > { %v1437_v60 = vadd.f32 %v2629_v21, %v1436_v47 }
 0x1f4   : > { %v1448_v12 = vpop.f32.mrf.mxu3 }
 0x1f5   : > { %v1484_v29 = vadd.f32 %v1468_v33, %v1437_v60  ;;  %v1449_v7 = vadd.f32 %v2629_v21, %v1448_v12  ;;  %v1173_v48 = vpop.permute.xlu1 %1172 }
 0x1f6   : > { %v1117_v32 = vpop.permute.xlu0 %1116  ;;  %v1328_v23 = vsel %vm1316_vm8, %v1311_v27, %v1173_v48 }
 0x1f7   : > { %v1488_v20 = vadd.f32 %v1472_v50, %v1449_v7  ;;  %v1315_v58 = vsel %vm1299_vm7, %v1298_v2, %v1117_v32  ;;  %1723 = vmatmul.msk.f32.gmra.mxu2 %vm1346_vm9, %v1328_v23  ;;  %1500 = vst.msk [vmem:[%s1963_s20 + $0x40] sm:$0xff] %vm459_vm0, %v1484_v29 }
 0x1f8   : > { %v1332_v11 = vsel %vm1316_vm8, %v1315_v58, %v1181_v1 }
 0x1f9   : > { %1727 = vmatmul.msk.f32.gmra.mxu3 %vm1346_vm9, %v1332_v11  ;;  %1504 = vst.msk [vmem:[%s1963_s20 + $0x60] sm:$0xff] %vm459_vm0, %v1488_v20 }
 0x1fd   : > { %v973_v3 = vpop.permute.xlu1 %972 }
 0x1fe   : > { %v965_v57 = vpop.permute.xlu0 %964  ;;  %v1273_v36 = vsel %vm1265_vm5, %v2473_v34, %v973_v3 }
 0x1ff   : > { %v1269_v8 = vsel %vm1265_vm5, %v2455_v24, %v965_v57 }
 0x200   : > { %v1286_v22 = vsel %vm1282_vm6, %v1269_v8, %v1029_v31 }
 0x205   : > { %v1093_v38 = vpop.permute.xlu1 %1092  ;;  %v1412_v51 = vpop.f32.mrf.mxu0 }
 0x206   : > { %v1037_v45 = vpop.permute.xlu0 %1036  ;;  %v1413_v43 = vadd.f32 %v2629_v21, %v1412_v51  ;;  %v1303_v46 = vsel %vm1299_vm7, %v1286_v22, %v1093_v38 }
 0x207   : > { %v1290_v52 = vsel %vm1282_vm6, %v1273_v36, %v1037_v45 }
 0x208   : > { %v1476_v9 = vadd.f32 %v1460_v4, %v1413_v43  ;;  %v1307_v37 = vsel %vm1299_vm7, %v1290_v52, %v1101_v13 }
 0x20a   : > { %1492 = vst.msk [vmem:[%s1963_s20] sm:$0xff] %vm459_vm0, %v1476_v9 }
 0x20d   : > { %v1165_v56 = vpop.permute.xlu1 %1164 }
 0x20e   : > { %v1157_v59 = vpop.permute.xlu0 %1156  ;;  %v1324_v34 = vsel %vm1316_vm8, %v1307_v37, %v1165_v56 }
 0x20f   : > { %v1320_v24 = vsel %vm1316_vm8, %v1303_v46, %v1157_v59  ;;  %1719 = vmatmul.msk.f32.gmra.mxu1 %vm1346_vm9, %v1324_v34 }
 0x210   : > { %1715 = vmatmul.msk.f32.gmra.mxu0 %vm1346_vm9, %v1320_v24 }
 0x215   : > { %v1424_v17 = vpop.f32.mrf.mxu1 }
 0x216   : > { %v1425_v44 = vadd.f32 %v2629_v21, %v1424_v17 }
 0x218   : > { %v1480_v35 = vadd.f32 %v1464_v18, %v1425_v44 }
 0x21a   : > { %1496 = vst.msk [vmem:[%s1963_s20 + $0x20] sm:$0xff] %vm459_vm0, %v1480_v35 }
 0x222   : > { %v1451_v19 = vpop.f32.mrf.mxu3 }
 0x223   : > { %v1439_v28 = vpop.f32.mrf.mxu2  ;;  %v1452_v30 = vadd.f32 %v2629_v21, %v1451_v19 }
 0x224   : > { %v1440_v62 = vadd.f32 %v2629_v21, %v1439_v28 }
 0x225   : > { %v1489_v54 = vadd.f32 %v1473_v39, %v1452_v30 }
 0x226   : > { %v1485_v10 = vadd.f32 %v1469_v42, %v1440_v62 }
 0x227   : > { %1505 = vst.msk [vmem:[%s1963_s20 + $0x68] sm:$0xff] %vm459_vm0, %v1489_v54 }
 0x228   : > { %1501 = vst.msk [vmem:[%s1963_s20 + $0x48] sm:$0xff] %vm459_vm0, %v1485_v10 }
 0x235   : > { %v1427_v6 = vpop.f32.mrf.mxu1 }
 0x236   : > { %v1428_v25 = vadd.f32 %v2629_v21, %v1427_v6 }
 0x238   : > { %v1481_v33 = vadd.f32 %v2644_v55, %v1428_v25 }
 0x23a   : > { %1497 = vst.msk [vmem:[%s1963_s20 + $0x28] sm:$0xff] %vm459_vm0, %v1481_v33 }
 0x23c   : > { %v1415_v53 = vpop.f32.mrf.mxu0 }
 0x23d   : > { %v1416_v16 = vadd.f32 %v2629_v21, %v1415_v53 }
 0x23f   : > { %v1477_v47 = vadd.f32 %v2647_v26, %v1416_v16 }
 0x241   : > { %1493 = vst.msk [vmem:[%s1963_s20 + $0x8] sm:$0xff] %vm459_vm0, %v1477_v47 }
 0x24c   : > { %v1442_v50 = vpop.f32.mrf.mxu2 }
 0x24d   : > { %v1443_v4 = vadd.f32 %v2629_v21, %v1442_v50 }
 0x24f   : > { %v1486_v18 = vadd.f32 %v2650_v49, %v1443_v4 }
 0x251   : > { %1502 = vst.msk [vmem:[%s1963_s20 + $0x50] sm:$0xff] %vm459_vm0, %v1486_v18 }
 0x253   : > { %v1454_v42 = vpop.f32.mrf.mxu3 }
 0x254   : > { %v1455_v39 = vadd.f32 %v2629_v21, %v1454_v42 }
 0x256   : > { %v1490_v55 = vadd.f32 %v2653_v63, %v1455_v39 }
 0x258   : > { %1506 = vst.msk [vmem:[%s1963_s20 + $0x70] sm:$0xff] %vm459_vm0, %v1490_v55 }
 0x26c   : > { %v1430_v26 = vpop.f32.mrf.mxu1 }
 0x26d   : > { %v1418_v61 = vpop.f32.mrf.mxu0  ;;  %v1431_v60 = vadd.f32 %v2629_v21, %v1430_v26 }
 0x26e   : > { %v1419_v12 = vadd.f32 %v2629_v21, %v1418_v61 }
 0x26f   : > { %v1482_v27 = vadd.f32 %v2661_v5, %v1431_v60 }
 0x270   : > { %v1478_v49 = vadd.f32 %v2658_v41, %v1419_v12 }
 0x271   : > { %1498 = vst.msk [vmem:[%s1963_s20 + $0x30] sm:$0xff] %vm459_vm0, %v1482_v27 }
 0x272   : > { %1494 = vst.msk [vmem:[%s1963_s20 + $0x10] sm:$0xff] %vm459_vm0, %v1478_v49 }
 0x27a   : > { %v1445_v63 = vpop.f32.mrf.mxu2 }
 0x27b   : > { %v1446_v29 = vadd.f32 %v2629_v21, %v1445_v63 }
 0x27c   : > { %v1457_v7 = vpop.f32.mrf.mxu3 }
 0x27d   : > { %v1487_v48 = vadd.f32 %v2664_v40, %v1446_v29  ;;  %v1458_v1 = vadd.f32 %v2629_v21, %v1457_v7 }
 0x27f   : > { %v1491_v2 = vadd.f32 %v2667_v0, %v1458_v1  ;;  %1503 = vst.msk [vmem:[%s1963_s20 + $0x58] sm:$0xff] %vm459_vm0, %v1487_v48 }
 0x281   : > { %1507 = vst.msk [vmem:[%s1963_s20 + $0x78] sm:$0xff] %vm459_vm0, %v1491_v2 }
 0x28c   : > { %v1433_v41 = vpop.f32.mrf.mxu1 }
 0x28d   : > { %v1421_v5 = vpop.f32.mrf.mxu0  ;;  %v1434_v32 = vadd.f32 %v2629_v21, %v1433_v41 }
 0x28e   : > { %v1422_v23 = vadd.f32 %v2629_v21, %v1421_v5 }
 0x28f   : > { %v1483_v20 = vadd.f32 %v2673_v15, %v1434_v32 }
 0x290   : > { %v1479_v58 = vadd.f32 %v2670_v14, %v1422_v23 }
 0x291   : > { %1499 = vst.msk [vmem:[%s1963_s20 + $0x38] sm:$0xff] %vm459_vm0, %v1483_v20 }
 0x292   : > { %1495 = vst.msk [vmem:[%s1963_s20 + $0x18] sm:$0xff] %vm459_vm0, %v1479_v58 }
 0x293 PF: > { %s16_s25 = sadd.s32 1, %s1847_s25   ;;  %s2774_s21 = smov %s1839_s23 }
 0x294   : > { %p13_p12 = scmp.ge.s32.totalorder %s16_s25, 6   ;;  %s2775_s22 = smov %s1843_s24 }
 0x295   : > { %s2776_s23 = smov %s2779_s26  ;;  %s2777_s24 = smov %s2783_s27 }
 0x296   :  { %15 = sbr.rel (!%p13_p12) target bundleno = 3 (0x3), region = 94 }

// kernel: rcan_a_forward.11
= control target key start
LH: loop header
LB: loop body
LE: loop exit
PB: predicated region body
PF: predicated region fallthrough
CT: control target
= control target key end

     0   :  { %s1894_s21 = smov 0   ;;  %s1896_s22 = smov 0   ;;  %s2767_s0 = inlined_call_operand.vmem [shape: f32[2,16,16,8], index: 0, kind: input, shape index: {}, may-alias: {0,1,2}]   ;;  %s2768_s1 = inlined_call_operand.vmem [shape: f32[2,16,16,8], index: 1, kind: input, shape index: {}, may-alias: {0,1,2}]   ;;  %s2769_s2 = inlined_call_operand.vmem [shape: f32[2,16,16,8], index: 2, kind: input, shape index: {}, may-alias: {0,1,2}]   ;;  %s2770_s3 = inlined_call_operand.vmem [shape: f32[72,3], index: 3, kind: input, shape index: {}]   ;;  %s2771_s4 = inlined_call_operand.vmem [shape: f32[1,3], index: 4, kind: input, shape index: {}]   ;;  %s2772_s5 = inlined_call_operand.vmem [shape: f32[2,16,16,3], index: 5, kind: input, shape index: {}, may-alias: {5,6}]   ;;  %s2773_s6 = inlined_call_operand.vmem [shape: f32[2,16,16,3], index: 6, kind: output, shape index: {}, may-alias: {5,6}]  }
   0x1   :  { %s1898_s23 = smov 0   ;;  %s1900_s24 = smov 0  }
   0x2   :  { %s1902_s25 = smov 0  }
   0x3 LB: > { %s25_s26 = sadd.s32 1, %s1840_s23  ;;  %s28_s27 = sadd.s32 1, %s1844_s24  ;;  %s1848_s25 = sphi %s1902_s25, %s16_s25   ;;  %s1844_s24 = sphi %s1900_s24, %s2778_s24   ;;  %s1840_s23 = sphi %s1898_s23, %s2777_s23   ;;  %s1836_s22 = sphi %s1896_s22, %s2776_s22   ;;  %s1832_s21 = sphi %s1894_s21, %s2775_s21  }
   0x4   : > { %p26_p0 = scmp.ge.s32.totalorder %s25_s26, 2  ;;  %p1681_p1 = scmp.ge.s32.totalorder %s1848_s25, 1 }
   0x5   : > { %p316_p2 = scmp.lt.s32.totalorder %s1848_s25, 5 }
   0x6   : > { %s2780_s26 = smov (%p26_p0, %s25_s26), 0  ;;  %s2782_s27 = smov (!%p26_p0, %s28_s27), %s1844_s24 }
   0x7   : > { %p317_p3 = pnand %p1681_p1, %p316_p2  ;;  %p30_p4 = scmp.ge.s32.totalorder %s2782_s27, 2 }
   0x8   : > { %s1682_s28 = sshll.u32 (!%p317_p3), %s1832_s21, 3  ;;  %p393_p5 = scmp.lt.s32.totalorder (!%p317_p3), %s1836_s22, 1 }
   0x9   : > { %s2784_s27 = smov (%p30_p4, %s2782_s27), 0  ;;  %320 = sbr.rel (%p317_p3) target bundleno = 659 (0x293), region = 44 }
   0xa   : > { %p395_p6 = scmp.lt.s32.totalorder (!%p317_p3), %s1682_s28, 15  ;;  %s1687_s29 = sadd.s32 (!%p317_p3), 4294967295, %s1682_s28 }
   0xb   : > { %p405_p7 = scmp.gt.s32.totalorder (!%p317_p3), %s1687_s29, 0  ;;  %p1688_p8 = scmp.lt.s32.totalorder (!%p317_p3), %s1687_s29, 15 }
   0xc   : > { %s421_s10 = sadd.s32 (!%p317_p3), 8, %s1682_s28  ;;  %p1711_p10 = scmp.le.s32.totalorder (!%p317_p3), %s1832_s21, 0 }
   0xd   : > { %p1939_p9 = scmp.lt.s32.totalorder (!%p317_p3), %s421_s10, 15 }
   0xe   : > { %vm459_vm0 = vcmask 64512   ;;  %v1850_v0 = vmov 0.0   ;;  %s2786_s22 = smov (!%p393_p5, %s1836_s22), 1  ;;  %vm462_vm1 = vcmask 58368  }
   0xf   : > { %464 = vst.msk [vmem:[#allocation2 + $0x18] sm:$0xff] %vm459_vm0, %v1850_v0  ;;  %s396_s30 = scalar_select %p395_p6, %s1682_s28, 15 }
  0x10   : > { %460 = vst.msk [vmem:[#allocation2] sm:$0xff] %vm459_vm0, %v1850_v0  ;;  %s1931_s7 = sshll.u32 %s2786_s22, 5  ;;  %s2788_s10 = smov (!%p1939_p9, %s421_s10), 15 }
  0x11   : > { %461 = vst.msk [vmem:[#allocation2 + $0x8] sm:$0xff] %vm459_vm0, %v1850_v0  ;;  %s1683_s8 = sshll.u32 %s396_s30, 1  ;;  %s2792_s10 = smov (!%p1939_p9, %s2788_s10), 15 }
  0x12   : > { %465 = vst.msk [vmem:[#allocation2 + $0x20] sm:$0xff] %vm459_vm0, %v1850_v0  ;;  %s399_s9 = sadd.s32 %s1931_s7, %s1683_s8  ;;  %s1700_s28 = sshll.u32 %s2792_s10, 1 }
  0x13   : > { %467 = vst.msk [vmem:[#allocation2 + $0x30] sm:$0xff] %vm459_vm0, %v1850_v0  ;;  %s1937_s11 = sshll.u32 %s399_s9, 3  ;;  %s430_s30 = sadd.s32 %s1700_s28, %s1931_s7 }
  0x14   : > { %468 = vst.msk [vmem:[#allocation2 + $0x38] sm:$0xff] %vm459_vm0, %v1850_v0  ;;  %s1948_s15 = scalar_lea.vmem %s2772_s5, %s1937_s11  ;;  %s1964_s20 = scalar_lea.vmem %s2773_s6, %s1937_s11 }
  0x15   : > { %470 = vst.msk [vmem:[#allocation2 + $0x48] sm:$0xff] %vm459_vm0, %v1850_v0  ;;  %s406_s16 = scalar_select %p405_p7, %s1687_s29, 0 }
  0x16   : > { %471 = vst.msk [vmem:[#allocation2 + $0x50] sm:$0xff] %vm459_vm0, %v1850_v0  ;;  %s1702_s13 = sshll.u32 %s430_s30, 3  ;;  %s1989_s18 = scalar_lea.vmem %s2767_s0, %s1937_s11 }
  0x17   : > { %473 = vst.msk [vmem:[#allocation2 + $0x60] sm:$0xff] %vm459_vm0, %v1850_v0  ;;  %s2790_s16 = smov (!%p1688_p8, %s406_s16), 15  ;;  %v491_v1 = vld [vmem:[%s1989_s18] sm:$0xff]  ;;  %v492_v2 = vld [vmem:[%s1989_s18 + $0x8] sm:$0xff]  ;;  %v493_v3 = vld [vmem:[%s1989_s18 + $0x10] sm:$0xff] }
  0x18   : > { %474 = vst.msk [vmem:[#allocation2 + $0x68] sm:$0xff] %vm459_vm0, %v1850_v0  ;;  %s1693_s17 = sshll.u32 %s2790_s16, 1  ;;  %v494_v4 = vld [vmem:[%s1989_s18 + $0x18] sm:$0xff]  ;;  %v495_v5 = vld [vmem:[%s1989_s18 + $0x20] sm:$0xff]  ;;  %v496_v6 = vld [vmem:[%s1989_s18 + $0x28] sm:$0xff] }
  0x19   : > { %476 = vst.msk [vmem:[#allocation2 + $0x78] sm:$0xff] %vm459_vm0, %v1850_v0  ;;  %s413_s22 = sadd.s32 %s1693_s17, %s1931_s7  ;;  %s1980_s17 = scalar_lea.vmem %s2769_s2, %s1702_s13  ;;  %v497_v7 = vld [vmem:[%s1989_s18 + $0x30] sm:$0xff]  ;;  %v498_v8 = vld [vmem:[%s1989_s18 + $0x38] sm:$0xff]  ;;  %v499_v9 = vld [vmem:[%s1989_s18 + $0x40] sm:$0xff] }
  0x1a   : > { %477 = vst.msk [vmem:[#allocation2 + $0x80] sm:$0xff] %vm459_vm0, %v1850_v0  ;;  %s1695_s29 = sshll.u32 %s413_s22, 3  ;;  %v500_v10 = vld [vmem:[%s1989_s18 + $0x48] sm:$0xff]  ;;  %v501_v11 = vld [vmem:[%s1989_s18 + $0x50] sm:$0xff]  ;;  %v502_v12 = vld [vmem:[%s1989_s18 + $0x58] sm:$0xff] }
  0x1b   : > { %479 = vst.msk [vmem:[#allocation2 + $0x90] sm:$0xff] %vm459_vm0, %v1850_v0  ;;  %s1974_s12 = scalar_lea.vmem %s2768_s1, %s1695_s29  ;;  %v503_v13 = vld [vmem:[%s1989_s18 + $0x60] sm:$0xff]  ;;  %v504_v14 = vld [vmem:[%s1989_s18 + $0x68] sm:$0xff]  ;;  %v505_v15 = vld [vmem:[%s1989_s18 + $0x70] sm:$0xff] }
  0x1c   : > { %480 = vst.msk [vmem:[#allocation2 + $0x98] sm:$0xff] %vm459_vm0, %v1850_v0  ;;  %v506_v16 = vld [vmem:[%s1989_s18 + $0x78] sm:$0xff] }
  0x1d   : > { %482 = vst.msk [vmem:[#allocation2 + $0xa8] sm:$0xff] %vm459_vm0, %v1850_v0 }
  0x1e   : > { %483 = vst.msk [vmem:[#allocation2 + $0xb0] sm:$0xff] %vm459_vm0, %v1850_v0 }
  0x1f   : > { %485 = vst.msk [vmem:[#allocation2 + $0xc0] sm:$0xff] %vm459_vm0, %v1850_v0 }
  0x20   : > { %486 = vst.msk [vmem:[#allocation2 + $0xc8] sm:$0xff] %vm459_vm0, %v1850_v0 }
  0x21   : > { %488 = vst.msk [vmem:[#allocation2 + $0xd8] sm:$0xff] %vm459_vm0, %v1850_v0 }
  0x22   : > { %489 = vst.msk [vmem:[#allocation2 + $0xe0] sm:$0xff] %vm459_vm0, %v1850_v0 }
  0x23   : > { %466 = vst.msk [vmem:[#allocation2 + $0x28] sm:$0x3] %vm462_vm1, %v1850_v0 }
  0x24   : > { %463 = vst.msk [vmem:[#allocation2 + $0x10] sm:$0x3] %vm462_vm1, %v1850_v0 }
  0x25   : > { %469 = vst.msk [vmem:[#allocation2 + $0x40] sm:$0x3] %vm462_vm1, %v1850_v0 }
  0x26   : > { %472 = vst.msk [vmem:[#allocation2 + $0x58] sm:$0x3] %vm462_vm1, %v1850_v0 }
  0x27   : > { %475 = vst.msk [vmem:[#allocation2 + $0x70] sm:$0x3] %vm462_vm1, %v1850_v0 }
  0x28   : > { %478 = vst.msk [vmem:[#allocation2 + $0x88] sm:$0x3] %vm462_vm1, %v1850_v0 }
  0x29   : > { %481 = vst.msk [vmem:[#allocation2 + $0xa0] sm:$0x3] %vm462_vm1, %v1850_v0 }
  0x2a   : > { %484 = vst.msk [vmem:[#allocation2 + $0xb8] sm:$0x3] %vm462_vm1, %v1850_v0 }
  0x2b   : > { %487 = vst.msk [vmem:[#allocation2 + $0xd0] sm:$0x3] %vm462_vm1, %v1850_v0 }
  0x2c   : > { %490 = vst.msk [vmem:[#allocation2 + $0xe8] sm:$0x3] %vm462_vm1, %v1850_v0 }
  0x2d   : > { %508 = vst.msk [vmem:[#allocation2 + $0x19] sm:$0xff] %vm459_vm0, %v491_v1 }
  0x2e   : > { %509 = vst.msk [vmem:[#allocation2 + $0x21] sm:$0xff] %vm459_vm0, %v492_v2 }
  0x2f   : > { %510 = vst.msk [vmem:[#allocation2 + $0x31] sm:$0xff] %vm459_vm0, %v493_v3 }
  0x30   : > { %511 = vst.msk [vmem:[#allocation2 + $0x39] sm:$0xff] %vm459_vm0, %v494_v4 }
  0x31   : > { %512 = vst.msk [vmem:[#allocation2 + $0x49] sm:$0xff] %vm459_vm0, %v495_v5 }
  0x32   : > { %513 = vst.msk [vmem:[#allocation2 + $0x51] sm:$0xff] %vm459_vm0, %v496_v6 }
  0x33   : > { %514 = vst.msk [vmem:[#allocation2 + $0x61] sm:$0xff] %vm459_vm0, %v497_v7 }
  0x34   : > { %515 = vst.msk [vmem:[#allocation2 + $0x69] sm:$0xff] %vm459_vm0, %v498_v8 }
  0x35   : > { %516 = vst.msk [vmem:[#allocation2 + $0x79] sm:$0xff] %vm459_vm0, %v499_v9 }
  0x36   : > { %517 = vst.msk [vmem:[#allocation2 + $0x81] sm:$0xff] %vm459_vm0, %v500_v10 }
  0x37   : > { %518 = vst.msk [vmem:[#allocation2 + $0x91] sm:$0xff] %vm459_vm0, %v501_v11 }
  0x38   : > { %519 = vst.msk [vmem:[#allocation2 + $0x99] sm:$0xff] %vm459_vm0, %v502_v12  ;;  %527 = sbr.rel (%p1711_p10) target bundleno = 64 (0x40), region = 48 }
  0x39   : > { %520 = vst.msk [vmem:[#allocation2 + $0xa9] sm:$0xff] %vm459_vm0, %v503_v13 }
  0x3a   : > { %521 = vst.msk [vmem:[#allocation2 + $0xb1] sm:$0xff] %vm459_vm0, %v504_v14 }
  0x3b   : > { %522 = vst.msk [vmem:[#allocation2 + $0xc1] sm:$0xff] %vm459_vm0, %v505_v15 }
  0x3c   : > { %523 = vst.msk [vmem:[#allocation2 + $0xc9] sm:$0xff] %vm459_vm0, %v506_v16 }
  0x3d   : > { %v528_v17 = vld [vmem:[%s1974_s12] sm:$0xff]  ;;  %v529_v18 = vld [vmem:[%s1974_s12 + $0x8] sm:$0xff] }
  0x3e   : > { %530 = vst.msk [vmem:[#allocation2 + $0x1] sm:$0xff] %vm459_vm0, %v528_v17 }
  0x3f   : > { %531 = vst.msk [vmem:[#allocation2 + $0x9] sm:$0xff] %vm459_vm0, %v529_v18 }
  0x40 PF: > { %p1712_p11 = scmp.ge.s32.totalorder %s1832_s21, 1 }
  0x42   : > { %535 = sbr.rel (%p1712_p11) target bundleno = 74 (0x4a), region = 52 }
  0x47   : > { %v536_v19 = vld [vmem:[%s1980_s17] sm:$0xff]  ;;  %v537_v20 = vld [vmem:[%s1980_s17 + $0x8] sm:$0xff] }
  0x48   : > { %539 = vst.msk [vmem:[#allocation2 + $0xd9] sm:$0xff] %vm459_vm0, %v536_v19 }
  0x49   : > { %540 = vst.msk [vmem:[#allocation2 + $0xe1] sm:$0xff] %vm459_vm0, %v537_v20 }
  0x4a PF: > { %v2033_v21 = vld [vmem:[#allocation2 + $0x31] sm:$0xff]  ;;  %v2035_v22 = vld [vmem:[#allocation2 + $0x19] sm:$0xff]  ;;  %v557_v23 = vld [vmem:[#allocation2 + $0x1] sm:$0xff]  ;;  %s1851_s11 = smov 8   ;;  %s1852_s21 = smov 16   ;;  %vm1214_vm2 = vcmask 130048  }
  0x4b   : > { %710 = vrot.lane.b32.xlu2 %v2033_v21, %s1851_s11  ;;  %706 = vrot.lane.b32.xlu1 %v2035_v22, %s1851_s11  ;;  %v2042_v24 = vld [vmem:[#allocation2 + $0x39] sm:$0xff]  ;;  %v2044_v25 = vld [vmem:[#allocation2 + $0x21] sm:$0xff]  ;;  %v558_v26 = vld [vmem:[#allocation2 + $0x9] sm:$0xff]  ;;  %s1853_s19 = smov 24   ;;  %s1854_s22 = smov 32   ;;  %vm1231_vm3 = vcmask 195584  }
  0x4c   : > { %702 = vrot.lane.b32.xlu0 %v557_v23, %s1851_s11  ;;  %v2051_v27 = vld [vmem:[#allocation2 + $0x61] sm:$0xff]  ;;  %v2053_v28 = vld [vmem:[#allocation2 + $0x51] sm:$0xff]  ;;  %v2055_v29 = vld [vmem:[#allocation2 + $0x49] sm:$0xff]  ;;  %s1855_s28 = smov 40   ;;  %s1856_s29 = smov 56   ;;  %vm1248_vm4 = vcmask 261120  }
  0x4d   : > { %v2063_v30 = vld [vmem:[#allocation2 + $0x81] sm:$0xff]  ;;  %v2065_v31 = vld [vmem:[#allocation2 + $0x79] sm:$0xff]  ;;  %v2067_v32 = vld [vmem:[#allocation2 + $0x69] sm:$0xff]  ;;  %s1857_s30 = smov 48   ;;  %s1858_s8 = smov 64   ;;  %vm1265_vm5 = vcmask 326656  }
  0x4e   : > { %v2075_v33 = vld [vmem:[#allocation2 + $0xa9] sm:$0xff]  ;;  %v2077_v34 = vld [vmem:[#allocation2 + $0x99] sm:$0xff]  ;;  %v2079_v35 = vld [vmem:[#allocation2 + $0x91] sm:$0xff]  ;;  %vm1282_vm6 = vcmask 392192   ;;  %vm1299_vm7 = vcmask 457728   ;;  %vm1316_vm8 = vcmask 523264  }
  0x4f   : > { %v574_v36 = vld [vmem:[#allocation2 + $0xa] sm:$0xff]  ;;  %v573_v37 = vld [vmem:[#allocation2 + $0x2] sm:$0xff]  ;;  %v2093_v39 = vld [vmem:[#allocation2 + $0x32] sm:$0xff]  ;;  %vm1346_vm9 = vcmask 588800   ;;  %vm1492_vm10 = vcmask 23552  }
  0x50   : > { %v2087_v38 = vld [vmem:[#allocation2 + $0xb1] sm:$0xff]  ;;  %v2095_v40 = vld [vmem:[#allocation2 + $0x22] sm:$0xff]  ;;  %v2097_v41 = vld [vmem:[#allocation2 + $0x1a] sm:$0xff] }
  0x51   : > { %v2105_v42 = vld [vmem:[#allocation2 + $0x52] sm:$0xff]  ;;  %v2107_v43 = vld [vmem:[#allocation2 + $0x4a] sm:$0xff]  ;;  %v2109_v44 = vld [vmem:[#allocation2 + $0x3a] sm:$0xff] }
  0x52   : > { %v2117_v45 = vld [vmem:[#allocation2 + $0x7a] sm:$0xff]  ;;  %v2119_v46 = vld [vmem:[#allocation2 + $0x6a] sm:$0xff]  ;;  %v2121_v47 = vld [vmem:[#allocation2 + $0x62] sm:$0xff] }
  0x53   : > { %712 = vrot.lane.b32.xlu2 %v2042_v24, %s1851_s11  ;;  %708 = vrot.lane.b32.xlu1 %v2044_v25, %s1851_s11  ;;  %v2129_v48 = vld [vmem:[#allocation2 + $0x9a] sm:$0xff]  ;;  %v2131_v49 = vld [vmem:[#allocation2 + $0x92] sm:$0xff]  ;;  %v2133_v50 = vld [vmem:[#allocation2 + $0x82] sm:$0xff] }
  0x54   : > { %704 = vrot.lane.b32.xlu0 %v558_v26, %s1851_s11  ;;  %v589_v51 = vld [vmem:[#allocation2 + $0x18] sm:$0xff]  ;;  %v2143_v53 = vld [vmem:[#allocation2 + $0xaa] sm:$0xff]  ;;  %v590_v56 = vld [vmem:[#allocation2 + $0x20] sm:$0xff] }
  0x55   : > { %v2141_v52 = vld [vmem:[#allocation2 + $0xb2] sm:$0xff]  ;;  %v2159_v58 = vld [vmem:[#allocation2 + $0x60] sm:$0xff]  ;;  %v2163_v60 = vld [vmem:[#allocation2 + $0x48] sm:$0xff] }
  0x56   : > { %v2150_v54 = vld [vmem:[#allocation2 + $0x38] sm:$0xff]  ;;  %v2152_v55 = vld [vmem:[#allocation2 + $0x30] sm:$0xff]  ;;  %v2173_v62 = vld [vmem:[#allocation2 + $0x80] sm:$0xff] }
  0x57   : > { %v2161_v59 = vld [vmem:[#allocation2 + $0x50] sm:$0xff]  ;;  %v2175_v63 = vld [vmem:[#allocation2 + $0x78] sm:$0xff]  ;;  %v2177_v0 = vld [vmem:[#allocation2 + $0x68] sm:$0xff] }
  0x58   : > { %v2187_v2 = vld [vmem:[#allocation2 + $0xa8] sm:$0xff]  ;;  %v2189_v3 = vld [vmem:[#allocation2 + $0x98] sm:$0xff]  ;;  %v2191_v4 = vld [vmem:[#allocation2 + $0x90] sm:$0xff] }
  0x59   : > { %v2202_v9 = vld [vmem:[#allocation2 + $0xc8] sm:$0xff]  ;;  %v603_v10 = vld [vmem:[#allocation2 + $0xc0] sm:$0xff]  ;;  %v2204_v11 = vld [vmem:[#allocation2 + $0xb0] sm:$0xff] }
  0x5a   : > { %v542_v16 = vld [vmem:[#allocation2 + $0x8] sm:$0xff] }
  0x5b   : > { %718 = vrot.lane.b32.xlu2 %v2051_v27, %s1851_s11  ;;  %716 = vrot.lane.b32.xlu1 %v2053_v28, %s1851_s11 }
  0x5c   : > { %714 = vrot.lane.b32.xlu0 %v2055_v29, %s1851_s11 }
  0x63   : > { %724 = vrot.lane.b32.xlu2 %v2063_v30, %s1851_s11  ;;  %722 = vrot.lane.b32.xlu1 %v2065_v31, %s1851_s11 }
  0x64   : > { %720 = vrot.lane.b32.xlu0 %v2067_v32, %s1851_s11 }
  0x6b   : > { %730 = vrot.lane.b32.xlu2 %v2075_v33, %s1851_s11  ;;  %728 = vrot.lane.b32.xlu1 %v2077_v34, %s1851_s11 }
  0x6c   : > { %726 = vrot.lane.b32.xlu0 %v2079_v35, %s1851_s11 }
  0x73   : > { %768 = vrot.lane.b32.xlu2 %v574_v36, %s1852_s21  ;;  %766 = vrot.lane.b32.xlu1 %v573_v37, %s1852_s21 }
  0x74   : > { %732 = vrot.lane.b32.xlu0 %v2087_v38, %s1851_s11 }
  0x7b   : > { %774 = vrot.lane.b32.xlu2 %v2093_v39, %s1852_s21  ;;  %772 = vrot.lane.b32.xlu1 %v2095_v40, %s1852_s21 }
  0x7c   : > { %770 = vrot.lane.b32.xlu0 %v2097_v41, %s1852_s21 }
  0x83   : > { %780 = vrot.lane.b32.xlu2 %v2105_v42, %s1852_s21  ;;  %778 = vrot.lane.b32.xlu1 %v2107_v43, %s1852_s21 }
  0x84   : > { %776 = vrot.lane.b32.xlu0 %v2109_v44, %s1852_s21 }
  0x8b   : > { %786 = vrot.lane.b32.xlu2 %v2117_v45, %s1852_s21  ;;  %784 = vrot.lane.b32.xlu1 %v2119_v46, %s1852_s21 }
  0x8c   : > { %782 = vrot.lane.b32.xlu0 %v2121_v47, %s1852_s21 }
  0x93   : > { %792 = vrot.lane.b32.xlu2 %v2129_v48, %s1852_s21  ;;  %790 = vrot.lane.b32.xlu1 %v2131_v49, %s1852_s21 }
  0x94   : > { %788 = vrot.lane.b32.xlu0 %v2133_v50, %s1852_s21 }
  0x9b   : > { %830 = vrot.lane.b32.xlu2 %v589_v51, %s1853_s19  ;;  %796 = vrot.lane.b32.xlu1 %v2141_v52, %s1852_s21 }
  0x9c   : > { %794 = vrot.lane.b32.xlu0 %v2143_v53, %s1852_s21 }
  0xa3   : > { %836 = vrot.lane.b32.xlu2 %v2150_v54, %s1853_s19  ;;  %834 = vrot.lane.b32.xlu1 %v2152_v55, %s1853_s19 }
  0xa4   : > { %832 = vrot.lane.b32.xlu0 %v590_v56, %s1853_s19 }
  0xa5   : > { %v711_v57 = vpop.permute.xlu2 %710 }
  0xab   : > { %842 = vrot.lane.b32.xlu2 %v2159_v58, %s1853_s19  ;;  %840 = vrot.lane.b32.xlu1 %v2161_v59, %s1853_s19 }
  0xac   : > { %838 = vrot.lane.b32.xlu0 %v2163_v60, %s1853_s19 }
  0xad   : > { %v2171_v61 = vpop.permute.xlu2 %712 }
  0xb3   : > { %848 = vrot.lane.b32.xlu2 %v2173_v62, %s1853_s19  ;;  %846 = vrot.lane.b32.xlu1 %v2175_v63, %s1853_s19 }
  0xb4   : > { %844 = vrot.lane.b32.xlu0 %v2177_v0, %s1853_s19 }
  0xb5   : > { %v2185_v1 = vpop.permute.xlu2 %718 }
  0xbb   : > { %854 = vrot.lane.b32.xlu2 %v2187_v2, %s1853_s19  ;;  %852 = vrot.lane.b32.xlu1 %v2189_v3, %s1853_s19 }
  0xbc   : > { %850 = vrot.lane.b32.xlu0 %v2191_v4, %s1853_s19 }
  0xbd   : > { %v2199_v5 = vpop.permute.xlu2 %724  ;;  %v707_v6 = vpop.permute.xlu1 %706 }
  0xbe   : > { %v1200_v7 = vsel %vm459_vm0, %v589_v51, %v707_v6  ;;  %v703_v8 = vpop.permute.xlu0 %702 }
  0xc3   : > { %860 = vrot.lane.b32.xlu2 %v2202_v9, %s1853_s19  ;;  %858 = vrot.lane.b32.xlu1 %v603_v10, %s1853_s19 }
  0xc4   : > { %856 = vrot.lane.b32.xlu0 %v2204_v11, %s1853_s19 }
  0xc5   : > { %v2211_v12 = vpop.permute.xlu2 %730  ;;  %v709_v13 = vpop.permute.xlu1 %708 }
  0xc6   : > { %v1201_v14 = vsel %vm459_vm0, %v590_v56, %v709_v13  ;;  %v705_v15 = vpop.permute.xlu0 %704 }
  0xc7   : > { %v1199_v17 = vsel %vm459_vm0, %v542_v16, %v705_v15  ;;  %v541_v16 = vld [vmem:[#allocation2] sm:$0xff] }
  0xcb   : > { %898 = vrot.lane.b32.xlu2 %v2033_v21, %s1854_s22  ;;  %896 = vrot.lane.b32.xlu1 %v2044_v25, %s1854_s22 }
  0xcc   : > { %894 = vrot.lane.b32.xlu0 %v2035_v22, %s1854_s22  ;;  %v1202_v22 = vsel %vm459_vm0, %v2152_v55, %v711_v57 }
  0xcd   : > { %v769_v18 = vpop.permute.xlu2 %768  ;;  %v717_v19 = vpop.permute.xlu1 %716 }
  0xce   : > { %v2222_v20 = vsel %vm1214_vm2, %v1199_v17, %v769_v18  ;;  %v715_v23 = vpop.permute.xlu0 %714  ;;  %v1205_v51 = vsel %vm459_vm0, %v2161_v59, %v717_v19  ;;  %v1198_v17 = vsel %vm459_vm0, %v541_v16, %v703_v8 }
  0xd3   : > { %904 = vrot.lane.b32.xlu2 %v2053_v28, %s1854_s22  ;;  %902 = vrot.lane.b32.xlu1 %v2055_v29, %s1854_s22 }
  0xd4   : > { %900 = vrot.lane.b32.xlu0 %v2042_v24, %s1854_s22 }
  0xd5   : > { %v775_v25 = vpop.permute.xlu2 %774  ;;  %v723_v26 = vpop.permute.xlu1 %722 }
  0xd6   : > { %v2233_v36 = vsel %vm1214_vm2, %v1202_v22, %v775_v25  ;;  %v721_v37 = vpop.permute.xlu0 %720  ;;  %v1208_v18 = vsel %vm459_vm0, %v2175_v63, %v723_v26 }
  0xdb   : > { %910 = vrot.lane.b32.xlu2 %v2065_v31, %s1854_s22  ;;  %908 = vrot.lane.b32.xlu1 %v2067_v32, %s1854_s22 }
  0xdc   : > { %906 = vrot.lane.b32.xlu0 %v2051_v27, %s1854_s22 }
  0xdd   : > { %v781_v56 = vpop.permute.xlu2 %780  ;;  %v729_v57 = vpop.permute.xlu1 %728 }
  0xde   : > { %v2244_v6 = vsel %vm1214_vm2, %v1205_v51, %v781_v56  ;;  %v727_v13 = vpop.permute.xlu0 %726  ;;  %v1211_v8 = vsel %vm459_vm0, %v2189_v3, %v729_v57  ;;  %v1204_v57 = vsel %vm459_vm0, %v2163_v60, %v715_v23 }
  0xdf   : > { %v1210_v15 = vsel %vm459_vm0, %v2191_v4, %v727_v13 }
  0xe3   : > { %916 = vrot.lane.b32.xlu2 %v2077_v34, %s1854_s22  ;;  %914 = vrot.lane.b32.xlu1 %v2079_v35, %s1854_s22 }
  0xe4   : > { %912 = vrot.lane.b32.xlu0 %v2063_v30, %s1854_s22 }
  0xe5   : > { %v787_v19 = vpop.permute.xlu2 %786  ;;  %v767_v22 = vpop.permute.xlu1 %766 }
  0xe6   : > { %v2258_v25 = vsel %vm1214_vm2, %v1208_v18, %v787_v19  ;;  %v1215_v51 = vsel %vm1214_vm2, %v1198_v17, %v767_v22  ;;  %v733_v56 = vpop.permute.xlu0 %732 }
  0xeb   : > { %982 = vrot.lane.b32.xlu2 %v2143_v53, %s1855_s28  ;;  %974 = vrot.lane.b32.xlu1 %v2117_v45, %s1855_s28 }
  0xec   : > { %918 = vrot.lane.b32.xlu0 %v2075_v33, %s1854_s22 }
  0xed   : > { %v793_v26 = vpop.permute.xlu2 %792  ;;  %v773_v13 = vpop.permute.xlu1 %772 }
  0xee   : > { %v2270_v16 = vsel %vm1214_vm2, %v1211_v8, %v793_v26  ;;  %v1218_v17 = vsel %vm1214_vm2, %v1201_v14, %v773_v13  ;;  %v771_v18 = vpop.permute.xlu0 %770  ;;  %v2289_v13 = vld [vmem:[#allocation2 + $0xc2] sm:$0xff] }
  0xef   : > { %v1217_v19 = vsel %vm1214_vm2, %v1200_v7, %v771_v18  ;;  %v1203_v7 = vsel %vm459_vm0, %v2150_v54, %v2171_v61  ;;  %v1207_v61 = vsel %vm459_vm0, %v2177_v0, %v721_v37  ;;  %v1206_v18 = vsel %vm459_vm0, %v2159_v58, %v2185_v1 }
  0xf0   : > { %v1209_v1 = vsel %vm459_vm0, %v2173_v62, %v2199_v5 }
  0xf3   : > { %1102 = vrot.lane.b32.xlu2 %v2079_v35, %s1856_s29  ;;  %1046 = vrot.lane.b32.xlu1 %v603_v10, %s1857_s30 }
  0xf4   : > { %1038 = vrot.lane.b32.xlu0 %v2191_v4, %s1857_s30  ;;  %v2291_v4 = vld [vmem:[#allocation2 + $0xc1] sm:$0xff] }
  0xf5   : > { %v831_v22 = vpop.permute.xlu2 %830  ;;  %v779_v8 = vpop.permute.xlu1 %778 }
  0xf6   : > { %v2285_v14 = vsel %vm1231_vm3, %v1215_v51, %v831_v22  ;;  %v1221_v35 = vsel %vm1214_vm2, %v1204_v57, %v779_v8  ;;  %v777_v26 = vpop.permute.xlu0 %776 }
  0xf7   : > { %v1220_v10 = vsel %vm1214_vm2, %v1203_v7, %v777_v26 }
  0xfb   : > { %1174 = vrot.lane.b32.xlu2 %v2289_v13, %s1858_s8  ;;  %1166 = vrot.lane.b32.xlu1 %v2131_v49, %s1858_s8 }
  0xfc   : > { %1110 = vrot.lane.b32.xlu0 %v2291_v4, %s1856_s29 }
  0xfd   : > { %v837_v23 = vpop.permute.xlu2 %836  ;;  %v785_v51 = vpop.permute.xlu1 %784 }
  0xfe   : > { %v2305_v57 = vsel %vm1231_vm3, %v1218_v17, %v837_v23  ;;  %v1224_v22 = vsel %vm1214_vm2, %v1207_v61, %v785_v51  ;;  %v783_v8 = vpop.permute.xlu0 %782 }
  0xff   : > { %v1223_v7 = vsel %vm1214_vm2, %v1206_v18, %v783_v8 }
 0x103   : > { %920 = vrot.lane.b32.xlu2 %v2087_v38, %s1854_s22  ;;  %966 = vrot.lane.b32.xlu1 %v2107_v43, %s1855_s28 }
 0x104   : > { %958 = vrot.lane.b32.xlu0 %v2097_v41, %s1855_s28  ;;  %v1213_v41 = vsel %vm459_vm0, %v2204_v11, %v733_v56 }
 0x105   : > { %v843_v37 = vpop.permute.xlu2 %842  ;;  %v791_v26 = vpop.permute.xlu1 %790 }
 0x106   : > { %v2319_v17 = vsel %vm1231_vm3, %v1221_v35, %v843_v37  ;;  %v1227_v61 = vsel %vm1214_vm2, %v1210_v15, %v791_v26  ;;  %v789_v23 = vpop.permute.xlu0 %788  ;;  %v1212_v15 = vsel %vm459_vm0, %v2187_v2, %v2211_v12 }
 0x107   : > { %v1226_v51 = vsel %vm1214_vm2, %v1209_v1, %v789_v23 }
 0x10b   : > { %976 = vrot.lane.b32.xlu2 %v2133_v50, %s1855_s28  ;;  %1030 = vrot.lane.b32.xlu1 %v2159_v58, %s1857_s30 }
 0x10c   : > { %1022 = vrot.lane.b32.xlu0 %v2152_v55, %s1857_s30 }
 0x10d   : > { %v849_v5 = vpop.permute.xlu2 %848  ;;  %v797_v35 = vpop.permute.xlu1 %796 }
 0x10e   : > { %v2335_v18 = vsel %vm1231_vm3, %v1224_v22, %v849_v5  ;;  %v1230_v8 = vsel %vm1214_vm2, %v1213_v41, %v797_v35  ;;  %v795_v37 = vpop.permute.xlu0 %794  ;;  %v2363_v41 = vld [vmem:[#allocation2 + $0xc9] sm:$0xff] }
 0x10f   : > { %v1229_v58 = vsel %vm1214_vm2, %v1212_v15, %v795_v37  ;;  %v2381_v15 = vld [vmem:[#allocation2 + $0xca] sm:$0xff] }
 0x113   : > { %1094 = vrot.lane.b32.xlu2 %v2051_v27, %s1856_s29  ;;  %1086 = vrot.lane.b32.xlu1 %v2033_v21, %s1856_s29 }
 0x114   : > { %984 = vrot.lane.b32.xlu0 %v2141_v52, %s1855_s28 }
 0x115   : > { %v855_v55 = vpop.permute.xlu2 %854  ;;  %v835_v56 = vpop.permute.xlu1 %834 }
 0x116   : > { %v2346_v12 = vsel %vm1231_vm3, %v1227_v61, %v855_v55  ;;  %v1234_v22 = vsel %vm1231_vm3, %v1217_v19, %v835_v56  ;;  %v833_v26 = vpop.permute.xlu0 %832 }
 0x117   : > { %v1233_v1 = vsel %vm1231_vm3, %v2222_v20, %v833_v26 }
 0x11b   : > { %1150 = vrot.lane.b32.xlu2 %v2093_v39, %s1858_s8  ;;  %1048 = vrot.lane.b32.xlu1 %v2202_v9, %s1857_s30 }
 0x11c   : > { %1040 = vrot.lane.b32.xlu0 %v2189_v3, %s1857_s30 }
 0x11d   : > { %v861_v21 = vpop.permute.xlu2 %860  ;;  %v841_v27 = vpop.permute.xlu1 %840 }
 0x11e   : > { %v2358_v61 = vsel %vm1231_vm3, %v1230_v8, %v861_v21  ;;  %v1237_v19 = vsel %vm1231_vm3, %v1220_v10, %v841_v27  ;;  %v839_v23 = vpop.permute.xlu0 %838 }
 0x11f   : > { %v1236_v20 = vsel %vm1231_vm3, %v2233_v36, %v839_v23  ;;  %v1336_v23 = vld [vmem:[%s2770_s3 + $0x18] sm:$0xff] }
 0x123   : > { %1112 = vrot.lane.b32.xlu2 %v2363_v41, %s1856_s29  ;;  %1104 = vrot.lane.b32.xlu1 %v2077_v34, %s1856_s29 }
 0x124   : > { %1158 = vrot.lane.b32.xlu0 %v2121_v47, %s1858_s8 }
 0x125   : > { %v899_v3 = vpop.permute.xlu2 %898  ;;  %v847_v9 = vpop.permute.xlu1 %846 }
 0x126   : > { %v2372_v10 = vsel %vm1248_vm4, %v1234_v22, %v899_v3  ;;  %v2375_v5 = vsel %vm1231_vm3, %v1223_v7, %v847_v9  ;;  %v845_v36 = vpop.permute.xlu0 %844  ;;  %v1335_v3 = vld [vmem:[%s2770_s3 + $0x10] sm:$0xff] }
 0x127   : > { %v2379_v35 = vsel %vm1231_vm3, %v2244_v6, %v845_v36 }
 0x12b   : > { %960 = vrot.lane.b32.xlu2 %v2095_v40, %s1855_s28  ;;  %1176 = vrot.lane.b32.xlu1 %v2381_v15, %s1858_s8 }
 0x12c   : > { %1168 = vrot.lane.b32.xlu0 %v2129_v48, %s1858_s8 }
 0x12d   : > { %v905_v34 = vpop.permute.xlu2 %904  ;;  %v853_v8 = vpop.permute.xlu1 %852 }
 0x12e   : > { %v2390_v7 = vsel %vm1248_vm4, %v1237_v19, %v905_v34  ;;  %v1243_v37 = vsel %vm1231_vm3, %v1226_v51, %v853_v8  ;;  %v851_v6 = vpop.permute.xlu0 %850 }
 0x12f   : > { %v2395_v55 = vsel %vm1231_vm3, %v2258_v25, %v851_v6 }
 0x133   : > { %1024 = vrot.lane.b32.xlu2 %v2150_v54, %s1857_s30  ;;  %922 = vrot.lane.b32.xlu1 %v2291_v4, %s1854_s22 }
 0x134   : > { %968 = vrot.lane.b32.xlu0 %v2105_v42, %s1855_s28 }
 0x135   : > { %v2403_v40 = vpop.permute.xlu2 %910  ;;  %v859_v56 = vpop.permute.xlu1 %858 }
 0x136   : > { %v2406_v22 = vsel %vm1231_vm3, %v1229_v58, %v859_v56  ;;  %v857_v51 = vpop.permute.xlu0 %856  ;;  %v668_v56 = vld [vmem:[#allocation2 + $0xd9] sm:$0xff] }
 0x137   : > { %v2410_v25 = vsel %vm1231_vm3, %v2270_v16, %v857_v51  ;;  %v1341_v16 = vld [vmem:[%s2770_s3 + $0x40] sm:$0xff] }
 0x138   : > { %1734 = vmatpush.msra.mxu2 %v1341_v16  ;;  %1735 = vmatpush.msra.mxu3 %v1341_v16 }
 0x139   : > { %1402 = vmatpush.msra.mxu0 %v1341_v16  ;;  %1733 = vmatpush.msra.mxu1 %v1341_v16 }
 0x13b   : > { %986 = vrot.lane.b32.xlu2 %v2289_v13, %s1855_s28  ;;  %978 = vrot.lane.b32.xlu1 %v2131_v49, %s1855_s28  ;;  %v1340_v49 = vld [vmem:[%s2770_s3 + $0x38] sm:$0xff] }
 0x13c   : > { %1032 = vrot.lane.b32.xlu0 %v2177_v0, %s1857_s30  ;;  %1737 = vmatpush.msra.mxu2 %v1340_v49  ;;  %v1339_v0 = vld [vmem:[%s2770_s3 + $0x30] sm:$0xff] }
 0x13d   : > { %v917_v54 = vpop.permute.xlu2 %916  ;;  %v897_v4 = vpop.permute.xlu1 %896  ;;  %1738 = vmatpush.msra.mxu3 %v1340_v49  ;;  %1403 = vmatpush.msra.mxu0 %v1340_v49 }
 0x13e   : > { %v2419_v26 = vsel %vm1248_vm4, %v1243_v37, %v917_v54  ;;  %v2422_v58 = vsel %vm1248_vm4, %v1233_v1, %v897_v4  ;;  %v895_v21 = vpop.permute.xlu0 %894  ;;  %1736 = vmatpush.msra.mxu1 %v1340_v49  ;;  %1740 = vmatpush.msra.mxu2 %v1339_v0  ;;  %v1333_v37 = vld [vmem:[%s2770_s3] sm:$0xff] }
 0x13f   : > { %v2429_v13 = vsel %vm1248_vm4, %v2285_v14, %v895_v21  ;;  %v1338_v14 = vld [vmem:[%s2770_s3 + $0x28] sm:$0xff]  ;;  %1741 = vmatpush.msra.mxu3 %v1339_v0  ;;  %1404 = vmatpush.msra.mxu0 %v1339_v0  ;;  %v684_v21 = vld [vmem:[#allocation2 + $0xda] sm:$0xff] }
 0x140   : > { %1743 = vmatpush.msra.mxu2 %v1338_v14  ;;  %1739 = vmatpush.msra.mxu1 %v1339_v0 }
 0x141   : > { %1744 = vmatpush.msra.mxu3 %v1338_v14  ;;  %1405 = vmatpush.msra.mxu0 %v1338_v14 }
 0x142   : > { %1742 = vmatpush.msra.mxu1 %v1338_v14 }
 0x143   : > { %1042 = vrot.lane.b32.xlu2 %v2187_v2, %s1857_s30  ;;  %1096 = vrot.lane.b32.xlu1 %v2067_v32, %s1856_s29  ;;  %v1337_v32 = vld [vmem:[%s2770_s3 + $0x20] sm:$0xff] }
 0x144   : > { %1088 = vrot.lane.b32.xlu0 %v2042_v24, %s1856_s29  ;;  %1746 = vmatpush.msra.mxu2 %v1337_v32 }
 0x145   : > { %v2446_v1 = vpop.permute.xlu2 %982  ;;  %v903_v27 = vpop.permute.xlu1 %902  ;;  %1747 = vmatpush.msra.mxu3 %v1337_v32  ;;  %1406 = vmatpush.msra.mxu0 %v1337_v32 }
 0x146   : > { %v2449_v19 = vsel %vm1248_vm4, %v1236_v20, %v903_v27  ;;  %v901_v2 = vpop.permute.xlu0 %900  ;;  %v652_v20 = vld [vmem:[#allocation2 + $0xd8] sm:$0xff]  ;;  %1749 = vmatpush.msra.mxu2 %v1336_v23  ;;  %1745 = vmatpush.msra.mxu1 %v1337_v32 }
 0x147   : > { %v2456_v24 = vsel %vm1248_vm4, %v2305_v57, %v901_v2  ;;  %1750 = vmatpush.msra.mxu3 %v1336_v23  ;;  %v1334_v57 = vld [vmem:[%s2770_s3 + $0x8] sm:$0xff]  ;;  %1407 = vmatpush.msra.mxu0 %v1336_v23 }
 0x148   : > { %1752 = vmatpush.msra.mxu2 %v1335_v3  ;;  %1748 = vmatpush.msra.mxu1 %v1336_v23 }
 0x149   : > { %1753 = vmatpush.msra.mxu3 %v1335_v3  ;;  %1408 = vmatpush.msra.mxu0 %v1335_v3 }
 0x14a   : > { %1755 = vmatpush.msra.mxu2 %v1334_v57  ;;  %1751 = vmatpush.msra.mxu1 %v1335_v3 }
 0x14b   : > { %1160 = vrot.lane.b32.xlu2 %v2119_v46, %s1858_s8  ;;  %1152 = vrot.lane.b32.xlu1 %v2109_v44, %s1858_s8 }
 0x14c   : > { %1050 = vrot.lane.b32.xlu0 %v652_v20, %s1857_s30  ;;  %1756 = vmatpush.msra.mxu3 %v1334_v57 }
 0x14d   : > { %v1103_v9 = vpop.permute.xlu2 %1102  ;;  %v909_v36 = vpop.permute.xlu1 %908  ;;  %1758 = vmatpush.msra.mxu2 %v1333_v37  ;;  %1409 = vmatpush.msra.mxu0 %v1334_v57 }
 0x14e   : > { %v2474_v34 = vsel %vm1248_vm4, %v2379_v35, %v909_v36  ;;  %v907_v8 = vpop.permute.xlu0 %906  ;;  %1759 = vmatpush.msra.mxu3 %v1333_v37  ;;  %1754 = vmatpush.msra.mxu1 %v1334_v57  ;;  %v669_v57 = vld [vmem:[#allocation2 + $0xe1] sm:$0xff] }
 0x14f   : > { %v2481_v6 = vsel %vm1248_vm4, %v2319_v17, %v907_v8  ;;  %1410 = vmatpush.msra.mxu0 %v1333_v37 }
 0x150   : > { %1757 = vmatpush.msra.mxu1 %v1333_v37 }
 0x153   : > { %1170 = vrot.lane.b32.xlu2 %v2143_v53, %s1858_s8  ;;  %1114 = vrot.lane.b32.xlu1 %v668_v56, %s1856_s29 }
 0x154   : > { %1106 = vrot.lane.b32.xlu0 %v2075_v33, %s1856_s29 }
 0x155   : > { %v1175_v17 = vpop.permute.xlu2 %1174  ;;  %v915_v35 = vpop.permute.xlu1 %914 }
 0x156   : > { %v2490_v51 = vsel %vm1248_vm4, %v2395_v55, %v915_v35  ;;  %v913_v54 = vpop.permute.xlu0 %912  ;;  %v1257_v55 = vsel %vm1248_vm4, %v2375_v5, %v2403_v40 }
 0x157   : > { %v2494_v4 = vsel %vm1248_vm4, %v2335_v18, %v913_v54 }
 0x15b   : > { %970 = vrot.lane.b32.xlu2 %v2121_v47, %s1855_s28  ;;  %962 = vrot.lane.b32.xlu1 %v2093_v39, %s1855_s28 }
 0x15c   : > { %1178 = vrot.lane.b32.xlu0 %v684_v21, %s1858_s8 }
 0x15d   : > { %v2501_v33 = vpop.permute.xlu2 %920  ;;  %v975_v53 = vpop.permute.xlu1 %974 }
 0x15e   : > { %v919_v16 = vpop.permute.xlu0 %918  ;;  %v1274_v49 = vsel %vm1265_vm5, %v1257_v55, %v975_v53 }
 0x163   : > { %1034 = vrot.lane.b32.xlu2 %v2175_v63, %s1857_s30  ;;  %1026 = vrot.lane.b32.xlu1 %v2163_v60, %s1857_s30  ;;  %v1261_v63 = vsel %vm1248_vm4, %v2346_v12, %v919_v16 }
 0x164   : > { %924 = vrot.lane.b32.xlu0 %v2363_v41, %s1854_s22  ;;  %v1278_v41 = vsel %vm1265_vm5, %v1261_v63, %v2446_v1 }
 0x165   : > { %v2509_v18 = vpop.permute.xlu2 %976  ;;  %v1047_v47 = vpop.permute.xlu1 %1046 }
 0x166   : > { %v1039_v39 = vpop.permute.xlu0 %1038  ;;  %v1295_v0 = vsel %vm1282_vm6, %v1278_v41, %v1047_v47 }
 0x167   : > { %v1291_v60 = vsel %vm1282_vm6, %v1274_v49, %v1039_v39 }
 0x168   : > { %v1308_v12 = vsel %vm1299_vm7, %v1291_v60, %v1103_v9 }
 0x16b   : > { %988 = vrot.lane.b32.xlu1 %v2381_v15, %s1855_s28  ;;  %1090 = vrot.lane.b32.xlu2 %v2055_v29, %s1856_s29 }
 0x16c   : > { %980 = vrot.lane.b32.xlu0 %v2129_v48, %s1855_s28  ;;  %v653_v48 = vld [vmem:[#allocation2 + $0xe0] sm:$0xff] }
 0x16d   : > { %v1095_v5 = vpop.permute.xlu2 %1094  ;;  %v1167_v40 = vpop.permute.xlu1 %1166 }
 0x16e   : > { %v1111_v14 = vpop.permute.xlu0 %1110  ;;  %v1325_v15 = vsel %vm1316_vm8, %v1308_v12, %v1167_v40 }
 0x16f   : > { %v1312_v27 = vsel %vm1299_vm7, %v1295_v0, %v1111_v14  ;;  %1721 = vmatmul.msk.f32.vlgmr.msra.gmra.mxu2 %vm1346_vm9, %v1325_v15 }
 0x170   : > { %v1329_v29 = vsel %vm1316_vm8, %v1312_v27, %v1175_v17 }
 0x171   : > { %1725 = vmatmul.msk.f32.vlgmr.msra.gmra.mxu3 %vm1346_vm9, %v1329_v29 }
 0x173   : > { %1044 = vrot.lane.b32.xlu1 %v2204_v11, %s1857_s30  ;;  %1052 = vrot.lane.b32.xlu2 %v653_v48, %s1857_s30  ;;  %v685_v11 = vld [vmem:[#allocation2 + $0xe2] sm:$0xff] }
 0x174   : > { %1098 = vrot.lane.b32.xlu0 %v2065_v31, %s1856_s29 }
 0x175   : > { %v967_v1 = vpop.permute.xlu1 %966  ;;  %v1151_v32 = vpop.permute.xlu2 %1150 }
 0x176   : > { %v959_v2 = vpop.permute.xlu0 %958  ;;  %v1270_v37 = vsel %vm1265_vm5, %v2449_v19, %v967_v1  ;;  %v1262_v19 = vsel %vm1248_vm4, %v2410_v25, %v2501_v33 }
 0x177   : > { %v1266_v31 = vsel %vm1265_vm5, %v2429_v13, %v959_v2 }
 0x17b   : > { %1162 = vrot.lane.b32.xlu1 %v2117_v45, %s1858_s8  ;;  %1108 = vrot.lane.b32.xlu2 %v2087_v38, %s1856_s29 }
 0x17c   : > { %1154 = vrot.lane.b32.xlu0 %v2107_v43, %s1858_s8 }
 0x17d   : > { %v1031_v23 = vpop.permute.xlu1 %1030  ;;  %v1113_v3 = vpop.permute.xlu2 %1112 }
 0x17e   : > { %v1023_v20 = vpop.permute.xlu0 %1022  ;;  %v1287_v56 = vsel %vm1282_vm6, %v1270_v37, %v1031_v23 }
 0x17f   : > { %v1283_v38 = vsel %vm1282_vm6, %v1266_v31, %v1023_v20 }
 0x183   : > { %1172 = vrot.lane.b32.xlu1 %v2141_v52, %s1858_s8  ;;  %1180 = vrot.lane.b32.xlu2 %v685_v11, %s1858_s8 }
 0x184   : > { %1116 = vrot.lane.b32.xlu0 %v669_v57, %s1856_s29 }
 0x185   : > { %v1087_v45 = vpop.permute.xlu1 %1086  ;;  %v961_v8 = vpop.permute.xlu2 %960 }
 0x186   : > { %v1300_v43 = vsel %vm1299_vm7, %v1283_v38, %v1087_v45  ;;  %v985_v9 = vpop.permute.xlu0 %984  ;;  %v1267_v0 = vsel %vm1265_vm5, %v2422_v58, %v961_v8 }
 0x187   : > { %v1317_v36 = vsel %vm1316_vm8, %v1300_v43, %v1151_v32 }
 0x188   : > { %1713 = vmatmul.msk.f32.vlgmr.msra.gmra.mxu0 %vm1346_vm9, %v1317_v36 }
 0x18b   : > { %972 = vrot.lane.b32.xlu1 %v2119_v46, %s1855_s28  ;;  %1028 = vrot.lane.b32.xlu2 %v2161_v59, %s1857_s30 }
 0x18c   : > { %964 = vrot.lane.b32.xlu0 %v2109_v44, %s1855_s28  ;;  %v1304_v44 = vsel %vm1299_vm7, %v1287_v56, %v1095_v5 }
 0x18d   : > { %v1049_v52 = vpop.permute.xlu1 %1048  ;;  %v1025_v46 = vpop.permute.xlu2 %1024 }
 0x18e   : > { %v1041_v13 = vpop.permute.xlu0 %1040  ;;  %v1284_v14 = vsel %vm1282_vm6, %v1267_v0, %v1025_v46  ;;  %v2668_v0 = vld [vmem:[%s1948_s15 + $0x78] sm:$0xff] }
 0x193   : > { %1092 = vrot.lane.b32.xlu1 %v2053_v28, %s1856_s29  ;;  %1100 = vrot.lane.b32.xlu2 %v2063_v30, %s1856_s29  ;;  %v1279_v28 = vsel %vm1265_vm5, %v1262_v19, %v985_v9 }
 0x194   : > { %1036 = vrot.lane.b32.xlu0 %v2173_v62, %s1857_s30  ;;  %v1296_v30 = vsel %vm1282_vm6, %v1279_v28, %v1049_v52  ;;  %v1275_v62 = vsel %vm1265_vm5, %v2494_v4, %v2509_v18 }
 0x195   : > { %v1105_v59 = vpop.permute.xlu1 %1104  ;;  %v1292_v54 = vsel %vm1282_vm6, %v1275_v62, %v1041_v13  ;;  %v1313_v25 = vsel %vm1299_vm7, %v1296_v30, %v1113_v3  ;;  %v987_v47 = vpop.permute.xlu2 %986 }
 0x196   : > { %v1159_v17 = vpop.permute.xlu0 %1158  ;;  %v1309_v33 = vsel %vm1299_vm7, %v1292_v54, %v1105_v59 }
 0x197   : > { %v1321_v35 = vsel %vm1316_vm8, %v1304_v44, %v1159_v17 }
 0x198   : > { %1717 = vmatmul.msk.f32.vlgmr.msra.gmra.mxu1 %vm1346_vm9, %v1321_v35 }
 0x19b   : > { %1164 = vrot.lane.b32.xlu1 %v2133_v50, %s1858_s8 }
 0x19c   : > { %1156 = vrot.lane.b32.xlu0 %v2105_v42, %s1858_s8 }
 0x19d   : > { %v1177_v21 = vpop.permute.xlu1 %1176  ;;  %v1043_v42 = vpop.permute.xlu2 %1042 }
 0x19e   : > { %v1169_v53 = vpop.permute.xlu0 %1168  ;;  %v1330_v16 = vsel %vm1316_vm8, %v1313_v25, %v1177_v21  ;;  %v2630_v21 = vld [vmem:[%s2771_s4] ss:$0 sm:$0xff] }
 0x19f   : > { %v1326_v50 = vsel %vm1316_vm8, %v1309_v33, %v1169_v53  ;;  %1726 = vmatmul.msk.f32.gmra.mxu3 %vm1346_vm9, %v1330_v16  ;;  %v1468_v33 = vld [vmem:[%s1948_s15 + $0x40] sm:$0xff] }
 0x1a0   : > { %1722 = vmatmul.msk.f32.gmra.mxu2 %vm1346_vm9, %v1326_v50  ;;  %v1472_v50 = vld [vmem:[%s1948_s15 + $0x60] sm:$0xff] }
 0x1a5   : > { %v923_v4 = vpop.permute.xlu1 %922  ;;  %v1161_v49 = vpop.permute.xlu2 %1160 }
 0x1a6   : > { %v969_v18 = vpop.permute.xlu0 %968  ;;  %v1263_v3 = vsel %vm1248_vm4, %v2406_v22, %v923_v4  ;;  %v1460_v4 = vld [vmem:[%s1948_s15] sm:$0xff] }
 0x1a7   : > { %v1271_v63 = vsel %vm1265_vm5, %v2390_v7, %v969_v18  ;;  %v1280_v57 = vsel %vm1265_vm5, %v1263_v3, %v987_v47  ;;  %v1464_v18 = vld [vmem:[%s1948_s15 + $0x20] sm:$0xff] }
 0x1ad   : > { %v979_v39 = vpop.permute.xlu1 %978  ;;  %v1171_v15 = vpop.permute.xlu2 %1170 }
 0x1ae   : > { %v1033_v55 = vpop.permute.xlu0 %1032  ;;  %v1276_v1 = vsel %vm1265_vm5, %v2490_v51, %v979_v39  ;;  %v1473_v39 = vld [vmem:[%s1948_s15 + $0x68] sm:$0xff] }
 0x1af   : > { %v1288_v60 = vsel %vm1282_vm6, %v1271_v63, %v1033_v55  ;;  %v1293_v23 = vsel %vm1282_vm6, %v1276_v1, %v1043_v42  ;;  %v1469_v42 = vld [vmem:[%s1948_s15 + $0x48] sm:$0xff]  ;;  %v2654_v63 = vld [vmem:[%s1948_s15 + $0x70] sm:$0xff] }
 0x1b0   : > { %v2645_v55 = vld [vmem:[%s1948_s15 + $0x28] sm:$0xff] }
 0x1b5   : > { %v1097_v41 = vpop.permute.xlu1 %1096  ;;  %v971_v20 = vpop.permute.xlu2 %970 }
 0x1b6   : > { %v1305_v5 = vsel %vm1299_vm7, %v1288_v60, %v1097_v41  ;;  %v1089_v40 = vpop.permute.xlu0 %1088  ;;  %v1272_v17 = vsel %vm1265_vm5, %v2481_v6, %v971_v20  ;;  %v2659_v41 = vld [vmem:[%s1948_s15 + $0x10] sm:$0xff] }
 0x1b7   : > { %v1322_v12 = vsel %vm1316_vm8, %v1305_v5, %v1161_v49  ;;  %v1301_v27 = vsel %vm1299_vm7, %v1284_v14, %v1089_v40  ;;  %v2651_v49 = vld [vmem:[%s1948_s15 + $0x50] sm:$0xff]  ;;  %v2665_v40 = vld [vmem:[%s1948_s15 + $0x58] sm:$0xff] }
 0x1b8   : > { %1718 = vmatmul.msk.f32.gmra.mxu1 %vm1346_vm9, %v1322_v12  ;;  %v2662_v5 = vld [vmem:[%s1948_s15 + $0x30] sm:$0xff]  ;;  %v2671_v14 = vld [vmem:[%s1948_s15 + $0x18] sm:$0xff] }
 0x1bd   : > { %v1153_v29 = vpop.permute.xlu1 %1152  ;;  %v1035_v9 = vpop.permute.xlu2 %1034 }
 0x1be   : > { %v1051_v7 = vpop.permute.xlu0 %1050  ;;  %v1318_v48 = vsel %vm1316_vm8, %v1301_v27, %v1153_v29  ;;  %v1289_v35 = vsel %vm1282_vm6, %v1272_v17, %v1035_v9 }
 0x1bf   : > { %1714 = vmatmul.msk.f32.gmra.mxu0 %vm1346_vm9, %v1318_v48  ;;  %v1297_v31 = vsel %vm1282_vm6, %v1280_v57, %v1051_v7 }
 0x1c5   : > { %v1115_v2 = vpop.permute.xlu1 %1114  ;;  %v1091_v52 = vpop.permute.xlu2 %1090 }
 0x1c6   : > { %v1107_v32 = vpop.permute.xlu0 %1106  ;;  %v1314_v51 = vsel %vm1299_vm7, %v1297_v31, %v1115_v2 }
 0x1c7   : > { %v1310_v58 = vsel %vm1299_vm7, %v1293_v23, %v1107_v32 }
 0x1c8   : > { %v1327_v11 = vsel %vm1316_vm8, %v1310_v58, %v1171_v15  ;;  %v2674_v15 = vld [vmem:[%s1948_s15 + $0x38] sm:$0xff] }
 0x1c9   : > { %1723 = vmatmul.msk.f32.gmra.mxu2 %vm1346_vm9, %v1327_v11 }
 0x1cd   : > { %v963_v38 = vpop.permute.xlu1 %962  ;;  %v1053_v37 = vpop.permute.xlu2 %1052 }
 0x1ce   : > { %v1179_v45 = vpop.permute.xlu0 %1178  ;;  %v1268_v59 = vsel %vm1265_vm5, %v2372_v10, %v963_v38 }
 0x1cf   : > { %v1331_v43 = vsel %vm1316_vm8, %v1314_v51, %v1179_v45 }
 0x1d0   : > { %1727 = vmatmul.msk.f32.gmra.mxu3 %vm1346_vm9, %v1331_v43 }
 0x1d5   : > { %v1027_v36 = vpop.permute.xlu1 %1026  ;;  %v1109_v28 = vpop.permute.xlu2 %1108 }
 0x1d6   : > { %v925_v8 = vpop.permute.xlu0 %924  ;;  %v1285_v44 = vsel %vm1282_vm6, %v1268_v59, %v1027_v36 }
 0x1d7   : > { %v1302_v62 = vsel %vm1299_vm7, %v1285_v44, %v1091_v52  ;;  %v1264_v53 = vsel %vm1248_vm4, %v2358_v61, %v925_v8 }
 0x1dd   : > { %v989_v13 = vpop.permute.xlu1 %988  ;;  %v1181_v1 = vpop.permute.xlu2 %1180 }
 0x1de   : > { %v981_v22 = vpop.permute.xlu0 %980  ;;  %v1281_v61 = vsel %vm1265_vm5, %v1264_v53, %v989_v13 }
 0x1df   : > { %v1277_v25 = vsel %vm1265_vm5, %v2419_v26, %v981_v22  ;;  %v2648_v26 = vld [vmem:[%s1948_s15 + $0x8] sm:$0xff]  ;;  %v1298_v2 = vsel %vm1282_vm6, %v1281_v61, %v1053_v37 }
 0x1e5   : > { %v1045_v56 = vpop.permute.xlu1 %1044  ;;  %v1029_v31 = vpop.permute.xlu2 %1028 }
 0x1e6   : > { %v1099_v46 = vpop.permute.xlu0 %1098  ;;  %v1294_v16 = vsel %vm1282_vm6, %v1277_v25, %v1045_v56 }
 0x1e7   : > { %v1306_v19 = vsel %vm1299_vm7, %v1289_v35, %v1099_v46  ;;  %v1311_v27 = vsel %vm1299_vm7, %v1294_v16, %v1109_v28 }
 0x1ed   : > { %v1163_v30 = vpop.permute.xlu1 %1162  ;;  %v1101_v13 = vpop.permute.xlu2 %1100 }
 0x1ee   : > { %v1155_v54 = vpop.permute.xlu0 %1154  ;;  %v1323_v10 = vsel %vm1316_vm8, %v1306_v19, %v1163_v30 }
 0x1ef   : > { %v1319_v6 = vsel %vm1316_vm8, %v1302_v62, %v1155_v54  ;;  %1719 = vmatmul.msk.f32.gmra.mxu1 %vm1346_vm9, %v1323_v10 }
 0x1f0   : > { %1715 = vmatmul.msk.f32.gmra.mxu0 %vm1346_vm9, %v1319_v6 }
 0x1f2   : > { %v1436_v47 = vpop.f32.mrf.mxu2 }
 0x1f3   : > { %v1437_v60 = vadd.f32 %v2630_v21, %v1436_v47 }
 0x1f4   : > { %v1448_v12 = vpop.f32.mrf.mxu3 }
 0x1f5   : > { %v1484_v29 = vadd.f32 %v1468_v33, %v1437_v60  ;;  %v1449_v7 = vadd.f32 %v2630_v21, %v1448_v12  ;;  %v1173_v48 = vpop.permute.xlu1 %1172 }
 0x1f6   : > { %v1117_v32 = vpop.permute.xlu0 %1116  ;;  %v1328_v23 = vsel %vm1316_vm8, %v1311_v27, %v1173_v48 }
 0x1f7   : > { %v1488_v20 = vadd.f32 %v1472_v50, %v1449_v7  ;;  %v1315_v58 = vsel %vm1299_vm7, %v1298_v2, %v1117_v32  ;;  %1724 = vmatmul.msk.f32.gmra.mxu2 %vm1346_vm9, %v1328_v23  ;;  %1501 = vst.msk [vmem:[%s1964_s20 + $0x40] sm:$0xff] %vm1492_vm10, %v1484_v29 }
 0x1f8   : > { %v1332_v11 = vsel %vm1316_vm8, %v1315_v58, %v1181_v1 }
 0x1f9   : > { %1728 = vmatmul.msk.f32.gmra.mxu3 %vm1346_vm9, %v1332_v11  ;;  %1505 = vst.msk [vmem:[%s1964_s20 + $0x60] sm:$0xff] %vm1492_vm10, %v1488_v20 }
 0x1fd   : > { %v973_v3 = vpop.permute.xlu1 %972 }
 0x1fe   : > { %v965_v57 = vpop.permute.xlu0 %964  ;;  %v1273_v36 = vsel %vm1265_vm5, %v2474_v34, %v973_v3 }
 0x1ff   : > { %v1269_v8 = vsel %vm1265_vm5, %v2456_v24, %v965_v57 }
 0x200   : > { %v1286_v22 = vsel %vm1282_vm6, %v1269_v8, %v1029_v31 }
 0x205   : > { %v1093_v38 = vpop.permute.xlu1 %1092  ;;  %v1412_v51 = vpop.f32.mrf.mxu0 }
 0x206   : > { %v1037_v45 = vpop.permute.xlu0 %1036  ;;  %v1413_v43 = vadd.f32 %v2630_v21, %v1412_v51  ;;  %v1303_v46 = vsel %vm1299_vm7, %v1286_v22, %v1093_v38 }
 0x207   : > { %v1290_v52 = vsel %vm1282_vm6, %v1273_v36, %v1037_v45 }
 0x208   : > { %v1476_v9 = vadd.f32 %v1460_v4, %v1413_v43  ;;  %v1307_v37 = vsel %vm1299_vm7, %v1290_v52, %v1101_v13 }
 0x20a   : > { %1493 = vst.msk [vmem:[%s1964_s20] sm:$0xff] %vm1492_vm10, %v1476_v9 }
 0x20d   : > { %v1165_v56 = vpop.permute.xlu1 %1164 }
 0x20e   : > { %v1157_v59 = vpop.permute.xlu0 %1156  ;;  %v1324_v34 = vsel %vm1316_vm8, %v1307_v37, %v1165_v56 }
 0x20f   : > { %v1320_v24 = vsel %vm1316_vm8, %v1303_v46, %v1157_v59  ;;  %1720 = vmatmul.msk.f32.gmra.mxu1 %vm1346_vm9, %v1324_v34 }
 0x210   : > { %1716 = vmatmul.msk.f32.gmra.mxu0 %vm1346_vm9, %v1320_v24 }
 0x215   : > { %v1424_v17 = vpop.f32.mrf.mxu1 }
 0x216   : > { %v1425_v44 = vadd.f32 %v2630_v21, %v1424_v17 }
 0x218   : > { %v1480_v35 = vadd.f32 %v1464_v18, %v1425_v44 }
 0x21a   : > { %1497 = vst.msk [vmem:[%s1964_s20 + $0x20] sm:$0xff] %vm1492_vm10, %v1480_v35 }
 0x222   : > { %v1451_v19 = vpop.f32.mrf.mxu3 }
 0x223   : > { %v1439_v28 = vpop.f32.mrf.mxu2  ;;  %v1452_v30 = vadd.f32 %v2630_v21, %v1451_v19 }
 0x224   : > { %v1440_v62 = vadd.f32 %v2630_v21, %v1439_v28 }
 0x225   : > { %v1489_v54 = vadd.f32 %v1473_v39, %v1452_v30 }
 0x226   : > { %v1485_v10 = vadd.f32 %v1469_v42, %v1440_v62 }
 0x227   : > { %1506 = vst.msk [vmem:[%s1964_s20 + $0x68] sm:$0xff] %vm1492_vm10, %v1489_v54 }
 0x228   : > { %1502 = vst.msk [vmem:[%s1964_s20 + $0x48] sm:$0xff] %vm1492_vm10, %v1485_v10 }
 0x235   : > { %v1427_v6 = vpop.f32.mrf.mxu1 }
 0x236   : > { %v1428_v25 = vadd.f32 %v2630_v21, %v1427_v6 }
 0x238   : > { %v1481_v33 = vadd.f32 %v2645_v55, %v1428_v25 }
 0x23a   : > { %1498 = vst.msk [vmem:[%s1964_s20 + $0x28] sm:$0xff] %vm1492_vm10, %v1481_v33 }
 0x23c   : > { %v1415_v53 = vpop.f32.mrf.mxu0 }
 0x23d   : > { %v1416_v16 = vadd.f32 %v2630_v21, %v1415_v53 }
 0x23f   : > { %v1477_v47 = vadd.f32 %v2648_v26, %v1416_v16 }
 0x241   : > { %1494 = vst.msk [vmem:[%s1964_s20 + $0x8] sm:$0xff] %vm1492_vm10, %v1477_v47 }
 0x24c   : > { %v1442_v50 = vpop.f32.mrf.mxu2 }
 0x24d   : > { %v1443_v4 = vadd.f32 %v2630_v21, %v1442_v50 }
 0x24f   : > { %v1486_v18 = vadd.f32 %v2651_v49, %v1443_v4 }
 0x251   : > { %1503 = vst.msk [vmem:[%s1964_s20 + $0x50] sm:$0xff] %vm1492_vm10, %v1486_v18 }
 0x253   : > { %v1454_v42 = vpop.f32.mrf.mxu3 }
 0x254   : > { %v1455_v39 = vadd.f32 %v2630_v21, %v1454_v42 }
 0x256   : > { %v1490_v55 = vadd.f32 %v2654_v63, %v1455_v39 }
 0x258   : > { %1507 = vst.msk [vmem:[%s1964_s20 + $0x70] sm:$0xff] %vm1492_vm10, %v1490_v55 }
 0x26c   : > { %v1430_v26 = vpop.f32.mrf.mxu1 }
 0x26d   : > { %v1418_v61 = vpop.f32.mrf.mxu0  ;;  %v1431_v60 = vadd.f32 %v2630_v21, %v1430_v26 }
 0x26e   : > { %v1419_v12 = vadd.f32 %v2630_v21, %v1418_v61 }
 0x26f   : > { %v1482_v27 = vadd.f32 %v2662_v5, %v1431_v60 }
 0x270   : > { %v1478_v49 = vadd.f32 %v2659_v41, %v1419_v12 }
 0x271   : > { %1499 = vst.msk [vmem:[%s1964_s20 + $0x30] sm:$0xff] %vm1492_vm10, %v1482_v27 }
 0x272   : > { %1495 = vst.msk [vmem:[%s1964_s20 + $0x10] sm:$0xff] %vm1492_vm10, %v1478_v49 }
 0x27a   : > { %v1445_v63 = vpop.f32.mrf.mxu2 }
 0x27b   : > { %v1446_v29 = vadd.f32 %v2630_v21, %v1445_v63 }
 0x27c   : > { %v1457_v7 = vpop.f32.mrf.mxu3 }
 0x27d   : > { %v1487_v48 = vadd.f32 %v2665_v40, %v1446_v29  ;;  %v1458_v1 = vadd.f32 %v2630_v21, %v1457_v7 }
 0x27f   : > { %v1491_v2 = vadd.f32 %v2668_v0, %v1458_v1  ;;  %1504 = vst.msk [vmem:[%s1964_s20 + $0x58] sm:$0xff] %vm1492_vm10, %v1487_v48 }
 0x281   : > { %1508 = vst.msk [vmem:[%s1964_s20 + $0x78] sm:$0xff] %vm1492_vm10, %v1491_v2 }
 0x28c   : > { %v1433_v41 = vpop.f32.mrf.mxu1 }
 0x28d   : > { %v1421_v5 = vpop.f32.mrf.mxu0  ;;  %v1434_v32 = vadd.f32 %v2630_v21, %v1433_v41 }
 0x28e   : > { %v1422_v23 = vadd.f32 %v2630_v21, %v1421_v5 }
 0x28f   : > { %v1483_v20 = vadd.f32 %v2674_v15, %v1434_v32 }
 0x290   : > { %v1479_v58 = vadd.f32 %v2671_v14, %v1422_v23 }
 0x291   : > { %1500 = vst.msk [vmem:[%s1964_s20 + $0x38] sm:$0xff] %vm1492_vm10, %v1483_v20 }
 0x292   : > { %1496 = vst.msk [vmem:[%s1964_s20 + $0x18] sm:$0xff] %vm1492_vm10, %v1479_v58 }
 0x293 PF: > { %s16_s25 = sadd.s32 1, %s1848_s25   ;;  %s2775_s21 = smov %s1840_s23 }
 0x294   : > { %p13_p12 = scmp.ge.s32.totalorder %s16_s25, 6   ;;  %s2776_s22 = smov %s1844_s24 }
 0x295   : > { %s2777_s23 = smov %s2780_s26  ;;  %s2778_s24 = smov %s2784_s27 }
 0x296   :  { %15 = sbr.rel (!%p13_p12) target bundleno = 3 (0x3), region = 94 }

// kernel: rcan_a_forward.7
= control target key start
LH: loop header
LB: loop body
LE: loop exit
PB: predicated region body
PF: predicated region fallthrough
CT: control target
= control target key end

     0   :  { %s4634_s30 = smov 0   ;;  %s8011_s0 = inlined_call_operand.vmem [shape: f32[2,16,16,8], index: 0, kind: input, shape index: {}]   ;;  %s8012_s1 = inlined_call_operand.vmem [shape: f32[72,8], index: 1, kind: input, shape index: {}]   ;;  %s8013_s2 = inlined_call_operand.vmem [shape: f32[1,8], index: 2, kind: input, shape index: {}]   ;;  %s8014_s3 = inlined_call_operand.vmem [shape: f32[72,8], index: 3, kind: input, shape index: {}]   ;;  %s8015_s4 = inlined_call_operand.vmem [shape: f32[1,8], index: 4, kind: input, shape index: {}]   ;;  %s8016_s5 = inlined_call_operand.vmem [shape: f32[8,4], index: 5, kind: input, shape index: {}]   ;;  %s8017_s6 = inlined_call_operand.vmem [shape: f32[1,4], index: 6, kind: input, shape index: {}]   ;;  %s8018_s7 = inlined_call_operand.vmem [shape: f32[4,8], index: 7, kind: input, shape index: {}]   ;;  %s8019_s8 = inlined_call_operand.vmem [shape: f32[1,8], index: 8, kind: input, shape index: {}]   ;;  %s8020_s9 = inlined_call_operand.vmem [shape: f32[2,16,16,8], index: 9, kind: output, shape index: {}]  }
   0x1 LB: > { %s4411_s10 = sadd.s32 4294967295, %s4572_s30   ;;  %p4415_p0 = scmp.ge.s32.totalorder %s4572_s30, 1  ;;  %s4572_s30 = sphi %s4634_s30, %s19_s30  }
   0x2   : > { %p287_p1 = scmp.lt.s32.totalorder %s4572_s30, 3 }
   0x4   : > { %p288_p2 = pnand %p4415_p0, %p287_p1 }
   0x6   : > { %291 = sbr.rel (%p288_p2) target bundleno = 2266 (0x8da), region = 56 }
   0xb   : > { %vm365_vm0 = vcmask 64512   ;;  %v4574_v0 = vmov 0.0   ;;  %s4575_s11 = smov 8   ;;  %p323_p3 = scmp.lt.s32.totalorder %s4411_s10, 1  ;;  %vm368_vm1 = vcmask 58368   ;;  %vm1799_vm2 = vcmask 130048  }
   0xc   : > { %366 = vst.msk [vmem:[#allocation2] sm:$0xff] %vm365_vm0, %v4574_v0  ;;  %s4576_s16 = smov 16   ;;  %s4577_s17 = smov 24   ;;  %vm1832_vm3 = vcmask 195584   ;;  %vm1898_vm4 = vcmask 326656   ;;  %vm1865_vm5 = vcmask 261120  }
   0xd   : > { %367 = vst.msk [vmem:[#allocation2 + $0x8] sm:$0xff] %vm365_vm0, %v4574_v0  ;;  %s8527_s10 = smov (!%p323_p3, %s4411_s10), 1  ;;  %s4578_s18 = smov 32   ;;  %vm1931_vm6 = vcmask 392192   ;;  %vm1997_vm7 = vcmask 523264   ;;  %vm1964_vm8 = vcmask 457728  }
   0xe   : > { %370 = vst.msk [vmem:[#allocation2 + $0x18] sm:$0xff] %vm365_vm0, %v4574_v0  ;;  %s4490_s12 = sshll.u32 %s8527_s10, 8  ;;  %s4579_s19 = smov 40   ;;  %vm2043_vm9 = vcmask 588800   ;;  %vm4216_vm10 = vcmask 1043456   ;;  %vm4212_vm12 = vcmask 31744  }
   0xf   : > { %371 = vst.msk [vmem:[#allocation2 + $0x20] sm:$0xff] %vm365_vm0, %v4574_v0  ;;  %s4717_s15 = scalar_lea.vmem %s8011_s0, %s4490_s12  ;;  %s4580_s20 = smov 48  }
  0x10   : > { %373 = vst.msk [vmem:[#allocation2 + $0x30] sm:$0xff] %vm365_vm0, %v4574_v0  ;;  %v4726_v2 = vld [vmem:[%s4717_s15 + $0x10] sm:$0xff]  ;;  %v4731_v3 = vld [vmem:[%s4717_s15] sm:$0xff]  ;;  %v4781_v7 = vld [vmem:[%s4717_s15 + $0x18] sm:$0xff]  ;;  %s4581_s21 = smov 56   ;;  %s4582_s22 = smov 64  }
  0x11   : > { %374 = vst.msk [vmem:[#allocation2 + $0x38] sm:$0xff] %vm365_vm0, %v4574_v0  ;;  %v4786_v8 = vld [vmem:[%s4717_s15 + $0x8] sm:$0xff]  ;;  %v4791_v9 = vld [vmem:[%s4717_s15 + $0x20] sm:$0xff]  ;;  %v4796_v10 = vld [vmem:[%s4717_s15 + $0x30] sm:$0xff]  ;;  %s7856_s23 = scalar_lea.vmem %s8020_s9, %s4490_s12 }
  0x12   : > { %376 = vst.msk [vmem:[#allocation2 + $0x48] sm:$0xff] %vm365_vm0, %v4574_v0  ;;  %v4801_v11 = vld [vmem:[%s4717_s15 + $0x28] sm:$0xff]  ;;  %v4806_v12 = vld [vmem:[%s4717_s15 + $0x38] sm:$0xff]  ;;  %v4816_v14 = vld [vmem:[%s4717_s15 + $0x40] sm:$0xff] }
  0x13   : > { %377 = vst.msk [vmem:[#allocation2 + $0x50] sm:$0xff] %vm365_vm0, %v4574_v0  ;;  %v4811_v13 = vld [vmem:[%s4717_s15 + $0x48] sm:$0xff]  ;;  %v4821_v15 = vld [vmem:[%s4717_s15 + $0x50] sm:$0xff]  ;;  %v4826_v16 = vld [vmem:[%s4717_s15 + $0x60] sm:$0xff] }
  0x14   : > { %v486_v1 = vld [vmem:[#allocation2 + $0x1] sm:$0xff]  ;;  %379 = vst.msk [vmem:[#allocation2 + $0x60] sm:$0xff] %vm365_vm0, %v4574_v0  ;;  %v4833_v18 = vld [vmem:[%s4717_s15 + $0x58] sm:$0xff]  ;;  %v4858_v23 = vld [vmem:[%s4717_s15 + $0x70] sm:$0xff] }
  0x15   : > { %775 = vrot.lane.b32.xlu0 %v486_v1, %s4575_s11  ;;  %380 = vst.msk [vmem:[#allocation2 + $0x68] sm:$0xff] %vm365_vm0, %v4574_v0  ;;  %v4842_v20 = vld [vmem:[%s4717_s15 + $0x68] sm:$0xff]  ;;  %v4851_v22 = vld [vmem:[%s4717_s15 + $0x78] sm:$0xff]  ;;  %v4863_v24 = vld [vmem:[%s4717_s15 + $0x80] sm:$0xff] }
  0x16   : > { %382 = vst.msk [vmem:[#allocation2 + $0x78] sm:$0xff] %vm365_vm0, %v4574_v0  ;;  %v4868_v25 = vld [vmem:[%s4717_s15 + $0x90] sm:$0xff]  ;;  %v4875_v27 = vld [vmem:[%s4717_s15 + $0x88] sm:$0xff]  ;;  %v4882_v29 = vld [vmem:[%s4717_s15 + $0x98] sm:$0xff] }
  0x17   : > { %383 = vst.msk [vmem:[#allocation2 + $0x80] sm:$0xff] %vm365_vm0, %v4574_v0  ;;  %v4893_v31 = vld [vmem:[%s4717_s15 + $0xa8] sm:$0xff]  ;;  %v4896_v32 = vld [vmem:[%s4717_s15 + $0xa0] sm:$0xff]  ;;  %v4907_v33 = vld [vmem:[%s4717_s15 + $0xb0] sm:$0xff] }
  0x18   : > { %385 = vst.msk [vmem:[#allocation2 + $0x90] sm:$0xff] %vm365_vm0, %v4574_v0  ;;  %v4922_v37 = vld [vmem:[%s4717_s15 + $0xc0] sm:$0xff]  ;;  %v4925_v38 = vld [vmem:[%s4717_s15 + $0xb8] sm:$0xff]  ;;  %v4936_v39 = vld [vmem:[%s4717_s15 + $0xc8] sm:$0xff] }
  0x19   : > { %386 = vst.msk [vmem:[#allocation2 + $0x98] sm:$0xff] %vm365_vm0, %v4574_v0  ;;  %v4949_v43 = vld [vmem:[%s4717_s15 + $0xd8] sm:$0xff]  ;;  %v4952_v44 = vld [vmem:[%s4717_s15 + $0xd0] sm:$0xff]  ;;  %v4963_v45 = vld [vmem:[%s4717_s15 + $0xe0] sm:$0xff] }
  0x1a   : > { %388 = vst.msk [vmem:[#allocation2 + $0xa8] sm:$0xff] %vm365_vm0, %v4574_v0  ;;  %v4976_v49 = vld [vmem:[%s4717_s15 + $0xe8] sm:$0xff] }
  0x1b   : > { %389 = vst.msk [vmem:[#allocation2 + $0xb0] sm:$0xff] %vm365_vm0, %v4574_v0  ;;  %v518_v62 = vld [vmem:[#allocation2 + $0x2] sm:$0xff] }
  0x1c   : > { %391 = vst.msk [vmem:[#allocation2 + $0xc0] sm:$0xff] %vm365_vm0, %v4574_v0 }
  0x1d   : > { %392 = vst.msk [vmem:[#allocation2 + $0xc8] sm:$0xff] %vm365_vm0, %v4574_v0 }
  0x1e   : > { %394 = vst.msk [vmem:[#allocation2 + $0xd8] sm:$0xff] %vm365_vm0, %v4574_v0 }
  0x1f   : > { %395 = vst.msk [vmem:[#allocation2 + $0xe0] sm:$0xff] %vm365_vm0, %v4574_v0 }
  0x20   : > { %397 = vst.msk [vmem:[#allocation2 + $0xf0] sm:$0xff] %vm365_vm0, %v4574_v0 }
  0x21   : > { %398 = vst.msk [vmem:[#allocation2 + $0xf8] sm:$0xff] %vm365_vm0, %v4574_v0 }
  0x22   : > { %400 = vst.msk [vmem:[#allocation2 + $0x108] sm:$0xff] %vm365_vm0, %v4574_v0 }
  0x23   : > { %401 = vst.msk [vmem:[#allocation2 + $0x110] sm:$0xff] %vm365_vm0, %v4574_v0 }
  0x24   : > { %403 = vst.msk [vmem:[#allocation2 + $0x120] sm:$0xff] %vm365_vm0, %v4574_v0 }
  0x25   : > { %404 = vst.msk [vmem:[#allocation2 + $0x128] sm:$0xff] %vm365_vm0, %v4574_v0 }
  0x26   : > { %406 = vst.msk [vmem:[#allocation2 + $0x138] sm:$0xff] %vm365_vm0, %v4574_v0 }
  0x27   : > { %407 = vst.msk [vmem:[#allocation2 + $0x140] sm:$0xff] %vm365_vm0, %v4574_v0 }
  0x28   : > { %409 = vst.msk [vmem:[#allocation2 + $0x150] sm:$0xff] %vm365_vm0, %v4574_v0 }
  0x29   : > { %410 = vst.msk [vmem:[#allocation2 + $0x158] sm:$0xff] %vm365_vm0, %v4574_v0 }
  0x2a   : > { %412 = vst.msk [vmem:[#allocation2 + $0x168] sm:$0xff] %vm365_vm0, %v4574_v0 }
  0x2b   : > { %413 = vst.msk [vmem:[#allocation2 + $0x170] sm:$0xff] %vm365_vm0, %v4574_v0 }
  0x2c   : > { %415 = vst.msk [vmem:[#allocation2 + $0x180] sm:$0xff] %vm365_vm0, %v4574_v0 }
  0x2d   : > { %416 = vst.msk [vmem:[#allocation2 + $0x188] sm:$0xff] %vm365_vm0, %v4574_v0 }
  0x2e   : > { %8076 = vst [vmem:[#allocation3_spill] sm:$0xff] %v4726_v2 }
  0x2f   : > { %418 = vst.msk [vmem:[#allocation2 + $0x198] sm:$0xff] %vm365_vm0, %v4574_v0 }
  0x30   : > { %8077 = vst [vmem:[#allocation4_spill] sm:$0xff] %v4731_v3 }
  0x31   : > { %419 = vst.msk [vmem:[#allocation2 + $0x1a0] sm:$0xff] %vm365_vm0, %v4574_v0 }
  0x32   : > { %424 = vst.msk [vmem:[#allocation2 + $0x31] sm:$0xff] %vm365_vm0, %v4726_v2 }
  0x33   : > { %422 = vst.msk [vmem:[#allocation2 + $0x19] sm:$0xff] %vm365_vm0, %v4731_v3 }
  0x34   : > { %369 = vst.msk [vmem:[#allocation2 + $0x10] sm:$0x3] %vm368_vm1, %v4574_v0 }
  0x35   : > { %372 = vst.msk [vmem:[#allocation2 + $0x28] sm:$0x3] %vm368_vm1, %v4574_v0 }
  0x36   : > { %375 = vst.msk [vmem:[#allocation2 + $0x40] sm:$0x3] %vm368_vm1, %v4574_v0 }
  0x37   : > { %378 = vst.msk [vmem:[#allocation2 + $0x58] sm:$0x3] %vm368_vm1, %v4574_v0 }
  0x38   : > { %381 = vst.msk [vmem:[#allocation2 + $0x70] sm:$0x3] %vm368_vm1, %v4574_v0 }
  0x39   : > { %v4749_v4 = vld [vmem:[#allocation2 + $0x31] sm:$0xff]  ;;  %384 = vst.msk [vmem:[#allocation2 + $0x88] sm:$0x3] %vm368_vm1, %v4574_v0 }
  0x3a   : > { %783 = vrot.lane.b32.xlu2 %v4749_v4, %s4575_s11  ;;  %v4755_v5 = vld [vmem:[#allocation2 + $0x19] sm:$0xff]  ;;  %387 = vst.msk [vmem:[#allocation2 + $0xa0] sm:$0x3] %vm368_vm1, %v4574_v0 }
  0x3b   : > { %779 = vrot.lane.b32.xlu1 %v4755_v5, %s4575_s11  ;;  %v487_v6 = vld [vmem:[#allocation2 + $0x9] sm:$0xff]  ;;  %390 = vst.msk [vmem:[#allocation2 + $0xb8] sm:$0x3] %vm368_vm1, %v4574_v0 }
  0x3c   : > { %777 = vrot.lane.b32.xlu0 %v487_v6, %s4575_s11  ;;  %393 = vst.msk [vmem:[#allocation2 + $0xd0] sm:$0x3] %vm368_vm1, %v4574_v0 }
  0x3d   : > { %396 = vst.msk [vmem:[#allocation2 + $0xe8] sm:$0x3] %vm368_vm1, %v4574_v0 }
  0x3e   : > { %399 = vst.msk [vmem:[#allocation2 + $0x100] sm:$0x3] %vm368_vm1, %v4574_v0 }
  0x3f   : > { %402 = vst.msk [vmem:[#allocation2 + $0x118] sm:$0x3] %vm368_vm1, %v4574_v0 }
  0x40   : > { %405 = vst.msk [vmem:[#allocation2 + $0x130] sm:$0x3] %vm368_vm1, %v4574_v0 }
  0x41   : > { %408 = vst.msk [vmem:[#allocation2 + $0x148] sm:$0x3] %vm368_vm1, %v4574_v0 }
  0x42   : > { %411 = vst.msk [vmem:[#allocation2 + $0x160] sm:$0x3] %vm368_vm1, %v4574_v0 }
  0x43   : > { %414 = vst.msk [vmem:[#allocation2 + $0x178] sm:$0x3] %vm368_vm1, %v4574_v0 }
  0x44   : > { %8078 = vst [vmem:[#allocation5_spill] sm:$0xff] %v4781_v7 }
  0x45   : > { %417 = vst.msk [vmem:[#allocation2 + $0x190] sm:$0x3] %vm368_vm1, %v4574_v0 }
  0x46   : > { %8079 = vst [vmem:[#allocation6_spill] sm:$0xff] %v4786_v8 }
  0x47   : > { %420 = vst.msk [vmem:[#allocation2 + $0x1a8] sm:$0x3] %vm368_vm1, %v4574_v0  ;;  %v519_v0 = vld [vmem:[#allocation2 + $0xa] sm:$0xff] }
  0x48   : > { %8080 = vst [vmem:[#allocation7_spill] sm:$0xff] %v4791_v9 }
  0x49   : > { %425 = vst.msk [vmem:[#allocation2 + $0x39] sm:$0xff] %vm365_vm0, %v4781_v7 }
  0x4a   : > { %8081 = vst [vmem:[#allocation8_spill] sm:$0xff] %v4796_v10 }
  0x4b   : > { %423 = vst.msk [vmem:[#allocation2 + $0x21] sm:$0xff] %vm365_vm0, %v4786_v8 }
  0x4c   : > { %8082 = vst [vmem:[#allocation9_spill] sm:$0xff] %v4801_v11 }
  0x4d   : > { %426 = vst.msk [vmem:[#allocation2 + $0x49] sm:$0xff] %vm365_vm0, %v4791_v9 }
  0x4e   : > { %8083 = vst [vmem:[#allocation10_spill] sm:$0xff] %v4806_v12 }
  0x4f   : > { %428 = vst.msk [vmem:[#allocation2 + $0x61] sm:$0xff] %vm365_vm0, %v4796_v10 }
  0x50   : > { %8084 = vst [vmem:[#allocation11_spill] sm:$0xff] %v4811_v13  ;;  %v4828_v17 = vld [vmem:[#allocation2 + $0x39] sm:$0xff] }
  0x51   : > { %427 = vst.msk [vmem:[#allocation2 + $0x51] sm:$0xff] %vm365_vm0, %v4801_v11  ;;  %785 = vrot.lane.b32.xlu2 %v4828_v17, %s4575_s11 }
  0x52   : > { %8085 = vst [vmem:[#allocation12_spill] sm:$0xff] %v4816_v14  ;;  %v4837_v19 = vld [vmem:[#allocation2 + $0x21] sm:$0xff] }
  0x53   : > { %429 = vst.msk [vmem:[#allocation2 + $0x69] sm:$0xff] %vm365_vm0, %v4806_v12  ;;  %781 = vrot.lane.b32.xlu1 %v4837_v19, %s4575_s11  ;;  %v5038_v1 = vld [vmem:[#allocation2 + $0x22] sm:$0xff]  ;;  %v5040_v6 = vld [vmem:[#allocation2 + $0x1a] sm:$0xff] }
  0x54   : > { %8086 = vst [vmem:[#allocation13_spill] sm:$0xff] %v4821_v15  ;;  %v4846_v21 = vld [vmem:[#allocation2 + $0x49] sm:$0xff] }
  0x55   : > { %431 = vst.msk [vmem:[#allocation2 + $0x81] sm:$0xff] %vm365_vm0, %v4811_v13  ;;  %787 = vrot.lane.b32.xlu0 %v4846_v21, %s4575_s11 }
  0x56   : > { %8087 = vst [vmem:[#allocation14_spill] sm:$0xff] %v4826_v16  ;;  %v4870_v26 = vld [vmem:[#allocation2 + $0x61] sm:$0xff] }
  0x57   : > { %430 = vst.msk [vmem:[#allocation2 + $0x79] sm:$0xff] %vm365_vm0, %v4816_v14 }
  0x58   : > { %8088 = vst [vmem:[#allocation15_spill] sm:$0xff] %v4833_v18  ;;  %v4877_v28 = vld [vmem:[#allocation2 + $0x51] sm:$0xff] }
  0x59   : > { %432 = vst.msk [vmem:[#allocation2 + $0x91] sm:$0xff] %vm365_vm0, %v4821_v15  ;;  %791 = vrot.lane.b32.xlu2 %v4870_v26, %s4575_s11 }
  0x5a   : > { %8089 = vst [vmem:[#allocation16_spill] sm:$0xff] %v4842_v20  ;;  %v4884_v30 = vld [vmem:[#allocation2 + $0x69] sm:$0xff] }
  0x5b   : > { %434 = vst.msk [vmem:[#allocation2 + $0xa9] sm:$0xff] %vm365_vm0, %v4826_v16  ;;  %789 = vrot.lane.b32.xlu1 %v4877_v28, %s4575_s11 }
  0x5c   : > { %8090 = vst [vmem:[#allocation17_spill] sm:$0xff] %v4851_v22  ;;  %v4913_v34 = vld [vmem:[#allocation2 + $0x81] sm:$0xff] }
  0x5d   : > { %433 = vst.msk [vmem:[#allocation2 + $0x99] sm:$0xff] %vm365_vm0, %v4833_v18  ;;  %793 = vrot.lane.b32.xlu0 %v4884_v30, %s4575_s11 }
  0x5e   : > { %8091 = vst [vmem:[#allocation18_spill] sm:$0xff] %v4858_v23  ;;  %v4915_v35 = vld [vmem:[#allocation2 + $0x79] sm:$0xff] }
  0x5f   : > { %435 = vst.msk [vmem:[#allocation2 + $0xb1] sm:$0xff] %vm365_vm0, %v4842_v20 }
  0x60   : > { %8092 = vst [vmem:[#allocation19_spill] sm:$0xff] %v4863_v24  ;;  %v4917_v36 = vld [vmem:[#allocation2 + $0x91] sm:$0xff] }
  0x61   : > { %437 = vst.msk [vmem:[#allocation2 + $0xc9] sm:$0xff] %vm365_vm0, %v4851_v22  ;;  %797 = vrot.lane.b32.xlu2 %v4913_v34, %s4575_s11 }
  0x62   : > { %8093 = vst [vmem:[#allocation20_spill] sm:$0xff] %v4868_v25  ;;  %v4940_v40 = vld [vmem:[#allocation2 + $0xa9] sm:$0xff] }
  0x63   : > { %436 = vst.msk [vmem:[#allocation2 + $0xc1] sm:$0xff] %vm365_vm0, %v4858_v23  ;;  %795 = vrot.lane.b32.xlu1 %v4915_v35, %s4575_s11 }
  0x64   : > { %8094 = vst [vmem:[#allocation21_spill] sm:$0xff] %v4875_v27  ;;  %v4942_v41 = vld [vmem:[#allocation2 + $0x99] sm:$0xff] }
  0x65   : > { %438 = vst.msk [vmem:[#allocation2 + $0xd9] sm:$0xff] %vm365_vm0, %v4863_v24  ;;  %799 = vrot.lane.b32.xlu0 %v4917_v36, %s4575_s11 }
  0x66   : > { %8095 = vst [vmem:[#allocation22_spill] sm:$0xff] %v4882_v29  ;;  %v4944_v42 = vld [vmem:[#allocation2 + $0xb1] sm:$0xff] }
  0x67   : > { %440 = vst.msk [vmem:[#allocation2 + $0xf1] sm:$0xff] %vm365_vm0, %v4868_v25  ;;  %v5086_v25 = vld [vmem:[#allocation2 + $0x9a] sm:$0xff]  ;;  %v5100_v23 = vld [vmem:[#allocation2 + $0xb2] sm:$0xff]  ;;  %v5102_v20 = vld [vmem:[#allocation2 + $0xaa] sm:$0xff] }
  0x68   : > { %439 = vst.msk [vmem:[#allocation2 + $0xe1] sm:$0xff] %vm365_vm0, %v4875_v27  ;;  %v4967_v46 = vld [vmem:[#allocation2 + $0xc9] sm:$0xff] }
  0x69   : > { %8096 = vst [vmem:[#allocation23_spill] sm:$0xff] %v4893_v31  ;;  %803 = vrot.lane.b32.xlu2 %v4940_v40, %s4575_s11  ;;  %v5120_v12 = vld [vmem:[#allocation2 + $0xca] sm:$0xff] }
  0x6a   : > { %8097 = vst [vmem:[#allocation24_spill] sm:$0xff] %v4896_v32  ;;  %v4969_v47 = vld [vmem:[#allocation2 + $0xc1] sm:$0xff] }
  0x6b   : > { %441 = vst.msk [vmem:[#allocation2 + $0xf9] sm:$0xff] %vm365_vm0, %v4882_v29  ;;  %801 = vrot.lane.b32.xlu1 %v4942_v41, %s4575_s11  ;;  %v5084_v29 = vld [vmem:[#allocation2 + $0x82] sm:$0xff] }
  0x6c   : > { %443 = vst.msk [vmem:[#allocation2 + $0x111] sm:$0xff] %vm365_vm0, %v4893_v31  ;;  %v4971_v48 = vld [vmem:[#allocation2 + $0xd9] sm:$0xff]  ;;  %v5104_v16 = vld [vmem:[#allocation2 + $0xc2] sm:$0xff] }
  0x6d   : > { %8098 = vst [vmem:[#allocation25_spill] sm:$0xff] %v4907_v33  ;;  %805 = vrot.lane.b32.xlu0 %v4944_v42, %s4575_s11 }
  0x6e   : > { %442 = vst.msk [vmem:[#allocation2 + $0x109] sm:$0xff] %vm365_vm0, %v4896_v32  ;;  %v4984_v50 = vld [vmem:[#allocation2 + $0xf1] sm:$0xff] }
  0x6f   : > { %444 = vst.msk [vmem:[#allocation2 + $0x121] sm:$0xff] %vm365_vm0, %v4907_v33  ;;  %v4986_v51 = vld [vmem:[#allocation2 + $0xe1] sm:$0xff]  ;;  %v5082_v32 = vld [vmem:[#allocation2 + $0x92] sm:$0xff] }
  0x70   : > { %8099 = vst [vmem:[#allocation26_spill] sm:$0xff] %v4922_v37  ;;  %v5118_v14 = vld [vmem:[#allocation2 + $0xda] sm:$0xff]  ;;  %v5122_v10 = vld [vmem:[#allocation2 + $0xe2] sm:$0xff] }
  0x71   : > { %8100 = vst [vmem:[#allocation27_spill] sm:$0xff] %v4925_v38  ;;  %809 = vrot.lane.b32.xlu2 %v4967_v46, %s4575_s11 }
  0x72   : > { %446 = vst.msk [vmem:[#allocation2 + $0x139] sm:$0xff] %vm365_vm0, %v4922_v37  ;;  %v4988_v52 = vld [vmem:[#allocation2 + $0xf9] sm:$0xff]  ;;  %v5068_v37 = vld [vmem:[#allocation2 + $0x62] sm:$0xff] }
  0x73   : > { %445 = vst.msk [vmem:[#allocation2 + $0x129] sm:$0xff] %vm365_vm0, %v4925_v38  ;;  %807 = vrot.lane.b32.xlu1 %v4969_v47, %s4575_s11  ;;  %v4996_v53 = vld [vmem:[#allocation2 + $0x111] sm:$0xff]  ;;  %v5070_v38 = vld [vmem:[#allocation2 + $0x7a] sm:$0xff] }
  0x74   : > { %8101 = vst [vmem:[#allocation28_spill] sm:$0xff] %v4936_v39  ;;  %v5136_v2 = vld [vmem:[#allocation2 + $0xfa] sm:$0xff]  ;;  %v5138_v8 = vld [vmem:[#allocation2 + $0xf2] sm:$0xff] }
  0x75   : > { %447 = vst.msk [vmem:[#allocation2 + $0x141] sm:$0xff] %vm365_vm0, %v4936_v39  ;;  %811 = vrot.lane.b32.xlu0 %v4971_v48, %s4575_s11  ;;  %v4998_v54 = vld [vmem:[#allocation2 + $0x109] sm:$0xff] }
  0x76   : > { %8102 = vst [vmem:[#allocation29_spill] sm:$0xff] %v4949_v43  ;;  %v5000_v55 = vld [vmem:[#allocation2 + $0x121] sm:$0xff]  ;;  %v5066_v39 = vld [vmem:[#allocation2 + $0x6a] sm:$0xff] }
  0x77   : > { %8103 = vst [vmem:[#allocation30_spill] sm:$0xff] %v4952_v44  ;;  %v5140_v3 = vld [vmem:[#allocation2 + $0x10a] sm:$0xff] }
  0x78   : > { %449 = vst.msk [vmem:[#allocation2 + $0x159] sm:$0xff] %vm365_vm0, %v4949_v43  ;;  %v5056_v43 = vld [vmem:[#allocation2 + $0x52] sm:$0xff] }
  0x79   : > { %448 = vst.msk [vmem:[#allocation2 + $0x151] sm:$0xff] %vm365_vm0, %v4952_v44  ;;  %815 = vrot.lane.b32.xlu2 %v4984_v50, %s4575_s11  ;;  %v5008_v56 = vld [vmem:[#allocation2 + $0x139] sm:$0xff] }
  0x7a   : > { %8104 = vst [vmem:[#allocation31_spill] sm:$0xff] %v4963_v45  ;;  %v5010_v57 = vld [vmem:[#allocation2 + $0x129] sm:$0xff] }
  0x7b   : > { %450 = vst.msk [vmem:[#allocation2 + $0x169] sm:$0xff] %vm365_vm0, %v4963_v45  ;;  %813 = vrot.lane.b32.xlu1 %v4986_v51, %s4575_s11 }
  0x7c   : > { %8105 = vst [vmem:[#allocation32_spill] sm:$0xff] %v4976_v49  ;;  %v5012_v58 = vld [vmem:[#allocation2 + $0x141] sm:$0xff] }
  0x7d   : > { %451 = vst.msk [vmem:[#allocation2 + $0x171] sm:$0xff] %vm365_vm0, %v4976_v49  ;;  %817 = vrot.lane.b32.xlu0 %v4988_v52, %s4575_s11  ;;  %v5042_v49 = vld [vmem:[#allocation2 + $0x32] sm:$0xff] }
  0x7f   : > { %v5020_v59 = vld [vmem:[#allocation2 + $0x159] sm:$0xff] }
  0x80   : > { %v5022_v60 = vld [vmem:[#allocation2 + $0x151] sm:$0xff] }
  0x81   : > { %821 = vrot.lane.b32.xlu2 %v4996_v53, %s4575_s11 }
  0x82   : > { %v5024_v61 = vld [vmem:[#allocation2 + $0x169] sm:$0xff] }
  0x83   : > { %819 = vrot.lane.b32.xlu1 %v4998_v54, %s4575_s11 }
  0x84   : > { %v5032_v63 = vld [vmem:[#allocation2 + $0x171] sm:$0xff] }
  0x85   : > { %823 = vrot.lane.b32.xlu0 %v5000_v55, %s4575_s11 }
  0x87   : > { %v5074_v33 = vpop.permute.xlu0 %775 }
  0x88   : > { %8108 = vst [vmem:[#allocation35_spill] sm:$0xff] %v5074_v33  ;;  %v457_v33 = vld [vmem:[#allocation2 + $0x20] sm:$0xff] }
  0x89   : > { %827 = vrot.lane.b32.xlu2 %v5008_v56, %s4575_s11 }
  0x8b   : > { %825 = vrot.lane.b32.xlu1 %v5010_v57, %s4575_s11 }
  0x8d   : > { %829 = vrot.lane.b32.xlu0 %v5012_v58, %s4575_s11 }
  0x91   : > { %833 = vrot.lane.b32.xlu2 %v5020_v59, %s4575_s11 }
  0x93   : > { %831 = vrot.lane.b32.xlu1 %v5022_v60, %s4575_s11 }
  0x94   : > { %v5046_v45 = vpop.permute.xlu2 %783 }
  0x95   : > { %835 = vrot.lane.b32.xlu0 %v5024_v61, %s4575_s11  ;;  %8106 = vst [vmem:[#allocation33_spill] sm:$0xff] %v5046_v45  ;;  %v5176_v45 = vld [vmem:[#allocation2 + $0x152] sm:$0xff] }
  0x96   : > { %8126 = vst [vmem:[#allocation53_spill] sm:$0xff] %v5176_v45 }
  0x99   : > { %903 = vrot.lane.b32.xlu2 %v518_v62, %s4576_s16  ;;  %v5052_v62 = vld [vmem:[#allocation2 + $0x4a] sm:$0xff] }
  0x9b   : > { %837 = vrot.lane.b32.xlu1 %v5032_v63, %s4575_s11 }
  0x9d   : > { %905 = vrot.lane.b32.xlu0 %v519_v0, %s4576_s16  ;;  %v5054_v0 = vld [vmem:[#allocation2 + $0x3a] sm:$0xff] }
  0xa1   : > { %909 = vrot.lane.b32.xlu2 %v5038_v1, %s4576_s16 }
  0xa3   : > { %907 = vrot.lane.b32.xlu1 %v5040_v6, %s4576_s16 }
  0xa5   : > { %911 = vrot.lane.b32.xlu0 %v5042_v49, %s4576_s16 }
  0xa9   : > { %915 = vrot.lane.b32.xlu2 %v5052_v62, %s4576_s16 }
  0xab   : > { %913 = vrot.lane.b32.xlu1 %v5054_v0, %s4576_s16  ;;  %v5064_v44 = vpop.permute.xlu2 %785 }
  0xac   : > { %8107 = vst [vmem:[#allocation34_spill] sm:$0xff] %v5064_v44  ;;  %v5174_v44 = vld [vmem:[#allocation2 + $0x13a] sm:$0xff] }
  0xad   : > { %917 = vrot.lane.b32.xlu0 %v5056_v43, %s4576_s16  ;;  %v5092_v27 = vpop.permute.xlu1 %779 }
  0xae   : > { %8110 = vst [vmem:[#allocation37_spill] sm:$0xff] %v5092_v27  ;;  %v5098_v22 = vpop.permute.xlu0 %777  ;;  %v5192_v27 = vld [vmem:[#allocation2 + $0x15a] sm:$0xff] }
  0xaf   : > { %8112 = vst [vmem:[#allocation39_spill] sm:$0xff] %v5098_v22  ;;  %v5194_v22 = vld [vmem:[#allocation2 + $0x172] sm:$0xff] }
  0xb0   : > { %8131 = vst [vmem:[#allocation58_spill] sm:$0xff] %v5192_v27 }
  0xb1   : > { %921 = vrot.lane.b32.xlu2 %v5066_v39, %s4576_s16  ;;  %8132 = vst [vmem:[#allocation59_spill] sm:$0xff] %v5194_v22 }
  0xb3   : > { %919 = vrot.lane.b32.xlu1 %v5068_v37, %s4576_s16  ;;  %v5080_v31 = vpop.permute.xlu2 %791 }
  0xb4   : > { %8109 = vst [vmem:[#allocation36_spill] sm:$0xff] %v5080_v31  ;;  %v5156_v31 = vld [vmem:[#allocation2 + $0x112] sm:$0xff] }
  0xb5   : > { %923 = vrot.lane.b32.xlu0 %v5070_v38, %s4576_s16 }
  0xb9   : > { %927 = vrot.lane.b32.xlu2 %v5082_v32, %s4576_s16 }
  0xbb   : > { %925 = vrot.lane.b32.xlu1 %v5084_v29, %s4576_s16  ;;  %v5096_v24 = vpop.permute.xlu2 %797 }
  0xbc   : > { %8111 = vst [vmem:[#allocation38_spill] sm:$0xff] %v5096_v24 }
  0xbd   : > { %929 = vrot.lane.b32.xlu0 %v5086_v25, %s4576_s16 }
  0xc1   : > { %933 = vrot.lane.b32.xlu2 %v5100_v23, %s4576_s16 }
  0xc3   : > { %931 = vrot.lane.b32.xlu1 %v5102_v20, %s4576_s16  ;;  %v5112_v18 = vpop.permute.xlu2 %803 }
  0xc4   : > { %8113 = vst [vmem:[#allocation40_spill] sm:$0xff] %v5112_v18 }
  0xc5   : > { %935 = vrot.lane.b32.xlu0 %v5104_v16, %s4576_s16  ;;  %v5114_v15 = vpop.permute.xlu1 %781 }
  0xc6   : > { %8114 = vst [vmem:[#allocation41_spill] sm:$0xff] %v5114_v15  ;;  %v5190_v15 = vld [vmem:[#allocation2 + $0x16a] sm:$0xff] }
  0xc7   : > { %v5116_v13 = vpop.permute.xlu0 %787  ;;  %8130 = vst [vmem:[#allocation57_spill] sm:$0xff] %v5190_v15 }
  0xc8   : > { %8115 = vst [vmem:[#allocation42_spill] sm:$0xff] %v5116_v13  ;;  %v5172_v13 = vld [vmem:[#allocation2 + $0x142] sm:$0xff] }
  0xc9   : > { %939 = vrot.lane.b32.xlu2 %v5118_v14, %s4576_s16  ;;  %8125 = vst [vmem:[#allocation52_spill] sm:$0xff] %v5172_v13 }
  0xcb   : > { %937 = vrot.lane.b32.xlu1 %v5120_v12, %s4576_s16  ;;  %v5130_v11 = vpop.permute.xlu2 %809 }
  0xcc   : > { %8116 = vst [vmem:[#allocation43_spill] sm:$0xff] %v5130_v11 }
  0xcd   : > { %941 = vrot.lane.b32.xlu0 %v5122_v10, %s4576_s16  ;;  %v5132_v9 = vpop.permute.xlu1 %789 }
  0xce   : > { %8117 = vst [vmem:[#allocation44_spill] sm:$0xff] %v5132_v9  ;;  %v5158_v9 = vld [vmem:[#allocation2 + $0x12a] sm:$0xff] }
  0xcf   : > { %v5134_v7 = vpop.permute.xlu0 %793 }
  0xd0   : > { %8118 = vst [vmem:[#allocation45_spill] sm:$0xff] %v5134_v7  ;;  %v5154_v7 = vld [vmem:[#allocation2 + $0x122] sm:$0xff] }
  0xd1   : > { %945 = vrot.lane.b32.xlu2 %v5136_v2, %s4576_s16 }
  0xd3   : > { %943 = vrot.lane.b32.xlu1 %v5138_v8, %s4576_s16  ;;  %v5148_v18 = vpop.permute.xlu2 %815 }
  0xd4   : > { %8119 = vst [vmem:[#allocation46_spill] sm:$0xff] %v5148_v18 }
  0xd5   : > { %947 = vrot.lane.b32.xlu0 %v5140_v3, %s4576_s16  ;;  %v5150_v11 = vpop.permute.xlu1 %795 }
  0xd6   : > { %8120 = vst [vmem:[#allocation47_spill] sm:$0xff] %v5150_v11 }
  0xd7   : > { %v5152_v24 = vpop.permute.xlu0 %799 }
  0xd8   : > { %8121 = vst [vmem:[#allocation48_spill] sm:$0xff] %v5152_v24 }
  0xd9   : > { %951 = vrot.lane.b32.xlu2 %v5154_v7, %s4576_s16 }
  0xdb   : > { %949 = vrot.lane.b32.xlu1 %v5156_v31, %s4576_s16  ;;  %v5166_v18 = vpop.permute.xlu2 %821 }
  0xdc   : > { %8122 = vst [vmem:[#allocation49_spill] sm:$0xff] %v5166_v18 }
  0xdd   : > { %953 = vrot.lane.b32.xlu0 %v5158_v9, %s4576_s16  ;;  %v5168_v11 = vpop.permute.xlu1 %801 }
  0xde   : > { %8123 = vst [vmem:[#allocation50_spill] sm:$0xff] %v5168_v11 }
  0xdf   : > { %v5170_v24 = vpop.permute.xlu0 %805 }
  0xe0   : > { %8124 = vst [vmem:[#allocation51_spill] sm:$0xff] %v5170_v24 }
  0xe1   : > { %957 = vrot.lane.b32.xlu2 %v5172_v13, %s4576_s16  ;;  %v458_v13 = vld [vmem:[#allocation2 + $0x30] sm:$0xff] }
  0xe3   : > { %955 = vrot.lane.b32.xlu1 %v5174_v44, %s4576_s16  ;;  %v5184_v18 = vpop.permute.xlu2 %827 }
  0xe4   : > { %8127 = vst [vmem:[#allocation54_spill] sm:$0xff] %v5184_v18 }
  0xe5   : > { %959 = vrot.lane.b32.xlu0 %v5176_v45, %s4576_s16  ;;  %v5186_v11 = vpop.permute.xlu1 %807  ;;  %v456_v45 = vld [vmem:[#allocation2 + $0x18] sm:$0xff] }
  0xe6   : > { %8128 = vst [vmem:[#allocation55_spill] sm:$0xff] %v5186_v11 }
  0xe7   : > { %v5188_v24 = vpop.permute.xlu0 %811 }
  0xe8   : > { %8129 = vst [vmem:[#allocation56_spill] sm:$0xff] %v5188_v24 }
  0xe9   : > { %963 = vrot.lane.b32.xlu2 %v5190_v15, %s4576_s16 }
  0xeb   : > { %961 = vrot.lane.b32.xlu1 %v5192_v27, %s4576_s16  ;;  %v5202_v18 = vpop.permute.xlu2 %833 }
  0xec   : > { %8133 = vst [vmem:[#allocation60_spill] sm:$0xff] %v5202_v18  ;;  %v5217_v18 = vld [vmem:[#allocation2 + $0x48] sm:$0xff] }
  0xed   : > { %965 = vrot.lane.b32.xlu0 %v5194_v22, %s4576_s16  ;;  %v5204_v11 = vpop.permute.xlu1 %813  ;;  %8139 = vst [vmem:[#allocation66_spill] sm:$0xff] %v5217_v18 }
  0xee   : > { %8134 = vst [vmem:[#allocation61_spill] sm:$0xff] %v5204_v11  ;;  %v459_v11 = vld [vmem:[#allocation2 + $0x38] sm:$0xff] }
  0xef   : > { %v5206_v24 = vpop.permute.xlu0 %817 }
  0xf0   : > { %8135 = vst [vmem:[#allocation62_spill] sm:$0xff] %v5206_v24  ;;  %v5221_v24 = vld [vmem:[#allocation2 + $0x50] sm:$0xff] }
  0xf1   : > { %1033 = vrot.lane.b32.xlu2 %v457_v33, %s4577_s17  ;;  %8140 = vst [vmem:[#allocation67_spill] sm:$0xff] %v5221_v24 }
  0xf3   : > { %1031 = vrot.lane.b32.xlu1 %v456_v45, %s4577_s17  ;;  %v5211_v15 = vpop.permute.xlu2 %903 }
  0xf4   : > { %8136 = vst [vmem:[#allocation63_spill] sm:$0xff] %v5211_v15  ;;  %v5236_v15 = vld [vmem:[#allocation2 + $0x78] sm:$0xff] }
  0xf5   : > { %1035 = vrot.lane.b32.xlu0 %v458_v13, %s4577_s17  ;;  %v5213_v27 = vpop.permute.xlu1 %819  ;;  %8145 = vst [vmem:[#allocation72_spill] sm:$0xff] %v5236_v15 }
  0xf6   : > { %8137 = vst [vmem:[#allocation64_spill] sm:$0xff] %v5213_v27  ;;  %v462_v27 = vld [vmem:[#allocation2 + $0x60] sm:$0xff] }
  0xf7   : > { %v5215_v22 = vpop.permute.xlu0 %823 }
  0xf8   : > { %8138 = vst [vmem:[#allocation65_spill] sm:$0xff] %v5215_v22  ;;  %v5232_v22 = vld [vmem:[#allocation2 + $0x68] sm:$0xff] }
  0xf9   : > { %1039 = vrot.lane.b32.xlu2 %v5217_v18, %s4577_s17  ;;  %8144 = vst [vmem:[#allocation71_spill] sm:$0xff] %v5232_v22  ;;  %v5285_v18 = vld [vmem:[%s4717_s15 + $0xf8] sm:$0xff] }
  0xfa   : > { %8161 = vst [vmem:[#allocation88_spill] sm:$0xff] %v5285_v18 }
  0xfb   : > { %1037 = vrot.lane.b32.xlu1 %v459_v11, %s4577_s17  ;;  %v5226_v13 = vpop.permute.xlu2 %909  ;;  %453 = vst.msk [vmem:[#allocation2 + $0x189] sm:$0xff] %vm365_vm0, %v5285_v18 }
  0xfc   : > { %8141 = vst [vmem:[#allocation68_spill] sm:$0xff] %v5226_v13 }
  0xfd   : > { %1041 = vrot.lane.b32.xlu0 %v5221_v24, %s4577_s17  ;;  %v5228_v33 = vpop.permute.xlu1 %825  ;;  %v465_v24 = vld [vmem:[#allocation2 + $0x80] sm:$0xff] }
  0xfe   : > { %8142 = vst [vmem:[#allocation69_spill] sm:$0xff] %v5228_v33 }
  0xff   : > { %v5230_v45 = vpop.permute.xlu0 %829 }
 0x100   : > { %8143 = vst [vmem:[#allocation70_spill] sm:$0xff] %v5230_v45  ;;  %v5247_v45 = vld [vmem:[#allocation2 + $0x90] sm:$0xff] }
 0x101   : > { %1045 = vrot.lane.b32.xlu2 %v5232_v22, %s4577_s17  ;;  %8149 = vst [vmem:[#allocation76_spill] sm:$0xff] %v5247_v45  ;;  %v5251_v22 = vld [vmem:[#allocation2 + $0x98] sm:$0xff] }
 0x102   : > { %8150 = vst [vmem:[#allocation77_spill] sm:$0xff] %v5251_v22 }
 0x103   : > { %1043 = vrot.lane.b32.xlu1 %v462_v27, %s4577_s17  ;;  %v5241_v11 = vpop.permute.xlu2 %915 }
 0x104   : > { %8146 = vst [vmem:[#allocation73_spill] sm:$0xff] %v5241_v11  ;;  %v5262_v11 = vld [vmem:[#allocation2 + $0xb0] sm:$0xff] }
 0x105   : > { %1047 = vrot.lane.b32.xlu0 %v5236_v15, %s4577_s17  ;;  %v5243_v13 = vpop.permute.xlu1 %831  ;;  %8154 = vst [vmem:[#allocation81_spill] sm:$0xff] %v5262_v11  ;;  %v468_v15 = vld [vmem:[#allocation2 + $0xa8] sm:$0xff] }
 0x106   : > { %8147 = vst [vmem:[#allocation74_spill] sm:$0xff] %v5243_v13 }
 0x107   : > { %v5245_v33 = vpop.permute.xlu0 %835 }
 0x108   : > { %8148 = vst [vmem:[#allocation75_spill] sm:$0xff] %v5245_v33 }
 0x109   : > { %1051 = vrot.lane.b32.xlu2 %v5247_v45, %s4577_s17  ;;  %v5266_v45 = vld [vmem:[#allocation2 + $0xc0] sm:$0xff] }
 0x10a   : > { %8155 = vst [vmem:[#allocation82_spill] sm:$0xff] %v5266_v45 }
 0x10b   : > { %1049 = vrot.lane.b32.xlu1 %v465_v24, %s4577_s17  ;;  %v5256_v27 = vpop.permute.xlu2 %921 }
 0x10c   : > { %8151 = vst [vmem:[#allocation78_spill] sm:$0xff] %v5256_v27 }
 0x10d   : > { %1053 = vrot.lane.b32.xlu0 %v5251_v22, %s4577_s17  ;;  %v5258_v13 = vpop.permute.xlu1 %837  ;;  %v471_v22 = vld [vmem:[#allocation2 + $0xc8] sm:$0xff] }
 0x10e   : > { %8152 = vst [vmem:[#allocation79_spill] sm:$0xff] %v5258_v13 }
 0x10f   : > { %v5260_v33 = vpop.permute.xlu0 %905 }
 0x110   : > { %8153 = vst [vmem:[#allocation80_spill] sm:$0xff] %v5260_v33  ;;  %v5277_v33 = vld [vmem:[#allocation2 + $0xd8] sm:$0xff] }
 0x111   : > { %1057 = vrot.lane.b32.xlu2 %v5262_v11, %s4577_s17  ;;  %8159 = vst [vmem:[#allocation86_spill] sm:$0xff] %v5277_v33  ;;  %v5282_v11 = vld [vmem:[%s4717_s15 + $0xf0] sm:$0xff] }
 0x112   : > { %8160 = vst [vmem:[#allocation87_spill] sm:$0xff] %v5282_v11 }
 0x113   : > { %1055 = vrot.lane.b32.xlu1 %v468_v15, %s4577_s17  ;;  %v5271_v24 = vpop.permute.xlu2 %927  ;;  %v5287_v15 = vld [vmem:[#allocation2 + $0xe0] sm:$0xff]  ;;  %452 = vst.msk [vmem:[#allocation2 + $0x181] sm:$0xff] %vm365_vm0, %v5282_v11 }
 0x114   : > { %8156 = vst [vmem:[#allocation83_spill] sm:$0xff] %v5271_v24 }
 0x115   : > { %1059 = vrot.lane.b32.xlu0 %v5266_v45, %s4577_s17  ;;  %v5273_v27 = vpop.permute.xlu1 %907  ;;  %v474_v45 = vld [vmem:[#allocation2 + $0xf0] sm:$0xff] }
 0x116   : > { %8157 = vst [vmem:[#allocation84_spill] sm:$0xff] %v5273_v27 }
 0x117   : > { %v5275_v13 = vpop.permute.xlu0 %911 }
 0x118   : > { %8158 = vst [vmem:[#allocation85_spill] sm:$0xff] %v5275_v13 }
 0x119   : > { %1063 = vrot.lane.b32.xlu2 %v5277_v33, %s4577_s17  ;;  %v5302_v33 = vld [vmem:[#allocation2 + $0xf8] sm:$0xff] }
 0x11a   : > { %8165 = vst [vmem:[#allocation92_spill] sm:$0xff] %v5302_v33 }
 0x11b   : > { %1061 = vrot.lane.b32.xlu1 %v471_v22, %s4577_s17  ;;  %v5294_v24 = vpop.permute.xlu2 %933  ;;  %v5306_v22 = vld [vmem:[#allocation2 + $0x108] sm:$0xff] }
 0x11c   : > { %8162 = vst [vmem:[#allocation89_spill] sm:$0xff] %v5294_v24 }
 0x11d   : > { %1065 = vrot.lane.b32.xlu0 %v5287_v15, %s4577_s17  ;;  %v5298_v13 = vpop.permute.xlu1 %913  ;;  %8166 = vst [vmem:[#allocation93_spill] sm:$0xff] %v5306_v22 }
 0x11e   : > { %8163 = vst [vmem:[#allocation90_spill] sm:$0xff] %v5298_v13  ;;  %v477_v13 = vld [vmem:[#allocation2 + $0x110] sm:$0xff] }
 0x11f   : > { %v5300_v27 = vpop.permute.xlu0 %917 }
 0x120   : > { %8164 = vst [vmem:[#allocation91_spill] sm:$0xff] %v5300_v27  ;;  %v5317_v27 = vld [vmem:[#allocation2 + $0x120] sm:$0xff] }
 0x121   : > { %1069 = vrot.lane.b32.xlu2 %v5302_v33, %s4577_s17  ;;  %8170 = vst [vmem:[#allocation97_spill] sm:$0xff] %v5317_v27  ;;  %v5321_v33 = vld [vmem:[#allocation2 + $0x128] sm:$0xff] }
 0x122   : > { %8171 = vst [vmem:[#allocation98_spill] sm:$0xff] %v5321_v33 }
 0x123   : > { %1067 = vrot.lane.b32.xlu1 %v474_v45, %s4577_s17  ;;  %v5311_v11 = vpop.permute.xlu2 %939 }
 0x124   : > { %8167 = vst [vmem:[#allocation94_spill] sm:$0xff] %v5311_v11 }
 0x125   : > { %1071 = vrot.lane.b32.xlu0 %v5306_v22, %s4577_s17  ;;  %v5313_v18 = vpop.permute.xlu1 %919  ;;  %v5334_v22 = vld [vmem:[#allocation2 + $0x138] sm:$0xff] }
 0x126   : > { %8168 = vst [vmem:[#allocation95_spill] sm:$0xff] %v5313_v18 }
 0x127   : > { %v5315_v24 = vpop.permute.xlu0 %923  ;;  %8176 = vst [vmem:[#allocation103_spill] sm:$0xff] %v5334_v22 }
 0x128   : > { %8169 = vst [vmem:[#allocation96_spill] sm:$0xff] %v5315_v24  ;;  %v5332_v24 = vld [vmem:[#allocation2 + $0x140] sm:$0xff] }
 0x129   : > { %1075 = vrot.lane.b32.xlu2 %v5317_v27, %s4577_s17  ;;  %8175 = vst [vmem:[#allocation102_spill] sm:$0xff] %v5332_v24  ;;  %v5338_v27 = vld [vmem:[#allocation2 + $0x150] sm:$0xff] }
 0x12a   : > { %8177 = vst [vmem:[#allocation104_spill] sm:$0xff] %v5338_v27 }
 0x12b   : > { %1073 = vrot.lane.b32.xlu1 %v477_v13, %s4577_s17  ;;  %v5326_v45 = vpop.permute.xlu2 %945 }
 0x12c   : > { %8172 = vst [vmem:[#allocation99_spill] sm:$0xff] %v5326_v45 }
 0x12d   : > { %1077 = vrot.lane.b32.xlu0 %v5321_v33, %s4577_s17  ;;  %v5328_v11 = vpop.permute.xlu1 %925  ;;  %v5352_v33 = vld [vmem:[#allocation2 + $0x158] sm:$0xff] }
 0x12e   : > { %8173 = vst [vmem:[#allocation100_spill] sm:$0xff] %v5328_v11  ;;  %v5350_v11 = vld [vmem:[#allocation2 + $0x168] sm:$0xff] }
 0x12f   : > { %v5330_v18 = vpop.permute.xlu0 %929  ;;  %8181 = vst [vmem:[#allocation108_spill] sm:$0xff] %v5350_v11 }
 0x130   : > { %8174 = vst [vmem:[#allocation101_spill] sm:$0xff] %v5330_v18 }
 0x131   : > { %1081 = vrot.lane.b32.xlu2 %v5332_v24, %s4577_s17  ;;  %v5356_v24 = vld [vmem:[#allocation2 + $0x170] sm:$0xff] }
 0x133   : > { %1079 = vrot.lane.b32.xlu1 %v5334_v22, %s4577_s17  ;;  %v5344_v13 = vpop.permute.xlu2 %951  ;;  %v5370_v22 = vld [vmem:[#allocation2 + $0x180] sm:$0xff] }
 0x134   : > { %8178 = vst [vmem:[#allocation105_spill] sm:$0xff] %v5344_v13 }
 0x135   : > { %1083 = vrot.lane.b32.xlu0 %v5338_v27, %s4577_s17  ;;  %v5346_v45 = vpop.permute.xlu1 %931  ;;  %v5368_v27 = vld [vmem:[#allocation2 + $0x188] sm:$0xff] }
 0x136   : > { %8179 = vst [vmem:[#allocation106_spill] sm:$0xff] %v5346_v45 }
 0x137   : > { %v5348_v18 = vpop.permute.xlu0 %935  ;;  %8185 = vst [vmem:[#allocation112_spill] sm:$0xff] %v5368_v27 }
 0x138   : > { %8180 = vst [vmem:[#allocation107_spill] sm:$0xff] %v5348_v18 }
 0x139   : > { %1087 = vrot.lane.b32.xlu2 %v5350_v11, %s4577_s17 }
 0x13b   : > { %1085 = vrot.lane.b32.xlu1 %v5352_v33, %s4577_s17  ;;  %v5362_v13 = vpop.permute.xlu2 %957 }
 0x13c   : > { %8182 = vst [vmem:[#allocation109_spill] sm:$0xff] %v5362_v13 }
 0x13d   : > { %1089 = vrot.lane.b32.xlu0 %v5356_v24, %s4577_s17  ;;  %v5364_v45 = vpop.permute.xlu1 %937 }
 0x13e   : > { %8183 = vst [vmem:[#allocation110_spill] sm:$0xff] %v5364_v45 }
 0x13f   : > { %v5366_v18 = vpop.permute.xlu0 %941 }
 0x140   : > { %8184 = vst [vmem:[#allocation111_spill] sm:$0xff] %v5366_v18 }
 0x141   : > { %1093 = vrot.lane.b32.xlu2 %v5368_v27, %s4577_s17 }
 0x143   : > { %1091 = vrot.lane.b32.xlu1 %v5370_v22, %s4577_s17  ;;  %v5376_v11 = vpop.permute.xlu2 %963 }
 0x144   : > { %8186 = vst [vmem:[#allocation113_spill] sm:$0xff] %v5376_v11 }
 0x145   : > { %1159 = vrot.lane.b32.xlu0 %v4755_v5, %s4578_s18  ;;  %v5380_v13 = vpop.permute.xlu1 %943 }
 0x146   : > { %8187 = vst [vmem:[#allocation114_spill] sm:$0xff] %v5380_v13 }
 0x147   : > { %v5382_v45 = vpop.permute.xlu0 %947 }
 0x148   : > { %8188 = vst [vmem:[#allocation115_spill] sm:$0xff] %v5382_v45  ;;  %v657_v45 = vld [vmem:[#allocation2 + $0xa8] sm:$0xff] }
 0x149   : > { %1163 = vrot.lane.b32.xlu2 %v4749_v4, %s4578_s18 }
 0x14b   : > { %1161 = vrot.lane.b32.xlu1 %v4837_v19, %s4578_s18  ;;  %v5390_v18 = vpop.permute.xlu2 %1033 }
 0x14d   : > { %1165 = vrot.lane.b32.xlu0 %v4828_v17, %s4578_s18  ;;  %v5392_v11 = vpop.permute.xlu1 %949 }
 0x14e   : > { %8189 = vst [vmem:[#allocation116_spill] sm:$0xff] %v5392_v11  ;;  %v8241_v11 = vld [vmem:[#allocation71_spill] sm:$0xff] }
 0x14f   : > { %v5394_v27 = vpop.permute.xlu0 %953 }
 0x150   : > { %8190 = vst [vmem:[#allocation117_spill] sm:$0xff] %v5394_v27  ;;  %v8237_v27 = vld [vmem:[#allocation66_spill] sm:$0xff] }
 0x151   : > { %1169 = vrot.lane.b32.xlu2 %v4877_v28, %s4578_s18 }
 0x153   : > { %1167 = vrot.lane.b32.xlu1 %v4846_v21, %s4578_s18  ;;  %v5402_v4 = vpop.permute.xlu2 %1039 }
 0x155   : > { %1171 = vrot.lane.b32.xlu0 %v4870_v26, %s4578_s18  ;;  %v5404_v5 = vpop.permute.xlu1 %955 }
 0x156   : > { %8191 = vst [vmem:[#allocation118_spill] sm:$0xff] %v5404_v5  ;;  %v648_v5 = vld [vmem:[#allocation2 + $0x38] sm:$0xff] }
 0x157   : > { %v5406_v17 = vpop.permute.xlu0 %959 }
 0x158   : > { %8192 = vst [vmem:[#allocation119_spill] sm:$0xff] %v5406_v17 }
 0x159   : > { %1175 = vrot.lane.b32.xlu2 %v4915_v35, %s4578_s18 }
 0x15b   : > { %1173 = vrot.lane.b32.xlu1 %v4884_v30, %s4578_s18  ;;  %v5414_v19 = vpop.permute.xlu2 %1045 }
 0x15d   : > { %1177 = vrot.lane.b32.xlu0 %v4913_v34, %s4578_s18  ;;  %v5416_v21 = vpop.permute.xlu1 %961 }
 0x15e   : > { %8193 = vst [vmem:[#allocation120_spill] sm:$0xff] %v5416_v21 }
 0x15f   : > { %v5418_v26 = vpop.permute.xlu0 %965 }
 0x160   : > { %8194 = vst [vmem:[#allocation121_spill] sm:$0xff] %v5418_v26  ;;  %v5506_v26 = vld [vmem:[#allocation2 + $0x189] sm:$0xff] }
 0x161   : > { %1181 = vrot.lane.b32.xlu2 %v4942_v41, %s4578_s18 }
 0x163   : > { %1179 = vrot.lane.b32.xlu1 %v4917_v36, %s4578_s18  ;;  %v5426_v28 = vpop.permute.xlu2 %1051 }
 0x164   : > { %8195 = vst [vmem:[#allocation122_spill] sm:$0xff] %v5426_v28 }
 0x165   : > { %1183 = vrot.lane.b32.xlu0 %v4940_v40, %s4578_s18  ;;  %v5428_v30 = vpop.permute.xlu1 %1031 }
 0x167   : > { %v5430_v34 = vpop.permute.xlu0 %1035 }
 0x169   : > { %1187 = vrot.lane.b32.xlu2 %v4969_v47, %s4578_s18 }
 0x16b   : > { %1185 = vrot.lane.b32.xlu1 %v4944_v42, %s4578_s18  ;;  %v5438_v35 = vpop.permute.xlu2 %1057 }
 0x16c   : > { %8196 = vst [vmem:[#allocation123_spill] sm:$0xff] %v5438_v35  ;;  %v689_v35 = vld [vmem:[#allocation2 + $0xa9] sm:$0xff] }
 0x16d   : > { %1189 = vrot.lane.b32.xlu0 %v4967_v46, %s4578_s18  ;;  %v5440_v36 = vpop.permute.xlu1 %1037 }
 0x16f   : > { %v5442_v40 = vpop.permute.xlu0 %1041 }
 0x171   : > { %1193 = vrot.lane.b32.xlu2 %v4986_v51, %s4578_s18 }
 0x173   : > { %1191 = vrot.lane.b32.xlu1 %v4971_v48, %s4578_s18  ;;  %v5450_v41 = vpop.permute.xlu2 %1063 }
 0x174   : > { %8197 = vst [vmem:[#allocation124_spill] sm:$0xff] %v5450_v41  ;;  %v8312_v41 = vld [vmem:[#allocation63_spill] sm:$0xff] }
 0x175   : > { %1195 = vrot.lane.b32.xlu0 %v4984_v50, %s4578_s18  ;;  %v5452_v42 = vpop.permute.xlu1 %1043 }
 0x177   : > { %v5454_v46 = vpop.permute.xlu0 %1047 }
 0x179   : > { %1199 = vrot.lane.b32.xlu2 %v4998_v54, %s4578_s18 }
 0x17b   : > { %1197 = vrot.lane.b32.xlu1 %v4988_v52, %s4578_s18  ;;  %v5462_v47 = vpop.permute.xlu2 %1069 }
 0x17c   : > { %8198 = vst [vmem:[#allocation125_spill] sm:$0xff] %v5462_v47  ;;  %v686_v47 = vld [vmem:[#allocation2 + $0x81] sm:$0xff] }
 0x17d   : > { %1201 = vrot.lane.b32.xlu0 %v4996_v53, %s4578_s18  ;;  %v5464_v48 = vpop.permute.xlu1 %1049 }
 0x17f   : > { %v5466_v50 = vpop.permute.xlu0 %1053 }
 0x180   : > { %8199 = vst [vmem:[#allocation126_spill] sm:$0xff] %v5466_v50  ;;  %v726_v50 = vld [vmem:[#allocation2 + $0xe2] sm:$0xff] }
 0x181   : > { %1205 = vrot.lane.b32.xlu2 %v5010_v57, %s4578_s18  ;;  %v5492_v57 = vld [vmem:[#allocation2 + $0x181] sm:$0xff] }
 0x183   : > { %1203 = vrot.lane.b32.xlu1 %v5000_v55, %s4578_s18  ;;  %v5474_v51 = vpop.permute.xlu2 %1075 }
 0x184   : > { %8200 = vst [vmem:[#allocation127_spill] sm:$0xff] %v5474_v51  ;;  %v654_v51 = vld [vmem:[#allocation2 + $0x80] sm:$0xff] }
 0x185   : > { %1207 = vrot.lane.b32.xlu0 %v5008_v56, %s4578_s18  ;;  %v5476_v52 = vpop.permute.xlu1 %1055 }
 0x186   : > { %8201 = vst [vmem:[#allocation128_spill] sm:$0xff] %v5476_v52  ;;  %v699_v52 = vld [vmem:[#allocation2 + $0x121] sm:$0xff] }
 0x187   : > { %v5478_v53 = vpop.permute.xlu0 %1059 }
 0x188   : > { %8202 = vst [vmem:[#allocation129_spill] sm:$0xff] %v5478_v53  ;;  %v8266_v53 = vld [vmem:[#allocation104_spill] sm:$0xff] }
 0x189   : > { %1211 = vrot.lane.b32.xlu2 %v5022_v60, %s4578_s18 }
 0x18b   : > { %1209 = vrot.lane.b32.xlu1 %v5012_v58, %s4578_s18  ;;  %v5486_v54 = vpop.permute.xlu2 %1081 }
 0x18c   : > { %8203 = vst [vmem:[#allocation130_spill] sm:$0xff] %v5486_v54  ;;  %v647_v54 = vld [vmem:[#allocation2 + $0x30] sm:$0xff] }
 0x18d   : > { %1213 = vrot.lane.b32.xlu0 %v5020_v59, %s4578_s18  ;;  %v5488_v55 = vpop.permute.xlu1 %1061 }
 0x18e   : > { %8204 = vst [vmem:[#allocation131_spill] sm:$0xff] %v5488_v55  ;;  %v8256_v55 = vld [vmem:[#allocation93_spill] sm:$0xff] }
 0x18f   : > { %v5490_v56 = vpop.permute.xlu0 %1065 }
 0x190   : > { %8205 = vst [vmem:[#allocation132_spill] sm:$0xff] %v5490_v56 }
 0x191   : > { %1217 = vrot.lane.b32.xlu2 %v5032_v63, %s4578_s18 }
 0x193   : > { %1215 = vrot.lane.b32.xlu1 %v5024_v61, %s4578_s18  ;;  %v5500_v58 = vpop.permute.xlu2 %1087 }
 0x194   : > { %8206 = vst [vmem:[#allocation133_spill] sm:$0xff] %v5500_v58 }
 0x195   : > { %1219 = vrot.lane.b32.xlu0 %v5492_v57, %s4578_s18  ;;  %v5502_v59 = vpop.permute.xlu1 %1067 }
 0x196   : > { %8207 = vst [vmem:[#allocation134_spill] sm:$0xff] %v5502_v59  ;;  %v698_v59 = vld [vmem:[#allocation2 + $0x111] sm:$0xff] }
 0x197   : > { %v5504_v60 = vpop.permute.xlu0 %1071 }
 0x198   : > { %8208 = vst [vmem:[#allocation135_spill] sm:$0xff] %v5504_v60 }
 0x199   : > { %1287 = vrot.lane.b32.xlu2 %v5040_v6, %s4579_s19 }
 0x19b   : > { %1221 = vrot.lane.b32.xlu1 %v5506_v26, %s4578_s18  ;;  %v5514_v61 = vpop.permute.xlu2 %1093 }
 0x19c   : > { %8209 = vst [vmem:[#allocation136_spill] sm:$0xff] %v5514_v61 }
 0x19d   : > { %1289 = vrot.lane.b32.xlu0 %v5038_v1, %s4579_s19  ;;  %v5516_v63 = vpop.permute.xlu1 %1073 }
 0x19e   : > { %8210 = vst [vmem:[#allocation137_spill] sm:$0xff] %v5516_v63  ;;  %v666_v63 = vld [vmem:[#allocation2 + $0x110] sm:$0xff] }
 0x19f   : > { %v5518_v21 = vpop.permute.xlu0 %1077 }
 0x1a0   : > { %8211 = vst [vmem:[#allocation138_spill] sm:$0xff] %v5518_v21  ;;  %v8240_v21 = vld [vmem:[#allocation67_spill] sm:$0xff] }
 0x1a1   : > { %1293 = vrot.lane.b32.xlu2 %v5054_v0, %s4579_s19 }
 0x1a3   : > { %1291 = vrot.lane.b32.xlu1 %v5042_v49, %s4579_s19  ;;  %v5526_v6 = vpop.permute.xlu2 %1163 }
 0x1a5   : > { %1295 = vrot.lane.b32.xlu0 %v5052_v62, %s4579_s19  ;;  %v5528_v58 = vpop.permute.xlu1 %1079 }
 0x1a6   : > { %8212 = vst [vmem:[#allocation139_spill] sm:$0xff] %v5528_v58 }
 0x1a7   : > { %v5530_v1 = vpop.permute.xlu0 %1083 }
 0x1a8   : > { %8213 = vst [vmem:[#allocation140_spill] sm:$0xff] %v5530_v1  ;;  %v5630_v1 = vld [vmem:[#allocation2 + $0x18a] sm:$0xff] }
 0x1a9   : > { %1299 = vrot.lane.b32.xlu2 %v5068_v37, %s4579_s19 }
 0x1ab   : > { %1297 = vrot.lane.b32.xlu1 %v5056_v43, %s4579_s19  ;;  %v5538_v0 = vpop.permute.xlu2 %1169 }
 0x1ad   : > { %1301 = vrot.lane.b32.xlu0 %v5066_v39, %s4579_s19  ;;  %v5540_v49 = vpop.permute.xlu1 %1085 }
 0x1ae   : > { %8214 = vst [vmem:[#allocation141_spill] sm:$0xff] %v5540_v49  ;;  %v5628_v49 = vld [vmem:[#allocation2 + $0x182] sm:$0xff] }
 0x1af   : > { %v5542_v62 = vpop.permute.xlu0 %1089 }
 0x1b0   : > { %8215 = vst [vmem:[#allocation142_spill] sm:$0xff] %v5542_v62  ;;  %v8228_v62 = vld [vmem:[#allocation53_spill] sm:$0xff] }
 0x1b1   : > { %1305 = vrot.lane.b32.xlu2 %v5084_v29, %s4579_s19 }
 0x1b3   : > { %1303 = vrot.lane.b32.xlu1 %v5070_v38, %s4579_s19  ;;  %v5550_v37 = vpop.permute.xlu2 %1175 }
 0x1b5   : > { %1307 = vrot.lane.b32.xlu0 %v5082_v32, %s4579_s19  ;;  %v5552_v43 = vpop.permute.xlu1 %1091 }
 0x1b6   : > { %8216 = vst [vmem:[#allocation143_spill] sm:$0xff] %v5552_v43  ;;  %v8227_v43 = vld [vmem:[#allocation58_spill] sm:$0xff] }
 0x1b7   : > { %v5554_v39 = vpop.permute.xlu0 %1159 }
 0x1b9   : > { %1311 = vrot.lane.b32.xlu2 %v5102_v20, %s4579_s19 }
 0x1bb   : > { %1309 = vrot.lane.b32.xlu1 %v5086_v25, %s4579_s19  ;;  %v5562_v29 = vpop.permute.xlu2 %1181 }
 0x1bc   : > { %8217 = vst [vmem:[#allocation144_spill] sm:$0xff] %v5562_v29  ;;  %v715_v29 = vld [vmem:[#allocation2 + $0x62] sm:$0xff] }
 0x1bd   : > { %1313 = vrot.lane.b32.xlu0 %v5100_v23, %s4579_s19  ;;  %v5564_v38 = vpop.permute.xlu1 %1161 }
 0x1bf   : > { %v5566_v32 = vpop.permute.xlu0 %1165 }
 0x1c1   : > { %1317 = vrot.lane.b32.xlu2 %v5120_v12, %s4579_s19 }
 0x1c3   : > { %1315 = vrot.lane.b32.xlu1 %v5104_v16, %s4579_s19  ;;  %v5574_v20 = vpop.permute.xlu2 %1187 }
 0x1c4   : > { %8218 = vst [vmem:[#allocation145_spill] sm:$0xff] %v5574_v20  ;;  %v8261_v20 = vld [vmem:[#allocation98_spill] sm:$0xff] }
 0x1c5   : > { %1319 = vrot.lane.b32.xlu0 %v5118_v14, %s4579_s19  ;;  %v5576_v25 = vpop.permute.xlu1 %1167 }
 0x1c7   : > { %v5578_v23 = vpop.permute.xlu0 %1171 }
 0x1c9   : > { %1323 = vrot.lane.b32.xlu2 %v5138_v8, %s4579_s19 }
 0x1cb   : > { %1321 = vrot.lane.b32.xlu1 %v5122_v10, %s4579_s19  ;;  %v5586_v12 = vpop.permute.xlu2 %1193 }
 0x1cc   : > { %8219 = vst [vmem:[#allocation146_spill] sm:$0xff] %v5586_v12  ;;  %v700_v12 = vld [vmem:[#allocation2 + $0x129] sm:$0xff] }
 0x1cd   : > { %1325 = vrot.lane.b32.xlu0 %v5136_v2, %s4579_s19  ;;  %v5588_v16 = vpop.permute.xlu1 %1173 }
 0x1cf   : > { %v5590_v14 = vpop.permute.xlu0 %1177 }
 0x1d1   : > { %1329 = vrot.lane.b32.xlu2 %v5156_v31, %s4579_s19  ;;  %v8223_v31 = vld [vmem:[#allocation52_spill] sm:$0xff] }
 0x1d3   : > { %1327 = vrot.lane.b32.xlu1 %v5140_v3, %s4579_s19  ;;  %v5598_v8 = vpop.permute.xlu2 %1199 }
 0x1d4   : > { %8220 = vst [vmem:[#allocation147_spill] sm:$0xff] %v5598_v8 }
 0x1d5   : > { %1331 = vrot.lane.b32.xlu0 %v5154_v7, %s4579_s19  ;;  %v5600_v10 = vpop.permute.xlu1 %1179 }
 0x1d6   : > { %8221 = vst [vmem:[#allocation148_spill] sm:$0xff] %v5600_v10  ;;  %v454_v10 = vld [vmem:[#allocation2] sm:$0xff] }
 0x1d7   : > { %v5602_v2 = vpop.permute.xlu0 %1183 }
 0x1d8   : > { %8222 = vst [vmem:[#allocation149_spill] sm:$0xff] %v5602_v2  ;;  %v712_v2 = vld [vmem:[#allocation2 + $0x3a] sm:$0xff] }
 0x1d9   : > { %1335 = vrot.lane.b32.xlu2 %v5174_v44, %s4579_s19  ;;  %v8229_v44 = vld [vmem:[#allocation57_spill] sm:$0xff] }
 0x1db   : > { %1333 = vrot.lane.b32.xlu1 %v5158_v9, %s4579_s19  ;;  %v5610_v61 = vpop.permute.xlu2 %1205 }
 0x1dc   : > { %8224 = vst [vmem:[#allocation52_spill] sm:$0xff] %v5610_v61 }
 0x1dd   : > { %1337 = vrot.lane.b32.xlu0 %v8223_v31, %s4579_s19  ;;  %v5612_v3 = vpop.permute.xlu1 %1185 }
 0x1de   : > { %8225 = vst [vmem:[#allocation150_spill] sm:$0xff] %v5612_v3  ;;  %v682_v3 = vld [vmem:[#allocation2 + $0x51] sm:$0xff] }
 0x1df   : > { %v5614_v7 = vpop.permute.xlu0 %1189 }
 0x1e0   : > { %8226 = vst [vmem:[#allocation151_spill] sm:$0xff] %v5614_v7  ;;  %v663_v7 = vld [vmem:[#allocation2 + $0xf0] sm:$0xff] }
 0x1e1   : > { %1341 = vrot.lane.b32.xlu2 %v8227_v43, %s4579_s19  ;;  %v8233_v43 = vld [vmem:[#allocation59_spill] sm:$0xff] }
 0x1e3   : > { %1339 = vrot.lane.b32.xlu1 %v8228_v62, %s4579_s19  ;;  %v5622_v17 = vpop.permute.xlu2 %1211 }
 0x1e4   : > { %8230 = vst [vmem:[#allocation58_spill] sm:$0xff] %v5622_v17 }
 0x1e5   : > { %1343 = vrot.lane.b32.xlu0 %v8229_v44, %s4579_s19  ;;  %v5624_v9 = vpop.permute.xlu1 %1191 }
 0x1e6   : > { %8231 = vst [vmem:[#allocation53_spill] sm:$0xff] %v5624_v9  ;;  %v736_v9 = vld [vmem:[#allocation2 + $0x15a] sm:$0xff] }
 0x1e7   : > { %v5626_v31 = vpop.permute.xlu0 %1195 }
 0x1e8   : > { %8232 = vst [vmem:[#allocation57_spill] sm:$0xff] %v5626_v31  ;;  %v696_v31 = vld [vmem:[#allocation2 + $0xf9] sm:$0xff] }
 0x1e9   : > { %1347 = vrot.lane.b32.xlu2 %v5628_v49, %s4579_s19 }
 0x1eb   : > { %1345 = vrot.lane.b32.xlu1 %v8233_v43, %s4579_s19  ;;  %v5638_v62 = vpop.permute.xlu2 %1217 }
 0x1ec   : > { %8234 = vst [vmem:[#allocation59_spill] sm:$0xff] %v5638_v62  ;;  %v651_v62 = vld [vmem:[#allocation2 + $0x60] sm:$0xff] }
 0x1ed   : > { %1349 = vrot.lane.b32.xlu0 %v5630_v1, %s4579_s19  ;;  %v5640_v44 = vpop.permute.xlu1 %1197 }
 0x1ee   : > { %8235 = vst [vmem:[#allocation152_spill] sm:$0xff] %v5640_v44  ;;  %v680_v44 = vld [vmem:[#allocation2 + $0x39] sm:$0xff] }
 0x1ef   : > { %v5642_v17 = vpop.permute.xlu0 %1201 }
 0x1f0   : > { %8236 = vst [vmem:[#allocation153_spill] sm:$0xff] %v5642_v17  ;;  %v660_v17 = vld [vmem:[#allocation2 + $0xc8] sm:$0xff] }
 0x1f1   : > { %1417 = vrot.lane.b32.xlu2 %v648_v5, %s4580_s20 }
 0x1f3   : > { %1415 = vrot.lane.b32.xlu1 %v647_v54, %s4580_s20  ;;  %v5648_v43 = vpop.permute.xlu2 %1287 }
 0x1f5   : > { %1419 = vrot.lane.b32.xlu0 %v8237_v27, %s4580_s20  ;;  %v5650_v58 = vpop.permute.xlu1 %1203 }
 0x1f6   : > { %8238 = vst [vmem:[#allocation66_spill] sm:$0xff] %v5650_v58 }
 0x1f7   : > { %v5652_v61 = vpop.permute.xlu0 %1207 }
 0x1f8   : > { %8239 = vst [vmem:[#allocation154_spill] sm:$0xff] %v5652_v61  ;;  %v8244_v61 = vld [vmem:[#allocation72_spill] sm:$0xff] }
 0x1f9   : > { %1423 = vrot.lane.b32.xlu2 %v651_v62, %s4580_s20  ;;  %v8245_v62 = vld [vmem:[#allocation76_spill] sm:$0xff] }
 0x1fb   : > { %1421 = vrot.lane.b32.xlu1 %v8240_v21, %s4580_s20  ;;  %v5659_v5 = vpop.permute.xlu2 %1293 }
 0x1fd   : > { %1425 = vrot.lane.b32.xlu0 %v8241_v11, %s4580_s20  ;;  %v5661_v54 = vpop.permute.xlu1 %1209 }
 0x1fe   : > { %8242 = vst [vmem:[#allocation67_spill] sm:$0xff] %v5661_v54 }
 0x1ff   : > { %v5663_v27 = vpop.permute.xlu0 %1213 }
 0x200   : > { %8243 = vst [vmem:[#allocation71_spill] sm:$0xff] %v5663_v27  ;;  %v8248_v27 = vld [vmem:[#allocation77_spill] sm:$0xff] }
 0x201   : > { %1429 = vrot.lane.b32.xlu2 %v654_v51, %s4580_s20  ;;  %v8249_v51 = vld [vmem:[#allocation81_spill] sm:$0xff] }
 0x203   : > { %1427 = vrot.lane.b32.xlu1 %v8244_v61, %s4580_s20  ;;  %v5670_v58 = vpop.permute.xlu2 %1299 }
 0x205   : > { %1431 = vrot.lane.b32.xlu0 %v8245_v62, %s4580_s20  ;;  %v5672_v21 = vpop.permute.xlu1 %1215 }
 0x206   : > { %8246 = vst [vmem:[#allocation72_spill] sm:$0xff] %v5672_v21 }
 0x207   : > { %v5674_v11 = vpop.permute.xlu0 %1219 }
 0x208   : > { %8247 = vst [vmem:[#allocation76_spill] sm:$0xff] %v5674_v11  ;;  %v8251_v11 = vld [vmem:[#allocation82_spill] sm:$0xff] }
 0x209   : > { %1435 = vrot.lane.b32.xlu2 %v657_v45, %s4580_s20  ;;  %v8252_v45 = vld [vmem:[#allocation86_spill] sm:$0xff] }
 0x20b   : > { %1433 = vrot.lane.b32.xlu1 %v8248_v27, %s4580_s20  ;;  %v5681_v54 = vpop.permute.xlu2 %1305 }
 0x20d   : > { %1437 = vrot.lane.b32.xlu0 %v8249_v51, %s4580_s20  ;;  %v5683_v61 = vpop.permute.xlu1 %1221 }
 0x20e   : > { %8250 = vst [vmem:[#allocation77_spill] sm:$0xff] %v5683_v61 }
 0x20f   : > { %v5685_v62 = vpop.permute.xlu0 %1289 }
 0x211   : > { %1441 = vrot.lane.b32.xlu2 %v660_v17, %s4580_s20  ;;  %v8254_v17 = vld [vmem:[#allocation92_spill] sm:$0xff] }
 0x213   : > { %1439 = vrot.lane.b32.xlu1 %v8251_v11, %s4580_s20  ;;  %v5692_v21 = vpop.permute.xlu2 %1311 }
 0x214   : > { %8253 = vst [vmem:[#allocation81_spill] sm:$0xff] %v5692_v21  ;;  %v711_v21 = vld [vmem:[#allocation2 + $0x32] sm:$0xff] }
 0x215   : > { %1443 = vrot.lane.b32.xlu0 %v8252_v45, %s4580_s20  ;;  %v5694_v27 = vpop.permute.xlu1 %1291 }
 0x217   : > { %v5696_v51 = vpop.permute.xlu0 %1295 }
 0x219   : > { %1447 = vrot.lane.b32.xlu2 %v663_v7, %s4580_s20  ;;  %v8257_v7 = vld [vmem:[#allocation97_spill] sm:$0xff] }
 0x21b   : > { %1445 = vrot.lane.b32.xlu1 %v5287_v15, %s4580_s20  ;;  %v5703_v61 = vpop.permute.xlu2 %1317 }
 0x21c   : > { %8255 = vst [vmem:[#allocation82_spill] sm:$0xff] %v5703_v61  ;;  %v8260_v61 = vld [vmem:[#allocation103_spill] sm:$0xff] }
 0x21d   : > { %1449 = vrot.lane.b32.xlu0 %v8254_v17, %s4580_s20  ;;  %v5705_v11 = vpop.permute.xlu1 %1297 }
 0x21f   : > { %v5707_v45 = vpop.permute.xlu0 %1301 }
 0x221   : > { %1453 = vrot.lane.b32.xlu2 %v666_v63, %s4580_s20  ;;  %v8262_v63 = vld [vmem:[#allocation102_spill] sm:$0xff] }
 0x223   : > { %1451 = vrot.lane.b32.xlu1 %v8256_v55, %s4580_s20  ;;  %v5714_v8 = vpop.permute.xlu2 %1323 }
 0x224   : > { %8258 = vst [vmem:[#allocation86_spill] sm:$0xff] %v5714_v8  ;;  %v692_v8 = vld [vmem:[#allocation2 + $0xc9] sm:$0xff] }
 0x225   : > { %1455 = vrot.lane.b32.xlu0 %v8257_v7, %s4580_s20  ;;  %v5716_v15 = vpop.permute.xlu1 %1303 }
 0x227   : > { %v5718_v17 = vpop.permute.xlu0 %1307 }
 0x228   : > { %8259 = vst [vmem:[#allocation92_spill] sm:$0xff] %v5718_v17  ;;  %v733_v17 = vld [vmem:[#allocation2 + $0x13a] sm:$0xff] }
 0x229   : > { %1459 = vrot.lane.b32.xlu2 %v8260_v61, %s4580_s20  ;;  %v8267_v61 = vld [vmem:[#allocation108_spill] sm:$0xff] }
 0x22b   : > { %1457 = vrot.lane.b32.xlu1 %v8261_v20, %s4580_s20  ;;  %v5726_v60 = vpop.permute.xlu2 %1329 }
 0x22c   : > { %8263 = vst [vmem:[#allocation93_spill] sm:$0xff] %v5726_v60 }
 0x22d   : > { %1461 = vrot.lane.b32.xlu0 %v8262_v63, %s4580_s20  ;;  %v5728_v55 = vpop.permute.xlu1 %1309 }
 0x22e   : > { %8264 = vst [vmem:[#allocation97_spill] sm:$0xff] %v5728_v55  ;;  %v714_v55 = vld [vmem:[#allocation2 + $0x52] sm:$0xff] }
 0x22f   : > { %v5730_v7 = vpop.permute.xlu0 %1313 }
 0x230   : > { %8265 = vst [vmem:[#allocation103_spill] sm:$0xff] %v5730_v7  ;;  %v677_v7 = vld [vmem:[#allocation2 + $0x198] sm:$0xff] }
 0x231   : > { %1465 = vrot.lane.b32.xlu2 %v5352_v33, %s4580_s20  ;;  %v8271_v33 = vld [vmem:[#allocation112_spill] sm:$0xff] }
 0x233   : > { %1463 = vrot.lane.b32.xlu1 %v8266_v53, %s4580_s20  ;;  %v5738_v13 = vpop.permute.xlu2 %1335 }
 0x234   : > { %8268 = vst [vmem:[#allocation98_spill] sm:$0xff] %v5738_v13  ;;  %v678_v13 = vld [vmem:[#allocation2 + $0x1a0] sm:$0xff] }
 0x235   : > { %1467 = vrot.lane.b32.xlu0 %v8267_v61, %s4580_s20  ;;  %v5740_v20 = vpop.permute.xlu1 %1315 }
 0x236   : > { %8269 = vst [vmem:[#allocation102_spill] sm:$0xff] %v5740_v20  ;;  %v679_v20 = vld [vmem:[#allocation2 + $0x31] sm:$0xff] }
 0x237   : > { %v5742_v63 = vpop.permute.xlu0 %1319 }
 0x238   : > { %8270 = vst [vmem:[#allocation104_spill] sm:$0xff] %v5742_v63  ;;  %v731_v63 = vld [vmem:[#allocation2 + $0x122] sm:$0xff] }
 0x239   : > { %1471 = vrot.lane.b32.xlu2 %v5370_v22, %s4580_s20 }
 0x23b   : > { %1469 = vrot.lane.b32.xlu1 %v5356_v24, %s4580_s20  ;;  %v5750_v60 = vpop.permute.xlu2 %1341 }
 0x23c   : > { %8272 = vst [vmem:[#allocation108_spill] sm:$0xff] %v5750_v60  ;;  %v681_v60 = vld [vmem:[#allocation2 + $0x49] sm:$0xff] }
 0x23d   : > { %1473 = vrot.lane.b32.xlu0 %v8271_v33, %s4580_s20  ;;  %v5752_v53 = vpop.permute.xlu1 %1321 }
 0x23e   : > { %8273 = vst [vmem:[#allocation112_spill] sm:$0xff] %v5752_v53  ;;  %v713_v53 = vld [vmem:[#allocation2 + $0x4a] sm:$0xff] }
 0x23f   : > { %v5754_v61 = vpop.permute.xlu0 %1325 }
 0x240   : > { %8274 = vst [vmem:[#allocation155_spill] sm:$0xff] %v5754_v61  ;;  %v683_v61 = vld [vmem:[#allocation2 + $0x61] sm:$0xff] }
 0x241   : > { %1477 = vrot.lane.b32.xlu2 %v678_v13, %s4580_s20 }
 0x243   : > { %1475 = vrot.lane.b32.xlu1 %v677_v7, %s4580_s20  ;;  %v5759_v24 = vpop.permute.xlu2 %1347 }
 0x244   : > { %8275 = vst [vmem:[#allocation156_spill] sm:$0xff] %v5759_v24  ;;  %v684_v24 = vld [vmem:[#allocation2 + $0x69] sm:$0xff] }
 0x245   : > { %1543 = vrot.lane.b32.xlu0 %v679_v20, %s4581_s21  ;;  %v5761_v22 = vpop.permute.xlu1 %1327 }
 0x246   : > { %8276 = vst [vmem:[#allocation157_spill] sm:$0xff] %v5761_v22  ;;  %v685_v22 = vld [vmem:[#allocation2 + $0x79] sm:$0xff] }
 0x247   : > { %v5763_v33 = vpop.permute.xlu0 %1331 }
 0x248   : > { %8277 = vst [vmem:[#allocation158_spill] sm:$0xff] %v5763_v33  ;;  %v687_v33 = vld [vmem:[#allocation2 + $0x91] sm:$0xff] }
 0x249   : > { %1547 = vrot.lane.b32.xlu2 %v681_v60, %s4581_s21 }
 0x24b   : > { %1545 = vrot.lane.b32.xlu1 %v680_v44, %s4581_s21  ;;  %v5768_v13 = vpop.permute.xlu2 %1417 }
 0x24d   : > { %1549 = vrot.lane.b32.xlu0 %v682_v3, %s4581_s21  ;;  %v5770_v7 = vpop.permute.xlu1 %1333 }
 0x24e   : > { %8278 = vst [vmem:[#allocation159_spill] sm:$0xff] %v5770_v7  ;;  %v688_v7 = vld [vmem:[#allocation2 + $0x99] sm:$0xff] }
 0x24f   : > { %v5772_v20 = vpop.permute.xlu0 %1337 }
 0x250   : > { %8279 = vst [vmem:[#allocation160_spill] sm:$0xff] %v5772_v20  ;;  %v690_v20 = vld [vmem:[#allocation2 + $0xb1] sm:$0xff] }
 0x251   : > { %1553 = vrot.lane.b32.xlu2 %v684_v24, %s4581_s21 }
 0x253   : > { %1551 = vrot.lane.b32.xlu1 %v683_v61, %s4581_s21  ;;  %v5777_v60 = vpop.permute.xlu2 %1423 }
 0x255   : > { %1555 = vrot.lane.b32.xlu0 %v685_v22, %s4581_s21  ;;  %v5779_v44 = vpop.permute.xlu1 %1339 }
 0x256   : > { %8280 = vst [vmem:[#allocation161_spill] sm:$0xff] %v5779_v44  ;;  %v691_v44 = vld [vmem:[#allocation2 + $0xc1] sm:$0xff] }
 0x257   : > { %v5781_v3 = vpop.permute.xlu0 %1343 }
 0x258   : > { %8281 = vst [vmem:[#allocation162_spill] sm:$0xff] %v5781_v3  ;;  %v693_v3 = vld [vmem:[#allocation2 + $0xd9] sm:$0xff] }
 0x259   : > { %1559 = vrot.lane.b32.xlu2 %v687_v33, %s4581_s21 }
 0x25b   : > { %1557 = vrot.lane.b32.xlu1 %v686_v47, %s4581_s21  ;;  %v5786_v24 = vpop.permute.xlu2 %1429 }
 0x25d   : > { %1561 = vrot.lane.b32.xlu0 %v688_v7, %s4581_s21  ;;  %v5788_v61 = vpop.permute.xlu1 %1345 }
 0x25e   : > { %8282 = vst [vmem:[#allocation163_spill] sm:$0xff] %v5788_v61  ;;  %v694_v61 = vld [vmem:[#allocation2 + $0xe1] sm:$0xff] }
 0x25f   : > { %v5790_v22 = vpop.permute.xlu0 %1349 }
 0x260   : > { %8283 = vst [vmem:[#allocation164_spill] sm:$0xff] %v5790_v22  ;;  %v695_v22 = vld [vmem:[#allocation2 + $0xf1] sm:$0xff] }
 0x261   : > { %1565 = vrot.lane.b32.xlu2 %v690_v20, %s4581_s21 }
 0x263   : > { %1563 = vrot.lane.b32.xlu1 %v689_v35, %s4581_s21  ;;  %v5795_v33 = vpop.permute.xlu2 %1435 }
 0x264   : > { %8284 = vst [vmem:[#allocation165_spill] sm:$0xff] %v5795_v33 }
 0x265   : > { %1567 = vrot.lane.b32.xlu0 %v691_v44, %s4581_s21  ;;  %v5797_v47 = vpop.permute.xlu1 %1415 }
 0x267   : > { %v5799_v7 = vpop.permute.xlu0 %1419 }
 0x269   : > { %1571 = vrot.lane.b32.xlu2 %v693_v3, %s4581_s21 }
 0x26b   : > { %1569 = vrot.lane.b32.xlu1 %v692_v8, %s4581_s21  ;;  %v5804_v20 = vpop.permute.xlu2 %1441 }
 0x26c   : > { %8285 = vst [vmem:[#allocation166_spill] sm:$0xff] %v5804_v20  ;;  %v697_v20 = vld [vmem:[#allocation2 + $0x109] sm:$0xff] }
 0x26d   : > { %1573 = vrot.lane.b32.xlu0 %v694_v61, %s4581_s21  ;;  %v5806_v35 = vpop.permute.xlu1 %1421 }
 0x26f   : > { %v5808_v44 = vpop.permute.xlu0 %1425 }
 0x271   : > { %1575 = vrot.lane.b32.xlu2 %v695_v22, %s4581_s21 }
 0x273   : > { %1671 = vrot.lane.b32.xlu1 %v711_v21, %s4582_s22  ;;  %v5813_v3 = vpop.permute.xlu2 %1447 }
 0x274   : > { %8286 = vst [vmem:[#allocation167_spill] sm:$0xff] %v5813_v3  ;;  %v730_v3 = vld [vmem:[#allocation2 + $0x112] sm:$0xff] }
 0x275   : > { %1577 = vrot.lane.b32.xlu0 %v696_v31, %s4581_s21  ;;  %v5815_v8 = vpop.permute.xlu1 %1427 }
 0x277   : > { %v5817_v61 = vpop.permute.xlu0 %1431 }
 0x279   : > { %1579 = vrot.lane.b32.xlu2 %v697_v20, %s4581_s21 }
 0x27b   : > { %1673 = vrot.lane.b32.xlu1 %v712_v2, %s4582_s22  ;;  %v5822_v22 = vpop.permute.xlu2 %1453 }
 0x27c   : > { %8287 = vst [vmem:[#allocation168_spill] sm:$0xff] %v5822_v22  ;;  %v701_v22 = vld [vmem:[#allocation2 + $0x139] sm:$0xff] }
 0x27d   : > { %1581 = vrot.lane.b32.xlu0 %v698_v59, %s4581_s21  ;;  %v5824_v21 = vpop.permute.xlu1 %1433 }
 0x27f   : > { %v5826_v31 = vpop.permute.xlu0 %1437 }
 0x280   : > { %8288 = vst [vmem:[#allocation169_spill] sm:$0xff] %v5826_v31  ;;  %v702_v31 = vld [vmem:[#allocation2 + $0x141] sm:$0xff] }
 0x281   : > { %1583 = vrot.lane.b32.xlu2 %v699_v52, %s4581_s21 }
 0x283   : > { %1675 = vrot.lane.b32.xlu1 %v713_v53, %s4582_s22  ;;  %v5831_v20 = vpop.permute.xlu2 %1459 }
 0x284   : > { %8289 = vst [vmem:[#allocation170_spill] sm:$0xff] %v5831_v20  ;;  %v703_v20 = vld [vmem:[#allocation2 + $0x151] sm:$0xff] }
 0x285   : > { %1677 = vrot.lane.b32.xlu0 %v714_v55, %s4582_s22  ;;  %v5833_v2 = vpop.permute.xlu1 %1439 }
 0x286   : > { %8290 = vst [vmem:[#allocation171_spill] sm:$0xff] %v5833_v2  ;;  %v716_v2 = vld [vmem:[#allocation2 + $0x6a] sm:$0xff] }
 0x287   : > { %v5835_v59 = vpop.permute.xlu0 %1443 }
 0x288   : > { %8291 = vst [vmem:[#allocation172_spill] sm:$0xff] %v5835_v59  ;;  %v704_v59 = vld [vmem:[#allocation2 + $0x159] sm:$0xff] }
 0x289   : > { %1587 = vrot.lane.b32.xlu2 %v701_v22, %s4581_s21 }
 0x28b   : > { %1585 = vrot.lane.b32.xlu1 %v700_v12, %s4581_s21  ;;  %v5840_v52 = vpop.permute.xlu2 %1465 }
 0x28c   : > { %8292 = vst [vmem:[#allocation173_spill] sm:$0xff] %v5840_v52  ;;  %v717_v52 = vld [vmem:[#allocation2 + $0x7a] sm:$0xff] }
 0x28d   : > { %1679 = vrot.lane.b32.xlu0 %v715_v29, %s4582_s22  ;;  %v5842_v53 = vpop.permute.xlu1 %1445 }
 0x28e   : > { %8293 = vst [vmem:[#allocation174_spill] sm:$0xff] %v5842_v53  ;;  %v705_v53 = vld [vmem:[#allocation2 + $0x169] sm:$0xff] }
 0x28f   : > { %v5844_v55 = vpop.permute.xlu0 %1449 }
 0x290   : > { %8294 = vst [vmem:[#allocation175_spill] sm:$0xff] %v5844_v55  ;;  %v706_v55 = vld [vmem:[#allocation2 + $0x171] sm:$0xff] }
 0x291   : > { %1591 = vrot.lane.b32.xlu2 %v703_v20, %s4581_s21 }
 0x293   : > { %1589 = vrot.lane.b32.xlu1 %v702_v31, %s4581_s21  ;;  %v5849_v22 = vpop.permute.xlu2 %1471 }
 0x294   : > { %8295 = vst [vmem:[#allocation176_spill] sm:$0xff] %v5849_v22  ;;  %v718_v22 = vld [vmem:[#allocation2 + $0x82] sm:$0xff] }
 0x295   : > { %1681 = vrot.lane.b32.xlu0 %v716_v2, %s4582_s22  ;;  %v5851_v12 = vpop.permute.xlu1 %1451 }
 0x296   : > { %8296 = vst [vmem:[#allocation177_spill] sm:$0xff] %v5851_v12 }
 0x297   : > { %v5853_v29 = vpop.permute.xlu0 %1455 }
 0x298   : > { %8297 = vst [vmem:[#allocation178_spill] sm:$0xff] %v5853_v29  ;;  %v709_v29 = vld [vmem:[#allocation2 + $0x199] sm:$0xff] }
 0x299   : > { %1683 = vrot.lane.b32.xlu2 %v717_v52, %s4582_s22 }
 0x29b   : > { %1593 = vrot.lane.b32.xlu1 %v704_v59, %s4581_s21  ;;  %v5858_v20 = vpop.permute.xlu2 %1477 }
 0x29c   : > { %8298 = vst [vmem:[#allocation179_spill] sm:$0xff] %v5858_v20  ;;  %v719_v20 = vld [vmem:[#allocation2 + $0x92] sm:$0xff] }
 0x29d   : > { %1595 = vrot.lane.b32.xlu0 %v705_v53, %s4581_s21  ;;  %v5860_v31 = vpop.permute.xlu1 %1457 }
 0x29e   : > { %8299 = vst [vmem:[#allocation180_spill] sm:$0xff] %v5860_v31  ;;  %v720_v31 = vld [vmem:[#allocation2 + $0x9a] sm:$0xff] }
 0x29f   : > { %v5862_v2 = vpop.permute.xlu0 %1461 }
 0x2a0   : > { %8300 = vst [vmem:[#allocation181_spill] sm:$0xff] %v5862_v2  ;;  %v710_v2 = vld [vmem:[#allocation2 + $0x1a1] sm:$0xff] }
 0x2a1   : > { %1685 = vrot.lane.b32.xlu2 %v718_v22, %s4582_s22 }
 0x2a3   : > { %1597 = vrot.lane.b32.xlu1 %v706_v55, %s4581_s21  ;;  %v5868_v52 = vpop.permute.xlu2 %1547 }
 0x2a5   : > { %1599 = vrot.lane.b32.xlu0 %v5492_v57, %s4581_s21  ;;  %v5870_v59 = vpop.permute.xlu1 %1463 }
 0x2a6   : > { %8301 = vst [vmem:[#allocation182_spill] sm:$0xff] %v5870_v59  ;;  %v721_v59 = vld [vmem:[#allocation2 + $0xaa] sm:$0xff] }
 0x2a7   : > { %v5872_v53 = vpop.permute.xlu0 %1467 }
 0x2a8   : > { %8302 = vst [vmem:[#allocation183_spill] sm:$0xff] %v5872_v53 }
 0x2a9   : > { %1687 = vrot.lane.b32.xlu2 %v719_v20, %s4582_s22 }
 0x2ab   : > { %1601 = vrot.lane.b32.xlu1 %v5506_v26, %s4581_s21  ;;  %v5878_v22 = vpop.permute.xlu2 %1553  ;;  %v2038_v26 = vld [vmem:[%s8012_s1 + $0x40] sm:$0xff] }
 0x2ac   : > { %2147 = vmatpush.msra.mxu0 %v2038_v26  ;;  %4492 = vmatpush.msra.mxu2 %v2038_v26  ;;  %v2035_v26 = vld [vmem:[%s8012_s1 + $0x28] sm:$0xff] }
 0x2ad   : > { %1603 = vrot.lane.b32.xlu0 %v709_v29, %s4581_s21  ;;  %v5880_v55 = vpop.permute.xlu1 %1469 }
 0x2ae   : > { %8303 = vst [vmem:[#allocation184_spill] sm:$0xff] %v5880_v55  ;;  %v723_v55 = vld [vmem:[#allocation2 + $0xc2] sm:$0xff] }
 0x2af   : > { %v5882_v57 = vpop.permute.xlu0 %1473 }
 0x2b0   : > { %8304 = vst [vmem:[#allocation185_spill] sm:$0xff] %v5882_v57 }
 0x2b1   : > { %1605 = vrot.lane.b32.xlu2 %v710_v2, %s4581_s21  ;;  %v2037_v2 = vld [vmem:[%s8012_s1 + $0x38] sm:$0xff] }
 0x2b2   : > { %2148 = vmatpush.msra.mxu0 %v2037_v2  ;;  %4493 = vmatpush.msra.mxu2 %v2037_v2  ;;  %v2034_v2 = vld [vmem:[%s8012_s1 + $0x20] sm:$0xff] }
 0x2b3   : > { %1689 = vrot.lane.b32.xlu1 %v720_v31, %s4582_s22  ;;  %v5894_v57 = vpop.permute.xlu2 %1559  ;;  %v2036_v31 = vld [vmem:[%s8012_s1 + $0x30] sm:$0xff] }
 0x2b4   : > { %2149 = vmatpush.msra.mxu0 %v2036_v31  ;;  %4494 = vmatpush.msra.mxu2 %v2036_v31  ;;  %v727_v31 = vld [vmem:[#allocation2 + $0xf2] sm:$0xff] }
 0x2b5   : > { %1691 = vrot.lane.b32.xlu0 %v721_v59, %s4582_s22  ;;  %v5887_v20 = vpop.permute.xlu1 %1475  ;;  %v722_v59 = vld [vmem:[#allocation2 + $0xb2] sm:$0xff] }
 0x2b6   : > { %8305 = vst [vmem:[#allocation186_spill] sm:$0xff] %v5887_v20  ;;  %v724_v20 = vld [vmem:[#allocation2 + $0xca] sm:$0xff]  ;;  %2150 = vmatpush.msra.mxu0 %v2035_v26  ;;  %4495 = vmatpush.msra.mxu2 %v2035_v26 }
 0x2b7   : > { %v5892_v29 = vpop.permute.xlu0 %1543  ;;  %v2031_v26 = vld [vmem:[%s8012_s1 + $0x8] sm:$0xff] }
 0x2b8   : > { %2151 = vmatpush.msra.mxu0 %v2034_v2  ;;  %4496 = vmatpush.msra.mxu2 %v2034_v2 }
 0x2b9   : > { %1695 = vrot.lane.b32.xlu2 %v723_v55, %s4582_s22  ;;  %v725_v55 = vld [vmem:[#allocation2 + $0xda] sm:$0xff] }
 0x2bb   : > { %1693 = vrot.lane.b32.xlu1 %v722_v59, %s4582_s22  ;;  %v2033_v59 = vld [vmem:[%s8012_s1 + $0x18] sm:$0xff]  ;;  %v5921_v56 = vpop.permute.xlu2 %1565 }
 0x2bc   : > { %2152 = vmatpush.msra.mxu0 %v2033_v59  ;;  %8306 = vst [vmem:[#allocation187_spill] sm:$0xff] %v5921_v56  ;;  %4497 = vmatpush.msra.mxu2 %v2033_v59  ;;  %v2030_v56 = vld [vmem:[%s8012_s1] sm:$0xff] }
 0x2bd   : > { %1697 = vrot.lane.b32.xlu0 %v724_v20, %s4582_s22  ;;  %v5908_v53 = vpop.permute.xlu1 %1545  ;;  %v2032_v20 = vld [vmem:[%s8012_s1 + $0x10] sm:$0xff] }
 0x2be   : > { %2153 = vmatpush.msra.mxu0 %v2032_v20  ;;  %4498 = vmatpush.msra.mxu2 %v2032_v20 }
 0x2bf   : > { %v5913_v12 = vpop.permute.xlu0 %1549 }
 0x2c0   : > { %2154 = vmatpush.msra.mxu0 %v2031_v26  ;;  %4499 = vmatpush.msra.mxu2 %v2031_v26  ;;  %v732_v26 = vld [vmem:[#allocation2 + $0x12a] sm:$0xff] }
 0x2c1   : > { %1699 = vrot.lane.b32.xlu2 %v725_v55, %s4582_s22  ;;  %v729_v55 = vld [vmem:[#allocation2 + $0x10a] sm:$0xff] }
 0x2c2   : > { %2155 = vmatpush.msra.mxu0 %v2030_v56  ;;  %4500 = vmatpush.msra.mxu2 %v2030_v56 }
 0x2c3   : > { %1703 = vrot.lane.b32.xlu1 %v727_v31, %s4582_s22  ;;  %v728_v31 = vld [vmem:[#allocation2 + $0xfa] sm:$0xff]  ;;  %v5937_v20 = vpop.permute.xlu2 %1571 }
 0x2c4   : > { %8307 = vst [vmem:[#allocation188_spill] sm:$0xff] %v5937_v20  ;;  %v734_v20 = vld [vmem:[#allocation2 + $0x142] sm:$0xff] }
 0x2c5   : > { %1701 = vrot.lane.b32.xlu0 %v726_v50, %s4582_s22  ;;  %v5929_v2 = vpop.permute.xlu1 %1551 }
 0x2c7   : > { %v5934_v59 = vpop.permute.xlu0 %1555 }
 0x2c9   : > { %1707 = vrot.lane.b32.xlu2 %v729_v55, %s4582_s22 }
 0x2cb   : > { %1705 = vrot.lane.b32.xlu1 %v728_v31, %s4582_s22  ;;  %v5948_v56 = vpop.permute.xlu2 %1575 }
 0x2cc   : > { %8308 = vst [vmem:[#allocation189_spill] sm:$0xff] %v5948_v56 }
 0x2cd   : > { %1709 = vrot.lane.b32.xlu0 %v730_v3, %s4582_s22  ;;  %v5941_v50 = vpop.permute.xlu1 %1557  ;;  %v735_v3 = vld [vmem:[#allocation2 + $0x152] sm:$0xff] }
 0x2cf   : > { %v5943_v33 = vpop.permute.xlu0 %1561 }
 0x2d1   : > { %1713 = vrot.lane.b32.xlu2 %v732_v26, %s4582_s22  ;;  %v8311_v26 = vld [vmem:[#allocation35_spill] sm:$0xff] }
 0x2d3   : > { %1711 = vrot.lane.b32.xlu1 %v731_v63, %s4582_s22  ;;  %v5963_v56 = vpop.permute.xlu2 %1579 }
 0x2d5   : > { %1715 = vrot.lane.b32.xlu0 %v733_v17, %s4582_s22  ;;  %v5950_v55 = vpop.permute.xlu1 %1563 }
 0x2d6   : > { %8309 = vst [vmem:[#allocation190_spill] sm:$0xff] %v5950_v55  ;;  %v1767_v55 = vsel %vm365_vm0, %v454_v10, %v8311_v26 }
 0x2d7   : > { %v5952_v31 = vpop.permute.xlu0 %1567  ;;  %v1800_v28 = vsel %vm1799_vm2, %v1767_v55, %v8312_v41  ;;  %v455_v41 = vld [vmem:[#allocation2 + $0x8] sm:$0xff] }
 0x2d8   : > { %8310 = vst [vmem:[#allocation191_spill] sm:$0xff] %v5952_v31  ;;  %v738_v31 = vld [vmem:[#allocation2 + $0x172] sm:$0xff] }
 0x2d9   : > { %1719 = vrot.lane.b32.xlu2 %v735_v3, %s4582_s22 }
 0x2db   : > { %1717 = vrot.lane.b32.xlu1 %v734_v20, %s4582_s22  ;;  %v737_v20 = vld [vmem:[#allocation2 + $0x16a] sm:$0xff] }
 0x2dd   : > { %1721 = vrot.lane.b32.xlu0 %v736_v9, %s4582_s22  ;;  %v5957_v63 = vpop.permute.xlu1 %1569  ;;  %v1833_v9 = vsel %vm1832_vm3, %v1800_v28, %v5428_v30 }
 0x2de   : > { %v1866_v3 = vsel %vm1865_vm5, %v1833_v9, %v5554_v39 }
 0x2df   : > { %v5959_v17 = vpop.permute.xlu0 %1573  ;;  %v1899_v10 = vsel %vm1898_vm4, %v1866_v3, %v5648_v43  ;;  %v5991_v3 = vpop.permute.xlu2 %1583 }
 0x2e0   : > { %v1932_v55 = vsel %vm1931_vm6, %v1899_v10, %v5797_v47  ;;  %v8314_v47 = vld [vmem:[#allocation80_spill] sm:$0xff] }
 0x2e1   : > { %1725 = vrot.lane.b32.xlu2 %v738_v31, %s4582_s22  ;;  %v1965_v28 = vsel %vm1964_vm8, %v1932_v55, %v5892_v29  ;;  %v8313_v31 = vld [vmem:[#allocation39_spill] sm:$0xff]  ;;  %v742_v29 = vld [vmem:[#allocation2 + $0x1a2] sm:$0xff] }
 0x2e2   : > { %v1768_v26 = vsel %vm365_vm0, %v455_v41, %v8313_v31  ;;  %v8315_v31 = vld [vmem:[#allocation37_spill] sm:$0xff] }
 0x2e3   : > { %1723 = vrot.lane.b32.xlu1 %v737_v20, %s4582_s22  ;;  %v741_v20 = vld [vmem:[#allocation2 + $0x19a] sm:$0xff]  ;;  %v1801_v9 = vsel %vm1799_vm2, %v1768_v26, %v8314_v47 }
 0x2e5   : > { %1727 = vrot.lane.b32.xlu0 %v5628_v49, %s4582_s22  ;;  %v1672_v30 = vpop.permute.xlu1 %1671  ;;  %v1834_v49 = vsel %vm1832_vm3, %v1801_v9, %v5390_v18 }
 0x2e6   : > { %v1998_v43 = vsel %vm1997_vm7, %v1965_v28, %v1672_v30  ;;  %v1867_v10 = vsel %vm1865_vm5, %v1834_v49, %v5564_v38 }
 0x2e7   : > { %v5981_v39 = vpop.permute.xlu0 %1577  ;;  %4420 = vmatmul.msk.f32.vlgmr.msra.gmra.mxu0 %vm2043_vm9, %v1998_v43  ;;  %v1900_v41 = vsel %vm1898_vm4, %v1867_v10, %v5685_v62  ;;  %v4536_v43 = vld [vmem:[#allocation2 + $0x18] sm:$0xff]  ;;  %v6019_v47 = vpop.permute.xlu2 %1587 }
 0x2e8   : > { %v1933_v55 = vsel %vm1931_vm6, %v1900_v41, %v5768_v13  ;;  %v1769_v62 = vsel %vm365_vm0, %v4536_v43, %v8315_v31 }
 0x2e9   : > { %1731 = vrot.lane.b32.xlu2 %v741_v20, %s4582_s22  ;;  %v1966_v18 = vsel %vm1964_vm8, %v1933_v55, %v5908_v53  ;;  %v4537_v55 = vld [vmem:[#allocation2 + $0x20] sm:$0xff] }
 0x2eb   : > { %1729 = vrot.lane.b32.xlu1 %v5630_v1, %s4582_s22  ;;  %v8316_v1 = vld [vmem:[#allocation84_spill] sm:$0xff] }
 0x2ec   : > { %v1802_v26 = vsel %vm1799_vm2, %v1769_v62, %v8316_v1 }
 0x2ed   : > { %1733 = vrot.lane.b32.xlu0 %v742_v29, %s4582_s22  ;;  %v1674_v28 = vpop.permute.xlu1 %1673  ;;  %v1835_v13 = vsel %vm1832_vm3, %v1802_v26, %v5430_v34  ;;  %v8317_v34 = vld [vmem:[#allocation41_spill] sm:$0xff] }
 0x2ee   : > { %v1999_v38 = vsel %vm1997_vm7, %v1966_v18, %v1674_v28  ;;  %v1868_v53 = vsel %vm1865_vm5, %v1835_v13, %v5526_v6  ;;  %v1770_v18 = vsel %vm365_vm0, %v4537_v55, %v8317_v34  ;;  %v8318_v6 = vld [vmem:[#allocation68_spill] sm:$0xff]  ;;  %v8319_v13 = vld [vmem:[#allocation33_spill] sm:$0xff]  ;;  %v8321_v34 = vld [vmem:[#allocation34_spill] sm:$0xff] }
 0x2ef   : > { %v6005_v30 = vpop.permute.xlu0 %1581  ;;  %4421 = vmatmul.msk.f32.gmra.mxu0 %vm2043_vm9, %v1999_v38  ;;  %v1901_v20 = vsel %vm1898_vm4, %v1868_v53, %v5694_v27  ;;  %v1803_v27 = vsel %vm1799_vm2, %v1770_v18, %v8318_v6  ;;  %v6041_v31 = vpop.permute.xlu2 %1591  ;;  %v4539_v55 = vld [vmem:[#allocation2 + $0x38] sm:$0xff] }
 0x2f0   : > { %v1934_v9 = vsel %vm1931_vm6, %v1901_v20, %v5799_v7  ;;  %v1836_v28 = vsel %vm1832_vm3, %v1803_v27, %v5440_v36  ;;  %v4538_v36 = vld [vmem:[#allocation2 + $0x30] sm:$0xff] }
 0x2f1   : > { %v1967_v49 = vsel %vm1964_vm8, %v1934_v9, %v5868_v52  ;;  %v1869_v7 = vsel %vm1865_vm5, %v1836_v28, %v5566_v32  ;;  %v1771_v32 = vsel %vm365_vm0, %v4538_v36, %v8319_v13 }
 0x2f2   : > { %v1902_v52 = vsel %vm1898_vm4, %v1869_v7, %v5659_v5  ;;  %v8320_v5 = vld [vmem:[#allocation85_spill] sm:$0xff] }
 0x2f3   : > { %v1935_v38 = vsel %vm1931_vm6, %v1902_v52, %v5806_v35  ;;  %v1804_v53 = vsel %vm1799_vm2, %v1771_v32, %v8320_v5 }
 0x2f4   : > { %v1968_v43 = vsel %vm1964_vm8, %v1935_v38, %v5913_v12  ;;  %v1837_v35 = vsel %vm1832_vm3, %v1804_v53, %v5402_v4  ;;  %v1772_v4 = vsel %vm365_vm0, %v4539_v55, %v8321_v34  ;;  %v4540_v38 = vld [vmem:[#allocation2 + $0x48] sm:$0xff] }
 0x2f5   : > { %v1676_v29 = vpop.permute.xlu1 %1675  ;;  %v1870_v12 = vsel %vm1865_vm5, %v1837_v35, %v5576_v25  ;;  %v8322_v25 = vld [vmem:[#allocation90_spill] sm:$0xff]  ;;  %v4541_v35 = vld [vmem:[#allocation2 + $0x50] sm:$0xff] }
 0x2f6   : > { %v2000_v41 = vsel %vm1997_vm7, %v1967_v49, %v1676_v29  ;;  %v1903_v20 = vsel %vm1898_vm4, %v1870_v12, %v5696_v51  ;;  %v1805_v51 = vsel %vm1799_vm2, %v1772_v4, %v8322_v25  ;;  %v8325_v12 = vld [vmem:[#allocation44_spill] sm:$0xff] }
 0x2f7   : > { %v1678_v10 = vpop.permute.xlu0 %1677  ;;  %4422 = vmatmul.msk.f32.gmra.mxu0 %vm2043_vm9, %v2000_v41  ;;  %v1936_v9 = vsel %vm1931_vm6, %v1903_v20, %v5777_v60  ;;  %v1684_v18 = vpop.permute.xlu2 %1683  ;;  %v1838_v60 = vsel %vm1832_vm3, %v1805_v51, %v5442_v40  ;;  %v8327_v4 = vld [vmem:[#allocation36_spill] sm:$0xff] }
 0x2f8   : > { %v2001_v26 = vsel %vm1997_vm7, %v1968_v43, %v1678_v10  ;;  %v1969_v49 = vsel %vm1964_vm8, %v1936_v9, %v5929_v2  ;;  %v1871_v2 = vsel %vm1865_vm5, %v1838_v60, %v5538_v0  ;;  %v8323_v43 = vld [vmem:[#allocation42_spill] sm:$0xff]  ;;  %v8324_v0 = vld [vmem:[#allocation73_spill] sm:$0xff] }
 0x2f9   : > { %v1904_v6 = vsel %vm1898_vm4, %v1871_v2, %v5705_v11  ;;  %v1773_v40 = vsel %vm365_vm0, %v4540_v38, %v8323_v43 }
 0x2fa   : > { %v1937_v27 = vsel %vm1931_vm6, %v1904_v6, %v5808_v44  ;;  %v1806_v11 = vsel %vm1799_vm2, %v1773_v40, %v8324_v0 }
 0x2fb   : > { %v1970_v28 = vsel %vm1964_vm8, %v1937_v27, %v5878_v22  ;;  %v1839_v44 = vsel %vm1832_vm3, %v1806_v11, %v5452_v42  ;;  %v1774_v42 = vsel %vm365_vm0, %v4541_v35, %v8325_v12  ;;  %v8334_v35 = vld [vmem:[#allocation107_spill] sm:$0xff]  ;;  %v8335_v12 = vld [vmem:[#allocation122_spill] sm:$0xff] }
 0x2fc   : > { %v1872_v22 = vsel %vm1865_vm5, %v1839_v44, %v5578_v23  ;;  %v8326_v23 = vld [vmem:[#allocation91_spill] sm:$0xff] }
 0x2fd   : > { %v6043_v62 = vpop.permute.xlu1 %1585  ;;  %v1905_v36 = vsel %vm1898_vm4, %v1872_v22, %v5670_v58  ;;  %v1807_v20 = vsel %vm1799_vm2, %v1774_v42, %v8326_v23  ;;  %v4544_v22 = vld [vmem:[#allocation2 + $0x78] sm:$0xff] }
 0x2fe   : > { %v1938_v13 = vsel %vm1931_vm6, %v1905_v36, %v5815_v8  ;;  %v1840_v58 = vsel %vm1832_vm3, %v1807_v20, %v5414_v19  ;;  %v4542_v19 = vld [vmem:[#allocation2 + $0x60] sm:$0xff]  ;;  %v8331_v36 = vld [vmem:[#allocation47_spill] sm:$0xff]  ;;  %v8336_v23 = vld [vmem:[#allocation124_spill] sm:$0xff] }
 0x2ff   : > { %v1680_v1 = vpop.permute.xlu0 %1679  ;;  %4423 = vmatmul.msk.f32.gmra.mxu0 %vm2043_vm9, %v2001_v26  ;;  %v1686_v26 = vpop.permute.xlu2 %1685  ;;  %v1971_v32 = vsel %vm1964_vm8, %v1938_v13, %v5934_v59  ;;  %v1873_v59 = vsel %vm1865_vm5, %v1840_v58, %v5588_v16  ;;  %v8328_v16 = vld [vmem:[#allocation95_spill] sm:$0xff]  ;;  %v4545_v13 = vld [vmem:[#allocation2 + $0xc0] sm:$0xff]  ;;  %v8337_v58 = vld [vmem:[#allocation148_spill] sm:$0xff] }
 0x300   : > { %v2002_v41 = vsel %vm1997_vm7, %v1969_v49, %v1680_v1  ;;  %v2004_v53 = vsel %vm1997_vm7, %v1971_v32, %v1684_v18  ;;  %v1906_v9 = vsel %vm1898_vm4, %v1873_v59, %v5707_v45  ;;  %v1775_v18 = vsel %vm365_vm0, %v4542_v19, %v8327_v4  ;;  %v8332_v32 = vld [vmem:[#allocation55_spill] sm:$0xff]  ;;  %v8341_v4 = vld [vmem:[#allocation165_spill] sm:$0xff] }
 0x301   : > { %v1808_v45 = vsel %vm1799_vm2, %v1775_v18, %v8328_v16  ;;  %v8342_v16 = vld [vmem:[#allocation167_spill] sm:$0xff] }
 0x302   : > { %v1841_v25 = vsel %vm1832_vm3, %v1808_v45, %v5454_v46  ;;  %v4543_v46 = vld [vmem:[#allocation2 + $0x68] sm:$0xff] }
 0x305   : > { %v6061_v29 = vpop.permute.xlu1 %1589 }
 0x307   : > { %v1682_v10 = vpop.permute.xlu0 %1681  ;;  %4424 = vmatmul.msk.f32.gmra.mxu0 %vm2043_vm9, %v2002_v41  ;;  %v1688_v49 = vpop.permute.xlu2 %1687 }
 0x308   : > { %v2003_v52 = vsel %vm1997_vm7, %v1970_v28, %v1682_v10  ;;  %v1939_v10 = vsel %vm1931_vm6, %v1906_v9, %v5786_v24  ;;  %v1874_v24 = vsel %vm1865_vm5, %v1841_v25, %v5550_v37  ;;  %v8338_v9 = vld [vmem:[#allocation53_spill] sm:$0xff] }
 0x309   : > { %v1972_v41 = vsel %vm1964_vm8, %v1939_v10, %v5941_v50  ;;  %v1907_v50 = vsel %vm1898_vm4, %v1874_v24, %v5716_v15  ;;  %v8330_v15 = vld [vmem:[#allocation78_spill] sm:$0xff]  ;;  %v8339_v10 = vld [vmem:[#allocation92_spill] sm:$0xff]  ;;  %v8343_v25 = vld [vmem:[#allocation189_spill] sm:$0xff] }
 0x30a   : > { %v2005_v34 = vsel %vm1997_vm7, %v1972_v41, %v1686_v26  ;;  %v1940_v60 = vsel %vm1931_vm6, %v1907_v50, %v5817_v61  ;;  %v8344_v50 = vld [vmem:[#allocation190_spill] sm:$0xff] }
 0x30b   : > { %v1973_v2 = vsel %vm1964_vm8, %v1940_v60, %v5894_v57 }
 0x30c   : > { %v2006_v28 = vsel %vm1997_vm7, %v1973_v2, %v1688_v49 }
 0x30d   : > { %v6079_v7 = vpop.permute.xlu1 %1593 }
 0x30f   : > { %v6084_v1 = vpop.permute.xlu0 %1595  ;;  %4425 = vmatmul.msk.f32.gmra.mxu0 %vm2043_vm9, %v2003_v52  ;;  %v6139_v6 = vpop.permute.xlu2 %1605  ;;  %v8329_v52 = vld [vmem:[#allocation45_spill] sm:$0xff] }
 0x310   : > { %v1776_v37 = vsel %vm365_vm0, %v4543_v46, %v8329_v52  ;;  %v4546_v46 = vld [vmem:[#allocation2 + $0x80] sm:$0xff]  ;;  %v8345_v52 = vld [vmem:[#allocation38_spill] sm:$0xff] }
 0x311   : > { %v1809_v38 = vsel %vm1799_vm2, %v1776_v37, %v8330_v15  ;;  %v1778_v37 = vsel %vm365_vm0, %v4546_v46, %v8345_v52  ;;  %v4547_v15 = vld [vmem:[#allocation2 + $0xc8] sm:$0xff] }
 0x312   : > { %v1842_v61 = vsel %vm1832_vm3, %v1809_v38, %v5464_v48  ;;  %v1777_v48 = vsel %vm365_vm0, %v4544_v22, %v8331_v36  ;;  %v8346_v38 = vld [vmem:[#allocation43_spill] sm:$0xff]  ;;  %v8350_v36 = vld [vmem:[#allocation132_spill] sm:$0xff] }
 0x313   : > { %v1875_v57 = vsel %vm1865_vm5, %v1842_v61, %v5590_v14  ;;  %v1783_v14 = vsel %vm365_vm0, %v4545_v13, %v8332_v32  ;;  %v1784_v61 = vsel %vm365_vm0, %v4547_v15, %v8346_v38  ;;  %v8351_v32 = vld [vmem:[#allocation144_spill] sm:$0xff]  ;;  %v8365_v38 = vld [vmem:[#allocation57_spill] sm:$0xff] }
 0x314   : > { %v1908_v43 = vsel %vm1898_vm4, %v1875_v57, %v5681_v54  ;;  %v8333_v54 = vld [vmem:[#allocation96_spill] sm:$0xff] }
 0x315   : > { %v6099_v5 = vpop.permute.xlu1 %1597  ;;  %v1941_v40 = vsel %vm1931_vm6, %v1908_v43, %v5824_v21  ;;  %v1810_v21 = vsel %vm1799_vm2, %v1777_v48, %v8333_v54  ;;  %v8347_v43 = vld [vmem:[#allocation100_spill] sm:$0xff]  ;;  %v8352_v54 = vld [vmem:[#allocation146_spill] sm:$0xff] }
 0x316   : > { %v1974_v0 = vsel %vm1964_vm8, %v1941_v40, %v5943_v33  ;;  %v1816_v33 = vsel %vm1799_vm2, %v1783_v14, %v8334_v35  ;;  %v1843_v42 = vsel %vm1832_vm3, %v1810_v21, %v8335_v12  ;;  %v1811_v40 = vsel %vm1799_vm2, %v1778_v37, %v8347_v43  ;;  %v8353_v35 = vld [vmem:[#allocation97_spill] sm:$0xff]  ;;  %v8354_v12 = vld [vmem:[#allocation112_spill] sm:$0xff] }
 0x317   : > { %4426 = vmatmul.msk.f32.gmra.mxu0 %vm2043_vm9, %v2004_v53  ;;  %v6109_v8 = vpop.permute.xlu0 %1599  ;;  %v1696_v53 = vpop.permute.xlu2 %1695  ;;  %v1849_v20 = vsel %vm1832_vm3, %v1816_v33, %v8336_v23  ;;  %v1876_v59 = vsel %vm1865_vm5, %v1843_v42, %v8337_v58  ;;  %v8355_v23 = vld [vmem:[#allocation169_spill] sm:$0xff]  ;;  %v8356_v58 = vld [vmem:[#allocation175_spill] sm:$0xff] }
 0x318   : > { %v1882_v49 = vsel %vm1865_vm5, %v1849_v20, %v8338_v9  ;;  %v1909_v41 = vsel %vm1898_vm4, %v1876_v59, %v8339_v10  ;;  %v8357_v9 = vld [vmem:[#allocation187_spill] sm:$0xff]  ;;  %v8364_v37 = vld [vmem:[#allocation149_spill] sm:$0xff] }
 0x319   : > { %v1942_v18 = vsel %vm1931_vm6, %v1909_v41, %v8341_v4  ;;  %v4548_v4 = vld [vmem:[#allocation2 + $0x90] sm:$0xff]  ;;  %v8366_v43 = vld [vmem:[#allocation81_spill] sm:$0xff] }
 0x31a   : > { %v1975_v60 = vsel %vm1964_vm8, %v1942_v18, %v8344_v50  ;;  %v8358_v18 = vld [vmem:[#allocation48_spill] sm:$0xff]  ;;  %v8360_v50 = vld [vmem:[#allocation83_spill] sm:$0xff] }
 0x31d   : > { %v6119_v55 = vpop.permute.xlu1 %1601 }
 0x31f   : > { %4427 = vmatmul.msk.f32.gmra.mxu0 %vm2043_vm9, %v2005_v34  ;;  %v6133_v51 = vpop.permute.xlu0 %1603  ;;  %v8340_v34 = vld [vmem:[#allocation104_spill] sm:$0xff]  ;;  %v6203_v13 = vpop.permute.xlu2 %1699 }
 0x320   : > { %v1915_v19 = vsel %vm1898_vm4, %v1882_v49, %v8340_v34 }
 0x321   : > { %v1948_v45 = vsel %vm1931_vm6, %v1915_v19, %v8342_v16  ;;  %v1779_v16 = vsel %vm365_vm0, %v4548_v4, %v8358_v18  ;;  %v8377_v4 = vld [vmem:[#allocation150_spill] sm:$0xff] }
 0x322   : > { %v1981_v24 = vsel %vm1964_vm8, %v1948_v45, %v8343_v25  ;;  %v4549_v45 = vld [vmem:[#allocation2 + $0xd8] sm:$0xff] }
 0x323   : > { %v8359_v25 = vld [vmem:[#allocation56_spill] sm:$0xff] }
 0x325   : > { %v1690_v27 = vpop.permute.xlu1 %1689 }
 0x326   : > { %v2007_v26 = vsel %vm1997_vm7, %v1974_v0, %v1690_v27  ;;  %v8348_v0 = vld [vmem:[#allocation110_spill] sm:$0xff] }
 0x327   : > { %4428 = vmatmul.msk.f32.gmra.mxu0 %vm2043_vm9, %v2006_v28  ;;  %v1692_v11 = vpop.permute.xlu0 %1691 }
 0x328   : > { %v2008_v27 = vsel %vm1997_vm7, %v1975_v60, %v1692_v11  ;;  %v1817_v11 = vsel %vm1799_vm2, %v1784_v61, %v8348_v0  ;;  %v8361_v60 = vld [vmem:[#allocation94_spill] sm:$0xff] }
 0x329   : > { %v1850_v48 = vsel %vm1832_vm3, %v1817_v11, %v8350_v36  ;;  %v8367_v0 = vld [vmem:[#allocation86_spill] sm:$0xff] }
 0x32a   : > { %v1883_v21 = vsel %vm1865_vm5, %v1850_v48, %v8352_v54  ;;  %v8369_v48 = vld [vmem:[#allocation177_spill] sm:$0xff]  ;;  %v8370_v54 = vld [vmem:[#allocation191_spill] sm:$0xff] }
 0x32b   : > { %v1916_v42 = vsel %vm1898_vm4, %v1883_v21, %v8354_v12  ;;  %v4550_v12 = vld [vmem:[#allocation2 + $0x98] sm:$0xff] }
 0x32c   : > { %v1949_v59 = vsel %vm1931_vm6, %v1916_v42, %v8356_v58  ;;  %v8371_v42 = vld [vmem:[#allocation50_spill] sm:$0xff]  ;;  %v8372_v58 = vld [vmem:[#allocation61_spill] sm:$0xff] }
 0x32d   : > { %v1694_v44 = vpop.permute.xlu1 %1693  ;;  %v1982_v10 = vsel %vm1964_vm8, %v1949_v59, %v5981_v39  ;;  %v1812_v39 = vsel %vm1799_vm2, %v1779_v16, %v8360_v50  ;;  %v8378_v16 = vld [vmem:[#allocation152_spill] sm:$0xff]  ;;  %v8380_v50 = vld [vmem:[#allocation155_spill] sm:$0xff] }
 0x32f   : > { %4429 = vmatmul.msk.f32.gmra.mxu0 %vm2043_vm9, %v2007_v26  ;;  %v1698_v57 = vpop.permute.xlu0 %1697  ;;  %v8349_v26 = vld [vmem:[#allocation126_spill] sm:$0xff] }
 0x330   : > { %v1844_v22 = vsel %vm1832_vm3, %v1811_v40, %v8349_v26  ;;  %v1708_v26 = vpop.permute.xlu2 %1707 }
 0x331   : > { %v1877_v14 = vsel %vm1865_vm5, %v1844_v22, %v8351_v32  ;;  %v8368_v22 = vld [vmem:[#allocation171_spill] sm:$0xff] }
 0x332   : > { %v1910_v33 = vsel %vm1898_vm4, %v1877_v14, %v8353_v35 }
 0x333   : > { %v1943_v20 = vsel %vm1931_vm6, %v1910_v33, %v8355_v23  ;;  %v1780_v23 = vsel %vm365_vm0, %v4550_v12, %v8371_v42  ;;  %v8391_v42 = vld [vmem:[#allocation102_spill] sm:$0xff] }
 0x334   : > { %v1976_v49 = vsel %vm1964_vm8, %v1943_v20, %v8357_v9  ;;  %v4551_v20 = vld [vmem:[#allocation2 + $0xe0] sm:$0xff] }
 0x335   : > { %v1704_v2 = vpop.permute.xlu1 %1703  ;;  %v2009_v34 = vsel %vm1997_vm7, %v1976_v49, %v1694_v44  ;;  %v1786_v59 = vsel %vm365_vm0, %v4551_v20, %v8372_v58  ;;  %v8374_v49 = vld [vmem:[#allocation111_spill] sm:$0xff]  ;;  %v8392_v20 = vld [vmem:[#allocation157_spill] sm:$0xff] }
 0x336   : > { %v2014_v28 = vsel %vm1997_vm7, %v1981_v24, %v1704_v2  ;;  %v1785_v24 = vsel %vm365_vm0, %v4549_v45, %v8359_v25  ;;  %v8362_v2 = vld [vmem:[#allocation128_spill] sm:$0xff]  ;;  %v8379_v25 = vld [vmem:[#allocation103_spill] sm:$0xff] }
 0x337   : > { %4430 = vmatmul.msk.f32.gmra.mxu0 %vm2043_vm9, %v2008_v27  ;;  %4436 = vmatmul.msk.f32.vlgmr.msra.gmra.mxu2 %vm2043_vm9, %v2014_v28  ;;  %v1818_v44 = vsel %vm1799_vm2, %v1785_v24, %v8361_v60  ;;  %v1845_v27 = vsel %vm1832_vm3, %v1812_v39, %v8362_v2  ;;  %v8363_v28 = vld [vmem:[#allocation134_spill] sm:$0xff]  ;;  %v6237_v52 = vpop.permute.xlu0 %1701 }
 0x338   : > { %v1851_v46 = vsel %vm1832_vm3, %v1818_v44, %v8363_v28  ;;  %v1878_v15 = vsel %vm1865_vm5, %v1845_v27, %v8364_v37  ;;  %v8381_v44 = vld [vmem:[#allocation166_spill] sm:$0xff]  ;;  %v8382_v27 = vld [vmem:[#allocation168_spill] sm:$0xff] }
 0x339   : > { %v1884_v61 = vsel %vm1865_vm5, %v1851_v46, %v8365_v38  ;;  %v1911_v40 = vsel %vm1898_vm4, %v1878_v15, %v8366_v43  ;;  %v8383_v43 = vld [vmem:[#allocation40_spill] sm:$0xff] }
 0x33a   : > { %v1917_v11 = vsel %vm1898_vm4, %v1884_v61, %v8367_v0  ;;  %v1944_v36 = vsel %vm1931_vm6, %v1911_v40, %v8368_v22  ;;  %v4552_v61 = vld [vmem:[#allocation2 + $0xa8] sm:$0xff]  ;;  %v4553_v0 = vld [vmem:[#allocation2 + $0xf0] sm:$0xff] }
 0x33b   : > { %v1950_v32 = vsel %vm1931_vm6, %v1917_v11, %v8369_v48  ;;  %v1977_v21 = vsel %vm1964_vm8, %v1944_v36, %v8370_v54  ;;  %v1781_v40 = vsel %vm365_vm0, %v4552_v61, %v8383_v43  ;;  %v8384_v11 = vld [vmem:[#allocation46_spill] sm:$0xff]  ;;  %v8387_v48 = vld [vmem:[#allocation129_spill] sm:$0xff] }
 0x33c   : > { %v1983_v14 = vsel %vm1964_vm8, %v1950_v32, %v5963_v56  ;;  %v2010_v35 = vsel %vm1997_vm7, %v1977_v21, %v1696_v53  ;;  %v8373_v56 = vld [vmem:[#allocation101_spill] sm:$0xff]  ;;  %v1819_v53 = vsel %vm1799_vm2, %v1786_v59, %v8374_v49  ;;  %v8394_v49 = vld [vmem:[#allocation178_spill] sm:$0xff] }
 0x33d   : > { %v1706_v41 = vpop.permute.xlu1 %1705  ;;  %v2016_v33 = vsel %vm1997_vm7, %v1983_v14, %v1708_v26  ;;  %v1813_v9 = vsel %vm1799_vm2, %v1780_v23, %v8373_v56  ;;  %v1787_v26 = vsel %vm365_vm0, %v4553_v0, %v8384_v11  ;;  %v2349_v36 = vld [vmem:[#allocation2 + $0x1] sm:$0xff]  ;;  %v8388_v14 = vld [vmem:[#allocation135_spill] sm:$0xff]  ;;  %v8393_v56 = vld [vmem:[#allocation172_spill] sm:$0xff] }
 0x33e   : > { %v2015_v19 = vsel %vm1997_vm7, %v1982_v10, %v1706_v41  ;;  %v8375_v10 = vld [vmem:[#allocation123_spill] sm:$0xff]  ;;  %2637 = vrot.lane.b32.xlu1 %v2349_v36, %s4575_s11  ;;  %v8389_v21 = vld [vmem:[#allocation145_spill] sm:$0xff]  ;;  %v8404_v43 = vld [vmem:[#allocation82_spill] sm:$0xff] }
 0x33f   : > { %4431 = vmatmul.msk.f32.gmra.mxu0 %vm2043_vm9, %v2009_v34  ;;  %4437 = vmatmul.msk.f32.gmra.mxu2 %vm2043_vm9, %v2015_v19  ;;  %v1846_v41 = vsel %vm1832_vm3, %v1813_v9, %v8375_v10  ;;  %v8376_v34 = vld [vmem:[#allocation125_spill] sm:$0xff]  ;;  %v1710_v60 = vpop.permute.xlu0 %1709  ;;  %v8395_v10 = vld [vmem:[#allocation188_spill] sm:$0xff] }
 0x340   : > { %v1852_v19 = vsel %vm1832_vm3, %v1819_v53, %v8376_v34  ;;  %v1879_v18 = vsel %vm1865_vm5, %v1846_v41, %v8377_v4  ;;  %v8405_v0 = vld [vmem:[#allocation93_spill] sm:$0xff] }
 0x341   : > { %v1885_v45 = vsel %vm1865_vm5, %v1852_v19, %v8378_v16  ;;  %v1912_v24 = vsel %vm1898_vm4, %v1879_v18, %v8379_v25  ;;  %v4554_v18 = vld [vmem:[#allocation2 + $0xb0] sm:$0xff]  ;;  %v4555_v25 = vld [vmem:[#allocation2 + $0xf8] sm:$0xff] }
 0x342   : > { %v1918_v39 = vsel %vm1898_vm4, %v1885_v45, %v8380_v50  ;;  %v1945_v2 = vsel %vm1931_vm6, %v1912_v24, %v8381_v44  ;;  %v8396_v16 = vld [vmem:[#allocation51_spill] sm:$0xff]  ;;  %v8397_v24 = vld [vmem:[#allocation62_spill] sm:$0xff] }
 0x343   : > { %v1951_v28 = vsel %vm1931_vm6, %v1918_v39, %v8382_v27  ;;  %v1978_v46 = vsel %vm1964_vm8, %v1945_v2, %v5957_v63  ;;  %v8385_v63 = vld [vmem:[#allocation106_spill] sm:$0xff]  ;;  %v1782_v45 = vsel %vm365_vm0, %v4554_v18, %v8396_v16  ;;  %v1788_v50 = vsel %vm365_vm0, %v4555_v25, %v8397_v24  ;;  %v8398_v39 = vld [vmem:[#allocation89_spill] sm:$0xff]  ;;  %v8400_v2 = vld [vmem:[#allocation131_spill] sm:$0xff] }
 0x344   : > { %v1984_v37 = vsel %vm1964_vm8, %v1951_v28, %v6005_v30  ;;  %v2011_v15 = vsel %vm1997_vm7, %v1978_v46, %v1698_v57  ;;  %v1814_v22 = vsel %vm1799_vm2, %v1781_v40, %v8385_v63  ;;  %v8386_v30 = vld [vmem:[#allocation114_spill] sm:$0xff]  ;;  %v8401_v28 = vld [vmem:[#allocation137_spill] sm:$0xff]  ;;  %v8415_v16 = vld [vmem:[#allocation116_spill] sm:$0xff] }
 0x345   : > { %v2017_v38 = vsel %vm1997_vm7, %v1984_v37, %v1710_v60  ;;  %v1820_v57 = vsel %vm1799_vm2, %v1787_v26, %v8386_v30  ;;  %v1847_v32 = vsel %vm1832_vm3, %v1814_v22, %v8387_v48  ;;  %v1712_v59 = vpop.permute.xlu1 %1711  ;;  %v8399_v60 = vld [vmem:[#allocation99_spill] sm:$0xff]  ;;  %v1714_v26 = vpop.permute.xlu2 %1713  ;;  %v8406_v63 = vld [vmem:[#allocation174_spill] sm:$0xff]  ;;  %v8407_v30 = vld [vmem:[#allocation180_spill] sm:$0xff] }
 0x346   : > { %v1853_v54 = vsel %vm1832_vm3, %v1820_v57, %v8388_v14  ;;  %v2350_v44 = vld [vmem:[#allocation2 + $0x9] sm:$0xff] }
 0x347   : > { %4432 = vmatmul.msk.f32.gmra.mxu0 %vm2043_vm9, %v2010_v35  ;;  %4438 = vmatmul.msk.f32.gmra.mxu2 %vm2043_vm9, %v2016_v33  ;;  %v1880_v35 = vsel %vm1865_vm5, %v1847_v32, %v8389_v21  ;;  %v8390_v33 = vld [vmem:[#allocation147_spill] sm:$0xff]  ;;  %v8408_v21 = vld [vmem:[#allocation64_spill] sm:$0xff]  ;;  %v8416_v25 = vld [vmem:[#allocation138_spill] sm:$0xff] }
 0x348   : > { %v1886_v12 = vsel %vm1865_vm5, %v1853_v54, %v8390_v33  ;;  %v1913_v23 = vsel %vm1898_vm4, %v1880_v35, %v8391_v42  ;;  %2639 = vrot.lane.b32.xlu2 %v2350_v44, %s4575_s11  ;;  %v8402_v37 = vld [vmem:[#allocation151_spill] sm:$0xff]  ;;  %v4556_v54 = vld [vmem:[#allocation2 + $0x108] sm:$0xff] }
 0x349   : > { %v1919_v58 = vsel %vm1898_vm4, %v1886_v12, %v8392_v20  ;;  %v1946_v9 = vsel %vm1931_vm6, %v1913_v23, %v8393_v56  ;;  %v1789_v35 = vsel %vm365_vm0, %v4556_v54, %v8408_v21  ;;  %v8409_v33 = vld [vmem:[#allocation115_spill] sm:$0xff]  ;;  %v8412_v20 = vld [vmem:[#allocation158_spill] sm:$0xff] }
 0x34a   : > { %v1952_v53 = vsel %vm1931_vm6, %v1919_v58, %v8394_v49  ;;  %v1979_v41 = vsel %vm1964_vm8, %v1946_v9, %v8395_v10  ;;  %v1822_v12 = vsel %vm1799_vm2, %v1789_v35, %v8409_v33  ;;  %v8413_v56 = vld [vmem:[#allocation170_spill] sm:$0xff]  ;;  %v8426_v33 = vld [vmem:[#allocation69_spill] sm:$0xff] }
 0x34b   : > { %v1985_v34 = vsel %vm1964_vm8, %v1952_v53, %v5991_v3  ;;  %v2012_v19 = vsel %vm1997_vm7, %v1979_v41, %v6203_v13  ;;  %v1815_v3 = vsel %vm1799_vm2, %v1782_v45, %v8398_v39  ;;  %v1821_v13 = vsel %vm1799_vm2, %v1788_v50, %v8399_v60  ;;  %v8418_v39 = vld [vmem:[#allocation159_spill] sm:$0xff]  ;;  %v4559_v35 = vld [vmem:[#allocation2 + $0x128] sm:$0xff] }
 0x34c   : > { %v2018_v4 = vsel %vm1997_vm7, %v1985_v34, %v1712_v59  ;;  %v1848_v27 = vsel %vm1832_vm3, %v1815_v3, %v8400_v2  ;;  %v1854_v46 = vsel %vm1832_vm3, %v1821_v13, %v8401_v28  ;;  %v1716_v59 = vpop.permute.xlu0 %1715  ;;  %v4557_v34 = vld [vmem:[#allocation2 + $0x110] sm:$0xff]  ;;  %v8419_v13 = vld [vmem:[#allocation181_spill] sm:$0xff] }
 0x34d   : > { %v1718_v60 = vpop.permute.xlu1 %1717 }
 0x34f   : > { %4433 = vmatmul.msk.f32.gmra.mxu0 %vm2043_vm9, %v2011_v15  ;;  %4439 = vmatmul.msk.f32.gmra.mxu2 %vm2043_vm9, %v2017_v38  ;;  %v1881_v15 = vsel %vm1865_vm5, %v1848_v27, %v8402_v37  ;;  %v8403_v38 = vld [vmem:[#allocation153_spill] sm:$0xff] }
 0x350   : > { %v1887_v61 = vsel %vm1865_vm5, %v1854_v46, %v8403_v38  ;;  %v1914_v40 = vsel %vm1898_vm4, %v1881_v15, %v8404_v43  ;;  %v4558_v37 = vld [vmem:[#allocation2 + $0x120] sm:$0xff] }
 0x351   : > { %v1920_v11 = vsel %vm1898_vm4, %v1887_v61, %v8405_v0  ;;  %v1947_v22 = vsel %vm1931_vm6, %v1914_v40, %v8406_v63  ;;  %v8420_v15 = vld [vmem:[#allocation65_spill] sm:$0xff] }
 0x352   : > { %v1953_v57 = vsel %vm1931_vm6, %v1920_v11, %v8407_v30  ;;  %v1980_v36 = vsel %vm1964_vm8, %v1947_v22, %v5959_v17  ;;  %v8410_v17 = vld [vmem:[#allocation127_spill] sm:$0xff]  ;;  %v1791_v38 = vsel %vm365_vm0, %v4558_v37, %v8420_v15  ;;  %v8421_v43 = vld [vmem:[#allocation105_spill] sm:$0xff]  ;;  %v8424_v22 = vld [vmem:[#allocation98_spill] sm:$0xff] }
 0x353   : > { %v1986_v48 = vsel %vm1964_vm8, %v1953_v57, %v6043_v62  ;;  %v2013_v32 = vsel %vm1997_vm7, %v1980_v36, %v6237_v52  ;;  %v1855_v42 = vsel %vm1832_vm3, %v1822_v12, %v8410_v17  ;;  %v6368_v62 = vld [vmem:[%s8013_s2] ss:$0 sm:$0xff]  ;;  %v8411_v52 = vld [vmem:[#allocation66_spill] sm:$0xff]  ;;  %v1824_v40 = vsel %vm1799_vm2, %v1791_v38, %v8421_v43  ;;  %v8422_v11 = vld [vmem:[#allocation139_spill] sm:$0xff]  ;;  %v1720_v57 = vpop.permute.xlu2 %1719 }
 0x354   : > { %v2019_v14 = vsel %vm1997_vm7, %v1986_v48, %v1714_v26  ;;  %v1888_v23 = vsel %vm1865_vm5, %v1855_v42, %v8411_v52  ;;  %v1857_v26 = vsel %vm1832_vm3, %v1824_v40, %v8422_v11  ;;  %v8425_v36 = vld [vmem:[#allocation182_spill] sm:$0xff]  ;;  %v1792_v12 = vsel %vm365_vm0, %v4559_v35, %v8426_v33  ;;  %v8427_v42 = vld [vmem:[#allocation117_spill] sm:$0xff] }
 0x355   : > { %v1921_v58 = vsel %vm1898_vm4, %v1888_v23, %v8412_v20  ;;  %v1825_v52 = vsel %vm1799_vm2, %v1792_v12, %v8427_v42  ;;  %v8428_v20 = vld [vmem:[#allocation130_spill] sm:$0xff] }
 0x356   : > { %v1954_v9 = vsel %vm1931_vm6, %v1921_v58, %v8413_v56  ;;  %v1858_v58 = vsel %vm1832_vm3, %v1825_v52, %v8428_v20  ;;  %v8430_v56 = vld [vmem:[#allocation160_spill] sm:$0xff]  ;;  %v8438_v43 = vld [vmem:[#allocation70_spill] sm:$0xff] }
 0x357   : > { %4434 = vmatmul.msk.f32.gmra.mxu0 %vm2043_vm9, %v2012_v19  ;;  %4440 = vmatmul.msk.f32.gmra.mxu2 %vm2043_vm9, %v2018_v4  ;;  %v1987_v53 = vsel %vm1964_vm8, %v1954_v9, %v6019_v47  ;;  %v8414_v19 = vld [vmem:[#allocation49_spill] sm:$0xff]  ;;  %v8417_v47 = vld [vmem:[#allocation52_spill] sm:$0xff]  ;;  %v8444_v42 = vld [vmem:[#allocation74_spill] sm:$0xff] }
 0x358   : > { %v2020_v41 = vsel %vm1997_vm7, %v1987_v53, %v1716_v59  ;;  %v1790_v4 = vsel %vm365_vm0, %v4557_v34, %v8414_v19  ;;  %v8431_v53 = vld [vmem:[#allocation173_spill] sm:$0xff] }
 0x359   : > { %v1823_v45 = vsel %vm1799_vm2, %v1790_v4, %v8415_v16  ;;  %v8432_v16 = vld [vmem:[#allocation54_spill] sm:$0xff] }
 0x35a   : > { %v1856_v24 = vsel %vm1832_vm3, %v1823_v45, %v8416_v25 }
 0x35b   : > { %v1889_v50 = vsel %vm1865_vm5, %v1856_v24, %v8417_v47  ;;  %v8433_v24 = vld [vmem:[#allocation118_spill] sm:$0xff] }
 0x35c   : > { %v1922_v3 = vsel %vm1898_vm4, %v1889_v50, %v8418_v39  ;;  %v8434_v39 = vld [vmem:[#allocation140_spill] sm:$0xff] }
 0x35d   : > { %v1955_v44 = vsel %vm1931_vm6, %v1922_v3, %v8419_v13  ;;  %v8436_v13 = vld [vmem:[#allocation161_spill] sm:$0xff] }
 0x35e   : > { %v1988_v27 = vsel %vm1964_vm8, %v1955_v44, %v6061_v29  ;;  %v8423_v29 = vld [vmem:[#allocation154_spill] sm:$0xff] }
 0x35f   : > { %4435 = vmatmul.msk.f32.gmra.mxu0 %vm2043_vm9, %v2013_v32  ;;  %4441 = vmatmul.msk.f32.gmra.mxu2 %vm2043_vm9, %v2019_v14  ;;  %v2021_v46 = vsel %vm1997_vm7, %v1988_v27, %v1718_v60  ;;  %v1890_v63 = vsel %vm1865_vm5, %v1857_v26, %v8423_v29  ;;  %v8437_v27 = vld [vmem:[#allocation183_spill] sm:$0xff]  ;;  %v8439_v26 = vld [vmem:[#allocation109_spill] sm:$0xff] }
 0x360   : > { %v1923_v30 = vsel %vm1898_vm4, %v1890_v63, %v8424_v22  ;;  %v8440_v22 = vld [vmem:[#allocation141_spill] sm:$0xff] }
 0x361   : > { %v1956_v48 = vsel %vm1931_vm6, %v1923_v30, %v8425_v36  ;;  %v8442_v36 = vld [vmem:[#allocation108_spill] sm:$0xff] }
 0x362   : > { %v1989_v14 = vsel %vm1964_vm8, %v1956_v48, %v6041_v31  ;;  %v8429_v31 = vld [vmem:[#allocation67_spill] sm:$0xff] }
 0x363   : > { %v2022_v21 = vsel %vm1997_vm7, %v1989_v14, %v1720_v57  ;;  %v1891_v59 = vsel %vm1865_vm5, %v1858_v58, %v8429_v31  ;;  %v8443_v14 = vld [vmem:[#allocation184_spill] sm:$0xff]  ;;  %v8445_v58 = vld [vmem:[#allocation119_spill] sm:$0xff] }
 0x364   : > { %v2157_v49 = vpop.f32.mrf.mxu0  ;;  %v1924_v9 = vsel %vm1898_vm4, %v1891_v59, %v8430_v56  ;;  %v8446_v56 = vld [vmem:[#allocation133_spill] sm:$0xff] }
 0x365   : > { %v2158_v10 = vadd.f32 %v6368_v62, %v2157_v49  ;;  %v1722_v49 = vpop.permute.xlu0 %1721 }
 0x367   : > { %v2253_v18 = vmax.f32 %v2158_v10, 0.0  ;;  %4442 = vmatmul.msk.f32.gmra.mxu2 %vm2043_vm9, %v2020_v41  ;;  %v1957_v10 = vsel %vm1931_vm6, %v1924_v9, %v8431_v53  ;;  %v8448_v53 = vld [vmem:[#allocation162_spill] sm:$0xff] }
 0x368   : > { %v1990_v34 = vsel %vm1964_vm8, %v1957_v10, %v6079_v7  ;;  %v8435_v7 = vld [vmem:[#allocation58_spill] sm:$0xff] }
 0x369   : > { %2285 = vst.msk [vmem:[#allocation2 + $0x19] sm:$0xff] %vm365_vm0, %v2253_v18  ;;  %v2023_v4 = vsel %vm1997_vm7, %v1990_v34, %v1722_v49  ;;  %v4560_v18 = vld [vmem:[#allocation2 + $0x138] sm:$0xff] }
 0x36a   : > { %v1793_v45 = vsel %vm365_vm0, %v4560_v18, %v8432_v16  ;;  %v8449_v34 = vld [vmem:[#allocation176_spill] sm:$0xff] }
 0x36b   : > { %v1826_v47 = vsel %vm1799_vm2, %v1793_v45, %v8433_v24  ;;  %v8450_v24 = vld [vmem:[#allocation60_spill] sm:$0xff] }
 0x36c   : > { %v2160_v2 = vpop.f32.mrf.mxu0  ;;  %v1859_v3 = vsel %vm1832_vm3, %v1826_v47, %v8434_v39 }
 0x36d   : > { %v2161_v28 = vadd.f32 %v6368_v62, %v2160_v2  ;;  %v1892_v60 = vsel %vm1865_vm5, %v1859_v3, %v8435_v7  ;;  %v1724_v2 = vpop.permute.xlu1 %1723  ;;  %v8451_v3 = vld [vmem:[#allocation120_spill] sm:$0xff] }
 0x36e   : > { %v1925_v44 = vsel %vm1898_vm4, %v1892_v60, %v8436_v13  ;;  %v8452_v13 = vld [vmem:[#allocation142_spill] sm:$0xff] }
 0x36f   : > { %v2254_v61 = vmax.f32 %v2161_v28, 0.0  ;;  %4443 = vmatmul.msk.f32.gmra.mxu2 %vm2043_vm9, %v2021_v46  ;;  %v1958_v28 = vsel %vm1931_vm6, %v1925_v44, %v8437_v27  ;;  %v8454_v27 = vld [vmem:[#allocation163_spill] sm:$0xff] }
 0x370   : > { %v6403_v0 = vld [vmem:[#allocation2 + $0x19] sm:$0xff]  ;;  %v1991_v37 = vsel %vm1964_vm8, %v1958_v28, %v6084_v1  ;;  %v8441_v1 = vld [vmem:[#allocation71_spill] sm:$0xff] }
 0x371   : > { %2286 = vst.msk [vmem:[#allocation2 + $0x21] sm:$0xff] %vm365_vm0, %v2254_v61  ;;  %2641 = vrot.lane.b32.xlu0 %v6403_v0, %s4575_s11  ;;  %v2024_v38 = vsel %vm1997_vm7, %v1991_v37, %v1724_v2  ;;  %v4561_v61 = vld [vmem:[#allocation2 + $0x140] sm:$0xff] }
 0x372   : > { %v1794_v40 = vsel %vm365_vm0, %v4561_v61, %v8438_v43  ;;  %v8455_v37 = vld [vmem:[#allocation185_spill] sm:$0xff] }
 0x373   : > { %v1827_v29 = vsel %vm1799_vm2, %v1794_v40, %v8439_v26  ;;  %v8456_v26 = vld [vmem:[#allocation75_spill] sm:$0xff] }
 0x374   : > { %v2163_v32 = vpop.f32.mrf.mxu0  ;;  %v1860_v30 = vsel %vm1832_vm3, %v1827_v29, %v8440_v22 }
 0x375   : > { %v2164_v54 = vadd.f32 %v6368_v62, %v2163_v32  ;;  %v1893_v57 = vsel %vm1865_vm5, %v1860_v30, %v8441_v1  ;;  %v1726_v32 = vpop.permute.xlu2 %1725  ;;  %v8457_v30 = vld [vmem:[#allocation113_spill] sm:$0xff] }
 0x376   : > { %v1926_v48 = vsel %vm1898_vm4, %v1893_v57, %v8442_v36  ;;  %v8458_v36 = vld [vmem:[#allocation143_spill] sm:$0xff] }
 0x377   : > { %v2255_v17 = vmax.f32 %v2164_v54, 0.0  ;;  %4444 = vmatmul.msk.f32.gmra.mxu2 %vm2043_vm9, %v2022_v21  ;;  %v1959_v54 = vsel %vm1931_vm6, %v1926_v48, %v8443_v14  ;;  %v8460_v14 = vld [vmem:[#allocation156_spill] sm:$0xff] }
 0x378   : > { %v6425_v23 = vld [vmem:[#allocation2 + $0x21] sm:$0xff]  ;;  %v1992_v35 = vsel %vm1964_vm8, %v1959_v54, %v6099_v5  ;;  %v8447_v5 = vld [vmem:[#allocation72_spill] sm:$0xff] }
 0x379   : > { %2287 = vst.msk [vmem:[#allocation2 + $0x31] sm:$0xff] %vm365_vm0, %v2255_v17  ;;  %2643 = vrot.lane.b32.xlu1 %v6425_v23, %s4575_s11  ;;  %v2025_v12 = vsel %vm1997_vm7, %v1992_v35, %v1726_v32  ;;  %v4562_v17 = vld [vmem:[#allocation2 + $0x150] sm:$0xff]  ;;  %v8461_v35 = vld [vmem:[#allocation186_spill] sm:$0xff] }
 0x37a   : > { %v1795_v52 = vsel %vm365_vm0, %v4562_v17, %v8444_v42 }
 0x37b   : > { %v1828_v31 = vsel %vm1799_vm2, %v1795_v52, %v8445_v58  ;;  %v8462_v58 = vld [vmem:[#allocation79_spill] sm:$0xff] }
 0x37c   : > { %v2166_v41 = vpop.f32.mrf.mxu0  ;;  %v1861_v9 = vsel %vm1832_vm3, %v1828_v31, %v8446_v56 }
 0x37d   : > { %v2167_v19 = vadd.f32 %v6368_v62, %v2166_v41  ;;  %v1894_v49 = vsel %vm1865_vm5, %v1861_v9, %v8447_v5  ;;  %v1728_v41 = vpop.permute.xlu0 %1727  ;;  %v8463_v9 = vld [vmem:[#allocation121_spill] sm:$0xff] }
 0x37e   : > { %v1927_v10 = vsel %vm1898_vm4, %v1894_v49, %v8448_v53  ;;  %v8464_v53 = vld [vmem:[#allocation136_spill] sm:$0xff] }
 0x37f   : > { %v2256_v25 = vmax.f32 %v2167_v19, 0.0  ;;  %4445 = vmatmul.msk.f32.gmra.mxu2 %vm2043_vm9, %v2023_v4  ;;  %v1960_v19 = vsel %vm1931_vm6, %v1927_v10, %v8449_v34  ;;  %v8466_v34 = vld [vmem:[#allocation164_spill] sm:$0xff] }
 0x380   : > { %v6447_v50 = vld [vmem:[#allocation2 + $0x31] sm:$0xff]  ;;  %v1993_v18 = vsel %vm1964_vm8, %v1960_v19, %v6109_v8 }
 0x381   : > { %2288 = vst.msk [vmem:[#allocation2 + $0x39] sm:$0xff] %vm365_vm0, %v2256_v25  ;;  %2645 = vrot.lane.b32.xlu2 %v6447_v50, %s4575_s11  ;;  %v2026_v45 = vsel %vm1997_vm7, %v1993_v18, %v1728_v41  ;;  %v4563_v25 = vld [vmem:[#allocation2 + $0x158] sm:$0xff]  ;;  %v8453_v8 = vld [vmem:[#allocation59_spill] sm:$0xff] }
 0x382   : > { %v1796_v47 = vsel %vm365_vm0, %v4563_v25, %v8450_v24  ;;  %v8467_v18 = vld [vmem:[#allocation179_spill] sm:$0xff] }
 0x383   : > { %v1829_v7 = vsel %vm1799_vm2, %v1796_v47, %v8451_v3 }
 0x384   : > { %v2169_v46 = vpop.f32.mrf.mxu0  ;;  %v1862_v44 = vsel %vm1832_vm3, %v1829_v7, %v8452_v13 }
 0x385   : > { %v2170_v15 = vadd.f32 %v6368_v62, %v2169_v46  ;;  %v1895_v2 = vsel %vm1865_vm5, %v1862_v44, %v8453_v8  ;;  %v1730_v46 = vpop.permute.xlu1 %1729 }
 0x386   : > { %v1928_v28 = vsel %vm1898_vm4, %v1895_v2, %v8454_v27 }
 0x387   : > { %v2257_v11 = vmax.f32 %v2170_v15, 0.0  ;;  %4446 = vmatmul.msk.f32.gmra.mxu2 %vm2043_vm9, %v2024_v38  ;;  %v1961_v15 = vsel %vm1931_vm6, %v1928_v28, %v8455_v37 }
 0x388   : > { %v6469_v63 = vld [vmem:[#allocation2 + $0x39] sm:$0xff]  ;;  %v1994_v61 = vsel %vm1964_vm8, %v1961_v15, %v6119_v55 }
 0x389   : > { %2289 = vst.msk [vmem:[#allocation2 + $0x49] sm:$0xff] %vm365_vm0, %v2257_v11  ;;  %2647 = vrot.lane.b32.xlu0 %v6469_v63, %s4575_s11  ;;  %v2027_v40 = vsel %vm1997_vm7, %v1994_v61, %v1730_v46  ;;  %v4564_v11 = vld [vmem:[#allocation2 + $0x168] sm:$0xff]  ;;  %v8459_v55 = vld [vmem:[#allocation76_spill] sm:$0xff] }
 0x38a   : > { %v1797_v29 = vsel %vm365_vm0, %v4564_v11, %v8456_v26 }
 0x38b   : > { %v1830_v1 = vsel %vm1799_vm2, %v1797_v29, %v8457_v30 }
 0x38c   : > { %v2172_v21 = vpop.f32.mrf.mxu0  ;;  %v1863_v48 = vsel %vm1832_vm3, %v1830_v1, %v8458_v36 }
 0x38d   : > { %v2173_v33 = vadd.f32 %v6368_v62, %v2172_v21  ;;  %v1896_v32 = vsel %vm1865_vm5, %v1863_v48, %v8459_v55  ;;  %v1732_v21 = vpop.permute.xlu2 %1731 }
 0x38e   : > { %v1929_v54 = vsel %vm1898_vm4, %v1896_v32, %v8460_v14 }
 0x38f   : > { %v2258_v20 = vmax.f32 %v2173_v33, 0.0  ;;  %4447 = vmatmul.msk.f32.gmra.mxu2 %vm2043_vm9, %v2025_v12  ;;  %v1962_v33 = vsel %vm1931_vm6, %v1929_v54, %v8461_v35 }
 0x390   : > { %v6491_v59 = vld [vmem:[#allocation2 + $0x49] sm:$0xff]  ;;  %v1995_v17 = vsel %vm1964_vm8, %v1962_v33, %v6133_v51  ;;  %v8465_v51 = vld [vmem:[#allocation77_spill] sm:$0xff] }
 0x391   : > { %2290 = vst.msk [vmem:[#allocation2 + $0x51] sm:$0xff] %vm365_vm0, %v2258_v20  ;;  %2649 = vrot.lane.b32.xlu1 %v6491_v59, %s4575_s11  ;;  %v2028_v52 = vsel %vm1997_vm7, %v1995_v17, %v1732_v21  ;;  %v4565_v20 = vld [vmem:[#allocation2 + $0x170] sm:$0xff] }
 0x392   : > { %v1798_v31 = vsel %vm365_vm0, %v4565_v20, %v8462_v58 }
 0x393   : > { %v1831_v5 = vsel %vm1799_vm2, %v1798_v31, %v8463_v9 }
 0x394   : > { %v2175_v4 = vpop.f32.mrf.mxu0  ;;  %v1864_v10 = vsel %vm1832_vm3, %v1831_v5, %v8464_v53 }
 0x395   : > { %v2176_v16 = vadd.f32 %v6368_v62, %v2175_v4  ;;  %v1897_v41 = vsel %vm1865_vm5, %v1864_v10, %v8465_v51  ;;  %v1734_v4 = vpop.permute.xlu0 %1733 }
 0x396   : > { %v1930_v19 = vsel %vm1898_vm4, %v1897_v41, %v8466_v34 }
 0x397   : > { %v2259_v39 = vmax.f32 %v2176_v16, 0.0  ;;  %4448 = vmatmul.msk.f32.gmra.mxu2 %vm2043_vm9, %v2026_v45  ;;  %v1963_v16 = vsel %vm1931_vm6, %v1930_v19, %v8467_v18 }
 0x398   : > { %v6513_v60 = vld [vmem:[#allocation2 + $0x51] sm:$0xff]  ;;  %v1996_v25 = vsel %vm1964_vm8, %v1963_v16, %v6139_v6 }
 0x399   : > { %2291 = vst.msk [vmem:[#allocation2 + $0x61] sm:$0xff] %vm365_vm0, %v2259_v39  ;;  %2651 = vrot.lane.b32.xlu2 %v6513_v60, %s4575_s11  ;;  %v2029_v47 = vsel %vm1997_vm7, %v1996_v25, %v1734_v4 }
 0x39c   : > { %v2178_v38 = vpop.f32.mrf.mxu0 }
 0x39d   : > { %v2179_v43 = vadd.f32 %v6368_v62, %v2178_v38 }
 0x39f   : > { %v2260_v22 = vmax.f32 %v2179_v43, 0.0  ;;  %4449 = vmatmul.msk.f32.gmra.mxu2 %vm2043_vm9, %v2027_v40 }
 0x3a0   : > { %v6535_v57 = vld [vmem:[#allocation2 + $0x61] sm:$0xff] }
 0x3a1   : > { %2292 = vst.msk [vmem:[#allocation2 + $0x69] sm:$0xff] %vm365_vm0, %v2260_v22  ;;  %2653 = vrot.lane.b32.xlu0 %v6535_v57, %s4575_s11 }
 0x3a4   : > { %v2181_v12 = vpop.f32.mrf.mxu0 }
 0x3a5   : > { %v2182_v42 = vadd.f32 %v6368_v62, %v2181_v12 }
 0x3a7   : > { %v2261_v56 = vmax.f32 %v2182_v42, 0.0  ;;  %4450 = vmatmul.msk.f32.gmra.mxu2 %vm2043_vm9, %v2028_v52 }
 0x3a8   : > { %v6557_v49 = vld [vmem:[#allocation2 + $0x69] sm:$0xff] }
 0x3a9   : > { %2293 = vst.msk [vmem:[#allocation2 + $0x79] sm:$0xff] %vm365_vm0, %v2261_v56  ;;  %2655 = vrot.lane.b32.xlu1 %v6557_v49, %s4575_s11 }
 0x3ac   : > { %v2184_v45 = vpop.f32.mrf.mxu0 }
 0x3ad   : > { %v2185_v24 = vadd.f32 %v6368_v62, %v2184_v45 }
 0x3af   : > { %v2262_v39 = vmax.f32 %v2185_v24, 0.0  ;;  %4451 = vmatmul.msk.f32.gmra.mxu2 %vm2043_vm9, %v2029_v47 }
 0x3b0   : > { %v6575_v3 = vld [vmem:[#allocation2 + $0x79] sm:$0xff] }
 0x3b1   : > { %2294 = vst.msk [vmem:[#allocation2 + $0x81] sm:$0xff] %vm365_vm0, %v2262_v39  ;;  %2657 = vrot.lane.b32.xlu2 %v6575_v3, %s4575_s11 }
 0x3b4   : > { %v2187_v7 = vpop.f32.mrf.mxu0 }
 0x3b5   : > { %v2188_v13 = vadd.f32 %v6368_v62, %v2187_v7 }
 0x3b7   : > { %v2263_v44 = vmax.f32 %v2188_v13, 0.0 }
 0x3b8   : > { %v6581_v8 = vld [vmem:[#allocation2 + $0x81] sm:$0xff] }
 0x3b9   : > { %2295 = vst.msk [vmem:[#allocation2 + $0x91] sm:$0xff] %vm365_vm0, %v2263_v44  ;;  %2659 = vrot.lane.b32.xlu0 %v6581_v8, %s4575_s11 }
 0x3ba   : > { %v2205_v6 = vpop.f32.mrf.mxu2 }
 0x3bb   : > { %v2206_v2 = vadd.f32 %v6368_v62, %v2205_v6 }
 0x3bc   : > { %v2190_v27 = vpop.f32.mrf.mxu0 }
 0x3bd   : > { %v2269_v28 = vmax.f32 %v2206_v2, 0.0  ;;  %v2191_v46 = vadd.f32 %v6368_v62, %v2190_v27 }
 0x3bf   : > { %2301 = vst.msk [vmem:[#allocation2 + $0xd9] sm:$0xff] %vm365_vm0, %v2269_v28  ;;  %v2264_v37 = vmax.f32 %v2191_v46, 0.0 }
 0x3c0   : > { %v6589_v15 = vld [vmem:[#allocation2 + $0x91] sm:$0xff] }
 0x3c1   : > { %2296 = vst.msk [vmem:[#allocation2 + $0x99] sm:$0xff] %vm365_vm0, %v2264_v37  ;;  %2661 = vrot.lane.b32.xlu1 %v6589_v15, %s4575_s11 }
 0x3c2   : > { %v2208_v38 = vpop.f32.mrf.mxu2 }
 0x3c3   : > { %v2209_v61 = vadd.f32 %v6368_v62, %v2208_v38 }
 0x3c4   : > { %v2193_v43 = vpop.f32.mrf.mxu0 }
 0x3c5   : > { %v2270_v40 = vmax.f32 %v2209_v61, 0.0  ;;  %v2194_v11 = vadd.f32 %v6368_v62, %v2193_v43 }
 0x3c6   : > { %v2367_v9 = vld [vmem:[#allocation2 + $0xd9] sm:$0xff] }
 0x3c7   : > { %2302 = vst.msk [vmem:[#allocation2 + $0xe1] sm:$0xff] %vm365_vm0, %v2270_v40  ;;  %v2265_v26 = vmax.f32 %v2194_v11, 0.0 }
 0x3c8   : > { %v2362_v29 = vld [vmem:[#allocation2 + $0x99] sm:$0xff] }
 0x3c9   : > { %2297 = vst.msk [vmem:[#allocation2 + $0xa9] sm:$0xff] %vm365_vm0, %v2265_v26  ;;  %2663 = vrot.lane.b32.xlu2 %v2362_v29, %s4575_s11 }
 0x3ca   : > { %v2211_v22 = vpop.f32.mrf.mxu2 }
 0x3cb   : > { %v2212_v30 = vadd.f32 %v6368_v62, %v2211_v22 }
 0x3cc   : > { %v2196_v1 = vpop.f32.mrf.mxu0 }
 0x3cd   : > { %v2271_v36 = vmax.f32 %v2212_v30, 0.0  ;;  %v2197_v48 = vadd.f32 %v6368_v62, %v2196_v1 }
 0x3ce   : > { %v6622_v19 = vld [vmem:[#allocation2 + $0xe1] sm:$0xff] }
 0x3cf   : > { %2303 = vst.msk [vmem:[#allocation2 + $0xf1] sm:$0xff] %vm365_vm0, %v2271_v36  ;;  %v2266_v55 = vmax.f32 %v2197_v48, 0.0 }
 0x3d0   : > { %v2363_v32 = vld [vmem:[#allocation2 + $0xa9] sm:$0xff] }
 0x3d1   : > { %2298 = vst.msk [vmem:[#allocation2 + $0xb1] sm:$0xff] %vm365_vm0, %v2266_v55  ;;  %2665 = vrot.lane.b32.xlu0 %v2363_v32, %s4575_s11 }
 0x3d2   : > { %v2214_v14 = vpop.f32.mrf.mxu2 }
 0x3d3   : > { %v2215_v54 = vadd.f32 %v6368_v62, %v2214_v14 }
 0x3d4   : > { %v2199_v21 = vpop.f32.mrf.mxu0 }
 0x3d5   : > { %v2272_v35 = vmax.f32 %v2215_v54, 0.0  ;;  %v2200_v33 = vadd.f32 %v6368_v62, %v2199_v21  ;;  %v2381_v54 = vld [vmem:[#allocation2 + $0x2] sm:$0xff] }
 0x3d6   : > { %v6628_v45 = vld [vmem:[#allocation2 + $0xf1] sm:$0xff] }
 0x3d7   : > { %2304 = vst.msk [vmem:[#allocation2 + $0xf9] sm:$0xff] %vm365_vm0, %v2272_v35  ;;  %v2267_v12 = vmax.f32 %v2200_v33, 0.0 }
 0x3d8   : > { %v2364_v17 = vld [vmem:[#allocation2 + $0xb1] sm:$0xff] }
 0x3d9   : > { %2299 = vst.msk [vmem:[#allocation2 + $0xc1] sm:$0xff] %vm365_vm0, %v2267_v12  ;;  %2667 = vrot.lane.b32.xlu1 %v2364_v17, %s4575_s11  ;;  %v2382_v17 = vld [vmem:[#allocation2 + $0xa] sm:$0xff] }
 0x3da   : > { %v2217_v42 = vpop.f32.mrf.mxu2 }
 0x3db   : > { %v2218_v52 = vadd.f32 %v6368_v62, %v2217_v42 }
 0x3dc   : > { %v2202_v20 = vpop.f32.mrf.mxu0 }
 0x3dd   : > { %v2273_v58 = vmax.f32 %v2218_v52, 0.0  ;;  %v2203_v31 = vadd.f32 %v6368_v62, %v2202_v20  ;;  %v2384_v52 = vld [vmem:[#allocation2 + $0x22] sm:$0xff] }
 0x3de   : > { %v6617_v41 = vld [vmem:[#allocation2 + $0xf9] sm:$0xff] }
 0x3df   : > { %2305 = vst.msk [vmem:[#allocation2 + $0x109] sm:$0xff] %vm365_vm0, %v2273_v58  ;;  %v2268_v56 = vmax.f32 %v2203_v31, 0.0 }
 0x3e0   : > { %v2365_v5 = vld [vmem:[#allocation2 + $0xc1] sm:$0xff] }
 0x3e1   : > { %2300 = vst.msk [vmem:[#allocation2 + $0xc9] sm:$0xff] %vm365_vm0, %v2268_v56  ;;  %2673 = vrot.lane.b32.xlu1 %v2367_v9, %s4575_s11  ;;  %2669 = vrot.lane.b32.xlu2 %v2365_v5, %s4575_s11  ;;  %v6674_v56 = vpop.permute.xlu2 %2639  ;;  %v2387_v5 = vld [vmem:[#allocation2 + $0x4a] sm:$0xff] }
 0x3e2   : > { %v2220_v53 = vpop.f32.mrf.mxu2 }
 0x3e3   : > { %v2221_v10 = vadd.f32 %v6368_v62, %v2220_v53  ;;  %v2385_v53 = vld [vmem:[#allocation2 + $0x32] sm:$0xff] }
 0x3e5   : > { %v2274_v51 = vmax.f32 %v2221_v10, 0.0  ;;  %v2383_v10 = vld [vmem:[#allocation2 + $0x1a] sm:$0xff] }
 0x3e6   : > { %v6632_v25 = vld [vmem:[#allocation2 + $0x109] sm:$0xff] }
 0x3e7   : > { %2306 = vst.msk [vmem:[#allocation2 + $0x111] sm:$0xff] %vm365_vm0, %v2274_v51 }
 0x3e8   : > { %v2366_v34 = vld [vmem:[#allocation2 + $0xc9] sm:$0xff] }
 0x3e9   : > { %2679 = vrot.lane.b32.xlu1 %v6617_v41, %s4575_s11  ;;  %2671 = vrot.lane.b32.xlu0 %v2366_v34, %s4575_s11  ;;  %v6680_v51 = vpop.permute.xlu2 %2645  ;;  %v6682_v34 = vld [vmem:[#allocation2 + $0x18] sm:$0xff] }
 0x3ea   : > { %2675 = vrot.lane.b32.xlu2 %v6622_v19, %s4575_s11  ;;  %v2223_v4 = vpop.f32.mrf.mxu2 }
 0x3eb   : > { %v2224_v18 = vadd.f32 %v6368_v62, %v2223_v4  ;;  %v6688_v4 = vpop.permute.xlu1 %2637 }
 0x3ed   : > { %v2275_v16 = vmax.f32 %v2224_v18, 0.0  ;;  %v6690_v18 = vpop.permute.xlu0 %2641 }
 0x3ee   : > { %v6642_v13 = vld [vmem:[#allocation2 + $0x111] sm:$0xff] }
 0x3ef   : > { %2307 = vst.msk [vmem:[#allocation2 + $0x121] sm:$0xff] %vm365_vm0, %v2275_v16  ;;  %v6692_v16 = vld [vmem:[#allocation2 + $0x30] sm:$0xff] }
 0x3f1   : > { %2677 = vrot.lane.b32.xlu0 %v6628_v45, %s4575_s11 }
 0x3f2   : > { %2681 = vrot.lane.b32.xlu2 %v6632_v25, %s4575_s11  ;;  %v2226_v24 = vpop.f32.mrf.mxu2 }
 0x3f3   : > { %v2227_v47 = vadd.f32 %v6368_v62, %v2226_v24  ;;  %v6694_v24 = vpop.permute.xlu2 %2651 }
 0x3f5   : > { %v2276_v39 = vmax.f32 %v2227_v47, 0.0  ;;  %v6701_v47 = vpop.permute.xlu1 %2643 }
 0x3f6   : > { %v6637_v7 = vld [vmem:[#allocation2 + $0x121] sm:$0xff] }
 0x3f7   : > { %2308 = vst.msk [vmem:[#allocation2 + $0x129] sm:$0xff] %vm365_vm0, %v2276_v39  ;;  %2685 = vrot.lane.b32.xlu1 %v6637_v7, %s4575_s11 }
 0x3f9   : > { %2683 = vrot.lane.b32.xlu0 %v6642_v13, %s4575_s11 }
 0x3fa   : > { %v2229_v44 = vpop.f32.mrf.mxu2 }
 0x3fb   : > { %v2230_v6 = vadd.f32 %v6368_v62, %v2229_v44  ;;  %v6703_v39 = vpop.permute.xlu0 %2647  ;;  %v6705_v44 = vld [vmem:[#allocation2 + $0x20] sm:$0xff] }
 0x3fd   : > { %v2277_v2 = vmax.f32 %v2230_v6, 0.0 }
 0x3fe   : > { %v6647_v27 = vld [vmem:[#allocation2 + $0x129] sm:$0xff] }
 0x3ff   : > { %2309 = vst.msk [vmem:[#allocation2 + $0x139] sm:$0xff] %vm365_vm0, %v2277_v2  ;;  %2687 = vrot.lane.b32.xlu2 %v6647_v27, %s4575_s11 }
 0x402   : > { %v2232_v28 = vpop.f32.mrf.mxu2 }
 0x403   : > { %v2233_v46 = vadd.f32 %v6368_v62, %v2232_v28  ;;  %v6714_v2 = vpop.permute.xlu1 %2649 }
 0x405   : > { %v2278_v37 = vmax.f32 %v2233_v46, 0.0 }
 0x406   : > { %v2375_v38 = vld [vmem:[#allocation2 + $0x139] sm:$0xff] }
 0x407   : > { %2310 = vst.msk [vmem:[#allocation2 + $0x141] sm:$0xff] %vm365_vm0, %v2278_v37  ;;  %2689 = vrot.lane.b32.xlu0 %v2375_v38, %s4575_s11 }
 0x40a   : > { %v2235_v61 = vpop.f32.mrf.mxu2 }
 0x40b   : > { %v2236_v43 = vadd.f32 %v6368_v62, %v2235_v61  ;;  %v6707_v6 = vpop.permute.xlu2 %2657 }
 0x40d   : > { %v2279_v40 = vmax.f32 %v2236_v43, 0.0 }
 0x40e   : > { %v2376_v11 = vld [vmem:[#allocation2 + $0x141] sm:$0xff] }
 0x40f   : > { %2311 = vst.msk [vmem:[#allocation2 + $0x151] sm:$0xff] %vm365_vm0, %v2279_v40  ;;  %2691 = vrot.lane.b32.xlu1 %v2376_v11, %s4575_s11  ;;  %v6742_v11 = vld [vmem:[#allocation2 + $0x48] sm:$0xff] }
 0x412   : > { %v2238_v26 = vpop.f32.mrf.mxu2 }
 0x413   : > { %v2239_v29 = vadd.f32 %v6368_v62, %v2238_v26  ;;  %v6716_v28 = vpop.permute.xlu0 %2653 }
 0x415   : > { %v2280_v22 = vmax.f32 %v2239_v29, 0.0 }
 0x416   : > { %v2377_v30 = vld [vmem:[#allocation2 + $0x151] sm:$0xff] }
 0x417   : > { %2312 = vst.msk [vmem:[#allocation2 + $0x159] sm:$0xff] %vm365_vm0, %v2280_v22  ;;  %2693 = vrot.lane.b32.xlu2 %v2377_v30, %s4575_s11  ;;  %v6762_v30 = vld [vmem:[#allocation2 + $0x50] sm:$0xff] }
 0x41a   : > { %v2241_v1 = vpop.f32.mrf.mxu2 }
 0x41b   : > { %v2242_v36 = vadd.f32 %v6368_v62, %v2241_v1  ;;  %v6727_v37 = vpop.permute.xlu1 %2655  ;;  %v6764_v1 = vld [vmem:[#allocation2 + $0x52] sm:$0xff] }
 0x41d   : > { %v2281_v48 = vmax.f32 %v2242_v36, 0.0 }
 0x41e   : > { %v2378_v55 = vld [vmem:[#allocation2 + $0x159] sm:$0xff] }
 0x41f   : > { %2313 = vst.msk [vmem:[#allocation2 + $0x169] sm:$0xff] %vm365_vm0, %v2281_v48  ;;  %2695 = vrot.lane.b32.xlu0 %v2378_v55, %s4575_s11 }
 0x422   : > { %v2244_v32 = vpop.f32.mrf.mxu2 }
 0x423   : > { %v2245_v14 = vadd.f32 %v6368_v62, %v2244_v32  ;;  %v6720_v46 = vpop.permute.xlu2 %2663 }
 0x424   : > { %8468 = vst [vmem:[#allocation35_spill] sm:$0xff] %v6720_v46  ;;  %v6893_v46 = vld [vmem:[#allocation2 + $0xf0] sm:$0xff] }
 0x425   : > { %v2282_v21 = vmax.f32 %v2245_v14, 0.0 }
 0x426   : > { %v2379_v35 = vld [vmem:[#allocation2 + $0x169] sm:$0xff] }
 0x427   : > { %2314 = vst.msk [vmem:[#allocation2 + $0x171] sm:$0xff] %vm365_vm0, %v2282_v21  ;;  %2697 = vrot.lane.b32.xlu1 %v2379_v35, %s4575_s11  ;;  %2765 = vrot.lane.b32.xlu0 %v2381_v54, %s4576_s16  ;;  %v6789_v54 = vld [vmem:[#allocation2 + $0x60] sm:$0xff] }
 0x428   : > { %v6791_v21 = vld [vmem:[#allocation2 + $0x62] sm:$0xff] }
 0x42a   : > { %v2247_v33 = vpop.f32.mrf.mxu2 }
 0x42b   : > { %v2248_v12 = vadd.f32 %v6368_v62, %v2247_v33  ;;  %v6729_v38 = vpop.permute.xlu0 %2659 }
 0x42d   : > { %v2283_v42 = vmax.f32 %v2248_v12, 0.0  ;;  %v3893_v12 = vld [vmem:[%s8014_s3 + $0x40] sm:$0xff] }
 0x42e   : > { %v2380_v20 = vld [vmem:[#allocation2 + $0x171] sm:$0xff]  ;;  %4001 = vmatpush.msra.mxu1 %v3893_v12  ;;  %4501 = vmatpush.msra.mxu3 %v3893_v12 }
 0x42f   : > { %2315 = vst.msk [vmem:[#allocation2 + $0x181] sm:$0xff] %vm365_vm0, %v2283_v42  ;;  %2767 = vrot.lane.b32.xlu1 %v2382_v17, %s4576_s16  ;;  %2771 = vrot.lane.b32.xlu0 %v2384_v52, %s4576_s16  ;;  %v3892_v17 = vld [vmem:[%s8014_s3 + $0x38] sm:$0xff]  ;;  %v6811_v42 = vld [vmem:[#allocation2 + $0xe0] sm:$0xff] }
 0x430   : > { %2699 = vrot.lane.b32.xlu2 %v2380_v20, %s4575_s11  ;;  %4002 = vmatpush.msra.mxu1 %v3892_v17 }
 0x431   : > { %4502 = vmatpush.msra.mxu3 %v3892_v17 }
 0x432   : > { %v2250_v58 = vpop.f32.mrf.mxu2 }
 0x433   : > { %v2251_v31 = vadd.f32 %v6368_v62, %v2250_v58  ;;  %v2386_v62 = vld [vmem:[#allocation2 + $0x3a] sm:$0xff]  ;;  %v6738_v43 = vpop.permute.xlu1 %2661 }
 0x434   : > { %8470 = vst [vmem:[#allocation39_spill] sm:$0xff] %v6738_v43 }
 0x435   : > { %v2284_v9 = vmax.f32 %v2251_v31, 0.0 }
 0x437   : > { %2316 = vst.msk [vmem:[#allocation2 + $0x189] sm:$0xff] %vm365_vm0, %v2284_v9  ;;  %2777 = vrot.lane.b32.xlu0 %v2387_v5, %s4576_s16  ;;  %2773 = vrot.lane.b32.xlu1 %v2385_v53, %s4576_s16  ;;  %v3890_v9 = vld [vmem:[%s8014_s3 + $0x28] sm:$0xff] }
 0x438   : > { %2769 = vrot.lane.b32.xlu2 %v2383_v10, %s4576_s16 }
 0x43b   : > { %v6731_v61 = vpop.permute.xlu2 %2669 }
 0x43c   : > { %8469 = vst [vmem:[#allocation63_spill] sm:$0xff] %v6731_v61 }
 0x43f   : > { %3149 = vrot.lane.b32.xlu0 %v2383_v10, %s4579_s19  ;;  %2893 = vrot.lane.b32.xlu1 %v6682_v34, %s4577_s17  ;;  %v3887_v10 = vld [vmem:[%s8014_s3 + $0x10] sm:$0xff] }
 0x440   : > { %2775 = vrot.lane.b32.xlu2 %v2386_v62, %s4576_s16 }
 0x443   : > { %v6740_v40 = vpop.permute.xlu0 %2665 }
 0x444   : > { %8471 = vst [vmem:[#allocation80_spill] sm:$0xff] %v6740_v40 }
 0x447   : > { %3533 = vrot.lane.b32.xlu0 %v2385_v53, %s4582_s22  ;;  %3277 = vrot.lane.b32.xlu1 %v6692_v16, %s4580_s20 }
 0x448   : > { %3021 = vrot.lane.b32.xlu2 %v6403_v0, %s4578_s18  ;;  %v6718_v0 = vld [vmem:[#allocation2 + $0x38] sm:$0xff] }
 0x44b   : > { %v6751_v26 = vpop.permute.xlu1 %2667 }
 0x44c   : > { %8472 = vst [vmem:[#allocation37_spill] sm:$0xff] %v6751_v26 }
 0x44f   : > { %3151 = vrot.lane.b32.xlu0 %v2384_v52, %s4579_s19  ;;  %2895 = vrot.lane.b32.xlu1 %v6705_v44, %s4577_s17  ;;  %v3891_v52 = vld [vmem:[%s8014_s3 + $0x30] sm:$0xff] }
 0x450   : > { %3405 = vrot.lane.b32.xlu2 %v6447_v50, %s4581_s21  ;;  %4003 = vmatpush.msra.mxu1 %v3891_v52 }
 0x451   : > { %4503 = vmatpush.msra.mxu3 %v3891_v52  ;;  %v6855_v52 = vld [vmem:[#allocation2 + $0xf8] sm:$0xff] }
 0x452   : > { %4004 = vmatpush.msra.mxu1 %v3890_v9 }
 0x453   : > { %v6766_v36 = vpop.permute.xlu1 %2673  ;;  %4504 = vmatpush.msra.mxu3 %v3890_v9  ;;  %v6857_v9 = vld [vmem:[#allocation2 + $0xe2] sm:$0xff] }
 0x457   : > { %3535 = vrot.lane.b32.xlu0 %v2386_v62, %s4582_s22  ;;  %3279 = vrot.lane.b32.xlu1 %v6718_v0, %s4580_s20 }
 0x458   : > { %3023 = vrot.lane.b32.xlu2 %v6425_v23, %s4578_s18  ;;  %v6747_v23 = vpop.permute.xlu2 %2675 }
 0x45b   : > { %v6753_v29 = vpop.permute.xlu0 %2671  ;;  %v6783_v55 = vpop.permute.xlu1 %2679 }
 0x45f   : > { %3153 = vrot.lane.b32.xlu0 %v2385_v53, %s4579_s19  ;;  %2897 = vrot.lane.b32.xlu1 %v6692_v16, %s4577_s17  ;;  %v3888_v53 = vld [vmem:[%s8014_s3 + $0x18] sm:$0xff] }
 0x460   : > { %3407 = vrot.lane.b32.xlu2 %v6469_v63, %s4581_s21  ;;  %v6760_v22 = vpop.permute.xlu2 %2681 }
 0x467   : > { %3537 = vrot.lane.b32.xlu0 %v2387_v5, %s4582_s22  ;;  %3281 = vrot.lane.b32.xlu1 %v6742_v11, %s4580_s20 }
 0x468   : > { %3025 = vrot.lane.b32.xlu2 %v6447_v50, %s4578_s18  ;;  %v6768_v50 = vpop.permute.xlu0 %2677  ;;  %v6776_v48 = vpop.permute.xlu2 %2687 }
 0x469   : > { %8473 = vst [vmem:[#allocation84_spill] sm:$0xff] %v6776_v48 }
 0x46f   : > { %3155 = vrot.lane.b32.xlu0 %v2386_v62, %s4579_s19  ;;  %2899 = vrot.lane.b32.xlu1 %v6718_v0, %s4577_s17 }
 0x470   : > { %3409 = vrot.lane.b32.xlu2 %v6491_v59, %s4581_s21  ;;  %v6785_v32 = vpop.permute.xlu0 %2683 }
 0x471   : > { %v6787_v14 = vpop.permute.xlu2 %2693 }
 0x472   : > { %8474 = vst [vmem:[#allocation41_spill] sm:$0xff] %v6787_v14  ;;  %v6881_v14 = vld [vmem:[#allocation2 + $0xfa] sm:$0xff] }
 0x477   : > { %3539 = vrot.lane.b32.xlu0 %v6764_v1, %s4582_s22  ;;  %3283 = vrot.lane.b32.xlu1 %v6762_v30, %s4580_s20 }
 0x478   : > { %3027 = vrot.lane.b32.xlu2 %v6469_v63, %s4578_s18  ;;  %v6799_v63 = vpop.permute.xlu1 %2685 }
 0x479   : > { %8475 = vst [vmem:[#allocation68_spill] sm:$0xff] %v6799_v63  ;;  %v6801_v35 = vpop.permute.xlu0 %2689  ;;  %v2399_v63 = vld [vmem:[#allocation2 + $0xda] sm:$0xff] }
 0x47a   : > { %8476 = vst [vmem:[#allocation33_spill] sm:$0xff] %v6801_v35 }
 0x47f   : > { %3157 = vrot.lane.b32.xlu0 %v2387_v5, %s4579_s19  ;;  %2901 = vrot.lane.b32.xlu1 %v6742_v11, %s4577_s17  ;;  %v3889_v5 = vld [vmem:[%s8014_s3 + $0x20] sm:$0xff] }
 0x480   : > { %3411 = vrot.lane.b32.xlu2 %v6513_v60, %s4581_s21  ;;  %4005 = vmatpush.msra.mxu1 %v3889_v5 }
 0x481   : > { %v6821_v20 = vpop.permute.xlu1 %2691  ;;  %4505 = vmatpush.msra.mxu3 %v3889_v5 }
 0x482   : > { %8478 = vst [vmem:[#allocation34_spill] sm:$0xff] %v6821_v20  ;;  %4006 = vmatpush.msra.mxu1 %v3888_v53 }
 0x483   : > { %4506 = vmatpush.msra.mxu3 %v3888_v53 }
 0x484   : > { %4007 = vmatpush.msra.mxu1 %v3887_v10 }
 0x485   : > { %4507 = vmatpush.msra.mxu3 %v3887_v10 }
 0x487   : > { %3541 = vrot.lane.b32.xlu0 %v6791_v21, %s4582_s22  ;;  %3285 = vrot.lane.b32.xlu1 %v6789_v54, %s4580_s20 }
 0x488   : > { %3029 = vrot.lane.b32.xlu2 %v6491_v59, %s4578_s18  ;;  %v2398_v59 = vld [vmem:[#allocation2 + $0xca] sm:$0xff] }
 0x48a   : > { %v6803_v33 = vpop.permute.xlu2 %2699 }
 0x48b   : > { %8477 = vst [vmem:[#allocation85_spill] sm:$0xff] %v6803_v33  ;;  %v6869_v33 = vld [vmem:[#allocation2 + $0x68] sm:$0xff] }
 0x48f   : > { %2927 = vrot.lane.b32.xlu0 %v6811_v42, %s4577_s17  ;;  %2799 = vrot.lane.b32.xlu1 %v2398_v59, %s4576_s16  ;;  %v3886_v59 = vld [vmem:[%s8014_s3 + $0x8] sm:$0xff] }
 0x490   : > { %3413 = vrot.lane.b32.xlu2 %v6535_v57, %s4581_s21  ;;  %4008 = vmatpush.msra.mxu1 %v3886_v59 }
 0x491   : > { %v6823_v58 = vpop.permute.xlu0 %2695  ;;  %4508 = vmatpush.msra.mxu3 %v3886_v59  ;;  %v6867_v59 = vld [vmem:[#allocation2 + $0x6a] sm:$0xff] }
 0x492   : > { %8479 = vst [vmem:[#allocation90_spill] sm:$0xff] %v6823_v58  ;;  %v6825_v31 = vpop.permute.xlu2 %2769  ;;  %v2317_v58 = vld [vmem:[#allocation2] sm:$0xff] }
 0x493   : > { %v3629_v61 = vsel %vm365_vm0, %v2317_v58, %v6688_v4 }
 0x497   : > { %3159 = vrot.lane.b32.xlu0 %v6764_v1, %s4579_s19  ;;  %3031 = vrot.lane.b32.xlu1 %v6513_v60, %s4578_s18  ;;  %v3885_v60 = vld [vmem:[%s8014_s3] sm:$0xff] }
 0x498   : > { %2903 = vrot.lane.b32.xlu2 %v6762_v30, %s4577_s17  ;;  %4009 = vmatpush.msra.mxu1 %v3885_v60 }
 0x499   : > { %v6845_v62 = vpop.permute.xlu1 %2697  ;;  %v2766_v12 = vpop.permute.xlu0 %2765  ;;  %4509 = vmatpush.msra.mxu3 %v3885_v60 }
 0x49a   : > { %8480 = vst [vmem:[#allocation42_spill] sm:$0xff] %v6845_v62  ;;  %v6847_v17 = vpop.permute.xlu2 %2775  ;;  %v3661_v35 = vsel %vm1799_vm2, %v3629_v61, %v2766_v12 }
 0x49f   : > { %3311 = vrot.lane.b32.xlu0 %v6855_v52, %s4580_s20  ;;  %3183 = vrot.lane.b32.xlu1 %v6857_v9, %s4579_s19 }
 0x4a0   : > { %3055 = vrot.lane.b32.xlu2 %v6622_v19, %s4578_s18 }
 0x4a1   : > { %v2768_v5 = vpop.permute.xlu1 %2767  ;;  %v6865_v53 = vpop.permute.xlu0 %2771 }
 0x4a2   : > { %v3022_v10 = vpop.permute.xlu2 %3021 }
 0x4a7   : > { %3543 = vrot.lane.b32.xlu0 %v6867_v59, %s4582_s22  ;;  %3415 = vrot.lane.b32.xlu1 %v6557_v49, %s4581_s21 }
 0x4a8   : > { %3287 = vrot.lane.b32.xlu2 %v6869_v33, %s4580_s20 }
 0x4a9   : > { %v6877_v62 = vpop.permute.xlu0 %2777  ;;  %v6879_v19 = vpop.permute.xlu1 %2773 }
 0x4aa   : > { %v3406_v60 = vpop.permute.xlu2 %3405 }
 0x4af   : > { %2905 = vrot.lane.b32.xlu0 %v6789_v54, %s4577_s17  ;;  %3567 = vrot.lane.b32.xlu1 %v6881_v14, %s4582_s22 }
 0x4b0   : > { %3439 = vrot.lane.b32.xlu2 %v6617_v41, %s4581_s21 }
 0x4b1   : > { %v3150_v26 = vpop.permute.xlu0 %3149  ;;  %v2894_v20 = vpop.permute.xlu1 %2893 }
 0x4b2   : > { %v3024_v40 = vpop.permute.xlu2 %3023  ;;  %v3693_v48 = vsel %vm1832_vm3, %v3661_v35, %v2894_v20 }
 0x4b3   : > { %v3725_v43 = vsel %vm1865_vm5, %v3693_v48, %v3022_v10  ;;  %v6906_v10 = vld [vmem:[#allocation2 + $0x78] sm:$0xff] }
 0x4b4   : > { %v3757_v61 = vsel %vm1898_vm4, %v3725_v43, %v3150_v26 }
 0x4b7   : > { %3057 = vrot.lane.b32.xlu0 %v6628_v45, %s4578_s18  ;;  %2929 = vrot.lane.b32.xlu1 %v6893_v46, %s4577_s17  ;;  %v2318_v45 = vld [vmem:[#allocation2 + $0x8] sm:$0xff] }
 0x4b8   : > { %2801 = vrot.lane.b32.xlu2 %v2399_v63, %s4576_s16  ;;  %v3630_v43 = vsel %vm365_vm0, %v2318_v45, %v6674_v56 }
 0x4b9   : > { %v3534_v4 = vpop.permute.xlu0 %3533  ;;  %v3278_v58 = vpop.permute.xlu1 %3277 }
 0x4ba   : > { %v3789_v12 = vsel %vm1931_vm6, %v3757_v61, %v3278_v58  ;;  %v3408_v35 = vpop.permute.xlu2 %3407  ;;  %v6918_v61 = vld [vmem:[#allocation2 + $0x108] sm:$0xff] }
 0x4bb   : > { %v3821_v20 = vsel %vm1964_vm8, %v3789_v12, %v3406_v60  ;;  %v3662_v60 = vsel %vm1799_vm2, %v3630_v43, %v2768_v5 }
 0x4bc   : > { %v3853_v48 = vsel %vm1997_vm7, %v3821_v20, %v3534_v4 }
 0x4bd   : > { %4452 = vmatmul.msk.f32.vlgmr.msra.gmra.mxu1 %vm2043_vm9, %v3853_v48 }
 0x4bf   : > { %3289 = vrot.lane.b32.xlu0 %v6906_v10, %s4580_s20  ;;  %3161 = vrot.lane.b32.xlu1 %v6791_v21, %s4579_s19 }
 0x4c0   : > { %3033 = vrot.lane.b32.xlu2 %v6535_v57, %s4578_s18  ;;  %v6925_v57 = vld [vmem:[#allocation2 + $0xf2] sm:$0xff] }
 0x4c1   : > { %v3152_v26 = vpop.permute.xlu0 %3151  ;;  %v2896_v63 = vpop.permute.xlu1 %2895 }
 0x4c2   : > { %v3026_v4 = vpop.permute.xlu2 %3025  ;;  %v3694_v58 = vsel %vm1832_vm3, %v3662_v60, %v2896_v63  ;;  %v6934_v63 = vld [vmem:[#allocation2 + $0x7a] sm:$0xff] }
 0x4c3   : > { %v3726_v12 = vsel %vm1865_vm5, %v3694_v58, %v3024_v40 }
 0x4c4   : > { %v3758_v20 = vsel %vm1898_vm4, %v3726_v12, %v3152_v26  ;;  %v3631_v26 = vsel %vm365_vm0, %v6682_v34, %v6690_v18 }
 0x4c5   : > { %v3663_v58 = vsel %vm1799_vm2, %v3631_v26, %v6825_v31 }
 0x4c7   : > { %3441 = vrot.lane.b32.xlu0 %v6632_v25, %s4581_s21  ;;  %3313 = vrot.lane.b32.xlu1 %v6918_v61, %s4580_s20 }
 0x4c8   : > { %3185 = vrot.lane.b32.xlu2 %v6925_v57, %s4579_s19 }
 0x4c9   : > { %v3536_v56 = vpop.permute.xlu0 %3535  ;;  %v3280_v5 = vpop.permute.xlu1 %3279 }
 0x4ca   : > { %v3790_v48 = vsel %vm1931_vm6, %v3758_v20, %v3280_v5  ;;  %v3410_v45 = vpop.permute.xlu2 %3409  ;;  %v6953_v5 = vld [vmem:[#allocation2 + $0x10a] sm:$0xff] }
 0x4cb   : > { %v3822_v40 = vsel %vm1964_vm8, %v3790_v48, %v3408_v35 }
 0x4cc   : > { %v3854_v43 = vsel %vm1997_vm7, %v3822_v40, %v3536_v56 }
 0x4cd   : > { %4453 = vmatmul.msk.f32.gmra.mxu1 %vm2043_vm9, %v3854_v43 }
 0x4cf   : > { %2779 = vrot.lane.b32.xlu0 %v6764_v1, %s4576_s16  ;;  %3545 = vrot.lane.b32.xlu1 %v6934_v63, %s4582_s22 }
 0x4d0   : > { %3417 = vrot.lane.b32.xlu2 %v6575_v3, %s4581_s21 }
 0x4d1   : > { %v3154_v35 = vpop.permute.xlu0 %3153  ;;  %v2898_v60 = vpop.permute.xlu1 %2897 }
 0x4d2   : > { %v3028_v12 = vpop.permute.xlu2 %3027  ;;  %v3695_v56 = vsel %vm1832_vm3, %v3663_v58, %v2898_v60  ;;  %v6974_v58 = vld [vmem:[#allocation2 + $0x110] sm:$0xff] }
 0x4d3   : > { %v3727_v1 = vsel %vm1865_vm5, %v3695_v56, %v3026_v4 }
 0x4d4   : > { %v3759_v31 = vsel %vm1898_vm4, %v3727_v1, %v3154_v35 }
 0x4d7   : > { %2931 = vrot.lane.b32.xlu0 %v6855_v52, %s4577_s17  ;;  %2803 = vrot.lane.b32.xlu1 %v6857_v9, %s4576_s16  ;;  %v3632_v9 = vsel %vm365_vm0, %v6705_v44, %v6701_v47 }
 0x4d8   : > { %3569 = vrot.lane.b32.xlu2 %v6953_v5, %s4582_s22 }
 0x4d9   : > { %v3538_v34 = vpop.permute.xlu0 %3537  ;;  %v3282_v18 = vpop.permute.xlu1 %3281 }
 0x4da   : > { %v3791_v20 = vsel %vm1931_vm6, %v3759_v31, %v3282_v18  ;;  %v3412_v48 = vpop.permute.xlu2 %3411  ;;  %v6988_v18 = vld [vmem:[#allocation2 + $0x82] sm:$0xff] }
 0x4db   : > { %v3823_v4 = vsel %vm1964_vm8, %v3791_v20, %v3410_v45  ;;  %v3664_v45 = vsel %vm1799_vm2, %v3632_v9, %v6865_v53  ;;  %v6990_v31 = vld [vmem:[#allocation2 + $0x80] sm:$0xff] }
 0x4dc   : > { %v3855_v40 = vsel %vm1997_vm7, %v3823_v4, %v3538_v34 }
 0x4dd   : > { %4454 = vmatmul.msk.f32.gmra.mxu1 %vm2043_vm9, %v3855_v40 }
 0x4df   : > { %3163 = vrot.lane.b32.xlu0 %v6867_v59, %s4579_s19  ;;  %3035 = vrot.lane.b32.xlu1 %v6557_v49, %s4578_s18 }
 0x4e0   : > { %2907 = vrot.lane.b32.xlu2 %v6869_v33, %s4577_s17 }
 0x4e1   : > { %v3156_v43 = vpop.permute.xlu0 %3155  ;;  %v2900_v26 = vpop.permute.xlu1 %2899 }
 0x4e2   : > { %v3030_v35 = vpop.permute.xlu2 %3029  ;;  %v3696_v60 = vsel %vm1832_vm3, %v3664_v45, %v2900_v26  ;;  %v7005_v26 = vld [vmem:[#allocation2 + $0x112] sm:$0xff] }
 0x4e3   : > { %v3728_v56 = vsel %vm1865_vm5, %v3696_v60, %v3028_v12 }
 0x4e4   : > { %v3760_v44 = vsel %vm1898_vm4, %v3728_v56, %v3156_v43 }
 0x4e7   : > { %3315 = vrot.lane.b32.xlu0 %v6974_v58, %s4580_s20  ;;  %3187 = vrot.lane.b32.xlu1 %v6881_v14, %s4579_s19 }
 0x4e8   : > { %3059 = vrot.lane.b32.xlu2 %v6617_v41, %s4578_s18  ;;  %v3633_v41 = vsel %vm365_vm0, %v6692_v16, %v6680_v51 }
 0x4e9   : > { %v3540_v49 = vpop.permute.xlu0 %3539  ;;  %v3284_v47 = vpop.permute.xlu1 %3283  ;;  %v3665_v4 = vsel %vm1799_vm2, %v3633_v41, %v6879_v19 }
 0x4ea   : > { %v3792_v53 = vsel %vm1931_vm6, %v3760_v44, %v3284_v47  ;;  %v3414_v1 = vpop.permute.xlu2 %3413 }
 0x4eb   : > { %v3824_v34 = vsel %vm1964_vm8, %v3792_v53, %v3412_v48  ;;  %v7030_v53 = vld [vmem:[#allocation2 + $0x90] sm:$0xff] }
 0x4ec   : > { %v3856_v12 = vsel %vm1997_vm7, %v3824_v34, %v3540_v49 }
 0x4ed   : > { %4455 = vmatmul.msk.f32.gmra.mxu1 %vm2043_vm9, %v3856_v12  ;;  %v2334_v12 = vld [vmem:[#allocation2 + $0xc8] sm:$0xff] }
 0x4ef   : > { %3547 = vrot.lane.b32.xlu0 %v6988_v18, %s4582_s22  ;;  %3419 = vrot.lane.b32.xlu1 %v6581_v8, %s4581_s21 }
 0x4f0   : > { %3291 = vrot.lane.b32.xlu2 %v6990_v31, %s4580_s20 }
 0x4f1   : > { %v3158_v20 = vpop.permute.xlu0 %3157  ;;  %v2902_v48 = vpop.permute.xlu1 %2901 }
 0x4f2   : > { %v2904_v40 = vpop.permute.xlu2 %2903  ;;  %v3697_v9 = vsel %vm1832_vm3, %v3665_v4, %v2902_v48 }
 0x4f3   : > { %v3729_v43 = vsel %vm1865_vm5, %v3697_v9, %v3030_v35  ;;  %v7051_v9 = vld [vmem:[#allocation2 + $0x120] sm:$0xff] }
 0x4f4   : > { %v3761_v16 = vsel %vm1898_vm4, %v3729_v43, %v3158_v20 }
 0x4f7   : > { %2805 = vrot.lane.b32.xlu0 %v6925_v57, %s4576_s16  ;;  %3571 = vrot.lane.b32.xlu1 %v7005_v26, %s4582_s22 }
 0x4f8   : > { %3443 = vrot.lane.b32.xlu2 %v6642_v13, %s4581_s21 }
 0x4f9   : > { %v3542_v8 = vpop.permute.xlu0 %3541  ;;  %v3286_v51 = vpop.permute.xlu1 %3285 }
 0x4fa   : > { %v3793_v19 = vsel %vm1931_vm6, %v3761_v16, %v3286_v51  ;;  %v3056_v45 = vpop.permute.xlu2 %3055 }
 0x4fb   : > { %v3825_v35 = vsel %vm1964_vm8, %v3793_v19, %v3414_v1 }
 0x4fc   : > { %v3857_v60 = vsel %vm1997_vm7, %v3825_v35, %v3542_v8 }
 0x4fd   : > { %4456 = vmatmul.msk.f32.gmra.mxu1 %vm2043_vm9, %v3857_v60  ;;  %v7071_v60 = vld [vmem:[#allocation2 + $0x92] sm:$0xff] }
 0x4ff   : > { %3037 = vrot.lane.b32.xlu0 %v6575_v3, %s4578_s18  ;;  %2909 = vrot.lane.b32.xlu1 %v6906_v10, %s4577_s17 }
 0x500   : > { %2781 = vrot.lane.b32.xlu2 %v6791_v21, %s4576_s16  ;;  %v3634_v21 = vsel %vm365_vm0, %v6718_v0, %v6703_v39  ;;  %v7049_v0 = vld [vmem:[#allocation2 + $0x122] sm:$0xff] }
 0x501   : > { %v2928_v57 = vpop.permute.xlu0 %2927  ;;  %v2800_v56 = vpop.permute.xlu1 %2799 }
 0x502   : > { %v3288_v49 = vpop.permute.xlu2 %3287 }
 0x507   : > { %3189 = vrot.lane.b32.xlu0 %v6953_v5, %s4579_s19  ;;  %3061 = vrot.lane.b32.xlu1 %v6632_v25, %s4578_s18  ;;  %v3666_v25 = vsel %vm1799_vm2, %v3634_v21, %v6847_v17 }
 0x508   : > { %2933 = vrot.lane.b32.xlu2 %v6918_v61, %s4577_s17  ;;  %v3698_v41 = vsel %vm1832_vm3, %v3666_v25, %v2904_v40  ;;  %v7084_v25 = vld [vmem:[#allocation2 + $0x98] sm:$0xff] }
 0x509   : > { %v3160_v47 = vpop.permute.xlu0 %3159  ;;  %v3032_v3 = vpop.permute.xlu1 %3031 }
 0x50a   : > { %v3440_v44 = vpop.permute.xlu2 %3439  ;;  %v3730_v48 = vsel %vm1865_vm5, %v3698_v41, %v3032_v3 }
 0x50b   : > { %v3762_v39 = vsel %vm1898_vm4, %v3730_v48, %v3160_v47  ;;  %v3635_v48 = vsel %vm365_vm0, %v6742_v11, %v6714_v2 }
 0x50c   : > { %v3794_v43 = vsel %vm1931_vm6, %v3762_v39, %v3288_v49  ;;  %v3667_v39 = vsel %vm1799_vm2, %v3635_v48, %v6877_v62 }
 0x50f   : > { %3421 = vrot.lane.b32.xlu0 %v6589_v15, %s4581_s21  ;;  %3293 = vrot.lane.b32.xlu1 %v7030_v53, %s4580_s20  ;;  %v3646_v15 = vsel %vm365_vm0, %v2334_v12, %v6753_v29 }
 0x510   : > { %3165 = vrot.lane.b32.xlu2 %v6934_v63, %s4579_s19  ;;  %v3678_v4 = vsel %vm1799_vm2, %v3646_v15, %v2800_v56 }
 0x511   : > { %v3312_v1 = vpop.permute.xlu0 %3311  ;;  %v3184_v34 = vpop.permute.xlu1 %3183  ;;  %v3710_v17 = vsel %vm1832_vm3, %v3678_v4, %v2928_v57  ;;  %v7098_v4 = vld [vmem:[#allocation2 + $0x128] sm:$0xff] }
 0x512   : > { %v2802_v20 = vpop.permute.xlu2 %2801  ;;  %v3742_v8 = vsel %vm1865_vm5, %v3710_v17, %v3056_v45 }
 0x513   : > { %v3774_v19 = vsel %vm1898_vm4, %v3742_v8, %v3184_v34 }
 0x517   : > { %3573 = vrot.lane.b32.xlu0 %v7049_v0, %s4582_s22  ;;  %3445 = vrot.lane.b32.xlu1 %v6637_v7, %s4581_s21  ;;  %v3806_v7 = vsel %vm1931_vm6, %v3774_v19, %v3312_v1  ;;  %v2335_v1 = vld [vmem:[#allocation2 + $0xd8] sm:$0xff] }
 0x518   : > { %3317 = vrot.lane.b32.xlu2 %v7051_v9, %s4580_s20  ;;  %v3838_v56 = vsel %vm1964_vm8, %v3806_v7, %v3440_v44  ;;  %v2454_v44 = vld [vmem:[#allocation2 + $0x81] sm:$0xff] }
 0x519   : > { %v3544_v29 = vpop.permute.xlu0 %3543  ;;  %v3416_v40 = vpop.permute.xlu1 %3415  ;;  %v7118_v19 = vld [vmem:[#allocation2 + $0x9a] sm:$0xff] }
 0x51a   : > { %v3826_v51 = vsel %vm1964_vm8, %v3794_v43, %v3416_v40  ;;  %v3034_v16 = vpop.permute.xlu2 %3033 }
 0x51b   : > { %v3858_v35 = vsel %vm1997_vm7, %v3826_v51, %v3544_v29 }
 0x51c   : > { %4457 = vmatmul.msk.f32.gmra.mxu1 %vm2043_vm9, %v3858_v35 }
 0x51f   : > { %2911 = vrot.lane.b32.xlu0 %v6990_v31, %s4577_s17  ;;  %2783 = vrot.lane.b32.xlu1 %v6867_v59, %s4576_s16 }
 0x520   : > { %3549 = vrot.lane.b32.xlu2 %v7071_v60, %s4582_s22 }
 0x521   : > { %v2906_v45 = vpop.permute.xlu0 %2905  ;;  %v3568_v57 = vpop.permute.xlu1 %3567 }
 0x522   : > { %v3186_v49 = vpop.permute.xlu2 %3185  ;;  %v3870_v47 = vsel %vm1997_vm7, %v3838_v56, %v3568_v57 }
 0x523   : > { %4469 = vmatmul.msk.f32.vlgmr.msra.gmra.mxu3 %vm2043_vm9, %v3870_v47 }
 0x527   : > { %3063 = vrot.lane.b32.xlu0 %v6642_v13, %s4578_s18  ;;  %2935 = vrot.lane.b32.xlu1 %v6974_v58, %s4577_s17  ;;  %v3647_v13 = vsel %vm365_vm0, %v2335_v1, %v6766_v36  ;;  %v3699_v36 = vsel %vm1832_vm3, %v3667_v39, %v2906_v45  ;;  %v3636_v1 = vsel %vm365_vm0, %v6762_v30, %v6694_v24 }
 0x528   : > { %2807 = vrot.lane.b32.xlu2 %v6881_v14, %s4576_s16  ;;  %v3679_v12 = vsel %vm1799_vm2, %v3647_v13, %v2802_v20  ;;  %v3731_v29 = vsel %vm1865_vm5, %v3699_v36, %v3034_v16  ;;  %v7124_v16 = vld [vmem:[#allocation2 + $0x99] sm:$0xff]  ;;  %v3648_v24 = vsel %vm365_vm0, %v6811_v42, %v6747_v23  ;;  %v7162_v36 = vld [vmem:[#allocation2 + $0xaa] sm:$0xff] }
 0x529   : > { %v3058_v59 = vpop.permute.xlu0 %3057  ;;  %v2930_v3 = vpop.permute.xlu1 %2929  ;;  %v7147_v13 = vld [vmem:[#allocation2 + $0x138] sm:$0xff] }
 0x52a   : > { %v3418_v21 = vpop.permute.xlu2 %3417  ;;  %v3711_v15 = vsel %vm1832_vm3, %v3679_v12, %v2930_v3  ;;  %v2455_v3 = vld [vmem:[#allocation2 + $0x91] sm:$0xff] }
 0x52b   : > { %v3743_v17 = vsel %vm1865_vm5, %v3711_v15, %v3058_v59 }
 0x52c   : > { %v3775_v11 = vsel %vm1898_vm4, %v3743_v17, %v3186_v49 }
 0x52f   : > { %3295 = vrot.lane.b32.xlu0 %v7084_v25, %s4580_s20  ;;  %3167 = vrot.lane.b32.xlu1 %v6988_v18, %s4579_s19 }
 0x530   : > { %3039 = vrot.lane.b32.xlu2 %v2454_v44, %s4578_s18 }
 0x531   : > { %v3290_v34 = vpop.permute.xlu0 %3289  ;;  %v3162_v14 = vpop.permute.xlu1 %3161 }
 0x532   : > { %v3570_v41 = vpop.permute.xlu2 %3569  ;;  %v3763_v43 = vsel %vm1898_vm4, %v3731_v29, %v3162_v14  ;;  %v2467_v14 = vld [vmem:[#allocation2 + $0x121] sm:$0xff] }
 0x533   : > { %v3795_v51 = vsel %vm1931_vm6, %v3763_v43, %v3290_v34 }
 0x534   : > { %v3827_v45 = vsel %vm1964_vm8, %v3795_v51, %v3418_v21 }
 0x537   : > { %3447 = vrot.lane.b32.xlu0 %v6647_v27, %s4581_s21  ;;  %3319 = vrot.lane.b32.xlu1 %v7098_v4, %s4580_s20 }
 0x538   : > { %3191 = vrot.lane.b32.xlu2 %v7005_v26, %s4579_s19 }
 0x539   : > { %v3442_v20 = vpop.permute.xlu0 %3441  ;;  %v3314_v2 = vpop.permute.xlu1 %3313 }
 0x53a   : > { %v3807_v62 = vsel %vm1931_vm6, %v3775_v11, %v3314_v2  ;;  %v2908_v40 = vpop.permute.xlu2 %2907  ;;  %v7166_v2 = vld [vmem:[#allocation2 + $0xa8] sm:$0xff] }
 0x53b   : > { %v3839_v8 = vsel %vm1964_vm8, %v3807_v62, %v3442_v20  ;;  %v7164_v20 = vld [vmem:[#allocation2 + $0xa9] sm:$0xff] }
 0x53c   : > { %v3871_v27 = vsel %vm1997_vm7, %v3839_v8, %v3570_v41 }
 0x53d   : > { %4470 = vmatmul.msk.f32.gmra.mxu3 %vm2043_vm9, %v3871_v27 }
 0x53f   : > { %2785 = vrot.lane.b32.xlu0 %v6934_v63, %s4576_s16  ;;  %3551 = vrot.lane.b32.xlu1 %v7118_v19, %s4582_s22  ;;  %v7135_v63 = vld [vmem:[#allocation2 + $0x12a] sm:$0xff] }
 0x540   : > { %3423 = vrot.lane.b32.xlu2 %v7124_v16, %s4581_s21 }
 0x541   : > { %v2780_v35 = vpop.permute.xlu0 %2779  ;;  %v3546_v7 = vpop.permute.xlu1 %3545 }
 0x542   : > { %v3060_v57 = vpop.permute.xlu2 %3059  ;;  %v3859_v56 = vsel %vm1997_vm7, %v3827_v45, %v3546_v7  ;;  %v3668_v34 = vsel %vm1799_vm2, %v3636_v1, %v2780_v35  ;;  %v7182_v35 = vld [vmem:[#allocation2 + $0x13a] sm:$0xff] }
 0x543   : > { %4458 = vmatmul.msk.f32.gmra.mxu1 %vm2043_vm9, %v3859_v56  ;;  %v3700_v15 = vsel %vm1832_vm3, %v3668_v34, %v2908_v40  ;;  %v7188_v7 = vld [vmem:[#allocation2 + $0x139] sm:$0xff] }
 0x547   : > { %2937 = vrot.lane.b32.xlu0 %v7051_v9, %s4577_s17  ;;  %2809 = vrot.lane.b32.xlu1 %v6953_v5, %s4576_s16 }
 0x548   : > { %3575 = vrot.lane.b32.xlu2 %v7135_v63, %s4582_s22 }
 0x549   : > { %v2932_v49 = vpop.permute.xlu0 %2931  ;;  %v2804_v47 = vpop.permute.xlu1 %2803 }
 0x54a   : > { %v3292_v59 = vpop.permute.xlu2 %3291  ;;  %v3680_v39 = vsel %vm1799_vm2, %v3648_v24, %v2804_v47  ;;  %v7216_v24 = vld [vmem:[#allocation2 + $0xb1] sm:$0xff] }
 0x54b   : > { %v3712_v11 = vsel %vm1832_vm3, %v3680_v39, %v2932_v49 }
 0x54c   : > { %v3744_v62 = vsel %vm1865_vm5, %v3712_v11, %v3060_v57 }
 0x54f   : > { %3169 = vrot.lane.b32.xlu0 %v7071_v60, %s4579_s19  ;;  %3041 = vrot.lane.b32.xlu1 %v2455_v3, %s4578_s18 }
 0x550   : > { %2913 = vrot.lane.b32.xlu2 %v7030_v53, %s4577_s17 }
 0x551   : > { %v3164_v21 = vpop.permute.xlu0 %3163  ;;  %v3036_v44 = vpop.permute.xlu1 %3035 }
 0x552   : > { %v3444_v5 = vpop.permute.xlu2 %3443  ;;  %v3732_v30 = vsel %vm1865_vm5, %v3700_v15, %v3036_v44  ;;  %v2468_v44 = vld [vmem:[#allocation2 + $0x129] sm:$0xff] }
 0x553   : > { %v3764_v17 = vsel %vm1898_vm4, %v3732_v30, %v3164_v21 }
 0x554   : > { %v3796_v29 = vsel %vm1931_vm6, %v3764_v17, %v3292_v59  ;;  %v2424_v59 = vld [vmem:[#allocation2 + $0x98] sm:$0xff] }
 0x557   : > { %3321 = vrot.lane.b32.xlu0 %v7147_v13, %s4580_s20  ;;  %3193 = vrot.lane.b32.xlu1 %v7049_v0, %s4579_s19 }
 0x558   : > { %3065 = vrot.lane.b32.xlu2 %v2467_v14, %s4578_s18 }
 0x559   : > { %v3316_v12 = vpop.permute.xlu0 %3315  ;;  %v3188_v41 = vpop.permute.xlu1 %3187 }
 0x55a   : > { %v2782_v48 = vpop.permute.xlu2 %2781  ;;  %v3776_v8 = vsel %vm1898_vm4, %v3744_v62, %v3188_v41  ;;  %v3649_v41 = vsel %vm365_vm0, %v6893_v46, %v6768_v50  ;;  %v7235_v62 = vld [vmem:[#allocation2 + $0x141] sm:$0xff] }
 0x55b   : > { %v3808_v51 = vsel %vm1931_vm6, %v3776_v8, %v3316_v12  ;;  %v7210_v12 = vld [vmem:[#allocation2 + $0xb0] sm:$0xff] }
 0x55c   : > { %v3840_v56 = vsel %vm1964_vm8, %v3808_v51, %v3444_v5 }
 0x55f   : > { %3553 = vrot.lane.b32.xlu0 %v7162_v36, %s4582_s22  ;;  %3425 = vrot.lane.b32.xlu1 %v7164_v20, %s4581_s21 }
 0x560   : > { %3297 = vrot.lane.b32.xlu2 %v7166_v2, %s4580_s20 }
 0x561   : > { %v3548_v23 = vpop.permute.xlu0 %3547  ;;  %v3420_v42 = vpop.permute.xlu1 %3419 }
 0x562   : > { %v3828_v40 = vsel %vm1964_vm8, %v3796_v29, %v3420_v42  ;;  %v2934_v43 = vpop.permute.xlu2 %2933  ;;  %v7233_v29 = vld [vmem:[#allocation2 + $0x142] sm:$0xff] }
 0x563   : > { %v3860_v27 = vsel %vm1997_vm7, %v3828_v40, %v3548_v23  ;;  %v7237_v40 = vld [vmem:[#allocation2 + $0x140] sm:$0xff] }
 0x564   : > { %4459 = vmatmul.msk.f32.gmra.mxu1 %vm2043_vm9, %v3860_v27 }
 0x567   : > { %2811 = vrot.lane.b32.xlu0 %v7005_v26, %s4576_s16  ;;  %3577 = vrot.lane.b32.xlu1 %v7182_v35, %s4582_s22 }
 0x568   : > { %3449 = vrot.lane.b32.xlu2 %v7188_v7, %s4581_s21 }
 0x569   : > { %v2806_v45 = vpop.permute.xlu0 %2805  ;;  %v3572_v57 = vpop.permute.xlu1 %3571 }
 0x56a   : > { %v3166_v49 = vpop.permute.xlu2 %3165  ;;  %v3872_v47 = vsel %vm1997_vm7, %v3840_v56, %v3572_v57  ;;  %v3681_v30 = vsel %vm1799_vm2, %v3649_v41, %v2806_v45  ;;  %v2425_v56 = vld [vmem:[#allocation2 + $0xa8] sm:$0xff] }
 0x56b   : > { %4471 = vmatmul.msk.f32.gmra.mxu3 %vm2043_vm9, %v3872_v47  ;;  %v3713_v46 = vsel %vm1832_vm3, %v3681_v30, %v2934_v43 }
 0x56f   : > { %3043 = vrot.lane.b32.xlu0 %v7124_v16, %s4578_s18  ;;  %2915 = vrot.lane.b32.xlu1 %v2424_v59, %s4577_s17  ;;  %v3637_v16 = vsel %vm365_vm0, %v6789_v54, %v6716_v28 }
 0x570   : > { %2787 = vrot.lane.b32.xlu2 %v6988_v18, %s4576_s16  ;;  %v3669_v18 = vsel %vm1799_vm2, %v3637_v16, %v2782_v48 }
 0x571   : > { %v3038_v26 = vpop.permute.xlu0 %3037  ;;  %v2910_v3 = vpop.permute.xlu1 %2909 }
 0x572   : > { %v3318_v21 = vpop.permute.xlu2 %3317  ;;  %v3701_v14 = vsel %vm1832_vm3, %v3669_v18, %v2910_v3  ;;  %v3638_v18 = vsel %vm365_vm0, %v6869_v33, %v6727_v37 }
 0x573   : > { %v3733_v15 = vsel %vm1865_vm5, %v3701_v14, %v3038_v26 }
 0x574   : > { %v3765_v48 = vsel %vm1898_vm4, %v3733_v15, %v3166_v49  ;;  %v7252_v49 = vld [vmem:[#allocation2 + $0xb2] sm:$0xff] }
 0x575   : > { %v7282_v15 = vld [vmem:[#allocation2 + $0x150] sm:$0xff] }
 0x577   : > { %3195 = vrot.lane.b32.xlu0 %v7135_v63, %s4579_s19  ;;  %3067 = vrot.lane.b32.xlu1 %v2468_v44, %s4578_s18  ;;  %v7262_v44 = vld [vmem:[#allocation2 + $0xc0] sm:$0xff] }
 0x578   : > { %2939 = vrot.lane.b32.xlu2 %v7098_v4, %s4577_s17 }
 0x579   : > { %v3190_v5 = vpop.permute.xlu0 %3189  ;;  %v3062_v1 = vpop.permute.xlu1 %3061 }
 0x57a   : > { %v3550_v34 = vpop.permute.xlu2 %3549  ;;  %v3745_v17 = vsel %vm1865_vm5, %v3713_v46, %v3062_v1 }
 0x57b   : > { %v3777_v42 = vsel %vm1898_vm4, %v3745_v17, %v3190_v5  ;;  %v7299_v17 = vld [vmem:[#allocation2 + $0xc2] sm:$0xff] }
 0x57c   : > { %v3809_v27 = vsel %vm1931_vm6, %v3777_v42, %v3318_v21 }
 0x57f   : > { %3427 = vrot.lane.b32.xlu0 %v7216_v24, %s4581_s21  ;;  %3299 = vrot.lane.b32.xlu1 %v7210_v12, %s4580_s20 }
 0x580   : > { %3171 = vrot.lane.b32.xlu2 %v7118_v19, %s4579_s19 }
 0x581   : > { %v3422_v28 = vpop.permute.xlu0 %3421  ;;  %v3294_v54 = vpop.permute.xlu1 %3293 }
 0x582   : > { %v3797_v50 = vsel %vm1931_vm6, %v3765_v48, %v3294_v54  ;;  %v2808_v39 = vpop.permute.xlu2 %2807 }
 0x583   : > { %v3829_v11 = vsel %vm1964_vm8, %v3797_v50, %v3422_v28 }
 0x584   : > { %v3861_v23 = vsel %vm1997_vm7, %v3829_v11, %v3550_v34  ;;  %v7305_v11 = vld [vmem:[#allocation2 + $0xc1] sm:$0xff] }
 0x585   : > { %4460 = vmatmul.msk.f32.gmra.mxu1 %vm2043_vm9, %v3861_v23 }
 0x587   : > { %3579 = vrot.lane.b32.xlu0 %v7233_v29, %s4582_s22  ;;  %3451 = vrot.lane.b32.xlu1 %v7235_v62, %s4581_s21 }
 0x588   : > { %3323 = vrot.lane.b32.xlu2 %v7237_v40, %s4580_s20 }
 0x589   : > { %v3574_v43 = vpop.permute.xlu0 %3573  ;;  %v3446_v8 = vpop.permute.xlu1 %3445 }
 0x58a   : > { %v3841_v51 = vsel %vm1964_vm8, %v3809_v27, %v3446_v8  ;;  %v3040_v45 = vpop.permute.xlu2 %3039 }
 0x58b   : > { %v3873_v57 = vsel %vm1997_vm7, %v3841_v51, %v3574_v43  ;;  %v2438_v51 = vld [vmem:[#allocation2 + $0x140] sm:$0xff] }
 0x58c   : > { %4472 = vmatmul.msk.f32.gmra.mxu3 %vm2043_vm9, %v3873_v57 }
 0x58f   : > { %2917 = vrot.lane.b32.xlu0 %v2425_v56, %s4577_s17  ;;  %2789 = vrot.lane.b32.xlu1 %v7071_v60, %s4576_s16 }
 0x590   : > { %3555 = vrot.lane.b32.xlu2 %v7252_v49, %s4582_s22 }
 0x591   : > { %v2912_v47 = vpop.permute.xlu0 %2911  ;;  %v2784_v59 = vpop.permute.xlu1 %2783 }
 0x592   : > { %v3192_v26 = vpop.permute.xlu2 %3191  ;;  %v3670_v14 = vsel %vm1799_vm2, %v3638_v18, %v2784_v59  ;;  %v7343_v18 = vld [vmem:[#allocation2 + $0xca] sm:$0xff] }
 0x597   : > { %3069 = vrot.lane.b32.xlu0 %v7188_v7, %s4578_s18  ;;  %2941 = vrot.lane.b32.xlu1 %v7147_v13, %s4577_s17  ;;  %v3650_v7 = vsel %vm365_vm0, %v6855_v52, %v6783_v55  ;;  %v3702_v55 = vsel %vm1832_vm3, %v3670_v14, %v2912_v47  ;;  %v2426_v47 = vld [vmem:[#allocation2 + $0xb0] sm:$0xff]  ;;  %v7352_v14 = vld [vmem:[#allocation2 + $0xc8] sm:$0xff] }
 0x598   : > { %2813 = vrot.lane.b32.xlu2 %v7049_v0, %s4576_s16  ;;  %v3682_v5 = vsel %vm1799_vm2, %v3650_v7, %v2808_v39  ;;  %v3734_v30 = vsel %vm1865_vm5, %v3702_v55, %v3040_v45 }
 0x599   : > { %v3064_v3 = vpop.permute.xlu0 %3063  ;;  %v2936_v21 = vpop.permute.xlu1 %2935 }
 0x59a   : > { %v3424_v60 = vpop.permute.xlu2 %3423  ;;  %v3714_v34 = vsel %vm1832_vm3, %v3682_v5, %v2936_v21  ;;  %v7327_v21 = vld [vmem:[#allocation2 + $0x158] sm:$0xff] }
 0x59b   : > { %v3746_v41 = vsel %vm1865_vm5, %v3714_v34, %v3064_v3  ;;  %v3639_v3 = vsel %vm365_vm0, %v6906_v10, %v6707_v6  ;;  %v3651_v6 = vsel %vm365_vm0, %v6918_v61, %v6760_v22  ;;  %v7345_v34 = vld [vmem:[#allocation2 + $0xc9] sm:$0xff] }
 0x59c   : > { %v3778_v52 = vsel %vm1898_vm4, %v3746_v41, %v3192_v26 }
 0x59f   : > { %3301 = vrot.lane.b32.xlu0 %v7262_v44, %s4580_s20  ;;  %3173 = vrot.lane.b32.xlu1 %v7162_v36, %s4579_s19 }
 0x5a0   : > { %3045 = vrot.lane.b32.xlu2 %v7164_v20, %s4578_s18  ;;  %v7280_v20 = vld [vmem:[#allocation2 + $0x151] sm:$0xff] }
 0x5a1   : > { %v3296_v16 = vpop.permute.xlu0 %3295  ;;  %v3168_v0 = vpop.permute.xlu1 %3167 }
 0x5a2   : > { %v3576_v1 = vpop.permute.xlu2 %3575  ;;  %v3766_v48 = vsel %vm1898_vm4, %v3734_v30, %v3168_v0 }
 0x5a3   : > { %v3798_v39 = vsel %vm1931_vm6, %v3766_v48, %v3296_v16  ;;  %v2566_v48 = vld [vmem:[#allocation2 + $0x159] sm:$0xff] }
 0x5a4   : > { %v3830_v43 = vsel %vm1964_vm8, %v3798_v39, %v3424_v60 }
 0x5a7   : > { %3453 = vrot.lane.b32.xlu0 %v7280_v20, %s4581_s21  ;;  %3325 = vrot.lane.b32.xlu1 %v7282_v15, %s4580_s20 }
 0x5a8   : > { %3197 = vrot.lane.b32.xlu2 %v7182_v35, %s4579_s19 }
 0x5a9   : > { %v3448_v37 = vpop.permute.xlu0 %3447  ;;  %v3320_v33 = vpop.permute.xlu1 %3319 }
 0x5aa   : > { %v3810_v28 = vsel %vm1931_vm6, %v3778_v52, %v3320_v33  ;;  %v2914_v54 = vpop.permute.xlu2 %2913 }
 0x5ab   : > { %v3842_v46 = vsel %vm1964_vm8, %v3810_v28, %v3448_v37 }
 0x5ac   : > { %v3874_v50 = vsel %vm1997_vm7, %v3842_v46, %v3576_v1 }
 0x5ad   : > { %4473 = vmatmul.msk.f32.gmra.mxu3 %vm2043_vm9, %v3874_v50 }
 0x5af   : > { %2791 = vrot.lane.b32.xlu0 %v7118_v19, %s4576_s16  ;;  %3557 = vrot.lane.b32.xlu1 %v7299_v17, %s4582_s22  ;;  %v7315_v19 = vld [vmem:[#allocation2 + $0x152] sm:$0xff] }
 0x5b0   : > { %3429 = vrot.lane.b32.xlu2 %v7305_v11, %s4581_s21 }
 0x5b1   : > { %v2786_v23 = vpop.permute.xlu0 %2785  ;;  %v3552_v42 = vpop.permute.xlu1 %3551 }
 0x5b2   : > { %v3066_v8 = vpop.permute.xlu2 %3065  ;;  %v3862_v27 = vsel %vm1997_vm7, %v3830_v43, %v3552_v42  ;;  %v3671_v60 = vsel %vm1799_vm2, %v3639_v3, %v2786_v23 }
 0x5b3   : > { %4461 = vmatmul.msk.f32.gmra.mxu1 %vm2043_vm9, %v3862_v27  ;;  %v3703_v16 = vsel %vm1832_vm3, %v3671_v60, %v2914_v54  ;;  %v7363_v54 = vld [vmem:[#allocation2 + $0x15a] sm:$0xff] }
 0x5b7   : > { %2943 = vrot.lane.b32.xlu0 %v2438_v51, %s4577_s17  ;;  %2815 = vrot.lane.b32.xlu1 %v7135_v63, %s4576_s16 }
 0x5b8   : > { %3581 = vrot.lane.b32.xlu2 %v7315_v19, %s4582_s22 }
 0x5b9   : > { %v2938_v45 = vpop.permute.xlu0 %2937  ;;  %v2810_v57 = vpop.permute.xlu1 %2809 }
 0x5ba   : > { %v3298_v56 = vpop.permute.xlu2 %3297  ;;  %v3683_v5 = vsel %vm1799_vm2, %v3651_v6, %v2810_v57  ;;  %v3652_v57 = vsel %vm365_vm0, %v6974_v58, %v6785_v32 }
 0x5bf   : > { %3175 = vrot.lane.b32.xlu0 %v7252_v49, %s4579_s19  ;;  %3047 = vrot.lane.b32.xlu1 %v7216_v24, %s4578_s18 }
 0x5c0   : > { %2919 = vrot.lane.b32.xlu2 %v2426_v47, %s4577_s17 }
 0x5c1   : > { %v3170_v59 = vpop.permute.xlu0 %3169  ;;  %v3042_v26 = vpop.permute.xlu1 %3041 }
 0x5c2   : > { %v3450_v63 = vpop.permute.xlu2 %3449  ;;  %v3735_v10 = vsel %vm1865_vm5, %v3703_v16, %v3042_v26  ;;  %v7415_v16 = vld [vmem:[#allocation2 + $0x169] sm:$0xff] }
 0x5c3   : > { %v3767_v1 = vsel %vm1898_vm4, %v3735_v10, %v3170_v59 }
 0x5c4   : > { %v3799_v41 = vsel %vm1931_vm6, %v3767_v1, %v3298_v56  ;;  %v7394_v56 = vld [vmem:[#allocation2 + $0xd9] sm:$0xff] }
 0x5c7   : > { %3327 = vrot.lane.b32.xlu0 %v7327_v21, %s4580_s20  ;;  %3199 = vrot.lane.b32.xlu1 %v7233_v29, %s4579_s19 }
 0x5c8   : > { %3071 = vrot.lane.b32.xlu2 %v7235_v62, %s4578_s18  ;;  %v3715_v62 = vsel %vm1832_vm3, %v3683_v5, %v2938_v45 }
 0x5c9   : > { %v3322_v24 = vpop.permute.xlu0 %3321  ;;  %v3194_v7 = vpop.permute.xlu1 %3193  ;;  %v3747_v55 = vsel %vm1865_vm5, %v3715_v62, %v3066_v8 }
 0x5ca   : > { %v2788_v0 = vpop.permute.xlu2 %2787  ;;  %v3779_v52 = vsel %vm1898_vm4, %v3747_v55, %v3194_v7  ;;  %v7413_v7 = vld [vmem:[#allocation2 + $0x16a] sm:$0xff] }
 0x5cb   : > { %v3811_v28 = vsel %vm1931_vm6, %v3779_v52, %v3322_v24 }
 0x5cc   : > { %v3843_v39 = vsel %vm1964_vm8, %v3811_v28, %v3450_v63 }
 0x5cf   : > { %3559 = vrot.lane.b32.xlu0 %v7343_v18, %s4582_s22  ;;  %3431 = vrot.lane.b32.xlu1 %v7345_v34, %s4581_s21 }
 0x5d0   : > { %3303 = vrot.lane.b32.xlu2 %v7352_v14, %s4580_s20 }
 0x5d1   : > { %v3554_v22 = vpop.permute.xlu0 %3553  ;;  %v3426_v61 = vpop.permute.xlu1 %3425 }
 0x5d2   : > { %v3831_v37 = vsel %vm1964_vm8, %v3799_v41, %v3426_v61  ;;  %v2940_v33 = vpop.permute.xlu2 %2939  ;;  %v2587_v61 = vld [vmem:[#allocation2 + $0xda] sm:$0xff] }
 0x5d3   : > { %v3863_v30 = vsel %vm1997_vm7, %v3831_v37, %v3554_v22 }
 0x5d4   : > { %4462 = vmatmul.msk.f32.gmra.mxu1 %vm2043_vm9, %v3863_v30  ;;  %v2524_v30 = vld [vmem:[#allocation2 + $0xe0] sm:$0xff] }
 0x5d7   : > { %2817 = vrot.lane.b32.xlu0 %v7182_v35, %s4576_s16  ;;  %3583 = vrot.lane.b32.xlu1 %v7363_v54, %s4582_s22 }
 0x5d8   : > { %3455 = vrot.lane.b32.xlu2 %v2566_v48, %s4581_s21 }
 0x5d9   : > { %v2812_v46 = vpop.permute.xlu0 %2811  ;;  %v3578_v50 = vpop.permute.xlu1 %3577 }
 0x5da   : > { %v3172_v23 = vpop.permute.xlu2 %3171  ;;  %v3875_v42 = vsel %vm1997_vm7, %v3843_v39, %v3578_v50  ;;  %v3684_v47 = vsel %vm1799_vm2, %v3652_v57, %v2812_v46  ;;  %v8482_v50 = vld [vmem:[#allocation39_spill] sm:$0xff] }
 0x5db   : > { %4474 = vmatmul.msk.f32.gmra.mxu3 %vm2043_vm9, %v3875_v42  ;;  %v3716_v58 = vsel %vm1832_vm3, %v3684_v47, %v2940_v33  ;;  %v3641_v39 = vsel %vm365_vm0, %v7030_v53, %v8482_v50  ;;  %v2556_v47 = vld [vmem:[#allocation2 + $0xe1] sm:$0xff] }
 0x5dc   : > { %v2601_v50 = vld [vmem:[#allocation2 + $0x182] sm:$0xff] }
 0x5df   : > { %3049 = vrot.lane.b32.xlu0 %v7305_v11, %s4578_s18  ;;  %2921 = vrot.lane.b32.xlu1 %v7262_v44, %s4577_s17  ;;  %v3640_v11 = vsel %vm365_vm0, %v6990_v31, %v6729_v38 }
 0x5e0   : > { %2793 = vrot.lane.b32.xlu2 %v7162_v36, %s4576_s16  ;;  %v3672_v36 = vsel %vm1799_vm2, %v3640_v11, %v2788_v0  ;;  %v7421_v0 = vld [vmem:[#allocation2 + $0x168] sm:$0xff] }
 0x5e1   : > { %v3044_v35 = vpop.permute.xlu0 %3043  ;;  %v2916_v43 = vpop.permute.xlu1 %2915 }
 0x5e2   : > { %v3324_v8 = vpop.permute.xlu2 %3323  ;;  %v3704_v45 = vsel %vm1832_vm3, %v3672_v36, %v2916_v43 }
 0x5e7   : > { %3201 = vrot.lane.b32.xlu0 %v7315_v19, %s4579_s19  ;;  %3073 = vrot.lane.b32.xlu1 %v7280_v20, %s4578_s18  ;;  %v3736_v20 = vsel %vm1865_vm5, %v3704_v45, %v3044_v35  ;;  %v7456_v35 = vld [vmem:[#allocation2 + $0x170] sm:$0xff] }
 0x5e8   : > { %2945 = vrot.lane.b32.xlu2 %v7282_v15, %s4577_s17  ;;  %v7396_v15 = vld [vmem:[#allocation2 + $0xd8] sm:$0xff]  ;;  %v3768_v32 = vsel %vm1898_vm4, %v3736_v20, %v3172_v23  ;;  %v2588_v20 = vld [vmem:[#allocation2 + $0xe2] sm:$0xff] }
 0x5e9   : > { %v3196_v44 = vpop.permute.xlu0 %3195  ;;  %v3068_v27 = vpop.permute.xlu1 %3067 }
 0x5ea   : > { %v3556_v51 = vpop.permute.xlu2 %3555  ;;  %v3748_v63 = vsel %vm1865_vm5, %v3716_v58, %v3068_v27 }
 0x5eb   : > { %v3780_v24 = vsel %vm1898_vm4, %v3748_v63, %v3196_v44 }
 0x5ec   : > { %v3812_v5 = vsel %vm1931_vm6, %v3780_v24, %v3324_v8 }
 0x5ef   : > { %3433 = vrot.lane.b32.xlu0 %v7394_v56, %s4581_s21  ;;  %3305 = vrot.lane.b32.xlu1 %v7396_v15, %s4580_s20 }
 0x5f0   : > { %3177 = vrot.lane.b32.xlu2 %v7299_v17, %s4579_s19 }
 0x5f1   : > { %v3428_v38 = vpop.permute.xlu0 %3427  ;;  %v3300_v31 = vpop.permute.xlu1 %3299 }
 0x5f2   : > { %v3800_v59 = vsel %vm1931_vm6, %v3768_v32, %v3300_v31  ;;  %v2814_v26 = vpop.permute.xlu2 %2813 }
 0x5f3   : > { %v3832_v3 = vsel %vm1964_vm8, %v3800_v59, %v3428_v38 }
 0x5f4   : > { %v3864_v60 = vsel %vm1997_vm7, %v3832_v3, %v3556_v51 }
 0x5f5   : > { %4463 = vmatmul.msk.f32.gmra.mxu1 %vm2043_vm9, %v3864_v60 }
 0x5f7   : > { %3585 = vrot.lane.b32.xlu0 %v7413_v7, %s4582_s22  ;;  %3457 = vrot.lane.b32.xlu1 %v7415_v16, %s4581_s21 }
 0x5f8   : > { %3329 = vrot.lane.b32.xlu2 %v7421_v0, %s4580_s20 }
 0x5f9   : > { %v3580_v6 = vpop.permute.xlu0 %3579  ;;  %v3452_v10 = vpop.permute.xlu1 %3451 }
 0x5fa   : > { %v3844_v1 = vsel %vm1964_vm8, %v3812_v5, %v3452_v10  ;;  %v3046_v62 = vpop.permute.xlu2 %3045  ;;  %v2537_v10 = vld [vmem:[#allocation2 + $0x180] sm:$0xff] }
 0x5fb   : > { %v3876_v22 = vsel %vm1997_vm7, %v3844_v1, %v3580_v6 }
 0x5fc   : > { %4475 = vmatmul.msk.f32.gmra.mxu3 %vm2043_vm9, %v3876_v22  ;;  %v8484_v22 = vld [vmem:[#allocation84_spill] sm:$0xff] }
 0x5ff   : > { %2923 = vrot.lane.b32.xlu0 %v7352_v14, %s4577_s17  ;;  %2795 = vrot.lane.b32.xlu1 %v7252_v49, %s4576_s16  ;;  %v8481_v49 = vld [vmem:[#allocation68_spill] sm:$0xff] }
 0x600   : > { %3561 = vrot.lane.b32.xlu2 %v2587_v61, %s4582_s22  ;;  %v3653_v28 = vsel %vm365_vm0, %v7051_v9, %v8481_v49 }
 0x601   : > { %v2918_v41 = vpop.permute.xlu0 %2917  ;;  %v2790_v55 = vpop.permute.xlu1 %2789 }
 0x602   : > { %v3198_v37 = vpop.permute.xlu2 %3197 }
 0x607   : > { %3075 = vrot.lane.b32.xlu0 %v2566_v48, %s4578_s18  ;;  %2947 = vrot.lane.b32.xlu1 %v7327_v21, %s4577_s17 }
 0x608   : > { %2819 = vrot.lane.b32.xlu2 %v7233_v29, %s4576_s16  ;;  %v3685_v29 = vsel %vm1799_vm2, %v3653_v28, %v2814_v26 }
 0x609   : > { %v3070_v33 = vpop.permute.xlu0 %3069  ;;  %v2942_v52 = vpop.permute.xlu1 %2941 }
 0x60a   : > { %v3430_v14 = vpop.permute.xlu2 %3429  ;;  %v3717_v23 = vsel %vm1832_vm3, %v3685_v29, %v2942_v52 }
 0x60b   : > { %v3749_v42 = vsel %vm1865_vm5, %v3717_v23, %v3070_v33  ;;  %v2557_v33 = vld [vmem:[#allocation2 + $0xf1] sm:$0xff] }
 0x60c   : > { %v3781_v8 = vsel %vm1898_vm4, %v3749_v42, %v3198_v37  ;;  %v2589_v37 = vld [vmem:[#allocation2 + $0xf2] sm:$0xff] }
 0x60f   : > { %3307 = vrot.lane.b32.xlu0 %v2524_v30, %s4580_s20  ;;  %3179 = vrot.lane.b32.xlu1 %v7343_v18, %s4579_s19  ;;  %v3673_v18 = vsel %vm1799_vm2, %v3641_v39, %v2790_v55  ;;  %v2569_v39 = vld [vmem:[#allocation2 + $0x181] sm:$0xff] }
 0x610   : > { %3051 = vrot.lane.b32.xlu2 %v7345_v34, %s4578_s18  ;;  %v7454_v34 = vld [vmem:[#allocation2 + $0x171] sm:$0xff]  ;;  %v3705_v9 = vsel %vm1832_vm3, %v3673_v18, %v2918_v41 }
 0x611   : > { %v3302_v21 = vpop.permute.xlu0 %3301  ;;  %v3174_v48 = vpop.permute.xlu1 %3173  ;;  %v3737_v11 = vsel %vm1865_vm5, %v3705_v9, %v3046_v62 }
 0x612   : > { %v3582_v46 = vpop.permute.xlu2 %3581  ;;  %v3769_v36 = vsel %vm1898_vm4, %v3737_v11, %v3174_v48 }
 0x613   : > { %v3801_v57 = vsel %vm1931_vm6, %v3769_v36, %v3302_v21 }
 0x614   : > { %v3833_v32 = vsel %vm1964_vm8, %v3801_v57, %v3430_v14 }
 0x617   : > { %3459 = vrot.lane.b32.xlu0 %v7454_v34, %s4581_s21  ;;  %3331 = vrot.lane.b32.xlu1 %v7456_v35, %s4580_s20 }
 0x618   : > { %3203 = vrot.lane.b32.xlu2 %v7363_v54, %s4579_s19 }
 0x619   : > { %v3454_v53 = vpop.permute.xlu0 %3453  ;;  %v3326_v43 = vpop.permute.xlu1 %3325 }
 0x61a   : > { %v3813_v44 = vsel %vm1931_vm6, %v3781_v8, %v3326_v43  ;;  %v2920_v27 = vpop.permute.xlu2 %2919  ;;  %v2538_v43 = vld [vmem:[#allocation2 + $0x188] sm:$0xff] }
 0x61b   : > { %v3845_v51 = vsel %vm1964_vm8, %v3813_v44, %v3454_v53  ;;  %v2570_v44 = vld [vmem:[#allocation2 + $0x189] sm:$0xff] }
 0x61c   : > { %v3877_v45 = vsel %vm1997_vm7, %v3845_v51, %v3582_v46 }
 0x61d   : > { %4476 = vmatmul.msk.f32.gmra.mxu3 %vm2043_vm9, %v3877_v45 }
 0x61f   : > { %2797 = vrot.lane.b32.xlu0 %v7299_v17, %s4576_s16  ;;  %3563 = vrot.lane.b32.xlu1 %v2588_v20, %s4582_s22  ;;  %v7484_v17 = vld [vmem:[#allocation2 + $0x172] sm:$0xff]  ;;  %v8486_v20 = vld [vmem:[#allocation33_spill] sm:$0xff] }
 0x620   : > { %3435 = vrot.lane.b32.xlu2 %v2556_v47, %s4581_s21 }
 0x621   : > { %v2792_v38 = vpop.permute.xlu0 %2791  ;;  %v3558_v31 = vpop.permute.xlu1 %3557 }
 0x622   : > { %v3072_v58 = vpop.permute.xlu2 %3071  ;;  %v3865_v59 = vsel %vm1997_vm7, %v3833_v32, %v3558_v31 }
 0x623   : > { %4464 = vmatmul.msk.f32.gmra.mxu1 %vm2043_vm9, %v3865_v59 }
 0x627   : > { %2949 = vrot.lane.b32.xlu0 %v7421_v0, %s4577_s17  ;;  %2821 = vrot.lane.b32.xlu1 %v7315_v19, %s4576_s16  ;;  %v8483_v19 = vld [vmem:[#allocation35_spill] sm:$0xff] }
 0x628   : > { %3587 = vrot.lane.b32.xlu2 %v7484_v17, %s4582_s22  ;;  %v3642_v6 = vsel %vm365_vm0, %v7084_v25, %v8483_v19  ;;  %v3654_v25 = vsel %vm365_vm0, %v7098_v4, %v8484_v22 }
 0x629   : > { %v2944_v26 = vpop.permute.xlu0 %2943  ;;  %v2816_v63 = vpop.permute.xlu1 %2815  ;;  %v3674_v5 = vsel %vm1799_vm2, %v3642_v6, %v2792_v38 }
 0x62a   : > { %v3304_v3 = vpop.permute.xlu2 %3303  ;;  %v3706_v1 = vsel %vm1832_vm3, %v3674_v5, %v2920_v27  ;;  %v3686_v41 = vsel %vm1799_vm2, %v3654_v25, %v2816_v63  ;;  %v8485_v27 = vld [vmem:[#allocation80_spill] sm:$0xff] }
 0x62b   : > { %v3718_v52 = vsel %vm1832_vm3, %v3686_v41, %v2944_v26  ;;  %v3643_v36 = vsel %vm365_vm0, %v7166_v2, %v8485_v27  ;;  %v2602_v2 = vld [vmem:[#allocation2 + $0x18a] sm:$0xff]  ;;  %v2572_v41 = vld [vmem:[#allocation2 + $0x1a1] sm:$0xff] }
 0x62c   : > { %v3750_v49 = vsel %vm1865_vm5, %v3718_v52, %v3072_v58  ;;  %v2604_v52 = vld [vmem:[#allocation2 + $0x1a2] sm:$0xff] }
 0x62f   : > { %3181 = vrot.lane.b32.xlu0 %v2587_v61, %s4579_s19  ;;  %3053 = vrot.lane.b32.xlu1 %v7394_v56, %s4578_s18 }
 0x630   : > { %2925 = vrot.lane.b32.xlu2 %v7396_v15, %s4577_s17 }
 0x631   : > { %v3176_v60 = vpop.permute.xlu0 %3175  ;;  %v3048_v24 = vpop.permute.xlu1 %3047 }
 0x632   : > { %v3456_v0 = vpop.permute.xlu2 %3455  ;;  %v3738_v61 = vsel %vm1865_vm5, %v3706_v1, %v3048_v24  ;;  %v2603_v24 = vld [vmem:[#allocation2 + $0x19a] sm:$0xff] }
 0x633   : > { %v3770_v55 = vsel %vm1898_vm4, %v3738_v61, %v3176_v60 }
 0x634   : > { %v3802_v4 = vsel %vm1931_vm6, %v3770_v55, %v3304_v3 }
 0x637   : > { %3333 = vrot.lane.b32.xlu0 %v2537_v10, %s4580_s20  ;;  %3205 = vrot.lane.b32.xlu1 %v7413_v7, %s4579_s19 }
 0x638   : > { %3077 = vrot.lane.b32.xlu2 %v7415_v16, %s4578_s18  ;;  %v2525_v16 = vld [vmem:[#allocation2 + $0xf0] sm:$0xff] }
 0x639   : > { %v3328_v56 = vpop.permute.xlu0 %3327  ;;  %v3200_v15 = vpop.permute.xlu1 %3199 }
 0x63a   : > { %v2794_v62 = vpop.permute.xlu2 %2793  ;;  %v3782_v48 = vsel %vm1898_vm4, %v3750_v49, %v3200_v15 }
 0x63b   : > { %v3814_v46 = vsel %vm1931_vm6, %v3782_v48, %v3328_v56 }
 0x63c   : > { %v3846_v42 = vsel %vm1964_vm8, %v3814_v46, %v3456_v0  ;;  %v2539_v0 = vld [vmem:[#allocation2 + $0x198] sm:$0xff] }
 0x63f   : > { %3565 = vrot.lane.b32.xlu0 %v2589_v37, %s4582_s22  ;;  %3437 = vrot.lane.b32.xlu1 %v2557_v33, %s4581_s21 }
 0x640   : > { %3309 = vrot.lane.b32.xlu2 %v2525_v16, %s4580_s20  ;;  %v2540_v16 = vld [vmem:[#allocation2 + $0x1a0] sm:$0xff] }
 0x641   : > { %v3560_v14 = vpop.permute.xlu0 %3559  ;;  %v3432_v30 = vpop.permute.xlu1 %3431 }
 0x642   : > { %v3834_v28 = vsel %vm1964_vm8, %v3802_v4, %v3432_v30  ;;  %v2946_v21 = vpop.permute.xlu2 %2945 }
 0x643   : > { %v3866_v29 = vsel %vm1997_vm7, %v3834_v28, %v3560_v14 }
 0x644   : > { %4465 = vmatmul.msk.f32.gmra.mxu1 %vm2043_vm9, %v3866_v29 }
 0x647   : > { %2951 = vrot.lane.b32.xlu0 %v7456_v35, %s4577_s17  ;;  %3589 = vrot.lane.b32.xlu1 %v2601_v50, %s4582_s22 }
 0x648   : > { %3461 = vrot.lane.b32.xlu2 %v2569_v39, %s4581_s21 }
 0x649   : > { %v2818_v23 = vpop.permute.xlu0 %2817  ;;  %v3584_v18 = vpop.permute.xlu1 %3583 }
 0x64a   : > { %v3178_v9 = vpop.permute.xlu2 %3177  ;;  %v3878_v53 = vsel %vm1997_vm7, %v3846_v42, %v3584_v18 }
 0x64b   : > { %4477 = vmatmul.msk.f32.gmra.mxu3 %vm2043_vm9, %v3878_v53 }
 0x64f   : > { %3335 = vrot.lane.b32.xlu0 %v2538_v43, %s4580_s20  ;;  %3079 = vrot.lane.b32.xlu1 %v7454_v34, %s4578_s18 }
 0x650   : > { %2823 = vrot.lane.b32.xlu2 %v7363_v54, %s4576_s16  ;;  %v3675_v54 = vsel %vm1799_vm2, %v3643_v36, %v2794_v62  ;;  %v2571_v62 = vld [vmem:[#allocation2 + $0x199] sm:$0xff] }
 0x651   : > { %v3050_v35 = vpop.permute.xlu0 %3049  ;;  %v2922_v8 = vpop.permute.xlu1 %2921 }
 0x652   : > { %v3330_v11 = vpop.permute.xlu2 %3329  ;;  %v3707_v57 = vsel %vm1832_vm3, %v3675_v54, %v2922_v8 }
 0x653   : > { %v3739_v47 = vsel %vm1865_vm5, %v3707_v57, %v3050_v35 }
 0x654   : > { %v3771_v58 = vsel %vm1898_vm4, %v3739_v47, %v3178_v9  ;;  %v8489_v47 = vld [vmem:[#allocation63_spill] sm:$0xff] }
 0x657   : > { %2825 = vrot.lane.b32.xlu0 %v7413_v7, %s4576_s16  ;;  %3463 = vrot.lane.b32.xlu1 %v2570_v44, %s4581_s21  ;;  %v3655_v7 = vsel %vm365_vm0, %v7147_v13, %v8486_v20 }
 0x658   : > { %3207 = vrot.lane.b32.xlu2 %v7484_v17, %s4579_s19  ;;  %v3687_v38 = vsel %vm1799_vm2, %v3655_v7, %v2818_v23  ;;  %v2333_v7 = vld [vmem:[#allocation2 + $0xc0] sm:$0xff] }
 0x659   : > { %v3202_v34 = vpop.permute.xlu0 %3201  ;;  %v3074_v51 = vpop.permute.xlu1 %3073  ;;  %v3719_v59 = vsel %vm1832_vm3, %v3687_v38, %v2946_v21  ;;  %v8488_v21 = vld [vmem:[#allocation37_spill] sm:$0xff]  ;;  %v3645_v38 = vsel %vm365_vm0, %v2333_v7, %v8489_v47 }
 0x65a   : > { %v3562_v45 = vpop.permute.xlu2 %3561  ;;  %v3751_v63 = vsel %vm1865_vm5, %v3719_v59, %v3074_v51  ;;  %v3644_v48 = vsel %vm365_vm0, %v7210_v12, %v8488_v21  ;;  %v2345_v59 = vld [vmem:[#allocation2 + $0x150] sm:$0xff] }
 0x65b   : > { %v3783_v19 = vsel %vm1898_vm4, %v3751_v63, %v3202_v34 }
 0x65c   : > { %v3815_v5 = vsel %vm1931_vm6, %v3783_v19, %v3330_v11 }
 0x65f   : > { %3209 = vrot.lane.b32.xlu0 %v2601_v50, %s4579_s19  ;;  %2953 = vrot.lane.b32.xlu1 %v2537_v10, %s4577_s17 }
 0x660   : > { %3591 = vrot.lane.b32.xlu2 %v2602_v2, %s4582_s22 }
 0x661   : > { %v3434_v31 = vpop.permute.xlu0 %3433  ;;  %v3306_v32 = vpop.permute.xlu1 %3305 }
 0x662   : > { %v3803_v26 = vsel %vm1931_vm6, %v3771_v58, %v3306_v32  ;;  %v2820_v13 = vpop.permute.xlu2 %2819 }
 0x663   : > { %v3835_v3 = vsel %vm1964_vm8, %v3803_v26, %v3434_v31 }
 0x664   : > { %v3867_v60 = vsel %vm1997_vm7, %v3835_v3, %v3562_v45 }
 0x665   : > { %4466 = vmatmul.msk.f32.gmra.mxu1 %vm2043_vm9, %v3867_v60 }
 0x667   : > { %3593 = vrot.lane.b32.xlu0 %v2603_v24, %s4582_s22  ;;  %3337 = vrot.lane.b32.xlu1 %v2539_v0, %s4580_s20 }
 0x668   : > { %3081 = vrot.lane.b32.xlu2 %v2569_v39, %s4578_s18 }
 0x669   : > { %v3586_v6 = vpop.permute.xlu0 %3585  ;;  %v3458_v10 = vpop.permute.xlu1 %3457 }
 0x66a   : > { %v3847_v56 = vsel %vm1964_vm8, %v3815_v5, %v3458_v10  ;;  %v3052_v15 = vpop.permute.xlu2 %3051 }
 0x66b   : > { %v3879_v1 = vsel %vm1997_vm7, %v3847_v56, %v3586_v6 }
 0x66c   : > { %4478 = vmatmul.msk.f32.gmra.mxu3 %vm2043_vm9, %v3879_v1 }
 0x66f   : > { %3083 = vrot.lane.b32.xlu0 %v2570_v44, %s4578_s18  ;;  %2827 = vrot.lane.b32.xlu1 %v7484_v17, %s4576_s16  ;;  %v8487_v17 = vld [vmem:[#allocation34_spill] sm:$0xff] }
 0x670   : > { %3465 = vrot.lane.b32.xlu2 %v2571_v62, %s4581_s21  ;;  %v3656_v14 = vsel %vm365_vm0, %v7237_v40, %v8487_v17 }
 0x671   : > { %v2924_v22 = vpop.permute.xlu0 %2923  ;;  %v2796_v25 = vpop.permute.xlu1 %2795  ;;  %v3688_v49 = vsel %vm1799_vm2, %v3656_v14, %v2820_v13  ;;  %v8490_v13 = vld [vmem:[#allocation41_spill] sm:$0xff] }
 0x672   : > { %v3204_v61 = vpop.permute.xlu2 %3203  ;;  %v3676_v46 = vsel %vm1799_vm2, %v3644_v48, %v2796_v25  ;;  %v3657_v63 = vsel %vm365_vm0, %v2345_v59, %v8490_v13 }
 0x673   : > { %v3708_v39 = vsel %vm1832_vm3, %v3676_v46, %v2924_v22 }
 0x674   : > { %v3740_v42 = vsel %vm1865_vm5, %v3708_v39, %v3052_v15 }
 0x677   : > { %3211 = vrot.lane.b32.xlu1 %v2602_v2, %s4579_s19  ;;  %3467 = vrot.lane.b32.xlu0 %v2572_v41, %s4581_s21 }
 0x678   : > { %2955 = vrot.lane.b32.xlu2 %v2538_v43, %s4577_s17 }
 0x679   : > { %v3076_v55 = vpop.permute.xlu0 %3075  ;;  %v2948_v37 = vpop.permute.xlu1 %2947 }
 0x67a   : > { %v3436_v33 = vpop.permute.xlu2 %3435  ;;  %v3720_v29 = vsel %vm1832_vm3, %v3688_v49, %v2948_v37 }
 0x67b   : > { %v3752_v50 = vsel %vm1865_vm5, %v3720_v29, %v3076_v55  ;;  %v7614_v55 = vpop.f32.mrf.mxu1 }
 0x67c   : > { %v3784_v40 = vsel %vm1898_vm4, %v3752_v50, %v3204_v61 }
 0x67f   : > { %3595 = vrot.lane.b32.xlu1 %v2604_v52, %s4582_s22  ;;  %v2346_v52 = vld [vmem:[#allocation2 + $0x158] sm:$0xff] }
 0x680   : > { %3339 = vrot.lane.b32.xlu2 %v2540_v16, %s4580_s20  ;;  %v8491_v16 = vld [vmem:[#allocation90_spill] sm:$0xff] }
 0x681   : > { %v3308_v30 = vpop.permute.xlu0 %3307  ;;  %v3180_v4 = vpop.permute.xlu1 %3179  ;;  %v3658_v17 = vsel %vm365_vm0, %v2346_v52, %v8491_v16  ;;  %v7660_v16 = vld [vmem:[%s8015_s4] ss:$0 sm:$0xff] }
 0x682   : > { %v3588_v28 = vpop.permute.xlu2 %3587  ;;  %v3772_v43 = vsel %vm1898_vm4, %v3740_v42, %v3180_v4 }
 0x683   : > { %v3804_v8 = vsel %vm1931_vm6, %v3772_v43, %v3308_v30  ;;  %v4014_v49 = vpop.f32.mrf.mxu1 }
 0x684   : > { %v3836_v27 = vsel %vm1964_vm8, %v3804_v8, %v3436_v33 }
 0x689   : > { %v3460_v23 = vpop.permute.xlu0 %3459  ;;  %v3332_v18 = vpop.permute.xlu1 %3331 }
 0x68a   : > { %v3816_v9 = vsel %vm1931_vm6, %v3784_v40, %v3332_v18  ;;  %v2926_v53 = vpop.permute.xlu2 %2925 }
 0x68b   : > { %v3848_v12 = vsel %vm1964_vm8, %v3816_v9, %v3460_v23  ;;  %v4017_v23 = vpop.f32.mrf.mxu1  ;;  %v2347_v9 = vld [vmem:[#allocation2 + $0x168] sm:$0xff] }
 0x68c   : > { %v3880_v35 = vsel %vm1997_vm7, %v3848_v12, %v3588_v28 }
 0x68d   : > { %4479 = vmatmul.msk.f32.gmra.mxu3 %vm2043_vm9, %v3880_v35 }
 0x691   : > { %v2798_v11 = vpop.permute.xlu0 %2797  ;;  %v3564_v44 = vpop.permute.xlu1 %3563 }
 0x692   : > { %v3078_v36 = vpop.permute.xlu2 %3077  ;;  %v3868_v34 = vsel %vm1997_vm7, %v3836_v27, %v3564_v44  ;;  %v3677_v31 = vsel %vm1799_vm2, %v3645_v38, %v2798_v11  ;;  %v4184_v27 = vld [vmem:[%s8016_s5] sm:$0xff] }
 0x693   : > { %4467 = vmatmul.msk.f32.gmra.mxu1 %vm2043_vm9, %v3868_v34  ;;  %v3709_v26 = vsel %vm1832_vm3, %v3677_v31, %v2926_v53  ;;  %v8492_v53 = vld [vmem:[#allocation42_spill] sm:$0xff]  ;;  %v4020_v8 = vpop.f32.mrf.mxu1  ;;  %4204 = vmatpush.msrb.mxu2 %v4184_v27 }
 0x694   : > { %v3659_v43 = vsel %vm365_vm0, %v2347_v9, %v8492_v53 }
 0x699   : > { %v2950_v51 = vpop.permute.xlu0 %2949  ;;  %v2822_v54 = vpop.permute.xlu1 %2821 }
 0x69a   : > { %v3310_v45 = vpop.permute.xlu2 %3309  ;;  %v3689_v60 = vsel %vm1799_vm2, %v3657_v63, %v2822_v54 }
 0x69b   : > { %v3721_v0 = vsel %vm1832_vm3, %v3689_v60, %v2950_v51 }
 0x69c   : > { %v3753_v56 = vsel %vm1865_vm5, %v3721_v0, %v3078_v36 }
 0x6a1   : > { %v3182_v57 = vpop.permute.xlu0 %3181  ;;  %v3054_v20 = vpop.permute.xlu1 %3053 }
 0x6a2   : > { %v3462_v2 = vpop.permute.xlu2 %3461  ;;  %v3741_v3 = vsel %vm1865_vm5, %v3709_v26, %v3054_v20 }
 0x6a3   : > { %v3773_v24 = vsel %vm1898_vm4, %v3741_v3, %v3182_v57 }
 0x6a4   : > { %v3805_v5 = vsel %vm1931_vm6, %v3773_v24, %v3310_v45  ;;  %v4023_v45 = vpop.f32.mrf.mxu1 }
 0x6a9   : > { %v3334_v32 = vpop.permute.xlu0 %3333  ;;  %v3206_v58 = vpop.permute.xlu1 %3205 }
 0x6aa   : > { %v2824_v19 = vpop.permute.xlu2 %2823  ;;  %v3785_v1 = vsel %vm1898_vm4, %v3753_v56, %v3206_v58 }
 0x6ab   : > { %v3817_v22 = vsel %vm1931_vm6, %v3785_v1, %v3334_v32  ;;  %v3690_v14 = vsel %vm1799_vm2, %v3658_v17, %v2824_v19  ;;  %v8493_v32 = vld [vmem:[#allocation85_spill] sm:$0xff] }
 0x6ac   : > { %v3849_v41 = vsel %vm1964_vm8, %v3817_v22, %v3462_v2  ;;  %v2348_v2 = vld [vmem:[#allocation2 + $0x170] sm:$0xff]  ;;  %v4026_v31 = vpop.f32.mrf.mxu1 }
 0x6ad   : > { %v3660_v58 = vsel %vm365_vm0, %v2348_v2, %v8493_v32 }
 0x6b1   : > { %v3566_v6 = vpop.permute.xlu0 %3565  ;;  %v3438_v10 = vpop.permute.xlu1 %3437 }
 0x6b2   : > { %v3837_v15 = vsel %vm1964_vm8, %v3805_v5, %v3438_v10  ;;  %v3208_v33 = vpop.permute.xlu2 %3207 }
 0x6b3   : > { %v3869_v62 = vsel %vm1997_vm7, %v3837_v15, %v3566_v6 }
 0x6b4   : > { %4468 = vmatmul.msk.f32.gmra.mxu1 %vm2043_vm9, %v3869_v62  ;;  %v4029_v60 = vpop.f32.mrf.mxu1 }
 0x6b9   : > { %v2952_v25 = vpop.permute.xlu0 %2951  ;;  %v3590_v61 = vpop.permute.xlu1 %3589 }
 0x6ba   : > { %v3881_v37 = vsel %vm1997_vm7, %v3849_v41, %v3590_v61  ;;  %v3722_v28 = vsel %vm1832_vm3, %v3690_v14, %v2952_v25  ;;  %v3592_v48 = vpop.permute.xlu2 %3591  ;;  %v7651_v25 = vpop.f32.mrf.mxu3  ;;  %v7665_v14 = vadd.f32 %v7660_v16, %v4014_v49 }
 0x6bb   : > { %4480 = vmatmul.msk.f32.gmra.mxu3 %vm2043_vm9, %v3881_v37 }
 0x6bc   : > { %v4032_v15 = vpop.f32.mrf.mxu1 }
 0x6c1   : > { %v3336_v30 = vpop.permute.xlu0 %3335  ;;  %v3080_v4 = vpop.permute.xlu1 %3079 }
 0x6c2   : > { %v3754_v21 = vsel %vm1865_vm5, %v3722_v28, %v3080_v4  ;;  %v3082_v42 = vpop.permute.xlu2 %3081  ;;  %v7653_v41 = vpop.f32.mrf.mxu3  ;;  %v7672_v4 = vadd.f32 %v7660_v16, %v4017_v23  ;;  %v7689_v23 = vadd.f32 %v7660_v16, %v4026_v31 }
 0x6c3   : > { %v3786_v29 = vsel %vm1898_vm4, %v3754_v21, %v3208_v33  ;;  %v4108_v21 = vsel %vm365_vm0, %v7665_v14, 0.0 }
 0x6c4   : > { %v3818_v39 = vsel %vm1931_vm6, %v3786_v29, %v3336_v30  ;;  %v4035_v62 = vpop.f32.mrf.mxu1  ;;  %v7669_v30 = vadd.f32 %v7660_v16, %v7614_v55  ;;  %v4110_v49 = vsel %vm365_vm0, %v7672_v4, 0.0 }
 0x6c6   : > { %v4107_v29 = vsel %vm365_vm0, %v7669_v30, 0.0 }
 0x6c7   : > { %v4109_v55 = vadd.f32 %v4108_v21, %v4107_v29  ;;  %v7758_v29 = vadd.f32 %v7660_v16, %v7653_v41 }
 0x6c9   : > { %v2826_v46 = vpop.permute.xlu0 %2825  ;;  %v3464_v50 = vpop.permute.xlu1 %3463 }
 0x6ca   : > { %v3850_v18 = vsel %vm1964_vm8, %v3818_v39, %v3464_v50  ;;  %v3691_v11 = vsel %vm1799_vm2, %v3659_v43, %v2826_v46  ;;  %v3466_v34 = vpop.permute.xlu2 %3465  ;;  %v7655_v33 = vpop.f32.mrf.mxu3  ;;  %v7684_v46 = vadd.f32 %v7660_v16, %v4023_v45  ;;  %v4116_v43 = vsel %vm365_vm0, %v7689_v23, 0.0 }
 0x6cb   : > { %v3882_v40 = vsel %vm1997_vm7, %v3850_v18, %v3592_v48  ;;  %v7677_v48 = vadd.f32 %v7660_v16, %v4020_v8  ;;  %v4111_v18 = vadd.f32 %v4110_v49, %v4109_v55  ;;  %v4142_v55 = vsel %vm365_vm0, %v7758_v29, 0.0 }
 0x6cc   : > { %4481 = vmatmul.msk.f32.gmra.mxu3 %vm2043_vm9, %v3882_v40  ;;  %v4038_v22 = vpop.f32.mrf.mxu1  ;;  %v4114_v40 = vsel %vm365_vm0, %v7684_v46, 0.0 }
 0x6cd   : > { %v4112_v39 = vsel %vm365_vm0, %v7677_v48, 0.0 }
 0x6ce   : > { %v4113_v9 = vadd.f32 %v4112_v39, %v4111_v18  ;;  %v7764_v39 = vadd.f32 %v7660_v16, %v7655_v33 }
 0x6d1   : > { %v3210_v12 = vpop.permute.xlu0 %3209  ;;  %v2954_v35 = vpop.permute.xlu1 %2953 }
 0x6d2   : > { %v3723_v44 = vsel %vm1832_vm3, %v3691_v11, %v2954_v35  ;;  %v2956_v59 = vpop.permute.xlu2 %2955  ;;  %v7662_v17 = vpop.f32.mrf.mxu3  ;;  %v4115_v35 = vadd.f32 %v4114_v40, %v4113_v9  ;;  %v7704_v11 = vadd.f32 %v7660_v16, %v4035_v62  ;;  %v4144_v40 = vsel %vm365_vm0, %v7764_v39, 0.0 }
 0x6d3   : > { %v3755_v36 = vsel %vm1865_vm5, %v3723_v44, %v3082_v42  ;;  %v7694_v42 = vadd.f32 %v7660_v16, %v4029_v60  ;;  %v7770_v9 = vadd.f32 %v7660_v16, %v7662_v17 }
 0x6d4   : > { %v3787_v54 = vsel %vm1898_vm4, %v3755_v36, %v3210_v12  ;;  %v4041_v61 = vpop.f32.mrf.mxu1  ;;  %v7699_v12 = vadd.f32 %v7660_v16, %v4032_v15  ;;  %v4117_v44 = vadd.f32 %v4116_v43, %v4115_v35 }
 0x6d5   : > { %v4118_v8 = vsel %vm365_vm0, %v7694_v42, 0.0  ;;  %v7714_v45 = vadd.f32 %v7660_v16, %v4041_v61  ;;  %v4146_v41 = vsel %vm365_vm0, %v7770_v9, 0.0 }
 0x6d6   : > { %v4120_v36 = vsel %vm365_vm0, %v7699_v12, 0.0 }
 0x6d7   : > { %v4126_v2 = vsel %vm365_vm0, %v7714_v45, 0.0 }
 0x6d9   : > { %v3338_v51 = vpop.permute.xlu1 %3337  ;;  %v3594_v20 = vpop.permute.xlu0 %3593 }
 0x6da   : > { %v3819_v57 = vsel %vm1931_vm6, %v3787_v54, %v3338_v51  ;;  %v3340_v19 = vpop.permute.xlu2 %3339  ;;  %v4074_v50 = vpop.f32.mrf.mxu3  ;;  %v4119_v51 = vadd.f32 %v4118_v8, %v4117_v44  ;;  %v4122_v54 = vsel %vm365_vm0, %v7704_v11, 0.0 }
 0x6db   : > { %v3851_v7 = vsel %vm1964_vm8, %v3819_v57, %v3466_v34  ;;  %v7709_v34 = vadd.f32 %v7660_v16, %v4038_v22  ;;  %v7775_v43 = vadd.f32 %v7660_v16, %v4074_v50 }
 0x6dc   : > { %v3883_v47 = vsel %vm1997_vm7, %v3851_v7, %v3594_v20  ;;  %v4044_v37 = vpop.f32.mrf.mxu1  ;;  %v4121_v57 = vadd.f32 %v4120_v36, %v4119_v51 }
 0x6dd   : > { %4482 = vmatmul.msk.f32.gmra.mxu3 %vm2043_vm9, %v3883_v47  ;;  %v4124_v7 = vsel %vm365_vm0, %v7709_v34, 0.0  ;;  %v7719_v47 = vadd.f32 %v7660_v16, %v4044_v37  ;;  %v7752_v37 = vadd.f32 %v7660_v16, %v7651_v25  ;;  %v4148_v33 = vsel %vm365_vm0, %v7775_v43, 0.0 }
 0x6df   : > { %v4140_v21 = vsel %vm365_vm0, %v7752_v37, 0.0 }
 0x6e1   : > { %v2828_v38 = vpop.permute.xlu1 %2827  ;;  %v3084_v13 = vpop.permute.xlu0 %3083 }
 0x6e2   : > { %v3692_v26 = vsel %vm1799_vm2, %v3660_v58, %v2828_v38  ;;  %v4077_v27 = vpop.f32.mrf.mxu3  ;;  %v4123_v38 = vadd.f32 %v4122_v54, %v4121_v57 }
 0x6e3   : > { %v3724_v63 = vsel %vm1832_vm3, %v3692_v26, %v2956_v59  ;;  %v4128_v59 = vsel %vm365_vm0, %v7719_v47, 0.0  ;;  %v7780_v44 = vadd.f32 %v7660_v16, %v4077_v27 }
 0x6e4   : > { %v3756_v24 = vsel %vm1865_vm5, %v3724_v63, %v3084_v13  ;;  %v4047_v52 = vpop.f32.mrf.mxu1  ;;  %v4125_v32 = vadd.f32 %v4124_v7, %v4123_v38 }
 0x6e5   : > { %v7724_v31 = vadd.f32 %v7660_v16, %v4047_v52  ;;  %v4150_v17 = vsel %vm365_vm0, %v7780_v44, 0.0 }
 0x6e6   : > { %v4127_v13 = vadd.f32 %v4126_v2, %v4125_v32 }
 0x6e7   : > { %v4130_v63 = vsel %vm365_vm0, %v7724_v31, 0.0 }
 0x6e8   : > { %v4129_v60 = vadd.f32 %v4128_v59, %v4127_v13 }
 0x6e9   : > { %v3212_v3 = vpop.permute.xlu1 %3211  ;;  %v3468_v10 = vpop.permute.xlu0 %3467 }
 0x6ea   : > { %v3788_v0 = vsel %vm1898_vm4, %v3756_v24, %v3212_v3  ;;  %v4080_v58 = vpop.f32.mrf.mxu3 }
 0x6eb   : > { %v3820_v6 = vsel %vm1931_vm6, %v3788_v0, %v3340_v19  ;;  %v7785_v51 = vadd.f32 %v7660_v16, %v4080_v58 }
 0x6ec   : > { %v3852_v5 = vsel %vm1964_vm8, %v3820_v6, %v3468_v10  ;;  %v4050_v28 = vpop.f32.mrf.mxu1  ;;  %v4131_v6 = vadd.f32 %v4130_v63, %v4129_v60  ;;  %v4210_v63 = vld [vmem:[%s8018_s7] sm:$0xf] }
 0x6ed   : > { %v7729_v26 = vadd.f32 %v7660_v16, %v4050_v28  ;;  %v4152_v50 = vsel %vm365_vm0, %v7785_v51, 0.0  ;;  %4485 = vmatpush.msk.msrb.mxu3 %vm4216_vm10, %v4210_v63 }
 0x6ef   : > { %v4132_v0 = vsel %vm365_vm0, %v7729_v26, 0.0 }
 0x6f0   : > { %v4133_v15 = vadd.f32 %v4132_v0, %v4131_v6  ;;  %v4583_v6 = vmov 256.0  }
 0x6f1   : > { %v3596_v56 = vpop.permute.xlu1 %3595  ;;  %4530 = vrcp.f32 %v4583_v6 }
 0x6f2   : > { %v3884_v1 = vsel %vm1997_vm7, %v3852_v5, %v3596_v56  ;;  %v4083_v56 = vpop.f32.mrf.mxu3 }
 0x6f3   : > { %4483 = vmatmul.msk.f32.gmra.mxu3 %vm2043_vm9, %v3884_v1 }
 0x6f4   : > { %v4053_v53 = vpop.f32.mrf.mxu1 }
 0x6f5   : > { %v7734_v3 = vadd.f32 %v7660_v16, %v4053_v53 }
 0x6f7   : > { %v4134_v10 = vsel %vm365_vm0, %v7734_v3, 0.0 }
 0x6f8   : > { %v4135_v62 = vadd.f32 %v4134_v10, %v4133_v15 }
 0x6fa   : > { %v4086_v28 = vpop.f32.mrf.mxu3 }
 0x6fb   : > { %v7795_v38 = vadd.f32 %v7660_v16, %v4086_v28 }
 0x6fd   : > { %v4156_v58 = vsel %vm365_vm0, %v7795_v38, 0.0 }
 0x702   : > { %v4089_v25 = vpop.f32.mrf.mxu3 }
 0x703   : > { %v7800_v59 = vadd.f32 %v7660_v16, %v4089_v25 }
 0x705   : > { %v4158_v60 = vsel %vm365_vm0, %v7800_v59, 0.0 }
 0x710   : > { %v4056_v20 = vpop.f32.mrf.mxu1  ;;  %v4092_v8 = vpop.f32.mrf.mxu3 }
 0x711   : > { %v7739_v19 = vadd.f32 %v7660_v16, %v4056_v20  ;;  %v7790_v20 = vadd.f32 %v7660_v16, %v4083_v56 }
 0x713   : > { %v4136_v1 = vsel %vm365_vm0, %v7739_v19, 0.0  ;;  %v4154_v27 = vsel %vm365_vm0, %v7790_v20, 0.0 }
 0x714   : > { %v4137_v61 = vadd.f32 %v4136_v1, %v4135_v62 }
 0x731   : > { %v4059_v24 = vpop.f32.mrf.mxu1 }
 0x732   : > { %v7744_v5 = vadd.f32 %v7660_v16, %v4059_v24  ;;  %v7808_v24 = vadd.f32 %v7660_v16, %v4092_v8 }
 0x734   : > { %v4138_v22 = vsel %vm365_vm0, %v7744_v5, 0.0  ;;  %v4160_v56 = vsel %vm365_vm0, %v7808_v24, 0.0 }
 0x735   : > { %v4139_v52 = vadd.f32 %v4138_v22, %v4137_v61  ;;  %v4531_v61 = vpop.eup %4530 }
 0x736   : > { %vm4181_vm11 = vweird.f32 %v4531_v61 }
 0x737   : > { %v4141_v49 = vadd.f32 %v4140_v21, %v4139_v52 }
 0x739   : > { %v4143_v18 = vadd.f32 %v4142_v55, %v4141_v49  ;;  %v4177_v55 = vmul.f32 256.0, %v4531_v61 }
 0x73b   : > { %v4145_v53 = vadd.f32 %v4144_v40, %v4143_v18 }
 0x73d   : > { %v4147_v35 = vadd.f32 %v4146_v41, %v4145_v53 }
 0x73e   : > { %v4095_v57 = vpop.f32.mrf.mxu3 }
 0x73f   : > { %v4149_v36 = vadd.f32 %v4148_v33, %v4147_v35  ;;  %v7813_v15 = vadd.f32 %v7660_v16, %v4095_v57  ;;  %v4178_v35 = vsub.f32 1.0, %v4177_v55 }
 0x741   : > { %v4151_v54 = vadd.f32 %v4150_v17, %v4149_v36  ;;  %v4162_v52 = vsel %vm365_vm0, %v7813_v15, 0.0  ;;  %v4179_v36 = vmul.f32 %v4531_v61, %v4178_v35 }
 0x743   : > { %v4153_v7 = vadd.f32 %v4152_v50, %v4151_v54  ;;  %v4180_v57 = vadd.f32 %v4531_v61, %v4179_v36 }
 0x745   : > { %v4155_v2 = vadd.f32 %v4154_v27, %v4153_v7  ;;  %v4182_v27 = vsel %vm4181_vm11, %v4531_v61, %v4180_v57  ;;  %v8495_v57 = vld [vmem:[#allocation6_spill] sm:$0xff] }
 0x747   : > { %v4157_v13 = vadd.f32 %v4156_v58, %v4155_v2 }
 0x749   : > { %v4159_v0 = vadd.f32 %v4158_v60, %v4157_v13  ;;  %v4211_v60 = vld [vmem:[%s8019_s8] sm:$0x1] }
 0x74b   : > { %v4161_v62 = vadd.f32 %v4160_v56, %v4159_v0 }
 0x74d   : > { %v4163_v21 = vadd.f32 %v4162_v52, %v4161_v62 }
 0x74f   : > { %v4098_v32 = vpop.f32.mrf.mxu3 }
 0x750   : > { %v7816_v1 = vadd.f32 %v7660_v16, %v4098_v32 }
 0x752   : > { %v4164_v28 = vsel %vm365_vm0, %v7816_v1, 0.0 }
 0x753   : > { %v4165_v18 = vadd.f32 %v4164_v28, %v4163_v21 }
 0x760   : > { %v4101_v10 = vpop.f32.mrf.mxu3 }
 0x761   : > { %v7819_v22 = vadd.f32 %v7660_v16, %v4101_v10 }
 0x763   : > { %v4166_v49 = vsel %vm365_vm0, %v7819_v22, 0.0 }
 0x764   : > { %v4167_v53 = vadd.f32 %v4166_v49, %v4165_v18 }
 0x776   : > { %v4104_v25 = vpop.f32.mrf.mxu3 }
 0x777   : > { %v7828_v40 = vadd.f32 %v7660_v16, %v4104_v25  ;;  %v4185_v16 = vld [vmem:[%s8017_s6] sm:$0x1] }
 0x779   : > { %v4168_v41 = vsel %vm365_vm0, %v7828_v40, 0.0 }
 0x77a   : > { %v4169_v8 = vadd.f32 %v4168_v41, %v4167_v53 }
 0x77c   : > { %v4170_v33 = vrot.slane %v4169_v8, 4 }
 0x77e   : > { %v4171_v17 = vadd.f32 %v4170_v33, %v4169_v8 }
 0x780   : > { %v4172_v54 = vrot.slane %v4171_v17, 2 }
 0x782   : > { %v4173_v50 = vadd.f32 %v4172_v54, %v4171_v17 }
 0x784   : > { %v4174_v7 = vrot.slane %v4173_v50, 1 }
 0x786   : > { %v4175_v2 = vadd.f32 %v4174_v7, %v4173_v50  ;;  %v8496_v50 = vld [vmem:[#allocation3_spill] sm:$0xff] }
 0x788   : > { %v4183_v32 = vmul.f32 %v4182_v27, %v4175_v2  ;;  %v8497_v2 = vld [vmem:[#allocation5_spill] sm:$0xff] }
 0x78a   : > { %4484 = vmatmul.msk.f32.vlgmr.msrb.gmra.mxu2 %vm365_vm0, %v4183_v32 }
 0x80d   : > { %v4206_v58 = vpop.f32.mrf.mxu2 }
 0x80e   : > { %v4207_v13 = vadd.f32 %v4206_v58, %v4185_v16 }
 0x810   : > { %v4209_v63 = vmax.f32 %v4207_v13, 0.0  ;;  %v8499_v13 = vld [vmem:[#allocation9_spill] sm:$0xff] }
 0x812   : > { %4486 = vmatmul.msk.f32.vlgmr.msrb.gmra.mxu3 %vm4212_vm12, %v4209_v63 }
 0x895   : > { %v4237_v0 = vpop.f32.mrf.mxu3 }
 0x896   : > { %v4238_v6 = vadd.f32 %v4237_v0, %v4211_v60  ;;  %v8500_v60 = vld [vmem:[#allocation8_spill] sm:$0xff] }
 0x898   : > { %v4487_v10 = vmul.f32 -1.442695, %v4238_v6  ;;  %v8501_v6 = vld [vmem:[#allocation10_spill] sm:$0xff] }
 0x89a   : > { %4532 = vpow2.f32 %v4487_v10 }
 0x8a0   : > { %v4533_v56 = vpop.eup %4532 }
 0x8a1   : > { %v4243_v62 = vadd.f32 1.0, %v4533_v56  ;;  %v8502_v56 = vld [vmem:[#allocation12_spill] sm:$0xff] }
 0x8a3   : > { %4534 = vrcp.f32 %v4243_v62  ;;  %v4255_v21 = vand.u32 2147483648, %v4243_v62  ;;  %v4253_v55 = vand.u32 2147483647, %v4243_v62  ;;  %vm4249_vm14 = vweird.f32 %v4243_v62 }
 0x8a5   : > { %v4256_v25 = vor.u32 1.1754944e-38, %v4255_v21  ;;  %vm4254_vm1 = vcmp.eq.f32.partialorder %v4253_v55, 8.507059e+37 }
 0x8a9   : > { %v4535_v61 = vpop.eup %4534 }
 0x8aa   : > { %v4245_v52 = vmul.f32 %v4535_v61, %v4243_v62  ;;  %vm4250_vm13 = vweird.f32 %v4535_v61 }
 0x8ab   : > { %vm4251_vm15 = vmor %vm4249_vm14, %vm4250_vm13 }
 0x8ac   : > { %v4246_v28 = vsub.f32 1.0, %v4245_v52 }
 0x8ae   : > { %v4247_v49 = vmul.f32 %v4535_v61, %v4246_v28  ;;  %v8504_v28 = vld [vmem:[#allocation13_spill] sm:$0xff] }
 0x8b0   : > { %v4248_v18 = vadd.f32 %v4535_v61, %v4247_v49  ;;  %v8505_v49 = vld [vmem:[#allocation15_spill] sm:$0xff] }
 0x8b2   : > { %v4252_v53 = vsel %vm4251_vm15, %v4535_v61, %v4248_v18  ;;  %v8503_v61 = vld [vmem:[#allocation11_spill] sm:$0xff]  ;;  %v8506_v18 = vld [vmem:[#allocation14_spill] sm:$0xff] }
 0x8b3   : > { %v4257_v41 = vsel %vm4254_vm1, %v4256_v25, %v4252_v53  ;;  %v8507_v53 = vld [vmem:[#allocation16_spill] sm:$0xff] }
 0x8b4   : > { %v7839_v35 = vperm.slane %v4257_v41, 0 }
 0x8b6   : > { %v4260_v8 = vmul.f32 %v7839_v35, %v7669_v30  ;;  %v4261_v33 = vmul.f32 %v7839_v35, %v7665_v14  ;;  %v4262_v36 = vmul.f32 %v7839_v35, %v7672_v4  ;;  %v4263_v17 = vmul.f32 %v7839_v35, %v7677_v48  ;;  %v8494_v4 = vld [vmem:[#allocation4_spill] sm:$0xff] }
 0x8b7   : > { %v4264_v54 = vmul.f32 %v7839_v35, %v7684_v46  ;;  %v4265_v14 = vmul.f32 %v7839_v35, %v7689_v23  ;;  %v4266_v30 = vmul.f32 %v7839_v35, %v7694_v42  ;;  %v4267_v27 = vmul.f32 %v7839_v35, %v7699_v12  ;;  %v8498_v23 = vld [vmem:[#allocation7_spill] sm:$0xff] }
 0x8b8   : > { %v4292_v48 = vadd.f32 %v4260_v8, %v8494_v4  ;;  %v4293_v46 = vadd.f32 %v4261_v33, %v8495_v57  ;;  %v4294_v7 = vadd.f32 %v4262_v36, %v8496_v50  ;;  %v4295_v32 = vadd.f32 %v4263_v17, %v8497_v2  ;;  %v8508_v8 = vld [vmem:[#allocation18_spill] sm:$0xff]  ;;  %v8509_v36 = vld [vmem:[#allocation17_spill] sm:$0xff]  ;;  %v8515_v2 = vld [vmem:[#allocation23_spill] sm:$0xff] }
 0x8b9   : > { %v4268_v16 = vmul.f32 %v7839_v35, %v7704_v11  ;;  %v4296_v58 = vadd.f32 %v4264_v54, %v8498_v23  ;;  %v4269_v42 = vmul.f32 %v7839_v35, %v7709_v34  ;;  %v4297_v63 = vadd.f32 %v4265_v14, %v8499_v13  ;;  %v8510_v54 = vld [vmem:[#allocation19_spill] sm:$0xff]  ;;  %v8518_v13 = vld [vmem:[#allocation26_spill] sm:$0xff] }
 0x8ba   : > { %4324 = vst.msk [vmem:[%s7856_s23] sm:$0xff] %vm365_vm0, %v4292_v48  ;;  %v4270_v12 = vmul.f32 %v7839_v35, %v7714_v45  ;;  %v4298_v0 = vadd.f32 %v4266_v30, %v8500_v60  ;;  %v4271_v11 = vmul.f32 %v7839_v35, %v7719_v47  ;;  %v4299_v10 = vadd.f32 %v4267_v27, %v8501_v6  ;;  %v8511_v30 = vld [vmem:[#allocation21_spill] sm:$0xff]  ;;  %v8512_v48 = vld [vmem:[#allocation20_spill] sm:$0xff] }
 0x8bb   : > { %4325 = vst.msk [vmem:[%s7856_s23 + $0x8] sm:$0xff] %vm365_vm0, %v4293_v46  ;;  %v4272_v34 = vmul.f32 %v7839_v35, %v7724_v31  ;;  %v4300_v62 = vadd.f32 %v4268_v16, %v8502_v56  ;;  %v4273_v45 = vmul.f32 %v7839_v35, %v7729_v26  ;;  %v4301_v52 = vadd.f32 %v4269_v42, %v8503_v61  ;;  %v8513_v46 = vld [vmem:[#allocation22_spill] sm:$0xff]  ;;  %v8516_v16 = vld [vmem:[#allocation25_spill] sm:$0xff]  ;;  %v8523_v56 = vld [vmem:[#allocation32_spill] sm:$0xff] }
 0x8bc   : > { %4326 = vst.msk [vmem:[%s7856_s23 + $0x10] sm:$0xff] %vm365_vm0, %v4294_v7  ;;  %v4274_v47 = vmul.f32 %v7839_v35, %v7734_v3  ;;  %v4302_v21 = vadd.f32 %v4270_v12, %v8504_v28  ;;  %v4275_v31 = vmul.f32 %v7839_v35, %v7739_v19  ;;  %v4303_v55 = vadd.f32 %v4271_v11, %v8505_v49  ;;  %v8514_v7 = vld [vmem:[#allocation24_spill] sm:$0xff] }
 0x8bd   : > { %4327 = vst.msk [vmem:[%s7856_s23 + $0x18] sm:$0xff] %vm365_vm0, %v4295_v32  ;;  %v4276_v26 = vmul.f32 %v7839_v35, %v7744_v5  ;;  %v4304_v25 = vadd.f32 %v4272_v34, %v8506_v18  ;;  %v4277_v3 = vmul.f32 %v7839_v35, %v7752_v37  ;;  %v4305_v41 = vadd.f32 %v4273_v45, %v8507_v53  ;;  %v8519_v12 = vld [vmem:[#allocation28_spill] sm:$0xff] }
 0x8be   : > { %4328 = vst.msk [vmem:[%s7856_s23 + $0x20] sm:$0xff] %vm365_vm0, %v4296_v58  ;;  %v4278_v19 = vmul.f32 %v7839_v35, %v7758_v29  ;;  %v4306_v33 = vadd.f32 %v4274_v47, %v8508_v8  ;;  %v4279_v5 = vmul.f32 %v7839_v35, %v7764_v39  ;;  %v4307_v17 = vadd.f32 %v4275_v31, %v8509_v36  ;;  %v8517_v58 = vld [vmem:[#allocation27_spill] sm:$0xff]  ;;  %v8525_v61 = vld [vmem:[#allocation88_spill] sm:$0xff] }
 0x8bf   : > { %4329 = vst.msk [vmem:[%s7856_s23 + $0x28] sm:$0xff] %vm365_vm0, %v4297_v63  ;;  %v4280_v37 = vmul.f32 %v7839_v35, %v7770_v9  ;;  %v4308_v14 = vadd.f32 %v4276_v26, %v8510_v54  ;;  %v4281_v29 = vmul.f32 %v7839_v35, %v7775_v43  ;;  %v4309_v4 = vadd.f32 %v4277_v3, %v8511_v30 }
 0x8c0   : > { %4330 = vst.msk [vmem:[%s7856_s23 + $0x30] sm:$0xff] %vm365_vm0, %v4298_v0  ;;  %v4282_v39 = vmul.f32 %v7839_v35, %v7780_v44  ;;  %v4310_v57 = vadd.f32 %v4278_v19, %v8512_v48  ;;  %v4283_v9 = vmul.f32 %v7839_v35, %v7785_v51  ;;  %v4311_v50 = vadd.f32 %v4279_v5, %v8513_v46  ;;  %v8520_v0 = vld [vmem:[#allocation30_spill] sm:$0xff] }
 0x8c1   : > { %4331 = vst.msk [vmem:[%s7856_s23 + $0x38] sm:$0xff] %vm365_vm0, %v4299_v10  ;;  %v4284_v43 = vmul.f32 %v7839_v35, %v7790_v20  ;;  %v4312_v27 = vadd.f32 %v4280_v37, %v8514_v7  ;;  %v4285_v44 = vmul.f32 %v7839_v35, %v7795_v38  ;;  %v4313_v32 = vadd.f32 %v4281_v29, %v8515_v2  ;;  %v8522_v10 = vld [vmem:[#allocation31_spill] sm:$0xff] }
 0x8c2   : > { %4332 = vst.msk [vmem:[%s7856_s23 + $0x40] sm:$0xff] %vm365_vm0, %v4300_v62  ;;  %v4286_v51 = vmul.f32 %v7839_v35, %v7800_v59  ;;  %v4314_v23 = vadd.f32 %v4282_v39, %v8516_v16  ;;  %v4287_v20 = vmul.f32 %v7839_v35, %v7808_v24  ;;  %v4315_v42 = vadd.f32 %v4283_v9, %v8517_v58 }
 0x8c3   : > { %4333 = vst.msk [vmem:[%s7856_s23 + $0x48] sm:$0xff] %vm365_vm0, %v4301_v52  ;;  %v4288_v38 = vmul.f32 %v7839_v35, %v7813_v15  ;;  %v4316_v63 = vadd.f32 %v4284_v43, %v8518_v13  ;;  %v4289_v59 = vmul.f32 %v7839_v35, %v7816_v1  ;;  %v4317_v24 = vadd.f32 %v4285_v44, %v8519_v12  ;;  %v8521_v1 = vld [vmem:[#allocation29_spill] sm:$0xff] }
 0x8c4   : > { %4334 = vst.msk [vmem:[%s7856_s23 + $0x50] sm:$0xff] %vm365_vm0, %v4302_v21  ;;  %v4290_v60 = vmul.f32 %v7839_v35, %v7819_v22  ;;  %v4318_v15 = vadd.f32 %v4286_v51, %v8520_v0  ;;  %v4291_v11 = vmul.f32 %v7839_v35, %v7828_v40  ;;  %v4319_v6 = vadd.f32 %v4287_v20, %v8521_v1  ;;  %v8524_v22 = vld [vmem:[#allocation87_spill] sm:$0xff] }
 0x8c5   : > { %4335 = vst.msk [vmem:[%s7856_s23 + $0x58] sm:$0xff] %vm365_vm0, %v4303_v55  ;;  %v4320_v34 = vadd.f32 %v4288_v38, %v8522_v10  ;;  %v4321_v62 = vadd.f32 %v4289_v59, %v8523_v56 }
 0x8c6   : > { %4336 = vst.msk [vmem:[%s7856_s23 + $0x60] sm:$0xff] %vm365_vm0, %v4304_v25  ;;  %v4322_v45 = vadd.f32 %v4290_v60, %v8524_v22  ;;  %v4323_v52 = vadd.f32 %v4291_v11, %v8525_v61 }
 0x8c7   : > { %4337 = vst.msk [vmem:[%s7856_s23 + $0x68] sm:$0xff] %vm365_vm0, %v4305_v41 }
 0x8c8   : > { %4338 = vst.msk [vmem:[%s7856_s23 + $0x70] sm:$0xff] %vm365_vm0, %v4306_v33 }
 0x8c9   : > { %4339 = vst.msk [vmem:[%s7856_s23 + $0x78] sm:$0xff] %vm365_vm0, %v4307_v17 }
 0x8ca   : > { %4340 = vst.msk [vmem:[%s7856_s23 + $0x80] sm:$0xff] %vm365_vm0, %v4308_v14 }
 0x8cb   : > { %4341 = vst.msk [vmem:[%s7856_s23 + $0x88] sm:$0xff] %vm365_vm0, %v4309_v4 }
 0x8cc   : > { %4342 = vst.msk [vmem:[%s7856_s23 + $0x90] sm:$0xff] %vm365_vm0, %v4310_v57 }
 0x8cd   : > { %4343 = vst.msk [vmem:[%s7856_s23 + $0x98] sm:$0xff] %vm365_vm0, %v4311_v50 }
 0x8ce   : > { %4344 = vst.msk [vmem:[%s7856_s23 + $0xa0] sm:$0xff] %vm365_vm0, %v4312_v27 }
 0x8cf   : > { %4345 = vst.msk [vmem:[%s7856_s23 + $0xa8] sm:$0xff] %vm365_vm0, %v4313_v32 }
 0x8d0   : > { %4346 = vst.msk [vmem:[%s7856_s23 + $0xb0] sm:$0xff] %vm365_vm0, %v4314_v23 }
 0x8d1   : > { %4347 = vst.msk [vmem:[%s7856_s23 + $0xb8] sm:$0xff] %vm365_vm0, %v4315_v42 }
 0x8d2   : > { %4348 = vst.msk [vmem:[%s7856_s23 + $0xc0] sm:$0xff] %vm365_vm0, %v4316_v63 }
 0x8d3   : > { %4349 = vst.msk [vmem:[%s7856_s23 + $0xc8] sm:$0xff] %vm365_vm0, %v4317_v24 }
 0x8d4   : > { %4350 = vst.msk [vmem:[%s7856_s23 + $0xd0] sm:$0xff] %vm365_vm0, %v4318_v15 }
 0x8d5   : > { %4351 = vst.msk [vmem:[%s7856_s23 + $0xd8] sm:$0xff] %vm365_vm0, %v4319_v6 }
 0x8d6   : > { %4352 = vst.msk [vmem:[%s7856_s23 + $0xe0] sm:$0xff] %vm365_vm0, %v4320_v34 }
 0x8d7   : > { %4353 = vst.msk [vmem:[%s7856_s23 + $0xe8] sm:$0xff] %vm365_vm0, %v4321_v62 }
 0x8d8   : > { %4354 = vst.msk [vmem:[%s7856_s23 + $0xf0] sm:$0xff] %vm365_vm0, %v4322_v45 }
 0x8d9   : > { %4355 = vst.msk [vmem:[%s7856_s23 + $0xf8] sm:$0xff] %vm365_vm0, %v4323_v52 }
 0x8da PF: > { %s19_s30 = sadd.s32 1, %s4572_s30  }
 0x8db   : > { %p16_p4 = scmp.ge.s32.totalorder %s19_s30, 4  }
 0x8dd   :  { %18 = sbr.rel (!%p16_p4) target bundleno = 1 (0x1), region = 88 }

</bundles_post_ra>
